<compile_context>
chip_gen: v5e
topology: v5e:2x2
jax: 0.10.0
libtpu: 0.0.40
codegen_flags: <defaults>
</compile_context>

<pallas_src>
import functools

import numpy as np
import jax
import jax.numpy as jnp
from jax.experimental import pallas as pl
from jax.experimental.pallas import tpu as pltpu

RASTERIZE_AT = np.array([64, 64, 64, 64, 64, 64, 64, 64]).reshape(-1, 2)
INV_SMOOTHNESS = 0.1   # pred_rasterizer inv_smoothness (mode='mask')
DICE_SMOOTH = 1.0
NPARAM = 11            # 7 pred params + 4 tgt params per edge


# --------------------------------------------------------------------------
# Pallas kernel: one grid step rasterizes G lane-packed batch PAIRS and emits
# a lane-dense (8, W2) partial-dice-sum tile per pair.
# --------------------------------------------------------------------------
def _raster_dice_kernel(params_ref, out_ref, *, H, W2, P, G, inv_smoothness):
    f32 = jnp.float32
    # Pixel grid & output row selector: hoisted once, shared by all G pairs.
    ys = jax.lax.broadcasted_iota(jnp.int32, (H, W2), 0).astype(f32)
    xs = jax.lax.broadcasted_iota(jnp.int32, (H, W2), 1).astype(f32)
    row_id = jax.lax.broadcasted_iota(jnp.int32, (8, W2), 0)

    def pair_body(gg, carry):
        pref = params_ref.at[gg]                      # (nrows, W2) VMEM view

        def prow(k, j):
            # (1, W2) lane-packed scalar row of param k for edge j (static row);
            # broadcasts over the H sublanes in the arithmetic below.
            return pref[pl.ds(k * P + j, 1), :]

        # ---- predicted polygon: min distance + even-odd parity -> soft mask ----
        min_d2 = jnp.full((H, W2), 1e12, dtype=f32)
        inside_p = jnp.zeros((H, W2), dtype=jnp.bool_)
        # Static unroll is fine for P=8; the pair-level fori_loop bounds liveness.
        for j in range(P):
            x0 = prow(0, j)
            y0 = prow(1, j)
            dx = jnp.broadcast_to(prow(2, j), (H, W2))   # consumed twice: bind once
            dy = jnp.broadcast_to(prow(3, j), (H, W2))
            inv_l2 = prow(4, j)      # 1/|d|^2, precomputed (no divides in-kernel)
            y1 = prow(5, j)
            slope = prow(6, j)       # dx/dy_safe, precomputed
            ex = xs - x0
            ey = ys - y0
            t = jnp.clip((ex * dx + ey * dy) * inv_l2, 0.0, 1.0)
            qx = ex - t * dx
            qy = ey - t * dy
            min_d2 = jnp.minimum(min_d2, qx * qx + qy * qy)
            # even-odd crossing test vs. a +x ray:  xs < x0 + ey*slope  <=>  ex < ey*slope
            straddle = (ey < 0.0) != (y1 > ys)
            inside_p = jnp.logical_xor(
                inside_p, jnp.logical_and(straddle, ex < ey * slope))
        sign_p = jnp.where(inside_p, 1.0, -1.0).astype(f32)
        # -80 clamp keeps fully-padded (length-0) elements benign given the 1e4
        # edge sentinels (sigmoid(-80) ~ 0).
        z = jnp.maximum(sign_p * jnp.sqrt(min_d2) * inv_smoothness, -80.0)
        pred_mask = 1.0 / (1.0 + jnp.exp(-z))          # exact sigmoid

        # ---- target polygon (hard mask): only the parity test, no distance ----
        inside_t = jnp.zeros((H, W2), dtype=jnp.bool_)
        for j in range(P):
            x0 = prow(7, j)
            y0 = prow(8, j)
            y1 = prow(9, j)
            slope = prow(10, j)
            ey = ys - y0
            straddle = (ey < 0.0) != (y1 > ys)
            inside_t = jnp.logical_xor(
                inside_t, jnp.logical_and(straddle, (xs - x0) < ey * slope))
        tgt_mask = jnp.where(inside_t, 1.0, 0.0).astype(f32)

        # ---- partial sums: reduce over sublanes only, keep lanes dense ----
        r_i = jnp.sum(pred_mask * tgt_mask, axis=0, keepdims=True)   # (1, W2)
        r_p = jnp.sum(pred_mask, axis=0, keepdims=True)
        r_t = jnp.sum(tgt_mask, axis=0, keepdims=True)
        tile = (jnp.where(row_id == 0, r_i, 0.0)
                + jnp.where(row_id == 1, r_p, 0.0)
                + jnp.where(row_id == 2, r_t, 0.0))
        out_ref[gg] = tile.astype(f32)                 # (8, W2) unmasked store
        return carry

    jax.lax.fori_loop(0, G, pair_body, 0)


# --------------------------------------------------------------------------
# Wrapper-side edge-parameter precompute (all divides hoisted out of the kernel)
# --------------------------------------------------------------------------
def _build_edge_params(poly, lengths, scale, need_dist):
    """poly (B, P, 2), lengths (B,) -> list of per-edge scalar tables, each (B, P).

    Invalid (padding) edges get far-away sentinel coordinates: they can never win
    the distance min and never straddle the scanline, so no validity mask is
    needed inside the kernel.
    """
    B, P, _ = poly.shape
    v = poly.astype(jnp.float32) * jnp.float32(scale)
    idx = jnp.arange(P, dtype=jnp.int32)
    nxt = jnp.where(idx[None, :] + 1 < lengths[:, None], idx[None, :] + 1, 0)
    x0 = v[..., 0]
    y0 = v[..., 1]
    x1 = jnp.take_along_axis(x0, nxt, axis=1)
    y1 = jnp.take_along_axis(y0, nxt, axis=1)
    valid = idx[None, :] < lengths[:, None]
    big = jnp.float32(1e4)
    x0 = jnp.where(valid, x0, big)
    x1 = jnp.where(valid, x1, big)
    y0 = jnp.where(valid, y0, -big)
    y1 = jnp.where(valid, y1, -big)
    dx = x1 - x0
    dy = y1 - y0
    slope = dx / jnp.where(dy == 0.0, 1.0, dy)
    if need_dist:
        inv_l2 = 1.0 / (dx * dx + dy * dy + 1e-12)
        return [x0, y0, dx, dy, inv_l2, y1, slope]
    return [x0, y0, y1, slope]


@functools.partial(jax.jit, static_argnames=("lid",))
def mask_rasterization_loss(preds, targets, target_len, lid=0):
    H = int(RASTERIZE_AT[lid, 0])
    W = int(RASTERIZE_AT[lid, 1])
    W2 = 2 * W                       # two images side-by-side on the lane axis
    B, P, _ = preds.shape
    scale = float(W)                 # forward() scales polygon coords by resolution[1]

    # ---- choose pairs-per-grid-step G, pad the batch ----
    B2 = (B + 1) // 2                                   # pairs needed
    G = max(1, min(8, B2 // 2)) if B2 >= 2 else 1       # keep >=2 steps (v7x 2-TC)
    steps = (B2 + G - 1) // G
    B2p = steps * G
    Bp = 2 * B2p
    if Bp != B:
        pad = Bp - B                 # padded elements have zero length -> contribute 0
        zpoly = jnp.zeros((pad, P, 2), preds.dtype)
        preds = jnp.concatenate([preds, zpoly], axis=0)
        targets = jnp.concatenate([targets, zpoly], axis=0)
        target_len = jnp.concatenate(
            [target_len, jnp.zeros((pad,), target_len.dtype)], axis=0)

    pred_params = _build_edge_params(preds, target_len, scale, need_dist=True)
    tgt_params = _build_edge_params(targets, target_len, scale, need_dist=False)
    # bake the +W lane offset of the second element of each pair into its x0
    xshift = (jnp.arange(Bp, dtype=jnp.int32) % 2).astype(jnp.float32)[:, None] * W
    pred_params[0] = pred_params[0] + xshift
    tgt_params[0] = tgt_params[0] + xshift

    plist = pred_params + tgt_params                    # NPARAM arrays of (Bp, P)
    stacked = jnp.stack(plist, axis=0)                  # (NPARAM, Bp, P)
    s = stacked.reshape(NPARAM, B2p, 2, P).transpose(1, 0, 3, 2)   # (B2p,NPARAM,P,2)
    lanes = jnp.repeat(s, W, axis=-1)                   # (B2p, NPARAM, P, W2)
    rows = NPARAM * P
    nrows = ((rows + 7) // 8) * 8                       # sublane-aligned row count
    flat = lanes.reshape(B2p, rows, W2)
    if nrows != rows:
        flat = jnp.pad(flat, ((0, 0), (0, nrows - rows), (0, 0)))
    params = flat                                       # (B2p, nrows, W2) lane-packed

    kernel = functools.partial(_raster_dice_kernel, H=H, W2=W2, P=P, G=G,
                               inv_smoothness=INV_SMOOTHNESS)
    out = pl.pallas_call(
        kernel,
        grid=(steps,),
        in_specs=[pl.BlockSpec((G, nrows, W2), lambda g: (g, 0, 0))],
        out_specs=pl.BlockSpec((G, 8, W2), lambda g: (g, 0, 0)),
        out_shape=jax.ShapeDtypeStruct((B2p, 8, W2), jnp.float32),
        compiler_params=pltpu.CompilerParams(
            dimension_semantics=("parallel",)),
    )(params)

    # tiny epilogue: finish the cross-lane reductions and the dice ratio
    inter = jnp.sum(out[:, 0, :])
    sum_p = jnp.sum(out[:, 1, :])
    sum_t = jnp.sum(out[:, 2, :])
    return 1.0 - (2.0 * inter + DICE_SMOOTH) / (sum_p + sum_t + DICE_SMOOTH)


# --------------------------------------------------------------------------
# Pure-JAX reference (same math, fully vectorized) for a correctness check.
# --------------------------------------------------------------------------
def _reference_loss(preds, targets, target_len, lid=0):
    H = int(RASTERIZE_AT[lid, 0])
    W = int(RASTERIZE_AT[lid, 1])
    scale = float(W)

    def edges(poly):
        v = poly.astype(jnp.float32) * scale
        P = poly.shape[1]
        idx = jnp.arange(P, dtype=jnp.int32)
        nxt = jnp.where(idx[None, :] + 1 < target_len[:, None], idx[None, :] + 1, 0)
        x0 = v[..., 0]
        y0 = v[..., 1]
        x1 = jnp.take_along_axis(x0, nxt, axis=1)
        y1 = jnp.take_along_axis(y0, nxt, axis=1)
        valid = (idx[None, :] < target_len[:, None]).astype(jnp.float32)
        return x0, y0, x1, y1, valid

    def rasterize(poly, hard):
        x0, y0, x1, y1, valid = edges(poly)
        X0, Y0 = x0[:, :, None, None], y0[:, :, None, None]
        X1, Y1 = x1[:, :, None, None], y1[:, :, None, None]
        V = valid[:, :, None, None]
        ys = jnp.arange(H, dtype=jnp.float32)[None, None, :, None]
        xs = jnp.arange(W, dtype=jnp.float32)[None, None, None, :]
        dx, dy = X1 - X0, Y1 - Y0
        ex, ey = xs - X0, ys - Y0
        l2 = dx * dx + dy * dy + 1e-12
        t = jnp.clip((ex * dx + ey * dy) / l2, 0.0, 1.0)
        qx, qy = ex - t * dx, ey - t * dy
        d2 = qx * qx + qy * qy + (1.0 - V) * 1e30
        min_d2 = jnp.min(d2, axis=1)
        straddle = (Y0 > ys) != (Y1 > ys)
        slope = dx / jnp.where(dy == 0.0, 1.0, dy)
        crosses = (straddle & (ex < ey * slope)).astype(jnp.int32) * V.astype(jnp.int32)
        inside = (jnp.sum(crosses, axis=1) % 2) == 1
        sign = jnp.where(inside, 1.0, -1.0)
        if hard:
            return (sign + 1.0) * 0.5
        dist = jnp.sqrt(min_d2)
        return 1.0 / (1.0 + jnp.exp(-(sign * dist * INV_SMOOTHNESS)))

    pred_masks = rasterize(preds, hard=False)
    tgt_masks = rasterize(targets, hard=True)
    inter = jnp.sum(pred_masks * tgt_masks)
    return 1.0 - (2.0 * inter + DICE_SMOOTH) / (
        jnp.sum(pred_masks) + jnp.sum(tgt_masks) + DICE_SMOOTH)


if __name__ == "__main__":
    key = jax.random.PRNGKey(0)

    # Case 1: minimal shape (B=2, P=8) -> one pair, one grid step.
    B, P = 2, 8
    k1, k2, k3, k4 = jax.random.split(key, 4)
    preds = jax.random.uniform(k1, (B, P, 2), dtype=jnp.float32)
    targets = jax.random.uniform(k2, (B, P, 2), dtype=jnp.float32)
    target_len = jnp.array([8, 6], dtype=jnp.int32)

    loss = jax.block_until_ready(mask_rasterization_loss(preds, targets, target_len, lid=0))
    ref = _reference_loss(preds, targets, target_len, lid=0)
    assert bool(jnp.isfinite(loss)), "kernel produced non-finite loss (case 1)"
    assert abs(float(loss) - float(ref)) < 5e-4, (float(loss), float(ref))

    # Case 2: B=7 -> exercises batch padding and G=2 pairs per grid step (2 steps).
    B2_ = 7
    preds2 = jax.random.uniform(k3, (B2_, P, 2), dtype=jnp.float32)
    targets2 = jax.random.uniform(k4, (B2_, P, 2), dtype=jnp.float32)
    target_len2 = jnp.array([8, 6, 5, 8, 3, 7, 4], dtype=jnp.int32)

    loss2 = jax.block_until_ready(
        mask_rasterization_loss(preds2, targets2, target_len2, lid=0))
    ref2 = _reference_loss(preds2, targets2, target_len2, lid=0)
    assert bool(jnp.isfinite(loss2)), "kernel produced non-finite loss (case 2)"
    assert abs(float(loss2) - float(ref2)) < 5e-4, (float(loss2), float(ref2))

    print("KERNEL_OK")
</pallas_src>

<mosaic_0001>
module attributes {stable_mosaic.version = 11 : i64} {
  func.func @_raster_dice_kernel(%arg0: i32, %arg1: memref<1x88x128xf32, #tpu.memory_space<vmem>>, %arg2: memref<1x8x128xf32, #tpu.memory_space<vmem>>) attributes {dimension_semantics = [#tpu.dimension_semantics<parallel>], iteration_bounds = array<i64: 1>, scalar_prefetch = 0 : i64, scratch_operands = 0 : i64, tpu.core_type = #tpu.core_type<tc>, window_params = [{transform_indices = @transform_0, window_bounds = array<i64: 1, 88, 128>}, {transform_indices = @transform_1, window_bounds = array<i64: 1, 8, 128>}]} {
    %0 = tpu.iota {dimensions = array<i32: 0>} : vector<64x128xi32>
    %1 = arith.sitofp %0 : vector<64x128xi32> to vector<64x128xf32>
    %2 = tpu.iota {dimensions = array<i32: 1>} : vector<64x128xi32>
    %3 = arith.sitofp %2 : vector<64x128xi32> to vector<64x128xf32>
    %4 = tpu.iota {dimensions = array<i32: 0>} : vector<8x128xi32>
    %c0_i32 = arith.constant 0 : i32
    %cst = arith.constant 9.99999995E+11 : f32
    %5 = vector.broadcast %cst : f32 to vector<64x128xf32>
    %false = arith.constant false
    %6 = vector.broadcast %false : i1 to vector<64x128xi1>
    %c0_i32_0 = arith.constant 0 : i32
    %c0_i32_1 = arith.constant 0 : i32
    %7 = tpu.memref_slice %arg1[%c0_i32, %c0_i32_0, %c0_i32_1] : memref<1x88x128xf32, #tpu.memory_space<vmem>> -> memref<1x88x128xf32, #tpu.memory_space<vmem>>
    %8 = tpu.memref_squeeze %7 : memref<1x88x128xf32, #tpu.memory_space<vmem>> -> memref<88x128xf32, #tpu.memory_space<vmem>>
    %c0 = arith.constant 0 : index
    %c0_2 = arith.constant 0 : index
    %9 = vector.load %8[%c0, %c0_2] : memref<88x128xf32, #tpu.memory_space<vmem>>, vector<1x128xf32>
    %c0_i32_3 = arith.constant 0 : i32
    %c0_i32_4 = arith.constant 0 : i32
    %10 = tpu.memref_slice %arg1[%c0_i32, %c0_i32_3, %c0_i32_4] : memref<1x88x128xf32, #tpu.memory_space<vmem>> -> memref<1x88x128xf32, #tpu.memory_space<vmem>>
    %11 = tpu.memref_squeeze %10 : memref<1x88x128xf32, #tpu.memory_space<vmem>> -> memref<88x128xf32, #tpu.memory_space<vmem>>
    %c8 = arith.constant 8 : index
    %c0_5 = arith.constant 0 : index
    %12 = vector.load %11[%c8, %c0_5] : memref<88x128xf32, #tpu.memory_space<vmem>>, vector<1x128xf32>
    %c0_i32_6 = arith.constant 0 : i32
    %c0_i32_7 = arith.constant 0 : i32
    %13 = tpu.memref_slice %arg1[%c0_i32, %c0_i32_6, %c0_i32_7] : memref<1x88x128xf32, #tpu.memory_space<vmem>> -> memref<1x88x128xf32, #tpu.memory_space<vmem>>
    %14 = tpu.memref_squeeze %13 : memref<1x88x128xf32, #tpu.memory_space<vmem>> -> memref<88x128xf32, #tpu.memory_space<vmem>>
    %c16 = arith.constant 16 : index
    %c0_8 = arith.constant 0 : index
    %15 = vector.load %14[%c16, %c0_8] : memref<88x128xf32, #tpu.memory_space<vmem>>, vector<1x128xf32>
    %16 = vector.shape_cast %15 : vector<1x128xf32> to vector<1x128xf32>
    %17 = vector.broadcast %16 : vector<1x128xf32> to vector<64x128xf32>
    %c0_i32_9 = arith.constant 0 : i32
    %c0_i32_10 = arith.constant 0 : i32
    %18 = tpu.memref_slice %arg1[%c0_i32, %c0_i32_9, %c0_i32_10] : memref<1x88x128xf32, #tpu.memory_space<vmem>> -> memref<1x88x128xf32, #tpu.memory_space<vmem>>
    %19 = tpu.memref_squeeze %18 : memref<1x88x128xf32, #tpu.memory_space<vmem>> -> memref<88x128xf32, #tpu.memory_space<vmem>>
    %c24 = arith.constant 24 : index
    %c0_11 = arith.constant 0 : index
    %20 = vector.load %19[%c24, %c0_11] : memref<88x128xf32, #tpu.memory_space<vmem>>, vector<1x128xf32>
    %21 = vector.shape_cast %20 : vector<1x128xf32> to vector<1x128xf32>
    %22 = vector.broadcast %21 : vector<1x128xf32> to vector<64x128xf32>
    %c0_i32_12 = arith.constant 0 : i32
    %c0_i32_13 = arith.constant 0 : i32
    %23 = tpu.memref_slice %arg1[%c0_i32, %c0_i32_12, %c0_i32_13] : memref<1x88x128xf32, #tpu.memory_space<vmem>> -> memref<1x88x128xf32, #tpu.memory_space<vmem>>
    %24 = tpu.memref_squeeze %23 : memref<1x88x128xf32, #tpu.memory_space<vmem>> -> memref<88x128xf32, #tpu.memory_space<vmem>>
    %c32 = arith.constant 32 : index
    %c0_14 = arith.constant 0 : index
    %25 = vector.load %24[%c32, %c0_14] : memref<88x128xf32, #tpu.memory_space<vmem>>, vector<1x128xf32>
    %c0_i32_15 = arith.constant 0 : i32
    %c0_i32_16 = arith.constant 0 : i32
    %26 = tpu.memref_slice %arg1[%c0_i32, %c0_i32_15, %c0_i32_16] : memref<1x88x128xf32, #tpu.memory_space<vmem>> -> memref<1x88x128xf32, #tpu.memory_space<vmem>>
    %27 = tpu.memref_squeeze %26 : memref<1x88x128xf32, #tpu.memory_space<vmem>> -> memref<88x128xf32, #tpu.memory_space<vmem>>
    %c40 = arith.constant 40 : index
    %c0_17 = arith.constant 0 : index
    %28 = vector.load %27[%c40, %c0_17] : memref<88x128xf32, #tpu.memory_space<vmem>>, vector<1x128xf32>
    %c0_i32_18 = arith.constant 0 : i32
    %c0_i32_19 = arith.constant 0 : i32
    %29 = tpu.memref_slice %arg1[%c0_i32, %c0_i32_18, %c0_i32_19] : memref<1x88x128xf32, #tpu.memory_space<vmem>> -> memref<1x88x128xf32, #tpu.memory_space<vmem>>
    %30 = tpu.memref_squeeze %29 : memref<1x88x128xf32, #tpu.memory_space<vmem>> -> memref<88x128xf32, #tpu.memory_space<vmem>>
    %c48 = arith.constant 48 : index
    %c0_20 = arith.constant 0 : index
    %31 = vector.load %30[%c48, %c0_20] : memref<88x128xf32, #tpu.memory_space<vmem>>, vector<1x128xf32>
    %32 = vector.broadcast %9 : vector<1x128xf32> to vector<64x128xf32>
    %33 = arith.subf %3, %32 : vector<64x128xf32>
    %34 = vector.broadcast %12 : vector<1x128xf32> to vector<64x128xf32>
    %35 = arith.subf %1, %34 : vector<64x128xf32>
    %36 = arith.mulf %33, %17 : vector<64x128xf32>
    %37 = arith.mulf %35, %22 : vector<64x128xf32>
    %38 = arith.addf %36, %37 : vector<64x128xf32>
    %39 = vector.broadcast %25 : vector<1x128xf32> to vector<64x128xf32>
    %40 = arith.mulf %38, %39 : vector<64x128xf32>
    %cst_21 = arith.constant 0.000000e+00 : f32
    %cst_22 = arith.constant 1.000000e+00 : f32
    %41 = vector.broadcast %cst_21 : f32 to vector<64x128xf32>
    %42 = arith.maximumf %41, %40 : vector<64x128xf32>
    %43 = vector.broadcast %cst_22 : f32 to vector<64x128xf32>
    %44 = arith.minimumf %43, %42 : vector<64x128xf32>
    %45 = arith.mulf %44, %17 : vector<64x128xf32>
    %46 = arith.subf %33, %45 : vector<64x128xf32>
    %47 = arith.mulf %44, %22 : vector<64x128xf32>
    %48 = arith.subf %35, %47 : vector<64x128xf32>
    %49 = arith.mulf %46, %46 : vector<64x128xf32>
    %50 = arith.mulf %48, %48 : vector<64x128xf32>
    %51 = arith.addf %49, %50 : vector<64x128xf32>
    %52 = arith.minimumf %5, %51 : vector<64x128xf32>
    %cst_23 = arith.constant 0.000000e+00 : f32
    %53 = vector.broadcast %cst_23 : f32 to vector<64x128xf32>
    %54 = arith.cmpf olt, %35, %53 : vector<64x128xf32>
    %55 = vector.broadcast %28 : vector<1x128xf32> to vector<64x128xf32>
    %56 = arith.cmpf ogt, %55, %1 : vector<64x128xf32>
    %57 = arith.xori %54, %56 : vector<64x128xi1>
    %58 = vector.broadcast %31 : vector<1x128xf32> to vector<64x128xf32>
    %59 = arith.mulf %35, %58 : vector<64x128xf32>
    %60 = arith.cmpf olt, %33, %59 : vector<64x128xf32>
    %61 = arith.andi %57, %60 : vector<64x128xi1>
    %62 = arith.xori %6, %61 : vector<64x128xi1>
    %c0_i32_24 = arith.constant 0 : i32
    %c0_i32_25 = arith.constant 0 : i32
    %63 = tpu.memref_slice %arg1[%c0_i32, %c0_i32_24, %c0_i32_25] : memref<1x88x128xf32, #tpu.memory_space<vmem>> -> memref<1x88x128xf32, #tpu.memory_space<vmem>>
    %64 = tpu.memref_squeeze %63 : memref<1x88x128xf32, #tpu.memory_space<vmem>> -> memref<88x128xf32, #tpu.memory_space<vmem>>
    %c1 = arith.constant 1 : index
    %c0_26 = arith.constant 0 : index
    %65 = vector.load %64[%c1, %c0_26] : memref<88x128xf32, #tpu.memory_space<vmem>>, vector<1x128xf32>
    %c0_i32_27 = arith.constant 0 : i32
    %c0_i32_28 = arith.constant 0 : i32
    %66 = tpu.memref_slice %arg1[%c0_i32, %c0_i32_27, %c0_i32_28] : memref<1x88x128xf32, #tpu.memory_space<vmem>> -> memref<1x88x128xf32, #tpu.memory_space<vmem>>
    %67 = tpu.memref_squeeze %66 : memref<1x88x128xf32, #tpu.memory_space<vmem>> -> memref<88x128xf32, #tpu.memory_space<vmem>>
    %c9 = arith.constant 9 : index
    %c0_29 = arith.constant 0 : index
    %68 = vector.load %67[%c9, %c0_29] : memref<88x128xf32, #tpu.memory_space<vmem>>, vector<1x128xf32>
    %c0_i32_30 = arith.constant 0 : i32
    %c0_i32_31 = arith.constant 0 : i32
    %69 = tpu.memref_slice %arg1[%c0_i32, %c0_i32_30, %c0_i32_31] : memref<1x88x128xf32, #tpu.memory_space<vmem>> -> memref<1x88x128xf32, #tpu.memory_space<vmem>>
    %70 = tpu.memref_squeeze %69 : memref<1x88x128xf32, #tpu.memory_space<vmem>> -> memref<88x128xf32, #tpu.memory_space<vmem>>
    %c17 = arith.constant 17 : index
    %c0_32 = arith.constant 0 : index
    %71 = vector.load %70[%c17, %c0_32] : memref<88x128xf32, #tpu.memory_space<vmem>>, vector<1x128xf32>
    %72 = vector.shape_cast %71 : vector<1x128xf32> to vector<1x128xf32>
    %73 = vector.broadcast %72 : vector<1x128xf32> to vector<64x128xf32>
    %c0_i32_33 = arith.constant 0 : i32
    %c0_i32_34 = arith.constant 0 : i32
    %74 = tpu.memref_slice %arg1[%c0_i32, %c0_i32_33, %c0_i32_34] : memref<1x88x128xf32, #tpu.memory_space<vmem>> -> memref<1x88x128xf32, #tpu.memory_space<vmem>>
    %75 = tpu.memref_squeeze %74 : memref<1x88x128xf32, #tpu.memory_space<vmem>> -> memref<88x128xf32, #tpu.memory_space<vmem>>
    %c25 = arith.constant 25 : index
    %c0_35 = arith.constant 0 : index
    %76 = vector.load %75[%c25, %c0_35] : memref<88x128xf32, #tpu.memory_space<vmem>>, vector<1x128xf32>
    %77 = vector.shape_cast %76 : vector<1x128xf32> to vector<1x128xf32>
    %78 = vector.broadcast %77 : vector<1x128xf32> to vector<64x128xf32>
    %c0_i32_36 = arith.constant 0 : i32
    %c0_i32_37 = arith.constant 0 : i32
    %79 = tpu.memref_slice %arg1[%c0_i32, %c0_i32_36, %c0_i32_37] : memref<1x88x128xf32, #tpu.memory_space<vmem>> -> memref<1x88x128xf32, #tpu.memory_space<vmem>>
    %80 = tpu.memref_squeeze %79 : memref<1x88x128xf32, #tpu.memory_space<vmem>> -> memref<88x128xf32, #tpu.memory_space<vmem>>
    %c33 = arith.constant 33 : index
    %c0_38 = arith.constant 0 : index
    %81 = vector.load %80[%c33, %c0_38] : memref<88x128xf32, #tpu.memory_space<vmem>>, vector<1x128xf32>
    %c0_i32_39 = arith.constant 0 : i32
    %c0_i32_40 = arith.constant 0 : i32
    %82 = tpu.memref_slice %arg1[%c0_i32, %c0_i32_39, %c0_i32_40] : memref<1x88x128xf32, #tpu.memory_space<vmem>> -> memref<1x88x128xf32, #tpu.memory_space<vmem>>
    %83 = tpu.memref_squeeze %82 : memref<1x88x128xf32, #tpu.memory_space<vmem>> -> memref<88x128xf32, #tpu.memory_space<vmem>>
    %c41 = arith.constant 41 : index
    %c0_41 = arith.constant 0 : index
    %84 = vector.load %83[%c41, %c0_41] : memref<88x128xf32, #tpu.memory_space<vmem>>, vector<1x128xf32>
    %c0_i32_42 = arith.constant 0 : i32
    %c0_i32_43 = arith.constant 0 : i32
    %85 = tpu.memref_slice %arg1[%c0_i32, %c0_i32_42, %c0_i32_43] : memref<1x88x128xf32, #tpu.memory_space<vmem>> -> memref<1x88x128xf32, #tpu.memory_space<vmem>>
    %86 = tpu.memref_squeeze %85 : memref<1x88x128xf32, #tpu.memory_space<vmem>> -> memref<88x128xf32, #tpu.memory_space<vmem>>
    %c49 = arith.constant 49 : index
    %c0_44 = arith.constant 0 : index
    %87 = vector.load %86[%c49, %c0_44] : memref<88x128xf32, #tpu.memory_space<vmem>>, vector<1x128xf32>
    %88 = vector.broadcast %65 : vector<1x128xf32> to vector<64x128xf32>
    %89 = arith.subf %3, %88 : vector<64x128xf32>
    %90 = vector.broadcast %68 : vector<1x128xf32> to vector<64x128xf32>
    %91 = arith.subf %1, %90 : vector<64x128xf32>
    %92 = arith.mulf %89, %73 : vector<64x128xf32>
    %93 = arith.mulf %91, %78 : vector<64x128xf32>
    %94 = arith.addf %92, %93 : vector<64x128xf32>
    %95 = vector.broadcast %81 : vector<1x128xf32> to vector<64x128xf32>
    %96 = arith.mulf %94, %95 : vector<64x128xf32>
    %cst_45 = arith.constant 0.000000e+00 : f32
    %cst_46 = arith.constant 1.000000e+00 : f32
    %97 = vector.broadcast %cst_45 : f32 to vector<64x128xf32>
    %98 = arith.maximumf %97, %96 : vector<64x128xf32>
    %99 = vector.broadcast %cst_46 : f32 to vector<64x128xf32>
    %100 = arith.minimumf %99, %98 : vector<64x128xf32>
    %101 = arith.mulf %100, %73 : vector<64x128xf32>
    %102 = arith.subf %89, %101 : vector<64x128xf32>
    %103 = arith.mulf %100, %78 : vector<64x128xf32>
    %104 = arith.subf %91, %103 : vector<64x128xf32>
    %105 = arith.mulf %102, %102 : vector<64x128xf32>
    %106 = arith.mulf %104, %104 : vector<64x128xf32>
    %107 = arith.addf %105, %106 : vector<64x128xf32>
    %108 = arith.minimumf %52, %107 : vector<64x128xf32>
    %cst_47 = arith.constant 0.000000e+00 : f32
    %109 = vector.broadcast %cst_47 : f32 to vector<64x128xf32>
    %110 = arith.cmpf olt, %91, %109 : vector<64x128xf32>
    %111 = vector.broadcast %84 : vector<1x128xf32> to vector<64x128xf32>
    %112 = arith.cmpf ogt, %111, %1 : vector<64x128xf32>
    %113 = arith.xori %110, %112 : vector<64x128xi1>
    %114 = vector.broadcast %87 : vector<1x128xf32> to vector<64x128xf32>
    %115 = arith.mulf %91, %114 : vector<64x128xf32>
    %116 = arith.cmpf olt, %89, %115 : vector<64x128xf32>
    %117 = arith.andi %113, %116 : vector<64x128xi1>
    %118 = arith.xori %62, %117 : vector<64x128xi1>
    %c0_i32_48 = arith.constant 0 : i32
    %c0_i32_49 = arith.constant 0 : i32
    %119 = tpu.memref_slice %arg1[%c0_i32, %c0_i32_48, %c0_i32_49] : memref<1x88x128xf32, #tpu.memory_space<vmem>> -> memref<1x88x128xf32, #tpu.memory_space<vmem>>
    %120 = tpu.memref_squeeze %119 : memref<1x88x128xf32, #tpu.memory_space<vmem>> -> memref<88x128xf32, #tpu.memory_space<vmem>>
    %c2 = arith.constant 2 : index
    %c0_50 = arith.constant 0 : index
    %121 = vector.load %120[%c2, %c0_50] : memref<88x128xf32, #tpu.memory_space<vmem>>, vector<1x128xf32>
    %c0_i32_51 = arith.constant 0 : i32
    %c0_i32_52 = arith.constant 0 : i32
    %122 = tpu.memref_slice %arg1[%c0_i32, %c0_i32_51, %c0_i32_52] : memref<1x88x128xf32, #tpu.memory_space<vmem>> -> memref<1x88x128xf32, #tpu.memory_space<vmem>>
    %123 = tpu.memref_squeeze %122 : memref<1x88x128xf32, #tpu.memory_space<vmem>> -> memref<88x128xf32, #tpu.memory_space<vmem>>
    %c10 = arith.constant 10 : index
    %c0_53 = arith.constant 0 : index
    %124 = vector.load %123[%c10, %c0_53] : memref<88x128xf32, #tpu.memory_space<vmem>>, vector<1x128xf32>
    %c0_i32_54 = arith.constant 0 : i32
    %c0_i32_55 = arith.constant 0 : i32
    %125 = tpu.memref_slice %arg1[%c0_i32, %c0_i32_54, %c0_i32_55] : memref<1x88x128xf32, #tpu.memory_space<vmem>> -> memref<1x88x128xf32, #tpu.memory_space<vmem>>
    %126 = tpu.memref_squeeze %125 : memref<1x88x128xf32, #tpu.memory_space<vmem>> -> memref<88x128xf32, #tpu.memory_space<vmem>>
    %c18 = arith.constant 18 : index
    %c0_56 = arith.constant 0 : index
    %127 = vector.load %126[%c18, %c0_56] : memref<88x128xf32, #tpu.memory_space<vmem>>, vector<1x128xf32>
    %128 = vector.shape_cast %127 : vector<1x128xf32> to vector<1x128xf32>
    %129 = vector.broadcast %128 : vector<1x128xf32> to vector<64x128xf32>
    %c0_i32_57 = arith.constant 0 : i32
    %c0_i32_58 = arith.constant 0 : i32
    %130 = tpu.memref_slice %arg1[%c0_i32, %c0_i32_57, %c0_i32_58] : memref<1x88x128xf32, #tpu.memory_space<vmem>> -> memref<1x88x128xf32, #tpu.memory_space<vmem>>
    %131 = tpu.memref_squeeze %130 : memref<1x88x128xf32, #tpu.memory_space<vmem>> -> memref<88x128xf32, #tpu.memory_space<vmem>>
    %c26 = arith.constant 26 : index
    %c0_59 = arith.constant 0 : index
    %132 = vector.load %131[%c26, %c0_59] : memref<88x128xf32, #tpu.memory_space<vmem>>, vector<1x128xf32>
    %133 = vector.shape_cast %132 : vector<1x128xf32> to vector<1x128xf32>
    %134 = vector.broadcast %133 : vector<1x128xf32> to vector<64x128xf32>
    %c0_i32_60 = arith.constant 0 : i32
    %c0_i32_61 = arith.constant 0 : i32
    %135 = tpu.memref_slice %arg1[%c0_i32, %c0_i32_60, %c0_i32_61] : memref<1x88x128xf32, #tpu.memory_space<vmem>> -> memref<1x88x128xf32, #tpu.memory_space<vmem>>
    %136 = tpu.memref_squeeze %135 : memref<1x88x128xf32, #tpu.memory_space<vmem>> -> memref<88x128xf32, #tpu.memory_space<vmem>>
    %c34 = arith.constant 34 : index
    %c0_62 = arith.constant 0 : index
    %137 = vector.load %136[%c34, %c0_62] : memref<88x128xf32, #tpu.memory_space<vmem>>, vector<1x128xf32>
    %c0_i32_63 = arith.constant 0 : i32
    %c0_i32_64 = arith.constant 0 : i32
    %138 = tpu.memref_slice %arg1[%c0_i32, %c0_i32_63, %c0_i32_64] : memref<1x88x128xf32, #tpu.memory_space<vmem>> -> memref<1x88x128xf32, #tpu.memory_space<vmem>>
    %139 = tpu.memref_squeeze %138 : memref<1x88x128xf32, #tpu.memory_space<vmem>> -> memref<88x128xf32, #tpu.memory_space<vmem>>
    %c42 = arith.constant 42 : index
    %c0_65 = arith.constant 0 : index
    %140 = vector.load %139[%c42, %c0_65] : memref<88x128xf32, #tpu.memory_space<vmem>>, vector<1x128xf32>
    %c0_i32_66 = arith.constant 0 : i32
    %c0_i32_67 = arith.constant 0 : i32
    %141 = tpu.memref_slice %arg1[%c0_i32, %c0_i32_66, %c0_i32_67] : memref<1x88x128xf32, #tpu.memory_space<vmem>> -> memref<1x88x128xf32, #tpu.memory_space<vmem>>
    %142 = tpu.memref_squeeze %141 : memref<1x88x128xf32, #tpu.memory_space<vmem>> -> memref<88x128xf32, #tpu.memory_space<vmem>>
    %c50 = arith.constant 50 : index
    %c0_68 = arith.constant 0 : index
    %143 = vector.load %142[%c50, %c0_68] : memref<88x128xf32, #tpu.memory_space<vmem>>, vector<1x128xf32>
    %144 = vector.broadcast %121 : vector<1x128xf32> to vector<64x128xf32>
    %145 = arith.subf %3, %144 : vector<64x128xf32>
    %146 = vector.broadcast %124 : vector<1x128xf32> to vector<64x128xf32>
    %147 = arith.subf %1, %146 : vector<64x128xf32>
    %148 = arith.mulf %145, %129 : vector<64x128xf32>
    %149 = arith.mulf %147, %134 : vector<64x128xf32>
    %150 = arith.addf %148, %149 : vector<64x128xf32>
    %151 = vector.broadcast %137 : vector<1x128xf32> to vector<64x128xf32>
    %152 = arith.mulf %150, %151 : vector<64x128xf32>
    %cst_69 = arith.constant 0.000000e+00 : f32
    %cst_70 = arith.constant 1.000000e+00 : f32
    %153 = vector.broadcast %cst_69 : f32 to vector<64x128xf32>
    %154 = arith.maximumf %153, %152 : vector<64x128xf32>
    %155 = vector.broadcast %cst_70 : f32 to vector<64x128xf32>
    %156 = arith.minimumf %155, %154 : vector<64x128xf32>
    %157 = arith.mulf %156, %129 : vector<64x128xf32>
    %158 = arith.subf %145, %157 : vector<64x128xf32>
    %159 = arith.mulf %156, %134 : vector<64x128xf32>
    %160 = arith.subf %147, %159 : vector<64x128xf32>
    %161 = arith.mulf %158, %158 : vector<64x128xf32>
    %162 = arith.mulf %160, %160 : vector<64x128xf32>
    %163 = arith.addf %161, %162 : vector<64x128xf32>
    %164 = arith.minimumf %108, %163 : vector<64x128xf32>
    %cst_71 = arith.constant 0.000000e+00 : f32
    %165 = vector.broadcast %cst_71 : f32 to vector<64x128xf32>
    %166 = arith.cmpf olt, %147, %165 : vector<64x128xf32>
    %167 = vector.broadcast %140 : vector<1x128xf32> to vector<64x128xf32>
    %168 = arith.cmpf ogt, %167, %1 : vector<64x128xf32>
    %169 = arith.xori %166, %168 : vector<64x128xi1>
    %170 = vector.broadcast %143 : vector<1x128xf32> to vector<64x128xf32>
    %171 = arith.mulf %147, %170 : vector<64x128xf32>
    %172 = arith.cmpf olt, %145, %171 : vector<64x128xf32>
    %173 = arith.andi %169, %172 : vector<64x128xi1>
    %174 = arith.xori %118, %173 : vector<64x128xi1>
    %c0_i32_72 = arith.constant 0 : i32
    %c0_i32_73 = arith.constant 0 : i32
    %175 = tpu.memref_slice %arg1[%c0_i32, %c0_i32_72, %c0_i32_73] : memref<1x88x128xf32, #tpu.memory_space<vmem>> -> memref<1x88x128xf32, #tpu.memory_space<vmem>>
    %176 = tpu.memref_squeeze %175 : memref<1x88x128xf32, #tpu.memory_space<vmem>> -> memref<88x128xf32, #tpu.memory_space<vmem>>
    %c3 = arith.constant 3 : index
    %c0_74 = arith.constant 0 : index
    %177 = vector.load %176[%c3, %c0_74] : memref<88x128xf32, #tpu.memory_space<vmem>>, vector<1x128xf32>
    %c0_i32_75 = arith.constant 0 : i32
    %c0_i32_76 = arith.constant 0 : i32
    %178 = tpu.memref_slice %arg1[%c0_i32, %c0_i32_75, %c0_i32_76] : memref<1x88x128xf32, #tpu.memory_space<vmem>> -> memref<1x88x128xf32, #tpu.memory_space<vmem>>
    %179 = tpu.memref_squeeze %178 : memref<1x88x128xf32, #tpu.memory_space<vmem>> -> memref<88x128xf32, #tpu.memory_space<vmem>>
    %c11 = arith.constant 11 : index
    %c0_77 = arith.constant 0 : index
    %180 = vector.load %179[%c11, %c0_77] : memref<88x128xf32, #tpu.memory_space<vmem>>, vector<1x128xf32>
    %c0_i32_78 = arith.constant 0 : i32
    %c0_i32_79 = arith.constant 0 : i32
    %181 = tpu.memref_slice %arg1[%c0_i32, %c0_i32_78, %c0_i32_79] : memref<1x88x128xf32, #tpu.memory_space<vmem>> -> memref<1x88x128xf32, #tpu.memory_space<vmem>>
    %182 = tpu.memref_squeeze %181 : memref<1x88x128xf32, #tpu.memory_space<vmem>> -> memref<88x128xf32, #tpu.memory_space<vmem>>
    %c19 = arith.constant 19 : index
    %c0_80 = arith.constant 0 : index
    %183 = vector.load %182[%c19, %c0_80] : memref<88x128xf32, #tpu.memory_space<vmem>>, vector<1x128xf32>
    %184 = vector.shape_cast %183 : vector<1x128xf32> to vector<1x128xf32>
    %185 = vector.broadcast %184 : vector<1x128xf32> to vector<64x128xf32>
    %c0_i32_81 = arith.constant 0 : i32
    %c0_i32_82 = arith.constant 0 : i32
    %186 = tpu.memref_slice %arg1[%c0_i32, %c0_i32_81, %c0_i32_82] : memref<1x88x128xf32, #tpu.memory_space<vmem>> -> memref<1x88x128xf32, #tpu.memory_space<vmem>>
    %187 = tpu.memref_squeeze %186 : memref<1x88x128xf32, #tpu.memory_space<vmem>> -> memref<88x128xf32, #tpu.memory_space<vmem>>
    %c27 = arith.constant 27 : index
    %c0_83 = arith.constant 0 : index
    %188 = vector.load %187[%c27, %c0_83] : memref<88x128xf32, #tpu.memory_space<vmem>>, vector<1x128xf32>
    %189 = vector.shape_cast %188 : vector<1x128xf32> to vector<1x128xf32>
    %190 = vector.broadcast %189 : vector<1x128xf32> to vector<64x128xf32>
    %c0_i32_84 = arith.constant 0 : i32
    %c0_i32_85 = arith.constant 0 : i32
    %191 = tpu.memref_slice %arg1[%c0_i32, %c0_i32_84, %c0_i32_85] : memref<1x88x128xf32, #tpu.memory_space<vmem>> -> memref<1x88x128xf32, #tpu.memory_space<vmem>>
    %192 = tpu.memref_squeeze %191 : memref<1x88x128xf32, #tpu.memory_space<vmem>> -> memref<88x128xf32, #tpu.memory_space<vmem>>
    %c35 = arith.constant 35 : index
    %c0_86 = arith.constant 0 : index
    %193 = vector.load %192[%c35, %c0_86] : memref<88x128xf32, #tpu.memory_space<vmem>>, vector<1x128xf32>
    %c0_i32_87 = arith.constant 0 : i32
    %c0_i32_88 = arith.constant 0 : i32
    %194 = tpu.memref_slice %arg1[%c0_i32, %c0_i32_87, %c0_i32_88] : memref<1x88x128xf32, #tpu.memory_space<vmem>> -> memref<1x88x128xf32, #tpu.memory_space<vmem>>
    %195 = tpu.memref_squeeze %194 : memref<1x88x128xf32, #tpu.memory_space<vmem>> -> memref<88x128xf32, #tpu.memory_space<vmem>>
    %c43 = arith.constant 43 : index
    %c0_89 = arith.constant 0 : index
    %196 = vector.load %195[%c43, %c0_89] : memref<88x128xf32, #tpu.memory_space<vmem>>, vector<1x128xf32>
    %c0_i32_90 = arith.constant 0 : i32
    %c0_i32_91 = arith.constant 0 : i32
    %197 = tpu.memref_slice %arg1[%c0_i32, %c0_i32_90, %c0_i32_91] : memref<1x88x128xf32, #tpu.memory_space<vmem>> -> memref<1x88x128xf32, #tpu.memory_space<vmem>>
    %198 = tpu.memref_squeeze %197 : memref<1x88x128xf32, #tpu.memory_space<vmem>> -> memref<88x128xf32, #tpu.memory_space<vmem>>
    %c51 = arith.constant 51 : index
    %c0_92 = arith.constant 0 : index
    %199 = vector.load %198[%c51, %c0_92] : memref<88x128xf32, #tpu.memory_space<vmem>>, vector<1x128xf32>
    %200 = vector.broadcast %177 : vector<1x128xf32> to vector<64x128xf32>
    %201 = arith.subf %3, %200 : vector<64x128xf32>
    %202 = vector.broadcast %180 : vector<1x128xf32> to vector<64x128xf32>
    %203 = arith.subf %1, %202 : vector<64x128xf32>
    %204 = arith.mulf %201, %185 : vector<64x128xf32>
    %205 = arith.mulf %203, %190 : vector<64x128xf32>
    %206 = arith.addf %204, %205 : vector<64x128xf32>
    %207 = vector.broadcast %193 : vector<1x128xf32> to vector<64x128xf32>
    %208 = arith.mulf %206, %207 : vector<64x128xf32>
    %cst_93 = arith.constant 0.000000e+00 : f32
    %cst_94 = arith.constant 1.000000e+00 : f32
    %209 = vector.broadcast %cst_93 : f32 to vector<64x128xf32>
    %210 = arith.maximumf %209, %208 : vector<64x128xf32>
    %211 = vector.broadcast %cst_94 : f32 to vector<64x128xf32>
    %212 = arith.minimumf %211, %210 : vector<64x128xf32>
    %213 = arith.mulf %212, %185 : vector<64x128xf32>
    %214 = arith.subf %201, %213 : vector<64x128xf32>
    %215 = arith.mulf %212, %190 : vector<64x128xf32>
    %216 = arith.subf %203, %215 : vector<64x128xf32>
    %217 = arith.mulf %214, %214 : vector<64x128xf32>
    %218 = arith.mulf %216, %216 : vector<64x128xf32>
    %219 = arith.addf %217, %218 : vector<64x128xf32>
    %220 = arith.minimumf %164, %219 : vector<64x128xf32>
    %cst_95 = arith.constant 0.000000e+00 : f32
    %221 = vector.broadcast %cst_95 : f32 to vector<64x128xf32>
    %222 = arith.cmpf olt, %203, %221 : vector<64x128xf32>
    %223 = vector.broadcast %196 : vector<1x128xf32> to vector<64x128xf32>
    %224 = arith.cmpf ogt, %223, %1 : vector<64x128xf32>
    %225 = arith.xori %222, %224 : vector<64x128xi1>
    %226 = vector.broadcast %199 : vector<1x128xf32> to vector<64x128xf32>
    %227 = arith.mulf %203, %226 : vector<64x128xf32>
    %228 = arith.cmpf olt, %201, %227 : vector<64x128xf32>
    %229 = arith.andi %225, %228 : vector<64x128xi1>
    %230 = arith.xori %174, %229 : vector<64x128xi1>
    %c0_i32_96 = arith.constant 0 : i32
    %c0_i32_97 = arith.constant 0 : i32
    %231 = tpu.memref_slice %arg1[%c0_i32, %c0_i32_96, %c0_i32_97] : memref<1x88x128xf32, #tpu.memory_space<vmem>> -> memref<1x88x128xf32, #tpu.memory_space<vmem>>
    %232 = tpu.memref_squeeze %231 : memref<1x88x128xf32, #tpu.memory_space<vmem>> -> memref<88x128xf32, #tpu.memory_space<vmem>>
    %c4 = arith.constant 4 : index
    %c0_98 = arith.constant 0 : index
    %233 = vector.load %232[%c4, %c0_98] : memref<88x128xf32, #tpu.memory_space<vmem>>, vector<1x128xf32>
    %c0_i32_99 = arith.constant 0 : i32
    %c0_i32_100 = arith.constant 0 : i32
    %234 = tpu.memref_slice %arg1[%c0_i32, %c0_i32_99, %c0_i32_100] : memref<1x88x128xf32, #tpu.memory_space<vmem>> -> memref<1x88x128xf32, #tpu.memory_space<vmem>>
    %235 = tpu.memref_squeeze %234 : memref<1x88x128xf32, #tpu.memory_space<vmem>> -> memref<88x128xf32, #tpu.memory_space<vmem>>
    %c12 = arith.constant 12 : index
    %c0_101 = arith.constant 0 : index
    %236 = vector.load %235[%c12, %c0_101] : memref<88x128xf32, #tpu.memory_space<vmem>>, vector<1x128xf32>
    %c0_i32_102 = arith.constant 0 : i32
    %c0_i32_103 = arith.constant 0 : i32
    %237 = tpu.memref_slice %arg1[%c0_i32, %c0_i32_102, %c0_i32_103] : memref<1x88x128xf32, #tpu.memory_space<vmem>> -> memref<1x88x128xf32, #tpu.memory_space<vmem>>
    %238 = tpu.memref_squeeze %237 : memref<1x88x128xf32, #tpu.memory_space<vmem>> -> memref<88x128xf32, #tpu.memory_space<vmem>>
    %c20 = arith.constant 20 : index
    %c0_104 = arith.constant 0 : index
    %239 = vector.load %238[%c20, %c0_104] : memref<88x128xf32, #tpu.memory_space<vmem>>, vector<1x128xf32>
    %240 = vector.shape_cast %239 : vector<1x128xf32> to vector<1x128xf32>
    %241 = vector.broadcast %240 : vector<1x128xf32> to vector<64x128xf32>
    %c0_i32_105 = arith.constant 0 : i32
    %c0_i32_106 = arith.constant 0 : i32
    %242 = tpu.memref_slice %arg1[%c0_i32, %c0_i32_105, %c0_i32_106] : memref<1x88x128xf32, #tpu.memory_space<vmem>> -> memref<1x88x128xf32, #tpu.memory_space<vmem>>
    %243 = tpu.memref_squeeze %242 : memref<1x88x128xf32, #tpu.memory_space<vmem>> -> memref<88x128xf32, #tpu.memory_space<vmem>>
    %c28 = arith.constant 28 : index
    %c0_107 = arith.constant 0 : index
    %244 = vector.load %243[%c28, %c0_107] : memref<88x128xf32, #tpu.memory_space<vmem>>, vector<1x128xf32>
    %245 = vector.shape_cast %244 : vector<1x128xf32> to vector<1x128xf32>
    %246 = vector.broadcast %245 : vector<1x128xf32> to vector<64x128xf32>
    %c0_i32_108 = arith.constant 0 : i32
    %c0_i32_109 = arith.constant 0 : i32
    %247 = tpu.memref_slice %arg1[%c0_i32, %c0_i32_108, %c0_i32_109] : memref<1x88x128xf32, #tpu.memory_space<vmem>> -> memref<1x88x128xf32, #tpu.memory_space<vmem>>
    %248 = tpu.memref_squeeze %247 : memref<1x88x128xf32, #tpu.memory_space<vmem>> -> memref<88x128xf32, #tpu.memory_space<vmem>>
    %c36 = arith.constant 36 : index
    %c0_110 = arith.constant 0 : index
    %249 = vector.load %248[%c36, %c0_110] : memref<88x128xf32, #tpu.memory_space<vmem>>, vector<1x128xf32>
    %c0_i32_111 = arith.constant 0 : i32
    %c0_i32_112 = arith.constant 0 : i32
    %250 = tpu.memref_slice %arg1[%c0_i32, %c0_i32_111, %c0_i32_112] : memref<1x88x128xf32, #tpu.memory_space<vmem>> -> memref<1x88x128xf32, #tpu.memory_space<vmem>>
    %251 = tpu.memref_squeeze %250 : memref<1x88x128xf32, #tpu.memory_space<vmem>> -> memref<88x128xf32, #tpu.memory_space<vmem>>
    %c44 = arith.constant 44 : index
    %c0_113 = arith.constant 0 : index
    %252 = vector.load %251[%c44, %c0_113] : memref<88x128xf32, #tpu.memory_space<vmem>>, vector<1x128xf32>
    %c0_i32_114 = arith.constant 0 : i32
    %c0_i32_115 = arith.constant 0 : i32
    %253 = tpu.memref_slice %arg1[%c0_i32, %c0_i32_114, %c0_i32_115] : memref<1x88x128xf32, #tpu.memory_space<vmem>> -> memref<1x88x128xf32, #tpu.memory_space<vmem>>
    %254 = tpu.memref_squeeze %253 : memref<1x88x128xf32, #tpu.memory_space<vmem>> -> memref<88x128xf32, #tpu.memory_space<vmem>>
    %c52 = arith.constant 52 : index
    %c0_116 = arith.constant 0 : index
    %255 = vector.load %254[%c52, %c0_116] : memref<88x128xf32, #tpu.memory_space<vmem>>, vector<1x128xf32>
    %256 = vector.broadcast %233 : vector<1x128xf32> to vector<64x128xf32>
    %257 = arith.subf %3, %256 : vector<64x128xf32>
    %258 = vector.broadcast %236 : vector<1x128xf32> to vector<64x128xf32>
    %259 = arith.subf %1, %258 : vector<64x128xf32>
    %260 = arith.mulf %257, %241 : vector<64x128xf32>
    %261 = arith.mulf %259, %246 : vector<64x128xf32>
    %262 = arith.addf %260, %261 : vector<64x128xf32>
    %263 = vector.broadcast %249 : vector<1x128xf32> to vector<64x128xf32>
    %264 = arith.mulf %262, %263 : vector<64x128xf32>
    %cst_117 = arith.constant 0.000000e+00 : f32
    %cst_118 = arith.constant 1.000000e+00 : f32
    %265 = vector.broadcast %cst_117 : f32 to vector<64x128xf32>
    %266 = arith.maximumf %265, %264 : vector<64x128xf32>
    %267 = vector.broadcast %cst_118 : f32 to vector<64x128xf32>
    %268 = arith.minimumf %267, %266 : vector<64x128xf32>
    %269 = arith.mulf %268, %241 : vector<64x128xf32>
    %270 = arith.subf %257, %269 : vector<64x128xf32>
    %271 = arith.mulf %268, %246 : vector<64x128xf32>
    %272 = arith.subf %259, %271 : vector<64x128xf32>
    %273 = arith.mulf %270, %270 : vector<64x128xf32>
    %274 = arith.mulf %272, %272 : vector<64x128xf32>
    %275 = arith.addf %273, %274 : vector<64x128xf32>
    %276 = arith.minimumf %220, %275 : vector<64x128xf32>
    %cst_119 = arith.constant 0.000000e+00 : f32
    %277 = vector.broadcast %cst_119 : f32 to vector<64x128xf32>
    %278 = arith.cmpf olt, %259, %277 : vector<64x128xf32>
    %279 = vector.broadcast %252 : vector<1x128xf32> to vector<64x128xf32>
    %280 = arith.cmpf ogt, %279, %1 : vector<64x128xf32>
    %281 = arith.xori %278, %280 : vector<64x128xi1>
    %282 = vector.broadcast %255 : vector<1x128xf32> to vector<64x128xf32>
    %283 = arith.mulf %259, %282 : vector<64x128xf32>
    %284 = arith.cmpf olt, %257, %283 : vector<64x128xf32>
    %285 = arith.andi %281, %284 : vector<64x128xi1>
    %286 = arith.xori %230, %285 : vector<64x128xi1>
    %c0_i32_120 = arith.constant 0 : i32
    %c0_i32_121 = arith.constant 0 : i32
    %287 = tpu.memref_slice %arg1[%c0_i32, %c0_i32_120, %c0_i32_121] : memref<1x88x128xf32, #tpu.memory_space<vmem>> -> memref<1x88x128xf32, #tpu.memory_space<vmem>>
    %288 = tpu.memref_squeeze %287 : memref<1x88x128xf32, #tpu.memory_space<vmem>> -> memref<88x128xf32, #tpu.memory_space<vmem>>
    %c5 = arith.constant 5 : index
    %c0_122 = arith.constant 0 : index
    %289 = vector.load %288[%c5, %c0_122] : memref<88x128xf32, #tpu.memory_space<vmem>>, vector<1x128xf32>
    %c0_i32_123 = arith.constant 0 : i32
    %c0_i32_124 = arith.constant 0 : i32
    %290 = tpu.memref_slice %arg1[%c0_i32, %c0_i32_123, %c0_i32_124] : memref<1x88x128xf32, #tpu.memory_space<vmem>> -> memref<1x88x128xf32, #tpu.memory_space<vmem>>
    %291 = tpu.memref_squeeze %290 : memref<1x88x128xf32, #tpu.memory_space<vmem>> -> memref<88x128xf32, #tpu.memory_space<vmem>>
    %c13 = arith.constant 13 : index
    %c0_125 = arith.constant 0 : index
    %292 = vector.load %291[%c13, %c0_125] : memref<88x128xf32, #tpu.memory_space<vmem>>, vector<1x128xf32>
    %c0_i32_126 = arith.constant 0 : i32
    %c0_i32_127 = arith.constant 0 : i32
    %293 = tpu.memref_slice %arg1[%c0_i32, %c0_i32_126, %c0_i32_127] : memref<1x88x128xf32, #tpu.memory_space<vmem>> -> memref<1x88x128xf32, #tpu.memory_space<vmem>>
    %294 = tpu.memref_squeeze %293 : memref<1x88x128xf32, #tpu.memory_space<vmem>> -> memref<88x128xf32, #tpu.memory_space<vmem>>
    %c21 = arith.constant 21 : index
    %c0_128 = arith.constant 0 : index
    %295 = vector.load %294[%c21, %c0_128] : memref<88x128xf32, #tpu.memory_space<vmem>>, vector<1x128xf32>
    %296 = vector.shape_cast %295 : vector<1x128xf32> to vector<1x128xf32>
    %297 = vector.broadcast %296 : vector<1x128xf32> to vector<64x128xf32>
    %c0_i32_129 = arith.constant 0 : i32
    %c0_i32_130 = arith.constant 0 : i32
    %298 = tpu.memref_slice %arg1[%c0_i32, %c0_i32_129, %c0_i32_130] : memref<1x88x128xf32, #tpu.memory_space<vmem>> -> memref<1x88x128xf32, #tpu.memory_space<vmem>>
    %299 = tpu.memref_squeeze %298 : memref<1x88x128xf32, #tpu.memory_space<vmem>> -> memref<88x128xf32, #tpu.memory_space<vmem>>
    %c29 = arith.constant 29 : index
    %c0_131 = arith.constant 0 : index
    %300 = vector.load %299[%c29, %c0_131] : memref<88x128xf32, #tpu.memory_space<vmem>>, vector<1x128xf32>
    %301 = vector.shape_cast %300 : vector<1x128xf32> to vector<1x128xf32>
    %302 = vector.broadcast %301 : vector<1x128xf32> to vector<64x128xf32>
    %c0_i32_132 = arith.constant 0 : i32
    %c0_i32_133 = arith.constant 0 : i32
    %303 = tpu.memref_slice %arg1[%c0_i32, %c0_i32_132, %c0_i32_133] : memref<1x88x128xf32, #tpu.memory_space<vmem>> -> memref<1x88x128xf32, #tpu.memory_space<vmem>>
    %304 = tpu.memref_squeeze %303 : memref<1x88x128xf32, #tpu.memory_space<vmem>> -> memref<88x128xf32, #tpu.memory_space<vmem>>
    %c37 = arith.constant 37 : index
    %c0_134 = arith.constant 0 : index
    %305 = vector.load %304[%c37, %c0_134] : memref<88x128xf32, #tpu.memory_space<vmem>>, vector<1x128xf32>
    %c0_i32_135 = arith.constant 0 : i32
    %c0_i32_136 = arith.constant 0 : i32
    %306 = tpu.memref_slice %arg1[%c0_i32, %c0_i32_135, %c0_i32_136] : memref<1x88x128xf32, #tpu.memory_space<vmem>> -> memref<1x88x128xf32, #tpu.memory_space<vmem>>
    %307 = tpu.memref_squeeze %306 : memref<1x88x128xf32, #tpu.memory_space<vmem>> -> memref<88x128xf32, #tpu.memory_space<vmem>>
    %c45 = arith.constant 45 : index
    %c0_137 = arith.constant 0 : index
    %308 = vector.load %307[%c45, %c0_137] : memref<88x128xf32, #tpu.memory_space<vmem>>, vector<1x128xf32>
    %c0_i32_138 = arith.constant 0 : i32
    %c0_i32_139 = arith.constant 0 : i32
    %309 = tpu.memref_slice %arg1[%c0_i32, %c0_i32_138, %c0_i32_139] : memref<1x88x128xf32, #tpu.memory_space<vmem>> -> memref<1x88x128xf32, #tpu.memory_space<vmem>>
    %310 = tpu.memref_squeeze %309 : memref<1x88x128xf32, #tpu.memory_space<vmem>> -> memref<88x128xf32, #tpu.memory_space<vmem>>
    %c53 = arith.constant 53 : index
    %c0_140 = arith.constant 0 : index
    %311 = vector.load %310[%c53, %c0_140] : memref<88x128xf32, #tpu.memory_space<vmem>>, vector<1x128xf32>
    %312 = vector.broadcast %289 : vector<1x128xf32> to vector<64x128xf32>
    %313 = arith.subf %3, %312 : vector<64x128xf32>
    %314 = vector.broadcast %292 : vector<1x128xf32> to vector<64x128xf32>
    %315 = arith.subf %1, %314 : vector<64x128xf32>
    %316 = arith.mulf %313, %297 : vector<64x128xf32>
    %317 = arith.mulf %315, %302 : vector<64x128xf32>
    %318 = arith.addf %316, %317 : vector<64x128xf32>
    %319 = vector.broadcast %305 : vector<1x128xf32> to vector<64x128xf32>
    %320 = arith.mulf %318, %319 : vector<64x128xf32>
    %cst_141 = arith.constant 0.000000e+00 : f32
    %cst_142 = arith.constant 1.000000e+00 : f32
    %321 = vector.broadcast %cst_141 : f32 to vector<64x128xf32>
    %322 = arith.maximumf %321, %320 : vector<64x128xf32>
    %323 = vector.broadcast %cst_142 : f32 to vector<64x128xf32>
    %324 = arith.minimumf %323, %322 : vector<64x128xf32>
    %325 = arith.mulf %324, %297 : vector<64x128xf32>
    %326 = arith.subf %313, %325 : vector<64x128xf32>
    %327 = arith.mulf %324, %302 : vector<64x128xf32>
    %328 = arith.subf %315, %327 : vector<64x128xf32>
    %329 = arith.mulf %326, %326 : vector<64x128xf32>
    %330 = arith.mulf %328, %328 : vector<64x128xf32>
    %331 = arith.addf %329, %330 : vector<64x128xf32>
    %332 = arith.minimumf %276, %331 : vector<64x128xf32>
    %cst_143 = arith.constant 0.000000e+00 : f32
    %333 = vector.broadcast %cst_143 : f32 to vector<64x128xf32>
    %334 = arith.cmpf olt, %315, %333 : vector<64x128xf32>
    %335 = vector.broadcast %308 : vector<1x128xf32> to vector<64x128xf32>
    %336 = arith.cmpf ogt, %335, %1 : vector<64x128xf32>
    %337 = arith.xori %334, %336 : vector<64x128xi1>
    %338 = vector.broadcast %311 : vector<1x128xf32> to vector<64x128xf32>
    %339 = arith.mulf %315, %338 : vector<64x128xf32>
    %340 = arith.cmpf olt, %313, %339 : vector<64x128xf32>
    %341 = arith.andi %337, %340 : vector<64x128xi1>
    %342 = arith.xori %286, %341 : vector<64x128xi1>
    %c0_i32_144 = arith.constant 0 : i32
    %c0_i32_145 = arith.constant 0 : i32
    %343 = tpu.memref_slice %arg1[%c0_i32, %c0_i32_144, %c0_i32_145] : memref<1x88x128xf32, #tpu.memory_space<vmem>> -> memref<1x88x128xf32, #tpu.memory_space<vmem>>
    %344 = tpu.memref_squeeze %343 : memref<1x88x128xf32, #tpu.memory_space<vmem>> -> memref<88x128xf32, #tpu.memory_space<vmem>>
    %c6 = arith.constant 6 : index
    %c0_146 = arith.constant 0 : index
    %345 = vector.load %344[%c6, %c0_146] : memref<88x128xf32, #tpu.memory_space<vmem>>, vector<1x128xf32>
    %c0_i32_147 = arith.constant 0 : i32
    %c0_i32_148 = arith.constant 0 : i32
    %346 = tpu.memref_slice %arg1[%c0_i32, %c0_i32_147, %c0_i32_148] : memref<1x88x128xf32, #tpu.memory_space<vmem>> -> memref<1x88x128xf32, #tpu.memory_space<vmem>>
    %347 = tpu.memref_squeeze %346 : memref<1x88x128xf32, #tpu.memory_space<vmem>> -> memref<88x128xf32, #tpu.memory_space<vmem>>
    %c14 = arith.constant 14 : index
    %c0_149 = arith.constant 0 : index
    %348 = vector.load %347[%c14, %c0_149] : memref<88x128xf32, #tpu.memory_space<vmem>>, vector<1x128xf32>
    %c0_i32_150 = arith.constant 0 : i32
    %c0_i32_151 = arith.constant 0 : i32
    %349 = tpu.memref_slice %arg1[%c0_i32, %c0_i32_150, %c0_i32_151] : memref<1x88x128xf32, #tpu.memory_space<vmem>> -> memref<1x88x128xf32, #tpu.memory_space<vmem>>
    %350 = tpu.memref_squeeze %349 : memref<1x88x128xf32, #tpu.memory_space<vmem>> -> memref<88x128xf32, #tpu.memory_space<vmem>>
    %c22 = arith.constant 22 : index
    %c0_152 = arith.constant 0 : index
    %351 = vector.load %350[%c22, %c0_152] : memref<88x128xf32, #tpu.memory_space<vmem>>, vector<1x128xf32>
    %352 = vector.shape_cast %351 : vector<1x128xf32> to vector<1x128xf32>
    %353 = vector.broadcast %352 : vector<1x128xf32> to vector<64x128xf32>
    %c0_i32_153 = arith.constant 0 : i32
    %c0_i32_154 = arith.constant 0 : i32
    %354 = tpu.memref_slice %arg1[%c0_i32, %c0_i32_153, %c0_i32_154] : memref<1x88x128xf32, #tpu.memory_space<vmem>> -> memref<1x88x128xf32, #tpu.memory_space<vmem>>
    %355 = tpu.memref_squeeze %354 : memref<1x88x128xf32, #tpu.memory_space<vmem>> -> memref<88x128xf32, #tpu.memory_space<vmem>>
    %c30 = arith.constant 30 : index
    %c0_155 = arith.constant 0 : index
    %356 = vector.load %355[%c30, %c0_155] : memref<88x128xf32, #tpu.memory_space<vmem>>, vector<1x128xf32>
    %357 = vector.shape_cast %356 : vector<1x128xf32> to vector<1x128xf32>
    %358 = vector.broadcast %357 : vector<1x128xf32> to vector<64x128xf32>
    %c0_i32_156 = arith.constant 0 : i32
    %c0_i32_157 = arith.constant 0 : i32
    %359 = tpu.memref_slice %arg1[%c0_i32, %c0_i32_156, %c0_i32_157] : memref<1x88x128xf32, #tpu.memory_space<vmem>> -> memref<1x88x128xf32, #tpu.memory_space<vmem>>
    %360 = tpu.memref_squeeze %359 : memref<1x88x128xf32, #tpu.memory_space<vmem>> -> memref<88x128xf32, #tpu.memory_space<vmem>>
    %c38 = arith.constant 38 : index
    %c0_158 = arith.constant 0 : index
    %361 = vector.load %360[%c38, %c0_158] : memref<88x128xf32, #tpu.memory_space<vmem>>, vector<1x128xf32>
    %c0_i32_159 = arith.constant 0 : i32
    %c0_i32_160 = arith.constant 0 : i32
    %362 = tpu.memref_slice %arg1[%c0_i32, %c0_i32_159, %c0_i32_160] : memref<1x88x128xf32, #tpu.memory_space<vmem>> -> memref<1x88x128xf32, #tpu.memory_space<vmem>>
    %363 = tpu.memref_squeeze %362 : memref<1x88x128xf32, #tpu.memory_space<vmem>> -> memref<88x128xf32, #tpu.memory_space<vmem>>
    %c46 = arith.constant 46 : index
    %c0_161 = arith.constant 0 : index
    %364 = vector.load %363[%c46, %c0_161] : memref<88x128xf32, #tpu.memory_space<vmem>>, vector<1x128xf32>
    %c0_i32_162 = arith.constant 0 : i32
    %c0_i32_163 = arith.constant 0 : i32
    %365 = tpu.memref_slice %arg1[%c0_i32, %c0_i32_162, %c0_i32_163] : memref<1x88x128xf32, #tpu.memory_space<vmem>> -> memref<1x88x128xf32, #tpu.memory_space<vmem>>
    %366 = tpu.memref_squeeze %365 : memref<1x88x128xf32, #tpu.memory_space<vmem>> -> memref<88x128xf32, #tpu.memory_space<vmem>>
    %c54 = arith.constant 54 : index
    %c0_164 = arith.constant 0 : index
    %367 = vector.load %366[%c54, %c0_164] : memref<88x128xf32, #tpu.memory_space<vmem>>, vector<1x128xf32>
    %368 = vector.broadcast %345 : vector<1x128xf32> to vector<64x128xf32>
    %369 = arith.subf %3, %368 : vector<64x128xf32>
    %370 = vector.broadcast %348 : vector<1x128xf32> to vector<64x128xf32>
    %371 = arith.subf %1, %370 : vector<64x128xf32>
    %372 = arith.mulf %369, %353 : vector<64x128xf32>
    %373 = arith.mulf %371, %358 : vector<64x128xf32>
    %374 = arith.addf %372, %373 : vector<64x128xf32>
    %375 = vector.broadcast %361 : vector<1x128xf32> to vector<64x128xf32>
    %376 = arith.mulf %374, %375 : vector<64x128xf32>
    %cst_165 = arith.constant 0.000000e+00 : f32
    %cst_166 = arith.constant 1.000000e+00 : f32
    %377 = vector.broadcast %cst_165 : f32 to vector<64x128xf32>
    %378 = arith.maximumf %377, %376 : vector<64x128xf32>
    %379 = vector.broadcast %cst_166 : f32 to vector<64x128xf32>
    %380 = arith.minimumf %379, %378 : vector<64x128xf32>
    %381 = arith.mulf %380, %353 : vector<64x128xf32>
    %382 = arith.subf %369, %381 : vector<64x128xf32>
    %383 = arith.mulf %380, %358 : vector<64x128xf32>
    %384 = arith.subf %371, %383 : vector<64x128xf32>
    %385 = arith.mulf %382, %382 : vector<64x128xf32>
    %386 = arith.mulf %384, %384 : vector<64x128xf32>
    %387 = arith.addf %385, %386 : vector<64x128xf32>
    %388 = arith.minimumf %332, %387 : vector<64x128xf32>
    %cst_167 = arith.constant 0.000000e+00 : f32
    %389 = vector.broadcast %cst_167 : f32 to vector<64x128xf32>
    %390 = arith.cmpf olt, %371, %389 : vector<64x128xf32>
    %391 = vector.broadcast %364 : vector<1x128xf32> to vector<64x128xf32>
    %392 = arith.cmpf ogt, %391, %1 : vector<64x128xf32>
    %393 = arith.xori %390, %392 : vector<64x128xi1>
    %394 = vector.broadcast %367 : vector<1x128xf32> to vector<64x128xf32>
    %395 = arith.mulf %371, %394 : vector<64x128xf32>
    %396 = arith.cmpf olt, %369, %395 : vector<64x128xf32>
    %397 = arith.andi %393, %396 : vector<64x128xi1>
    %398 = arith.xori %342, %397 : vector<64x128xi1>
    %c0_i32_168 = arith.constant 0 : i32
    %c0_i32_169 = arith.constant 0 : i32
    %399 = tpu.memref_slice %arg1[%c0_i32, %c0_i32_168, %c0_i32_169] : memref<1x88x128xf32, #tpu.memory_space<vmem>> -> memref<1x88x128xf32, #tpu.memory_space<vmem>>
    %400 = tpu.memref_squeeze %399 : memref<1x88x128xf32, #tpu.memory_space<vmem>> -> memref<88x128xf32, #tpu.memory_space<vmem>>
    %c7 = arith.constant 7 : index
    %c0_170 = arith.constant 0 : index
    %401 = vector.load %400[%c7, %c0_170] : memref<88x128xf32, #tpu.memory_space<vmem>>, vector<1x128xf32>
    %c0_i32_171 = arith.constant 0 : i32
    %c0_i32_172 = arith.constant 0 : i32
    %402 = tpu.memref_slice %arg1[%c0_i32, %c0_i32_171, %c0_i32_172] : memref<1x88x128xf32, #tpu.memory_space<vmem>> -> memref<1x88x128xf32, #tpu.memory_space<vmem>>
    %403 = tpu.memref_squeeze %402 : memref<1x88x128xf32, #tpu.memory_space<vmem>> -> memref<88x128xf32, #tpu.memory_space<vmem>>
    %c15 = arith.constant 15 : index
    %c0_173 = arith.constant 0 : index
    %404 = vector.load %403[%c15, %c0_173] : memref<88x128xf32, #tpu.memory_space<vmem>>, vector<1x128xf32>
    %c0_i32_174 = arith.constant 0 : i32
    %c0_i32_175 = arith.constant 0 : i32
    %405 = tpu.memref_slice %arg1[%c0_i32, %c0_i32_174, %c0_i32_175] : memref<1x88x128xf32, #tpu.memory_space<vmem>> -> memref<1x88x128xf32, #tpu.memory_space<vmem>>
    %406 = tpu.memref_squeeze %405 : memref<1x88x128xf32, #tpu.memory_space<vmem>> -> memref<88x128xf32, #tpu.memory_space<vmem>>
    %c23 = arith.constant 23 : index
    %c0_176 = arith.constant 0 : index
    %407 = vector.load %406[%c23, %c0_176] : memref<88x128xf32, #tpu.memory_space<vmem>>, vector<1x128xf32>
    %408 = vector.shape_cast %407 : vector<1x128xf32> to vector<1x128xf32>
    %409 = vector.broadcast %408 : vector<1x128xf32> to vector<64x128xf32>
    %c0_i32_177 = arith.constant 0 : i32
    %c0_i32_178 = arith.constant 0 : i32
    %410 = tpu.memref_slice %arg1[%c0_i32, %c0_i32_177, %c0_i32_178] : memref<1x88x128xf32, #tpu.memory_space<vmem>> -> memref<1x88x128xf32, #tpu.memory_space<vmem>>
    %411 = tpu.memref_squeeze %410 : memref<1x88x128xf32, #tpu.memory_space<vmem>> -> memref<88x128xf32, #tpu.memory_space<vmem>>
    %c31 = arith.constant 31 : index
    %c0_179 = arith.constant 0 : index
    %412 = vector.load %411[%c31, %c0_179] : memref<88x128xf32, #tpu.memory_space<vmem>>, vector<1x128xf32>
    %413 = vector.shape_cast %412 : vector<1x128xf32> to vector<1x128xf32>
    %414 = vector.broadcast %413 : vector<1x128xf32> to vector<64x128xf32>
    %c0_i32_180 = arith.constant 0 : i32
    %c0_i32_181 = arith.constant 0 : i32
    %415 = tpu.memref_slice %arg1[%c0_i32, %c0_i32_180, %c0_i32_181] : memref<1x88x128xf32, #tpu.memory_space<vmem>> -> memref<1x88x128xf32, #tpu.memory_space<vmem>>
    %416 = tpu.memref_squeeze %415 : memref<1x88x128xf32, #tpu.memory_space<vmem>> -> memref<88x128xf32, #tpu.memory_space<vmem>>
    %c39 = arith.constant 39 : index
    %c0_182 = arith.constant 0 : index
    %417 = vector.load %416[%c39, %c0_182] : memref<88x128xf32, #tpu.memory_space<vmem>>, vector<1x128xf32>
    %c0_i32_183 = arith.constant 0 : i32
    %c0_i32_184 = arith.constant 0 : i32
    %418 = tpu.memref_slice %arg1[%c0_i32, %c0_i32_183, %c0_i32_184] : memref<1x88x128xf32, #tpu.memory_space<vmem>> -> memref<1x88x128xf32, #tpu.memory_space<vmem>>
    %419 = tpu.memref_squeeze %418 : memref<1x88x128xf32, #tpu.memory_space<vmem>> -> memref<88x128xf32, #tpu.memory_space<vmem>>
    %c47 = arith.constant 47 : index
    %c0_185 = arith.constant 0 : index
    %420 = vector.load %419[%c47, %c0_185] : memref<88x128xf32, #tpu.memory_space<vmem>>, vector<1x128xf32>
    %c0_i32_186 = arith.constant 0 : i32
    %c0_i32_187 = arith.constant 0 : i32
    %421 = tpu.memref_slice %arg1[%c0_i32, %c0_i32_186, %c0_i32_187] : memref<1x88x128xf32, #tpu.memory_space<vmem>> -> memref<1x88x128xf32, #tpu.memory_space<vmem>>
    %422 = tpu.memref_squeeze %421 : memref<1x88x128xf32, #tpu.memory_space<vmem>> -> memref<88x128xf32, #tpu.memory_space<vmem>>
    %c55 = arith.constant 55 : index
    %c0_188 = arith.constant 0 : index
    %423 = vector.load %422[%c55, %c0_188] : memref<88x128xf32, #tpu.memory_space<vmem>>, vector<1x128xf32>
    %424 = vector.broadcast %401 : vector<1x128xf32> to vector<64x128xf32>
    %425 = arith.subf %3, %424 : vector<64x128xf32>
    %426 = vector.broadcast %404 : vector<1x128xf32> to vector<64x128xf32>
    %427 = arith.subf %1, %426 : vector<64x128xf32>
    %428 = arith.mulf %425, %409 : vector<64x128xf32>
    %429 = arith.mulf %427, %414 : vector<64x128xf32>
    %430 = arith.addf %428, %429 : vector<64x128xf32>
    %431 = vector.broadcast %417 : vector<1x128xf32> to vector<64x128xf32>
    %432 = arith.mulf %430, %431 : vector<64x128xf32>
    %cst_189 = arith.constant 0.000000e+00 : f32
    %cst_190 = arith.constant 1.000000e+00 : f32
    %433 = vector.broadcast %cst_189 : f32 to vector<64x128xf32>
    %434 = arith.maximumf %433, %432 : vector<64x128xf32>
    %435 = vector.broadcast %cst_190 : f32 to vector<64x128xf32>
    %436 = arith.minimumf %435, %434 : vector<64x128xf32>
    %437 = arith.mulf %436, %409 : vector<64x128xf32>
    %438 = arith.subf %425, %437 : vector<64x128xf32>
    %439 = arith.mulf %436, %414 : vector<64x128xf32>
    %440 = arith.subf %427, %439 : vector<64x128xf32>
    %441 = arith.mulf %438, %438 : vector<64x128xf32>
    %442 = arith.mulf %440, %440 : vector<64x128xf32>
    %443 = arith.addf %441, %442 : vector<64x128xf32>
    %444 = arith.minimumf %388, %443 : vector<64x128xf32>
    %cst_191 = arith.constant 0.000000e+00 : f32
    %445 = vector.broadcast %cst_191 : f32 to vector<64x128xf32>
    %446 = arith.cmpf olt, %427, %445 : vector<64x128xf32>
    %447 = vector.broadcast %420 : vector<1x128xf32> to vector<64x128xf32>
    %448 = arith.cmpf ogt, %447, %1 : vector<64x128xf32>
    %449 = arith.xori %446, %448 : vector<64x128xi1>
    %450 = vector.broadcast %423 : vector<1x128xf32> to vector<64x128xf32>
    %451 = arith.mulf %427, %450 : vector<64x128xf32>
    %452 = arith.cmpf olt, %425, %451 : vector<64x128xf32>
    %453 = arith.andi %449, %452 : vector<64x128xi1>
    %454 = arith.xori %398, %453 : vector<64x128xi1>
    %cst_192 = arith.constant 1.000000e+00 : f32
    %cst_193 = arith.constant -1.000000e+00 : f32
    %455 = vector.broadcast %cst_192 : f32 to vector<64x128xf32>
    %456 = vector.broadcast %cst_193 : f32 to vector<64x128xf32>
    %457 = arith.select %454, %455, %456 : vector<64x128xi1>, vector<64x128xf32>
    %458 = math.sqrt %444 : vector<64x128xf32>
    %459 = arith.mulf %457, %458 : vector<64x128xf32>
    %cst_194 = arith.constant 1.000000e-01 : f32
    %460 = vector.broadcast %cst_194 : f32 to vector<64x128xf32>
    %461 = arith.mulf %459, %460 : vector<64x128xf32>
    %cst_195 = arith.constant -8.000000e+01 : f32
    %462 = vector.broadcast %cst_195 : f32 to vector<64x128xf32>
    %463 = arith.maximumf %461, %462 : vector<64x128xf32>
    %cst_196 = arith.constant 0.000000e+00 : f32
    %464 = vector.broadcast %cst_196 : f32 to vector<64x128xf32>
    %465 = arith.subf %464, %463 : vector<64x128xf32>
    %466 = math.exp %465 : vector<64x128xf32>
    %cst_197 = arith.constant 1.000000e+00 : f32
    %467 = vector.broadcast %cst_197 : f32 to vector<64x128xf32>
    %468 = arith.addf %467, %466 : vector<64x128xf32>
    %cst_198 = arith.constant 1.000000e+00 : f32
    %469 = vector.broadcast %cst_198 : f32 to vector<64x128xf32>
    %470 = arith.divf %469, %468 : vector<64x128xf32>
    %false_199 = arith.constant false
    %471 = vector.broadcast %false_199 : i1 to vector<64x128xi1>
    %c0_i32_200 = arith.constant 0 : i32
    %c0_i32_201 = arith.constant 0 : i32
    %472 = tpu.memref_slice %arg1[%c0_i32, %c0_i32_200, %c0_i32_201] : memref<1x88x128xf32, #tpu.memory_space<vmem>> -> memref<1x88x128xf32, #tpu.memory_space<vmem>>
    %473 = tpu.memref_squeeze %472 : memref<1x88x128xf32, #tpu.memory_space<vmem>> -> memref<88x128xf32, #tpu.memory_space<vmem>>
    %c56 = arith.constant 56 : index
    %c0_202 = arith.constant 0 : index
    %474 = vector.load %473[%c56, %c0_202] : memref<88x128xf32, #tpu.memory_space<vmem>>, vector<1x128xf32>
    %c0_i32_203 = arith.constant 0 : i32
    %c0_i32_204 = arith.constant 0 : i32
    %475 = tpu.memref_slice %arg1[%c0_i32, %c0_i32_203, %c0_i32_204] : memref<1x88x128xf32, #tpu.memory_space<vmem>> -> memref<1x88x128xf32, #tpu.memory_space<vmem>>
    %476 = tpu.memref_squeeze %475 : memref<1x88x128xf32, #tpu.memory_space<vmem>> -> memref<88x128xf32, #tpu.memory_space<vmem>>
    %c64 = arith.constant 64 : index
    %c0_205 = arith.constant 0 : index
    %477 = vector.load %476[%c64, %c0_205] : memref<88x128xf32, #tpu.memory_space<vmem>>, vector<1x128xf32>
    %c0_i32_206 = arith.constant 0 : i32
    %c0_i32_207 = arith.constant 0 : i32
    %478 = tpu.memref_slice %arg1[%c0_i32, %c0_i32_206, %c0_i32_207] : memref<1x88x128xf32, #tpu.memory_space<vmem>> -> memref<1x88x128xf32, #tpu.memory_space<vmem>>
    %479 = tpu.memref_squeeze %478 : memref<1x88x128xf32, #tpu.memory_space<vmem>> -> memref<88x128xf32, #tpu.memory_space<vmem>>
    %c72 = arith.constant 72 : index
    %c0_208 = arith.constant 0 : index
    %480 = vector.load %479[%c72, %c0_208] : memref<88x128xf32, #tpu.memory_space<vmem>>, vector<1x128xf32>
    %c0_i32_209 = arith.constant 0 : i32
    %c0_i32_210 = arith.constant 0 : i32
    %481 = tpu.memref_slice %arg1[%c0_i32, %c0_i32_209, %c0_i32_210] : memref<1x88x128xf32, #tpu.memory_space<vmem>> -> memref<1x88x128xf32, #tpu.memory_space<vmem>>
    %482 = tpu.memref_squeeze %481 : memref<1x88x128xf32, #tpu.memory_space<vmem>> -> memref<88x128xf32, #tpu.memory_space<vmem>>
    %c80 = arith.constant 80 : index
    %c0_211 = arith.constant 0 : index
    %483 = vector.load %482[%c80, %c0_211] : memref<88x128xf32, #tpu.memory_space<vmem>>, vector<1x128xf32>
    %484 = vector.broadcast %477 : vector<1x128xf32> to vector<64x128xf32>
    %485 = arith.subf %1, %484 : vector<64x128xf32>
    %cst_212 = arith.constant 0.000000e+00 : f32
    %486 = vector.broadcast %cst_212 : f32 to vector<64x128xf32>
    %487 = arith.cmpf olt, %485, %486 : vector<64x128xf32>
    %488 = vector.broadcast %480 : vector<1x128xf32> to vector<64x128xf32>
    %489 = arith.cmpf ogt, %488, %1 : vector<64x128xf32>
    %490 = arith.xori %487, %489 : vector<64x128xi1>
    %491 = vector.broadcast %474 : vector<1x128xf32> to vector<64x128xf32>
    %492 = arith.subf %3, %491 : vector<64x128xf32>
    %493 = vector.broadcast %483 : vector<1x128xf32> to vector<64x128xf32>
    %494 = arith.mulf %485, %493 : vector<64x128xf32>
    %495 = arith.cmpf olt, %492, %494 : vector<64x128xf32>
    %496 = arith.andi %490, %495 : vector<64x128xi1>
    %497 = arith.xori %471, %496 : vector<64x128xi1>
    %c0_i32_213 = arith.constant 0 : i32
    %c0_i32_214 = arith.constant 0 : i32
    %498 = tpu.memref_slice %arg1[%c0_i32, %c0_i32_213, %c0_i32_214] : memref<1x88x128xf32, #tpu.memory_space<vmem>> -> memref<1x88x128xf32, #tpu.memory_space<vmem>>
    %499 = tpu.memref_squeeze %498 : memref<1x88x128xf32, #tpu.memory_space<vmem>> -> memref<88x128xf32, #tpu.memory_space<vmem>>
    %c57 = arith.constant 57 : index
    %c0_215 = arith.constant 0 : index
    %500 = vector.load %499[%c57, %c0_215] : memref<88x128xf32, #tpu.memory_space<vmem>>, vector<1x128xf32>
    %c0_i32_216 = arith.constant 0 : i32
    %c0_i32_217 = arith.constant 0 : i32
    %501 = tpu.memref_slice %arg1[%c0_i32, %c0_i32_216, %c0_i32_217] : memref<1x88x128xf32, #tpu.memory_space<vmem>> -> memref<1x88x128xf32, #tpu.memory_space<vmem>>
    %502 = tpu.memref_squeeze %501 : memref<1x88x128xf32, #tpu.memory_space<vmem>> -> memref<88x128xf32, #tpu.memory_space<vmem>>
    %c65 = arith.constant 65 : index
    %c0_218 = arith.constant 0 : index
    %503 = vector.load %502[%c65, %c0_218] : memref<88x128xf32, #tpu.memory_space<vmem>>, vector<1x128xf32>
    %c0_i32_219 = arith.constant 0 : i32
    %c0_i32_220 = arith.constant 0 : i32
    %504 = tpu.memref_slice %arg1[%c0_i32, %c0_i32_219, %c0_i32_220] : memref<1x88x128xf32, #tpu.memory_space<vmem>> -> memref<1x88x128xf32, #tpu.memory_space<vmem>>
    %505 = tpu.memref_squeeze %504 : memref<1x88x128xf32, #tpu.memory_space<vmem>> -> memref<88x128xf32, #tpu.memory_space<vmem>>
    %c73 = arith.constant 73 : index
    %c0_221 = arith.constant 0 : index
    %506 = vector.load %505[%c73, %c0_221] : memref<88x128xf32, #tpu.memory_space<vmem>>, vector<1x128xf32>
    %c0_i32_222 = arith.constant 0 : i32
    %c0_i32_223 = arith.constant 0 : i32
    %507 = tpu.memref_slice %arg1[%c0_i32, %c0_i32_222, %c0_i32_223] : memref<1x88x128xf32, #tpu.memory_space<vmem>> -> memref<1x88x128xf32, #tpu.memory_space<vmem>>
    %508 = tpu.memref_squeeze %507 : memref<1x88x128xf32, #tpu.memory_space<vmem>> -> memref<88x128xf32, #tpu.memory_space<vmem>>
    %c81 = arith.constant 81 : index
    %c0_224 = arith.constant 0 : index
    %509 = vector.load %508[%c81, %c0_224] : memref<88x128xf32, #tpu.memory_space<vmem>>, vector<1x128xf32>
    %510 = vector.broadcast %503 : vector<1x128xf32> to vector<64x128xf32>
    %511 = arith.subf %1, %510 : vector<64x128xf32>
    %cst_225 = arith.constant 0.000000e+00 : f32
    %512 = vector.broadcast %cst_225 : f32 to vector<64x128xf32>
    %513 = arith.cmpf olt, %511, %512 : vector<64x128xf32>
    %514 = vector.broadcast %506 : vector<1x128xf32> to vector<64x128xf32>
    %515 = arith.cmpf ogt, %514, %1 : vector<64x128xf32>
    %516 = arith.xori %513, %515 : vector<64x128xi1>
    %517 = vector.broadcast %500 : vector<1x128xf32> to vector<64x128xf32>
    %518 = arith.subf %3, %517 : vector<64x128xf32>
    %519 = vector.broadcast %509 : vector<1x128xf32> to vector<64x128xf32>
    %520 = arith.mulf %511, %519 : vector<64x128xf32>
    %521 = arith.cmpf olt, %518, %520 : vector<64x128xf32>
    %522 = arith.andi %516, %521 : vector<64x128xi1>
    %523 = arith.xori %497, %522 : vector<64x128xi1>
    %c0_i32_226 = arith.constant 0 : i32
    %c0_i32_227 = arith.constant 0 : i32
    %524 = tpu.memref_slice %arg1[%c0_i32, %c0_i32_226, %c0_i32_227] : memref<1x88x128xf32, #tpu.memory_space<vmem>> -> memref<1x88x128xf32, #tpu.memory_space<vmem>>
    %525 = tpu.memref_squeeze %524 : memref<1x88x128xf32, #tpu.memory_space<vmem>> -> memref<88x128xf32, #tpu.memory_space<vmem>>
    %c58 = arith.constant 58 : index
    %c0_228 = arith.constant 0 : index
    %526 = vector.load %525[%c58, %c0_228] : memref<88x128xf32, #tpu.memory_space<vmem>>, vector<1x128xf32>
    %c0_i32_229 = arith.constant 0 : i32
    %c0_i32_230 = arith.constant 0 : i32
    %527 = tpu.memref_slice %arg1[%c0_i32, %c0_i32_229, %c0_i32_230] : memref<1x88x128xf32, #tpu.memory_space<vmem>> -> memref<1x88x128xf32, #tpu.memory_space<vmem>>
    %528 = tpu.memref_squeeze %527 : memref<1x88x128xf32, #tpu.memory_space<vmem>> -> memref<88x128xf32, #tpu.memory_space<vmem>>
    %c66 = arith.constant 66 : index
    %c0_231 = arith.constant 0 : index
    %529 = vector.load %528[%c66, %c0_231] : memref<88x128xf32, #tpu.memory_space<vmem>>, vector<1x128xf32>
    %c0_i32_232 = arith.constant 0 : i32
    %c0_i32_233 = arith.constant 0 : i32
    %530 = tpu.memref_slice %arg1[%c0_i32, %c0_i32_232, %c0_i32_233] : memref<1x88x128xf32, #tpu.memory_space<vmem>> -> memref<1x88x128xf32, #tpu.memory_space<vmem>>
    %531 = tpu.memref_squeeze %530 : memref<1x88x128xf32, #tpu.memory_space<vmem>> -> memref<88x128xf32, #tpu.memory_space<vmem>>
    %c74 = arith.constant 74 : index
    %c0_234 = arith.constant 0 : index
    %532 = vector.load %531[%c74, %c0_234] : memref<88x128xf32, #tpu.memory_space<vmem>>, vector<1x128xf32>
    %c0_i32_235 = arith.constant 0 : i32
    %c0_i32_236 = arith.constant 0 : i32
    %533 = tpu.memref_slice %arg1[%c0_i32, %c0_i32_235, %c0_i32_236] : memref<1x88x128xf32, #tpu.memory_space<vmem>> -> memref<1x88x128xf32, #tpu.memory_space<vmem>>
    %534 = tpu.memref_squeeze %533 : memref<1x88x128xf32, #tpu.memory_space<vmem>> -> memref<88x128xf32, #tpu.memory_space<vmem>>
    %c82 = arith.constant 82 : index
    %c0_237 = arith.constant 0 : index
    %535 = vector.load %534[%c82, %c0_237] : memref<88x128xf32, #tpu.memory_space<vmem>>, vector<1x128xf32>
    %536 = vector.broadcast %529 : vector<1x128xf32> to vector<64x128xf32>
    %537 = arith.subf %1, %536 : vector<64x128xf32>
    %cst_238 = arith.constant 0.000000e+00 : f32
    %538 = vector.broadcast %cst_238 : f32 to vector<64x128xf32>
    %539 = arith.cmpf olt, %537, %538 : vector<64x128xf32>
    %540 = vector.broadcast %532 : vector<1x128xf32> to vector<64x128xf32>
    %541 = arith.cmpf ogt, %540, %1 : vector<64x128xf32>
    %542 = arith.xori %539, %541 : vector<64x128xi1>
    %543 = vector.broadcast %526 : vector<1x128xf32> to vector<64x128xf32>
    %544 = arith.subf %3, %543 : vector<64x128xf32>
    %545 = vector.broadcast %535 : vector<1x128xf32> to vector<64x128xf32>
    %546 = arith.mulf %537, %545 : vector<64x128xf32>
    %547 = arith.cmpf olt, %544, %546 : vector<64x128xf32>
    %548 = arith.andi %542, %547 : vector<64x128xi1>
    %549 = arith.xori %523, %548 : vector<64x128xi1>
    %c0_i32_239 = arith.constant 0 : i32
    %c0_i32_240 = arith.constant 0 : i32
    %550 = tpu.memref_slice %arg1[%c0_i32, %c0_i32_239, %c0_i32_240] : memref<1x88x128xf32, #tpu.memory_space<vmem>> -> memref<1x88x128xf32, #tpu.memory_space<vmem>>
    %551 = tpu.memref_squeeze %550 : memref<1x88x128xf32, #tpu.memory_space<vmem>> -> memref<88x128xf32, #tpu.memory_space<vmem>>
    %c59 = arith.constant 59 : index
    %c0_241 = arith.constant 0 : index
    %552 = vector.load %551[%c59, %c0_241] : memref<88x128xf32, #tpu.memory_space<vmem>>, vector<1x128xf32>
    %c0_i32_242 = arith.constant 0 : i32
    %c0_i32_243 = arith.constant 0 : i32
    %553 = tpu.memref_slice %arg1[%c0_i32, %c0_i32_242, %c0_i32_243] : memref<1x88x128xf32, #tpu.memory_space<vmem>> -> memref<1x88x128xf32, #tpu.memory_space<vmem>>
    %554 = tpu.memref_squeeze %553 : memref<1x88x128xf32, #tpu.memory_space<vmem>> -> memref<88x128xf32, #tpu.memory_space<vmem>>
    %c67 = arith.constant 67 : index
    %c0_244 = arith.constant 0 : index
    %555 = vector.load %554[%c67, %c0_244] : memref<88x128xf32, #tpu.memory_space<vmem>>, vector<1x128xf32>
    %c0_i32_245 = arith.constant 0 : i32
    %c0_i32_246 = arith.constant 0 : i32
    %556 = tpu.memref_slice %arg1[%c0_i32, %c0_i32_245, %c0_i32_246] : memref<1x88x128xf32, #tpu.memory_space<vmem>> -> memref<1x88x128xf32, #tpu.memory_space<vmem>>
    %557 = tpu.memref_squeeze %556 : memref<1x88x128xf32, #tpu.memory_space<vmem>> -> memref<88x128xf32, #tpu.memory_space<vmem>>
    %c75 = arith.constant 75 : index
    %c0_247 = arith.constant 0 : index
    %558 = vector.load %557[%c75, %c0_247] : memref<88x128xf32, #tpu.memory_space<vmem>>, vector<1x128xf32>
    %c0_i32_248 = arith.constant 0 : i32
    %c0_i32_249 = arith.constant 0 : i32
    %559 = tpu.memref_slice %arg1[%c0_i32, %c0_i32_248, %c0_i32_249] : memref<1x88x128xf32, #tpu.memory_space<vmem>> -> memref<1x88x128xf32, #tpu.memory_space<vmem>>
    %560 = tpu.memref_squeeze %559 : memref<1x88x128xf32, #tpu.memory_space<vmem>> -> memref<88x128xf32, #tpu.memory_space<vmem>>
    %c83 = arith.constant 83 : index
    %c0_250 = arith.constant 0 : index
    %561 = vector.load %560[%c83, %c0_250] : memref<88x128xf32, #tpu.memory_space<vmem>>, vector<1x128xf32>
    %562 = vector.broadcast %555 : vector<1x128xf32> to vector<64x128xf32>
    %563 = arith.subf %1, %562 : vector<64x128xf32>
    %cst_251 = arith.constant 0.000000e+00 : f32
    %564 = vector.broadcast %cst_251 : f32 to vector<64x128xf32>
    %565 = arith.cmpf olt, %563, %564 : vector<64x128xf32>
    %566 = vector.broadcast %558 : vector<1x128xf32> to vector<64x128xf32>
    %567 = arith.cmpf ogt, %566, %1 : vector<64x128xf32>
    %568 = arith.xori %565, %567 : vector<64x128xi1>
    %569 = vector.broadcast %552 : vector<1x128xf32> to vector<64x128xf32>
    %570 = arith.subf %3, %569 : vector<64x128xf32>
    %571 = vector.broadcast %561 : vector<1x128xf32> to vector<64x128xf32>
    %572 = arith.mulf %563, %571 : vector<64x128xf32>
    %573 = arith.cmpf olt, %570, %572 : vector<64x128xf32>
    %574 = arith.andi %568, %573 : vector<64x128xi1>
    %575 = arith.xori %549, %574 : vector<64x128xi1>
    %c0_i32_252 = arith.constant 0 : i32
    %c0_i32_253 = arith.constant 0 : i32
    %576 = tpu.memref_slice %arg1[%c0_i32, %c0_i32_252, %c0_i32_253] : memref<1x88x128xf32, #tpu.memory_space<vmem>> -> memref<1x88x128xf32, #tpu.memory_space<vmem>>
    %577 = tpu.memref_squeeze %576 : memref<1x88x128xf32, #tpu.memory_space<vmem>> -> memref<88x128xf32, #tpu.memory_space<vmem>>
    %c60 = arith.constant 60 : index
    %c0_254 = arith.constant 0 : index
    %578 = vector.load %577[%c60, %c0_254] : memref<88x128xf32, #tpu.memory_space<vmem>>, vector<1x128xf32>
    %c0_i32_255 = arith.constant 0 : i32
    %c0_i32_256 = arith.constant 0 : i32
    %579 = tpu.memref_slice %arg1[%c0_i32, %c0_i32_255, %c0_i32_256] : memref<1x88x128xf32, #tpu.memory_space<vmem>> -> memref<1x88x128xf32, #tpu.memory_space<vmem>>
    %580 = tpu.memref_squeeze %579 : memref<1x88x128xf32, #tpu.memory_space<vmem>> -> memref<88x128xf32, #tpu.memory_space<vmem>>
    %c68 = arith.constant 68 : index
    %c0_257 = arith.constant 0 : index
    %581 = vector.load %580[%c68, %c0_257] : memref<88x128xf32, #tpu.memory_space<vmem>>, vector<1x128xf32>
    %c0_i32_258 = arith.constant 0 : i32
    %c0_i32_259 = arith.constant 0 : i32
    %582 = tpu.memref_slice %arg1[%c0_i32, %c0_i32_258, %c0_i32_259] : memref<1x88x128xf32, #tpu.memory_space<vmem>> -> memref<1x88x128xf32, #tpu.memory_space<vmem>>
    %583 = tpu.memref_squeeze %582 : memref<1x88x128xf32, #tpu.memory_space<vmem>> -> memref<88x128xf32, #tpu.memory_space<vmem>>
    %c76 = arith.constant 76 : index
    %c0_260 = arith.constant 0 : index
    %584 = vector.load %583[%c76, %c0_260] : memref<88x128xf32, #tpu.memory_space<vmem>>, vector<1x128xf32>
    %c0_i32_261 = arith.constant 0 : i32
    %c0_i32_262 = arith.constant 0 : i32
    %585 = tpu.memref_slice %arg1[%c0_i32, %c0_i32_261, %c0_i32_262] : memref<1x88x128xf32, #tpu.memory_space<vmem>> -> memref<1x88x128xf32, #tpu.memory_space<vmem>>
    %586 = tpu.memref_squeeze %585 : memref<1x88x128xf32, #tpu.memory_space<vmem>> -> memref<88x128xf32, #tpu.memory_space<vmem>>
    %c84 = arith.constant 84 : index
    %c0_263 = arith.constant 0 : index
    %587 = vector.load %586[%c84, %c0_263] : memref<88x128xf32, #tpu.memory_space<vmem>>, vector<1x128xf32>
    %588 = vector.broadcast %581 : vector<1x128xf32> to vector<64x128xf32>
    %589 = arith.subf %1, %588 : vector<64x128xf32>
    %cst_264 = arith.constant 0.000000e+00 : f32
    %590 = vector.broadcast %cst_264 : f32 to vector<64x128xf32>
    %591 = arith.cmpf olt, %589, %590 : vector<64x128xf32>
    %592 = vector.broadcast %584 : vector<1x128xf32> to vector<64x128xf32>
    %593 = arith.cmpf ogt, %592, %1 : vector<64x128xf32>
    %594 = arith.xori %591, %593 : vector<64x128xi1>
    %595 = vector.broadcast %578 : vector<1x128xf32> to vector<64x128xf32>
    %596 = arith.subf %3, %595 : vector<64x128xf32>
    %597 = vector.broadcast %587 : vector<1x128xf32> to vector<64x128xf32>
    %598 = arith.mulf %589, %597 : vector<64x128xf32>
    %599 = arith.cmpf olt, %596, %598 : vector<64x128xf32>
    %600 = arith.andi %594, %599 : vector<64x128xi1>
    %601 = arith.xori %575, %600 : vector<64x128xi1>
    %c0_i32_265 = arith.constant 0 : i32
    %c0_i32_266 = arith.constant 0 : i32
    %602 = tpu.memref_slice %arg1[%c0_i32, %c0_i32_265, %c0_i32_266] : memref<1x88x128xf32, #tpu.memory_space<vmem>> -> memref<1x88x128xf32, #tpu.memory_space<vmem>>
    %603 = tpu.memref_squeeze %602 : memref<1x88x128xf32, #tpu.memory_space<vmem>> -> memref<88x128xf32, #tpu.memory_space<vmem>>
    %c61 = arith.constant 61 : index
    %c0_267 = arith.constant 0 : index
    %604 = vector.load %603[%c61, %c0_267] : memref<88x128xf32, #tpu.memory_space<vmem>>, vector<1x128xf32>
    %c0_i32_268 = arith.constant 0 : i32
    %c0_i32_269 = arith.constant 0 : i32
    %605 = tpu.memref_slice %arg1[%c0_i32, %c0_i32_268, %c0_i32_269] : memref<1x88x128xf32, #tpu.memory_space<vmem>> -> memref<1x88x128xf32, #tpu.memory_space<vmem>>
    %606 = tpu.memref_squeeze %605 : memref<1x88x128xf32, #tpu.memory_space<vmem>> -> memref<88x128xf32, #tpu.memory_space<vmem>>
    %c69 = arith.constant 69 : index
    %c0_270 = arith.constant 0 : index
    %607 = vector.load %606[%c69, %c0_270] : memref<88x128xf32, #tpu.memory_space<vmem>>, vector<1x128xf32>
    %c0_i32_271 = arith.constant 0 : i32
    %c0_i32_272 = arith.constant 0 : i32
    %608 = tpu.memref_slice %arg1[%c0_i32, %c0_i32_271, %c0_i32_272] : memref<1x88x128xf32, #tpu.memory_space<vmem>> -> memref<1x88x128xf32, #tpu.memory_space<vmem>>
    %609 = tpu.memref_squeeze %608 : memref<1x88x128xf32, #tpu.memory_space<vmem>> -> memref<88x128xf32, #tpu.memory_space<vmem>>
    %c77 = arith.constant 77 : index
    %c0_273 = arith.constant 0 : index
    %610 = vector.load %609[%c77, %c0_273] : memref<88x128xf32, #tpu.memory_space<vmem>>, vector<1x128xf32>
    %c0_i32_274 = arith.constant 0 : i32
    %c0_i32_275 = arith.constant 0 : i32
    %611 = tpu.memref_slice %arg1[%c0_i32, %c0_i32_274, %c0_i32_275] : memref<1x88x128xf32, #tpu.memory_space<vmem>> -> memref<1x88x128xf32, #tpu.memory_space<vmem>>
    %612 = tpu.memref_squeeze %611 : memref<1x88x128xf32, #tpu.memory_space<vmem>> -> memref<88x128xf32, #tpu.memory_space<vmem>>
    %c85 = arith.constant 85 : index
    %c0_276 = arith.constant 0 : index
    %613 = vector.load %612[%c85, %c0_276] : memref<88x128xf32, #tpu.memory_space<vmem>>, vector<1x128xf32>
    %614 = vector.broadcast %607 : vector<1x128xf32> to vector<64x128xf32>
    %615 = arith.subf %1, %614 : vector<64x128xf32>
    %cst_277 = arith.constant 0.000000e+00 : f32
    %616 = vector.broadcast %cst_277 : f32 to vector<64x128xf32>
    %617 = arith.cmpf olt, %615, %616 : vector<64x128xf32>
    %618 = vector.broadcast %610 : vector<1x128xf32> to vector<64x128xf32>
    %619 = arith.cmpf ogt, %618, %1 : vector<64x128xf32>
    %620 = arith.xori %617, %619 : vector<64x128xi1>
    %621 = vector.broadcast %604 : vector<1x128xf32> to vector<64x128xf32>
    %622 = arith.subf %3, %621 : vector<64x128xf32>
    %623 = vector.broadcast %613 : vector<1x128xf32> to vector<64x128xf32>
    %624 = arith.mulf %615, %623 : vector<64x128xf32>
    %625 = arith.cmpf olt, %622, %624 : vector<64x128xf32>
    %626 = arith.andi %620, %625 : vector<64x128xi1>
    %627 = arith.xori %601, %626 : vector<64x128xi1>
    %c0_i32_278 = arith.constant 0 : i32
    %c0_i32_279 = arith.constant 0 : i32
    %628 = tpu.memref_slice %arg1[%c0_i32, %c0_i32_278, %c0_i32_279] : memref<1x88x128xf32, #tpu.memory_space<vmem>> -> memref<1x88x128xf32, #tpu.memory_space<vmem>>
    %629 = tpu.memref_squeeze %628 : memref<1x88x128xf32, #tpu.memory_space<vmem>> -> memref<88x128xf32, #tpu.memory_space<vmem>>
    %c62 = arith.constant 62 : index
    %c0_280 = arith.constant 0 : index
    %630 = vector.load %629[%c62, %c0_280] : memref<88x128xf32, #tpu.memory_space<vmem>>, vector<1x128xf32>
    %c0_i32_281 = arith.constant 0 : i32
    %c0_i32_282 = arith.constant 0 : i32
    %631 = tpu.memref_slice %arg1[%c0_i32, %c0_i32_281, %c0_i32_282] : memref<1x88x128xf32, #tpu.memory_space<vmem>> -> memref<1x88x128xf32, #tpu.memory_space<vmem>>
    %632 = tpu.memref_squeeze %631 : memref<1x88x128xf32, #tpu.memory_space<vmem>> -> memref<88x128xf32, #tpu.memory_space<vmem>>
    %c70 = arith.constant 70 : index
    %c0_283 = arith.constant 0 : index
    %633 = vector.load %632[%c70, %c0_283] : memref<88x128xf32, #tpu.memory_space<vmem>>, vector<1x128xf32>
    %c0_i32_284 = arith.constant 0 : i32
    %c0_i32_285 = arith.constant 0 : i32
    %634 = tpu.memref_slice %arg1[%c0_i32, %c0_i32_284, %c0_i32_285] : memref<1x88x128xf32, #tpu.memory_space<vmem>> -> memref<1x88x128xf32, #tpu.memory_space<vmem>>
    %635 = tpu.memref_squeeze %634 : memref<1x88x128xf32, #tpu.memory_space<vmem>> -> memref<88x128xf32, #tpu.memory_space<vmem>>
    %c78 = arith.constant 78 : index
    %c0_286 = arith.constant 0 : index
    %636 = vector.load %635[%c78, %c0_286] : memref<88x128xf32, #tpu.memory_space<vmem>>, vector<1x128xf32>
    %c0_i32_287 = arith.constant 0 : i32
    %c0_i32_288 = arith.constant 0 : i32
    %637 = tpu.memref_slice %arg1[%c0_i32, %c0_i32_287, %c0_i32_288] : memref<1x88x128xf32, #tpu.memory_space<vmem>> -> memref<1x88x128xf32, #tpu.memory_space<vmem>>
    %638 = tpu.memref_squeeze %637 : memref<1x88x128xf32, #tpu.memory_space<vmem>> -> memref<88x128xf32, #tpu.memory_space<vmem>>
    %c86 = arith.constant 86 : index
    %c0_289 = arith.constant 0 : index
    %639 = vector.load %638[%c86, %c0_289] : memref<88x128xf32, #tpu.memory_space<vmem>>, vector<1x128xf32>
    %640 = vector.broadcast %633 : vector<1x128xf32> to vector<64x128xf32>
    %641 = arith.subf %1, %640 : vector<64x128xf32>
    %cst_290 = arith.constant 0.000000e+00 : f32
    %642 = vector.broadcast %cst_290 : f32 to vector<64x128xf32>
    %643 = arith.cmpf olt, %641, %642 : vector<64x128xf32>
    %644 = vector.broadcast %636 : vector<1x128xf32> to vector<64x128xf32>
    %645 = arith.cmpf ogt, %644, %1 : vector<64x128xf32>
    %646 = arith.xori %643, %645 : vector<64x128xi1>
    %647 = vector.broadcast %630 : vector<1x128xf32> to vector<64x128xf32>
    %648 = arith.subf %3, %647 : vector<64x128xf32>
    %649 = vector.broadcast %639 : vector<1x128xf32> to vector<64x128xf32>
    %650 = arith.mulf %641, %649 : vector<64x128xf32>
    %651 = arith.cmpf olt, %648, %650 : vector<64x128xf32>
    %652 = arith.andi %646, %651 : vector<64x128xi1>
    %653 = arith.xori %627, %652 : vector<64x128xi1>
    %c0_i32_291 = arith.constant 0 : i32
    %c0_i32_292 = arith.constant 0 : i32
    %654 = tpu.memref_slice %arg1[%c0_i32, %c0_i32_291, %c0_i32_292] : memref<1x88x128xf32, #tpu.memory_space<vmem>> -> memref<1x88x128xf32, #tpu.memory_space<vmem>>
    %655 = tpu.memref_squeeze %654 : memref<1x88x128xf32, #tpu.memory_space<vmem>> -> memref<88x128xf32, #tpu.memory_space<vmem>>
    %c63 = arith.constant 63 : index
    %c0_293 = arith.constant 0 : index
    %656 = vector.load %655[%c63, %c0_293] : memref<88x128xf32, #tpu.memory_space<vmem>>, vector<1x128xf32>
    %c0_i32_294 = arith.constant 0 : i32
    %c0_i32_295 = arith.constant 0 : i32
    %657 = tpu.memref_slice %arg1[%c0_i32, %c0_i32_294, %c0_i32_295] : memref<1x88x128xf32, #tpu.memory_space<vmem>> -> memref<1x88x128xf32, #tpu.memory_space<vmem>>
    %658 = tpu.memref_squeeze %657 : memref<1x88x128xf32, #tpu.memory_space<vmem>> -> memref<88x128xf32, #tpu.memory_space<vmem>>
    %c71 = arith.constant 71 : index
    %c0_296 = arith.constant 0 : index
    %659 = vector.load %658[%c71, %c0_296] : memref<88x128xf32, #tpu.memory_space<vmem>>, vector<1x128xf32>
    %c0_i32_297 = arith.constant 0 : i32
    %c0_i32_298 = arith.constant 0 : i32
    %660 = tpu.memref_slice %arg1[%c0_i32, %c0_i32_297, %c0_i32_298] : memref<1x88x128xf32, #tpu.memory_space<vmem>> -> memref<1x88x128xf32, #tpu.memory_space<vmem>>
    %661 = tpu.memref_squeeze %660 : memref<1x88x128xf32, #tpu.memory_space<vmem>> -> memref<88x128xf32, #tpu.memory_space<vmem>>
    %c79 = arith.constant 79 : index
    %c0_299 = arith.constant 0 : index
    %662 = vector.load %661[%c79, %c0_299] : memref<88x128xf32, #tpu.memory_space<vmem>>, vector<1x128xf32>
    %c0_i32_300 = arith.constant 0 : i32
    %c0_i32_301 = arith.constant 0 : i32
    %663 = tpu.memref_slice %arg1[%c0_i32, %c0_i32_300, %c0_i32_301] : memref<1x88x128xf32, #tpu.memory_space<vmem>> -> memref<1x88x128xf32, #tpu.memory_space<vmem>>
    %664 = tpu.memref_squeeze %663 : memref<1x88x128xf32, #tpu.memory_space<vmem>> -> memref<88x128xf32, #tpu.memory_space<vmem>>
    %c87 = arith.constant 87 : index
    %c0_302 = arith.constant 0 : index
    %665 = vector.load %664[%c87, %c0_302] : memref<88x128xf32, #tpu.memory_space<vmem>>, vector<1x128xf32>
    %666 = vector.broadcast %659 : vector<1x128xf32> to vector<64x128xf32>
    %667 = arith.subf %1, %666 : vector<64x128xf32>
    %cst_303 = arith.constant 0.000000e+00 : f32
    %668 = vector.broadcast %cst_303 : f32 to vector<64x128xf32>
    %669 = arith.cmpf olt, %667, %668 : vector<64x128xf32>
    %670 = vector.broadcast %662 : vector<1x128xf32> to vector<64x128xf32>
    %671 = arith.cmpf ogt, %670, %1 : vector<64x128xf32>
    %672 = arith.xori %669, %671 : vector<64x128xi1>
    %673 = vector.broadcast %656 : vector<1x128xf32> to vector<64x128xf32>
    %674 = arith.subf %3, %673 : vector<64x128xf32>
    %675 = vector.broadcast %665 : vector<1x128xf32> to vector<64x128xf32>
    %676 = arith.mulf %667, %675 : vector<64x128xf32>
    %677 = arith.cmpf olt, %674, %676 : vector<64x128xf32>
    %678 = arith.andi %672, %677 : vector<64x128xi1>
    %679 = arith.xori %653, %678 : vector<64x128xi1>
    %cst_304 = arith.constant 1.000000e+00 : f32
    %cst_305 = arith.constant 0.000000e+00 : f32
    %680 = vector.broadcast %cst_304 : f32 to vector<64x128xf32>
    %681 = vector.broadcast %cst_305 : f32 to vector<64x128xf32>
    %682 = arith.select %679, %680, %681 : vector<64x128xi1>, vector<64x128xf32>
    %683 = arith.mulf %470, %682 : vector<64x128xf32>
    %cst_306 = arith.constant dense<0.000000e+00> : vector<128xf32>
    %684 = vector.multi_reduction <add>, %683, %cst_306 [0] : vector<64x128xf32> to vector<128xf32>
    %685 = vector.shape_cast %684 : vector<128xf32> to vector<1x128xf32>
    %cst_307 = arith.constant dense<0.000000e+00> : vector<128xf32>
    %686 = vector.multi_reduction <add>, %470, %cst_307 [0] : vector<64x128xf32> to vector<128xf32>
    %687 = vector.shape_cast %686 : vector<128xf32> to vector<1x128xf32>
    %cst_308 = arith.constant dense<0.000000e+00> : vector<128xf32>
    %688 = vector.multi_reduction <add>, %682, %cst_308 [0] : vector<64x128xf32> to vector<128xf32>
    %689 = vector.shape_cast %688 : vector<128xf32> to vector<1x128xf32>
    %c0_i32_309 = arith.constant 0 : i32
    %690 = vector.broadcast %c0_i32_309 : i32 to vector<8x128xi32>
    %691 = arith.cmpi eq, %4, %690 : vector<8x128xi32>
    %cst_310 = arith.constant 0.000000e+00 : f32
    %692 = vector.shape_cast %685 : vector<1x128xf32> to vector<1x128xf32>
    %693 = vector.broadcast %692 : vector<1x128xf32> to vector<8x128xf32>
    %694 = vector.broadcast %cst_310 : f32 to vector<8x128xf32>
    %695 = arith.select %691, %693, %694 : vector<8x128xi1>, vector<8x128xf32>
    %c1_i32 = arith.constant 1 : i32
    %696 = vector.broadcast %c1_i32 : i32 to vector<8x128xi32>
    %697 = arith.cmpi eq, %4, %696 : vector<8x128xi32>
    %cst_311 = arith.constant 0.000000e+00 : f32
    %698 = vector.shape_cast %687 : vector<1x128xf32> to vector<1x128xf32>
    %699 = vector.broadcast %698 : vector<1x128xf32> to vector<8x128xf32>
    %700 = vector.broadcast %cst_311 : f32 to vector<8x128xf32>
    %701 = arith.select %697, %699, %700 : vector<8x128xi1>, vector<8x128xf32>
    %702 = arith.addf %695, %701 : vector<8x128xf32>
    %c2_i32 = arith.constant 2 : i32
    %703 = vector.broadcast %c2_i32 : i32 to vector<8x128xi32>
    %704 = arith.cmpi eq, %4, %703 : vector<8x128xi32>
    %cst_312 = arith.constant 0.000000e+00 : f32
    %705 = vector.shape_cast %689 : vector<1x128xf32> to vector<1x128xf32>
    %706 = vector.broadcast %705 : vector<1x128xf32> to vector<8x128xf32>
    %707 = vector.broadcast %cst_312 : f32 to vector<8x128xf32>
    %708 = arith.select %704, %706, %707 : vector<8x128xi1>, vector<8x128xf32>
    %709 = arith.addf %702, %708 : vector<8x128xf32>
    %710 = arith.index_cast %c0_i32 : i32 to index
    %c0_313 = arith.constant 0 : index
    %c0_314 = arith.constant 0 : index
    %711 = vector.load %arg2[%710, %c0_313, %c0_314] : memref<1x8x128xf32, #tpu.memory_space<vmem>>, vector<1x8x128xf32>
    %712 = vector.shape_cast %711 : vector<1x8x128xf32> to vector<8x128xf32>
    %713 = vector.shape_cast %709 : vector<8x128xf32> to vector<1x8x128xf32>
    tpu.vector_store %arg2[%710, %c0_313, %c0_314], %713 {strides = array<i32>} : memref<1x8x128xf32, #tpu.memory_space<vmem>>, vector<1x8x128xf32>,
    %c1_i32_315 = arith.constant 1 : i32
    return
  }
  func.func @transform_0(%arg0: i32) -> (i32, i32, i32) {
    %c0_i32 = arith.constant 0 : i32
    %c0_i32_0 = arith.constant 0 : i32
    %c0_i32_1 = arith.constant 0 : i32
    return %arg0, %c0_i32, %c0_i32_0 : i32, i32, i32
  }
  func.func @transform_1(%arg0: i32) -> (i32, i32, i32) {
    %c0_i32 = arith.constant 0 : i32
    %c0_i32_0 = arith.constant 0 : i32
    %c0_i32_1 = arith.constant 0 : i32
    return %arg0, %c0_i32, %c0_i32_0 : i32, i32, i32
  }
}

</mosaic_0001>

<bundles_post_ra>
// kernel: mask_rasterization_loss.1
= control target key start
LH: loop header
LB: loop body
LE: loop exit
PB: predicated region body
PF: predicated region fallthrough
CT: control target
= control target key end

     0   :  { %v8_v0 = vlaneseq  ;;  %s8321_s0 = inlined_call_operand.vmem [shape: f32[1,88,128], index: 0, kind: input, shape index: {}]   ;;  %s8322_s1 = inlined_call_operand.vmem [shape: f32[1,8,128], index: 1, kind: output, shape index: {}]  }
   0x1   :  { %v2421_v11 = vld [vmem:[%s8321_s0 + $0x8] ss:$0 sm:$0xff]  ;;  %v2420_v16 = vld [vmem:[%s8321_s0] ss:$0 sm:$0xff]  ;;  %v2603_v21 = vld [vmem:[%s8321_s0 + $0x18] ss:$0 sm:$0xff] }
   0x2   :  { %v2566_v1 = vshrl.u32 %v8_v0, 7  ;;  %v26_v5 = vand.u32 127, %v8_v0  ;;  %v2418_v23 = vld [vmem:[%s8321_s0 + $0x10] ss:$0 sm:$0xff]  ;;  %v2422_v45 = vld [vmem:[%s8321_s0 + $0x20] ss:$0 sm:$0xff] }
   0x4   :  { %8782 = vst [vmem:[#allocation2_spill] sm:$0xff] %v2566_v1  ;;  %v10_v2 = vadd.s32 8, %v2566_v1  ;;  %v11_v3 = vadd.s32 16, %v2566_v1  ;;  %v12_v4 = vadd.s32 24, %v2566_v1  ;;  %v13_v6 = vadd.s32 32, %v2566_v1 }
   0x5   :  { %v14_v7 = vadd.s32 40, %v2566_v1  ;;  %v15_v8 = vadd.s32 48, %v2566_v1  ;;  %v16_v9 = vadd.s32 56, %v2566_v1  ;;  %v2576_v10 = vcvt.s32.f32 %v2566_v1 }
   0x6   :  { %v2581_v12 = vcvt.s32.f32 %v10_v2  ;;  %v2583_v13 = vcvt.s32.f32 %v11_v3  ;;  %v2585_v14 = vcvt.s32.f32 %v12_v4  ;;  %v2587_v15 = vcvt.s32.f32 %v26_v5 }
   0x7   :  { %8783 = vst [vmem:[#allocation3_spill] sm:$0xff] %v2576_v10  ;;  %v2592_v17 = vcvt.s32.f32 %v13_v6  ;;  %v2594_v18 = vcvt.s32.f32 %v14_v7  ;;  %v2596_v19 = vcvt.s32.f32 %v15_v8  ;;  %v2598_v20 = vcvt.s32.f32 %v16_v9 }
   0x8   :  { %8784 = vst [vmem:[#allocation4_spill] sm:$0xff] %v2581_v12  ;;  %v2606_v22 = vsub.f32 %v2576_v10, %v2421_v11  ;;  %v2612_v24 = vsub.f32 %v2587_v15, %v2420_v16  ;;  %v2615_v25 = vsub.f32 %v2581_v12, %v2421_v11  ;;  %v2618_v26 = vsub.f32 %v2583_v13, %v2421_v11 }
   0x9   :  { %8785 = vst [vmem:[#allocation5_spill] sm:$0xff] %v2583_v13  ;;  %v2621_v27 = vsub.f32 %v2585_v14, %v2421_v11  ;;  %v2624_v28 = vsub.f32 %v2592_v17, %v2421_v11  ;;  %v2627_v29 = vsub.f32 %v2594_v18, %v2421_v11  ;;  %v2630_v30 = vsub.f32 %v2596_v19, %v2421_v11 }
   0xa   :  { %8786 = vst [vmem:[#allocation6_spill] sm:$0xff] %v2585_v14  ;;  %v2633_v31 = vsub.f32 %v2598_v20, %v2421_v11  ;;  %v49_v32 = vmul.f32 %v2603_v21, %v2606_v22  ;;  %v48_v33 = vmul.f32 %v2418_v23, %v2612_v24  ;;  %v50_v34 = vmul.f32 %v2603_v21, %v2615_v25 }
   0xb   :  { %8787 = vst [vmem:[#allocation7_spill] sm:$0xff] %v2587_v15  ;;  %v51_v35 = vmul.f32 %v2603_v21, %v2618_v26  ;;  %v52_v36 = vmul.f32 %v2603_v21, %v2621_v27  ;;  %v53_v37 = vmul.f32 %v2603_v21, %v2624_v28  ;;  %v54_v38 = vmul.f32 %v2603_v21, %v2627_v29 }
   0xc   :  { %8788 = vst [vmem:[#allocation8_spill] sm:$0xff] %v2592_v17  ;;  %v55_v39 = vmul.f32 %v2603_v21, %v2630_v30  ;;  %v56_v40 = vmul.f32 %v2603_v21, %v2633_v31  ;;  %v57_v41 = vadd.f32 %v49_v32, %v48_v33  ;;  %v58_v42 = vadd.f32 %v50_v34, %v48_v33 }
   0xd   :  { %8789 = vst [vmem:[#allocation9_spill] sm:$0xff] %v2594_v18  ;;  %v59_v43 = vadd.f32 %v51_v35, %v48_v33  ;;  %v60_v44 = vadd.f32 %v52_v36, %v48_v33  ;;  %v61_v46 = vadd.f32 %v53_v37, %v48_v33  ;;  %v62_v47 = vadd.f32 %v54_v38, %v48_v33 }
   0xe   :  { %8790 = vst [vmem:[#allocation10_spill] sm:$0xff] %v2596_v19  ;;  %v63_v48 = vadd.f32 %v55_v39, %v48_v33  ;;  %v64_v49 = vadd.f32 %v56_v40, %v48_v33  ;;  %v66_v50 = vmul.f32 %v2422_v45, %v57_v41  ;;  %v67_v51 = vmul.f32 %v2422_v45, %v58_v42  ;;  %v2427_v39 = vld [vmem:[%s8321_s0 + $0x1] ss:$0 sm:$0xff]  ;;  %v2428_v40 = vld [vmem:[%s8321_s0 + $0x9] ss:$0 sm:$0xff] }
   0xf   :  { %8791 = vst [vmem:[#allocation11_spill] sm:$0xff] %v2598_v20  ;;  %v68_v52 = vmul.f32 %v2422_v45, %v59_v43  ;;  %v69_v53 = vmul.f32 %v2422_v45, %v60_v44  ;;  %v70_v54 = vmul.f32 %v2422_v45, %v61_v46  ;;  %v71_v55 = vmul.f32 %v2422_v45, %v62_v47 }
  0x10   :  { %8792 = vst [vmem:[#allocation12_spill] sm:$0xff] %v2606_v22  ;;  %v72_v56 = vmul.f32 %v2422_v45, %v63_v48  ;;  %v73_v57 = vmul.f32 %v2422_v45, %v64_v49  ;;  %v74_v58 = vmax.f32 %v66_v50, 0.0  ;;  %v75_v59 = vmax.f32 %v67_v51, 0.0  ;;  %v2674_v50 = vld [vmem:[%s8321_s0 + $0x11] ss:$0 sm:$0xff] }
  0x11   :  { %8793 = vst [vmem:[#allocation13_spill] sm:$0xff] %v2612_v24  ;;  %v76_v60 = vmax.f32 %v68_v52, 0.0  ;;  %v77_v61 = vmax.f32 %v69_v53, 0.0  ;;  %v78_v62 = vmax.f32 %v70_v54, 0.0  ;;  %v79_v63 = vmax.f32 %v71_v55, 0.0 }
  0x12   :  { %8794 = vst [vmem:[#allocation14_spill] sm:$0xff] %v2615_v25  ;;  %v80_v0 = vmax.f32 %v72_v56, 0.0  ;;  %v81_v2 = vmax.f32 %v73_v57, 0.0  ;;  %v82_v3 = vmin.f32 %v74_v58, 1.0  ;;  %v83_v4 = vmin.f32 %v75_v59, 1.0 }
  0x13   :  { %8795 = vst [vmem:[#allocation15_spill] sm:$0xff] %v2618_v26  ;;  %v84_v5 = vmin.f32 %v76_v60, 1.0  ;;  %v85_v6 = vmin.f32 %v77_v61, 1.0  ;;  %v86_v7 = vmin.f32 %v78_v62, 1.0  ;;  %v87_v8 = vmin.f32 %v79_v63, 1.0 }
  0x14   :  { %8796 = vst [vmem:[#allocation16_spill] sm:$0xff] %v2621_v27  ;;  %v88_v9 = vmin.f32 %v80_v0, 1.0  ;;  %v89_v11 = vmin.f32 %v81_v2, 1.0  ;;  %v90_v16 = vmul.f32 %v2418_v23, %v82_v3  ;;  %v91_v32 = vmul.f32 %v2418_v23, %v83_v4  ;;  %v2679_v51 = vld [vmem:[%s8321_s0 + $0x19] ss:$0 sm:$0xff] }
  0x15   :  { %8797 = vst [vmem:[#allocation17_spill] sm:$0xff] %v2624_v28  ;;  %v92_v33 = vmul.f32 %v2418_v23, %v84_v5  ;;  %v93_v34 = vmul.f32 %v2418_v23, %v85_v6  ;;  %v94_v35 = vmul.f32 %v2418_v23, %v86_v7  ;;  %v95_v36 = vmul.f32 %v2418_v23, %v87_v8 }
  0x16   :  { %8798 = vst [vmem:[#allocation18_spill] sm:$0xff] %v2627_v29  ;;  %v96_v37 = vmul.f32 %v2418_v23, %v88_v9  ;;  %v97_v38 = vmul.f32 %v2418_v23, %v89_v11  ;;  %v98_v41 = vsub.f32 %v2612_v24, %v90_v16  ;;  %v99_v42 = vsub.f32 %v2612_v24, %v91_v32 }
  0x17   :  { %8799 = vst [vmem:[#allocation19_spill] sm:$0xff] %v2630_v30  ;;  %v100_v43 = vsub.f32 %v2612_v24, %v92_v33  ;;  %v101_v44 = vsub.f32 %v2612_v24, %v93_v34  ;;  %v102_v45 = vsub.f32 %v2612_v24, %v94_v35  ;;  %v103_v23 = vsub.f32 %v2612_v24, %v95_v36 }
  0x18   :  { %8800 = vst [vmem:[#allocation20_spill] sm:$0xff] %v2633_v31  ;;  %v104_v46 = vsub.f32 %v2612_v24, %v96_v37  ;;  %v105_v47 = vsub.f32 %v2612_v24, %v97_v38  ;;  %v106_v48 = vmul.f32 %v2603_v21, %v82_v3  ;;  %v107_v49 = vmul.f32 %v2603_v21, %v83_v4 }
  0x19   :  { %v2682_v52 = vsub.f32 %v2587_v15, %v2427_v39  ;;  %v2685_v53 = vsub.f32 %v2576_v10, %v2428_v40  ;;  %v2688_v54 = vsub.f32 %v2581_v12, %v2428_v40  ;;  %v2691_v55 = vsub.f32 %v2583_v13, %v2428_v40 }
  0x1a   :  { %v2694_v56 = vsub.f32 %v2585_v14, %v2428_v40  ;;  %v2697_v57 = vsub.f32 %v2592_v17, %v2428_v40  ;;  %v108_v58 = vmul.f32 %v2603_v21, %v84_v5  ;;  %v2701_v59 = vsub.f32 %v2594_v18, %v2428_v40 }
  0x1b   :  { %8801 = vst [vmem:[#allocation21_spill] sm:$0xff] %v2682_v52  ;;  %v2704_v60 = vsub.f32 %v2596_v19, %v2428_v40  ;;  %v2707_v61 = vsub.f32 %v2598_v20, %v2428_v40  ;;  %v109_v62 = vmul.f32 %v2603_v21, %v85_v6  ;;  %v110_v63 = vmul.f32 %v2603_v21, %v86_v7 }
  0x1c   :  { %8802 = vst [vmem:[#allocation22_spill] sm:$0xff] %v2685_v53  ;;  %v111_v0 = vmul.f32 %v2603_v21, %v87_v8  ;;  %v112_v2 = vmul.f32 %v2603_v21, %v88_v9  ;;  %v113_v3 = vmul.f32 %v2603_v21, %v89_v11  ;;  %v114_v4 = vsub.f32 %v2606_v22, %v106_v48 }
  0x1d   :  { %8803 = vst [vmem:[#allocation23_spill] sm:$0xff] %v2688_v54  ;;  %v224_v5 = vmul.f32 %v2674_v50, %v2682_v52  ;;  %v225_v16 = vmul.f32 %v2679_v51, %v2685_v53  ;;  %v226_v32 = vmul.f32 %v2679_v51, %v2688_v54  ;;  %v227_v6 = vmul.f32 %v2679_v51, %v2691_v55 }
  0x1e   :  { %8804 = vst [vmem:[#allocation24_spill] sm:$0xff] %v2691_v55  ;;  %v228_v7 = vmul.f32 %v2679_v51, %v2694_v56  ;;  %v229_v21 = vmul.f32 %v2679_v51, %v2697_v57  ;;  %v115_v8 = vsub.f32 %v2615_v25, %v107_v49  ;;  %v230_v9 = vmul.f32 %v2679_v51, %v2701_v59  ;;  %v2429_v49 = vld [vmem:[%s8321_s0 + $0x21] ss:$0 sm:$0xff] }
  0x1f   :  { %8805 = vst [vmem:[#allocation25_spill] sm:$0xff] %v2694_v56  ;;  %v231_v11 = vmul.f32 %v2679_v51, %v2704_v60  ;;  %v232_v33 = vmul.f32 %v2679_v51, %v2707_v61  ;;  %v116_v34 = vsub.f32 %v2618_v26, %v108_v58  ;;  %v117_v35 = vsub.f32 %v2621_v27, %v109_v62 }
  0x20   :  { %8806 = vst [vmem:[#allocation26_spill] sm:$0xff] %v2697_v57  ;;  %v118_v36 = vsub.f32 %v2624_v28, %v110_v63  ;;  %v119_v37 = vsub.f32 %v2627_v29, %v111_v0  ;;  %v120_v38 = vsub.f32 %v2630_v30, %v112_v2  ;;  %v121_v39 = vsub.f32 %v2633_v31, %v113_v3 }
  0x21   :  { %8807 = vst [vmem:[#allocation27_spill] sm:$0xff] %v2701_v59  ;;  %v122_v40 = vmul.f32 %v98_v41, %v98_v41  ;;  %v233_v48 = vadd.f32 %v225_v16, %v224_v5  ;;  %v234_v1 = vadd.f32 %v226_v32, %v224_v5  ;;  %v235_v24 = vadd.f32 %v227_v6, %v224_v5 }
  0x22   :  { %8808 = vst [vmem:[#allocation28_spill] sm:$0xff] %v2704_v60  ;;  %v237_v58 = vadd.f32 %v229_v21, %v224_v5  ;;  %v123_v60 = vmul.f32 %v99_v42, %v99_v42  ;;  %v238_v62 = vadd.f32 %v230_v9, %v224_v5  ;;  %v239_v59 = vadd.f32 %v231_v11, %v224_v5 }
  0x23   :  { %8809 = vst [vmem:[#allocation29_spill] sm:$0xff] %v2707_v61  ;;  %v236_v61 = vadd.f32 %v228_v7, %v224_v5  ;;  %v240_v63 = vadd.f32 %v232_v33, %v224_v5  ;;  %v124_v57 = vmul.f32 %v100_v43, %v100_v43  ;;  %v125_v0 = vmul.f32 %v101_v44, %v101_v44 }
  0x24   :  { %v126_v56 = vmul.f32 %v102_v45, %v102_v45  ;;  %v127_v2 = vmul.f32 %v103_v23, %v103_v23  ;;  %v128_v55 = vmul.f32 %v104_v46, %v104_v46  ;;  %v129_v3 = vmul.f32 %v105_v47, %v105_v47 }
  0x25   :  { %v130_v41 = vmul.f32 %v114_v4, %v114_v4  ;;  %v242_v16 = vmul.f32 %v2429_v49, %v233_v48  ;;  %v243_v54 = vmul.f32 %v2429_v49, %v234_v1  ;;  %v244_v53 = vmul.f32 %v2429_v49, %v235_v24 }
  0x26   :  { %v245_v20 = vmul.f32 %v2429_v49, %v236_v61  ;;  %v246_v19 = vmul.f32 %v2429_v49, %v237_v58  ;;  %v131_v32 = vmul.f32 %v115_v8, %v115_v8  ;;  %v247_v6 = vmul.f32 %v2429_v49, %v238_v62 }
  0x27   :  { %v248_v7 = vmul.f32 %v2429_v49, %v239_v59  ;;  %v249_v21 = vmul.f32 %v2429_v49, %v240_v63  ;;  %v132_v42 = vmul.f32 %v116_v34, %v116_v34  ;;  %v133_v9 = vmul.f32 %v117_v35, %v117_v35 }
  0x28   :  { %v134_v11 = vmul.f32 %v118_v36, %v118_v36  ;;  %v135_v5 = vmul.f32 %v119_v37, %v119_v37  ;;  %v136_v43 = vmul.f32 %v120_v38, %v120_v38  ;;  %v137_v44 = vmul.f32 %v121_v39, %v121_v39 }
  0x29   :  { %v2743_v45 = vadd.f32 %v130_v41, %v122_v40  ;;  %v250_v23 = vmax.f32 %v242_v16, 0.0  ;;  %v251_v46 = vmax.f32 %v243_v54, 0.0  ;;  %v252_v47 = vmax.f32 %v244_v53, 0.0  ;;  %v2424_v53 = vld [vmem:[%s8321_s0 + $0x30] ss:$0 sm:$0xff] }
  0x2a   :  { %v253_v4 = vmax.f32 %v245_v20, 0.0  ;;  %v254_v1 = vmax.f32 %v246_v19, 0.0  ;;  %v2745_v24 = vadd.f32 %v131_v32, %v123_v60  ;;  %v255_v61 = vmax.f32 %v247_v6, 0.0 }
  0x2b   :  { %v256_v8 = vmax.f32 %v248_v7, 0.0  ;;  %v257_v33 = vmax.f32 %v249_v21, 0.0  ;;  %v2747_v59 = vadd.f32 %v132_v42, %v124_v57  ;;  %v2749_v34 = vadd.f32 %v133_v9, %v125_v0 }
  0x2c   :  { %v2751_v35 = vadd.f32 %v134_v11, %v126_v56  ;;  %v2753_v36 = vadd.f32 %v135_v5, %v127_v2  ;;  %v2755_v37 = vadd.f32 %v136_v43, %v128_v55  ;;  %v2757_v38 = vadd.f32 %v137_v44, %v129_v3 }
  0x2d   :  { %v258_v19 = vmin.f32 %v250_v23, 1.0  ;;  %v259_v54 = vmin.f32 %v251_v46, 1.0  ;;  %v260_v57 = vmin.f32 %v252_v47, 1.0  ;;  %v261_v60 = vmin.f32 %v253_v4, 1.0  ;;  %v2434_v23 = vld [vmem:[%s8321_s0 + $0x2] ss:$0 sm:$0xff] }
  0x2e   :  { %v262_v39 = vmin.f32 %v254_v1, 1.0  ;;  %v263_v40 = vmin.f32 %v255_v61, 1.0  ;;  %v264_v48 = vmin.f32 %v256_v8, 1.0  ;;  %v265_v49 = vmin.f32 %v257_v33, 1.0 }
  0x2f   :  { %v266_v3 = vmul.f32 %v2674_v50, %v258_v19  ;;  %v267_v41 = vmul.f32 %v2674_v50, %v259_v54  ;;  %v268_v16 = vmul.f32 %v2674_v50, %v260_v57  ;;  %v269_v32 = vmul.f32 %v2674_v50, %v261_v60 }
  0x30   :  { %v270_v6 = vmul.f32 %v2674_v50, %v262_v39  ;;  %v2776_v7 = vmul.f32 %v2424_v53, %v2606_v22  ;;  %v271_v21 = vmul.f32 %v2674_v50, %v263_v40  ;;  %v272_v42 = vmul.f32 %v2674_v50, %v264_v48  ;;  %v8835_v22 = vld [vmem:[#allocation27_spill] sm:$0xff] }
  0x31   :  { %v273_v9 = vmul.f32 %v2674_v50, %v265_v49  ;;  %v2782_v11 = vmul.f32 %v2424_v53, %v2615_v25  ;;  %v2785_v5 = vmul.f32 %v2424_v53, %v2618_v26  ;;  %v2788_v43 = vmul.f32 %v2424_v53, %v2621_v27  ;;  %v2435_v50 = vld [vmem:[%s8321_s0 + $0xa] ss:$0 sm:$0xff]  ;;  %v8834_v26 = vld [vmem:[#allocation26_spill] sm:$0xff] }
  0x32   :  { %8810 = vst [vmem:[#allocation30_spill] sm:$0xff] %v2776_v7  ;;  %v2791_v44 = vmul.f32 %v2424_v53, %v2624_v28  ;;  %v2800_v46 = vmul.f32 %v2424_v53, %v2627_v29  ;;  %v2803_v47 = vmul.f32 %v2424_v53, %v2630_v30  ;;  %v2806_v4 = vmul.f32 %v2424_v53, %v2633_v31  ;;  %v2820_v53 = vld [vmem:[%s8321_s0 + $0x12] ss:$0 sm:$0xff]  ;;  %v8831_v29 = vld [vmem:[#allocation23_spill] sm:$0xff]  ;;  %v8833_v28 = vld [vmem:[#allocation25_spill] sm:$0xff] }
  0x33   :  { %8811 = vst [vmem:[#allocation31_spill] sm:$0xff] %v2782_v11  ;;  %v274_v1 = vsub.f32 %v2682_v52, %v266_v3  ;;  %v275_v61 = vsub.f32 %v2682_v52, %v267_v41  ;;  %v276_v8 = vsub.f32 %v2682_v52, %v268_v16  ;;  %v277_v33 = vsub.f32 %v2682_v52, %v269_v32  ;;  %v2825_v3 = vld [vmem:[%s8321_s0 + $0x1a] ss:$0 sm:$0xff] }
  0x34   :  { %8812 = vst [vmem:[#allocation32_spill] sm:$0xff] %v2785_v5  ;;  %v278_v2 = vsub.f32 %v2682_v52, %v270_v6  ;;  %v279_v0 = vsub.f32 %v2682_v52, %v271_v21  ;;  %v280_v63 = vsub.f32 %v2682_v52, %v272_v42  ;;  %v281_v62 = vsub.f32 %v2682_v52, %v273_v9  ;;  %v8826_v9 = vld [vmem:[#allocation10_spill] sm:$0xff]  ;;  %v8832_v5 = vld [vmem:[#allocation24_spill] sm:$0xff] }
  0x35   :  { %8813 = vst [vmem:[#allocation33_spill] sm:$0xff] %v2788_v43  ;;  %v282_v58 = vmul.f32 %v2679_v51, %v258_v19  ;;  %v2828_v41 = vsub.f32 %v2587_v15, %v2434_v23  ;;  %v2831_v16 = vsub.f32 %v2576_v10, %v2435_v50  ;;  %v2834_v32 = vsub.f32 %v2581_v12, %v2435_v50 }
  0x36   :  { %8814 = vst [vmem:[#allocation34_spill] sm:$0xff] %v2791_v44  ;;  %v2837_v19 = vsub.f32 %v2583_v13, %v2435_v50  ;;  %v2840_v6 = vsub.f32 %v2585_v14, %v2435_v50  ;;  %v2843_v21 = vsub.f32 %v2592_v17, %v2435_v50  ;;  %v2846_v42 = vsub.f32 %v2594_v18, %v2435_v50 }
  0x37   :  { %8815 = vst [vmem:[#allocation35_spill] sm:$0xff] %v2800_v46  ;;  %v2849_v23 = vsub.f32 %v8826_v9, %v2435_v50  ;;  %v283_v55 = vmul.f32 %v2679_v51, %v259_v54  ;;  %v284_v56 = vmul.f32 %v2679_v51, %v260_v57  ;;  %v285_v20 = vmul.f32 %v2679_v51, %v261_v60 }
  0x38   :  { %8816 = vst [vmem:[#allocation36_spill] sm:$0xff] %v2803_v47  ;;  %v286_v31 = vmul.f32 %v2679_v51, %v262_v39  ;;  %v287_v46 = vmul.f32 %v2679_v51, %v263_v40  ;;  %v288_v30 = vmul.f32 %v2679_v51, %v264_v48  ;;  %v289_v44 = vmul.f32 %v2679_v51, %v265_v49  ;;  %v8830_v49 = vld [vmem:[#allocation22_spill] sm:$0xff] }
  0x39   :  { %8817 = vst [vmem:[#allocation37_spill] sm:$0xff] %v2806_v4  ;;  %v8828_v4 = vld [vmem:[#allocation11_spill] sm:$0xff]  ;;  %v408_v52 = vmul.f32 %v2820_v53, %v2828_v41  ;;  %v409_v54 = vmul.f32 %v2825_v3, %v2831_v16  ;;  %v410_v57 = vmul.f32 %v2825_v3, %v2834_v32  ;;  %v411_v60 = vmul.f32 %v2825_v3, %v2837_v19 }
  0x3a   :  { %8818 = vst [vmem:[#allocation38_spill] sm:$0xff] %v2825_v3  ;;  %v2855_v47 = vsub.f32 %v8828_v4, %v2435_v50  ;;  %v412_v39 = vmul.f32 %v2825_v3, %v2840_v6  ;;  %v413_v40 = vmul.f32 %v2825_v3, %v2843_v21  ;;  %v414_v51 = vmul.f32 %v2825_v3, %v2846_v42 }
  0x3b   :  { %8819 = vst [vmem:[#allocation39_spill] sm:$0xff] %v2828_v41  ;;  %v415_v48 = vmul.f32 %v2825_v3, %v2849_v23  ;;  %v290_v50 = vsub.f32 %v8830_v49, %v282_v58  ;;  %v291_v43 = vsub.f32 %v8831_v29, %v283_v55  ;;  %v292_v11 = vsub.f32 %v8832_v5, %v284_v56  ;;  %v2436_v56 = vld [vmem:[%s8321_s0 + $0x22] ss:$0 sm:$0xff] }
  0x3c   :  { %8820 = vst [vmem:[#allocation40_spill] sm:$0xff] %v2831_v16  ;;  %v416_v7 = vmul.f32 %v2825_v3, %v2855_v47  ;;  %v293_v27 = vsub.f32 %v8833_v28, %v285_v20  ;;  %v294_v25 = vsub.f32 %v8834_v26, %v286_v31  ;;  %v418_v16 = vadd.f32 %v410_v57, %v408_v52 }
  0x3d   :  { %8821 = vst [vmem:[#allocation41_spill] sm:$0xff] %v2834_v32  ;;  %v419_v58 = vadd.f32 %v411_v60, %v408_v52  ;;  %v420_v55 = vadd.f32 %v412_v39, %v408_v52  ;;  %v421_v4 = vadd.f32 %v413_v40, %v408_v52  ;;  %v423_v9 = vadd.f32 %v415_v48, %v408_v52 }
  0x3e   :  { %8822 = vst [vmem:[#allocation42_spill] sm:$0xff] %v2837_v19  ;;  %v8837_v19 = vld [vmem:[#allocation29_spill] sm:$0xff]  ;;  %v298_v20 = vmul.f32 %v274_v1, %v274_v1  ;;  %v299_v18 = vmul.f32 %v275_v61, %v275_v61  ;;  %v300_v31 = vmul.f32 %v276_v8, %v276_v8  ;;  %v424_v17 = vadd.f32 %v416_v7, %v408_v52 }
  0x3f   :  { %8823 = vst [vmem:[#allocation43_spill] sm:$0xff] %v2840_v6  ;;  %v8836_v6 = vld [vmem:[#allocation28_spill] sm:$0xff]  ;;  %v297_v32 = vsub.f32 %v8837_v19, %v289_v44  ;;  %v302_v14 = vmul.f32 %v278_v2, %v278_v2  ;;  %v304_v13 = vmul.f32 %v280_v63, %v280_v63  ;;  %v305_v44 = vmul.f32 %v281_v62, %v281_v62 }
  0x40   :  { %8824 = vst [vmem:[#allocation44_spill] sm:$0xff] %v2843_v21  ;;  %v295_v21 = vsub.f32 %v8835_v22, %v287_v46  ;;  %v301_v46 = vmul.f32 %v277_v33, %v277_v33  ;;  %v427_v57 = vmul.f32 %v2436_v56, %v418_v16  ;;  %v428_v60 = vmul.f32 %v2436_v56, %v419_v58 }
  0x41   :  { %8825 = vst [vmem:[#allocation45_spill] sm:$0xff] %v2846_v42  ;;  %v296_v42 = vsub.f32 %v8836_v6, %v288_v30  ;;  %v303_v30 = vmul.f32 %v279_v0, %v279_v0  ;;  %v429_v12 = vmul.f32 %v2436_v56, %v420_v55  ;;  %v430_v10 = vmul.f32 %v2436_v56, %v421_v4 }
  0x42   :  { %8827 = vst [vmem:[#allocation46_spill] sm:$0xff] %v2849_v23  ;;  %v417_v23 = vadd.f32 %v409_v54, %v408_v52  ;;  %v432_v3 = vmul.f32 %v2436_v56, %v423_v9  ;;  %v306_v39 = vmul.f32 %v290_v50, %v290_v50  ;;  %v307_v40 = vmul.f32 %v291_v43, %v291_v43 }
  0x43   :  { %8829 = vst [vmem:[#allocation47_spill] sm:$0xff] %v2855_v47  ;;  %v422_v47 = vadd.f32 %v414_v51, %v408_v52  ;;  %v308_v51 = vmul.f32 %v292_v11, %v292_v11  ;;  %v433_v48 = vmul.f32 %v2436_v56, %v424_v17  ;;  %v309_v1 = vmul.f32 %v293_v27, %v293_v27 }
  0x44   :  { %v426_v54 = vmul.f32 %v2436_v56, %v417_v23  ;;  %v310_v61 = vmul.f32 %v294_v25, %v294_v25  ;;  %v311_v8 = vmul.f32 %v295_v21, %v295_v21  ;;  %v312_v52 = vmul.f32 %v296_v42, %v296_v42 }
  0x45   :  { %v431_v15 = vmul.f32 %v2436_v56, %v422_v47  ;;  %v313_v7 = vmul.f32 %v297_v32, %v297_v32  ;;  %v435_v0 = vmax.f32 %v427_v57, 0.0  ;;  %v436_v63 = vmax.f32 %v428_v60, 0.0 }
  0x46   :  { %v434_v2 = vmax.f32 %v426_v54, 0.0  ;;  %v437_v62 = vmax.f32 %v429_v12, 0.0  ;;  %v438_v33 = vmax.f32 %v430_v10, 0.0  ;;  %v440_v23 = vmax.f32 %v432_v3, 0.0 }
  0x47   :  { %v439_v16 = vmax.f32 %v431_v15, 0.0  ;;  %v314_v58 = vadd.f32 %v306_v39, %v298_v20  ;;  %v315_v4 = vadd.f32 %v307_v40, %v299_v18  ;;  %v316_v47 = vadd.f32 %v308_v51, %v300_v31 }
  0x48   :  { %v441_v9 = vmax.f32 %v433_v48, 0.0  ;;  %v317_v50 = vadd.f32 %v309_v1, %v301_v46  ;;  %v318_v43 = vadd.f32 %v310_v61, %v302_v14  ;;  %v319_v11 = vadd.f32 %v311_v8, %v303_v30 }
  0x49   :  { %v320_v17 = vadd.f32 %v312_v52, %v304_v13  ;;  %v321_v27 = vadd.f32 %v313_v7, %v305_v44  ;;  %v442_v25 = vmin.f32 %v434_v2, 1.0  ;;  %v443_v21 = vmin.f32 %v435_v0, 1.0  ;;  %v2431_v13 = vld [vmem:[%s8321_s0 + $0x31] ss:$0 sm:$0xff]  ;;  %v2441_v52 = vld [vmem:[%s8321_s0 + $0x3] ss:$0 sm:$0xff] }
  0x4a   :  { %v444_v42 = vmin.f32 %v436_v63, 1.0  ;;  %v445_v32 = vmin.f32 %v437_v62, 1.0  ;;  %v446_v56 = vmin.f32 %v438_v33, 1.0  ;;  %v447_v55 = vmin.f32 %v439_v16, 1.0  ;;  %v2442_v7 = vld [vmem:[%s8321_s0 + $0xb] ss:$0 sm:$0xff] }
  0x4b   :  { %v448_v54 = vmin.f32 %v440_v23, 1.0  ;;  %v8838_v10 = vmin.f32 %v2743_v45, 1e+12  ;;  %v8839_v15 = vmin.f32 %v2745_v24, 1e+12  ;;  %v449_v20 = vmin.f32 %v441_v9, 1.0 }
  0x4c   :  { %v8840_v14 = vmin.f32 %v2747_v59, 1e+12  ;;  %v8841_v31 = vmin.f32 %v2749_v34, 1e+12  ;;  %v8842_v45 = vmin.f32 %v2751_v35, 1e+12  ;;  %v450_v34 = vmul.f32 %v2820_v53, %v442_v25 }
  0x4d   :  { %v2892_v12 = vmin.f32 %v8838_v10, %v314_v58  ;;  %v2896_v18 = vmin.f32 %v8839_v15, %v315_v4  ;;  %v8843_v24 = vmin.f32 %v2753_v36, 1e+12  ;;  %v8844_v59 = vmin.f32 %v2755_v37, 1e+12  ;;  %v8856_v10 = vld [vmem:[#allocation7_spill] sm:$0xff] }
  0x4e   :  { %v2900_v3 = vmin.f32 %v8840_v14, %v316_v47  ;;  %v2907_v46 = vmin.f32 %v8841_v31, %v317_v50  ;;  %v2911_v30 = vmin.f32 %v8842_v45, %v318_v43  ;;  %v8845_v60 = vmin.f32 %v2757_v38, 1e+12  ;;  %v8854_v43 = vld [vmem:[#allocation38_spill] sm:$0xff]  ;;  %v8858_v14 = vld [vmem:[#allocation3_spill] sm:$0xff]  ;;  %v8860_v31 = vld [vmem:[#allocation4_spill] sm:$0xff] }
  0x4f   :  { %v2915_v44 = vmin.f32 %v8843_v24, %v319_v11  ;;  %v2919_v57 = vmin.f32 %v8844_v59, %v320_v17  ;;  %v451_v40 = vmul.f32 %v2820_v53, %v443_v21  ;;  %v452_v35 = vmul.f32 %v2820_v53, %v444_v42  ;;  %v2975_v17 = vld [vmem:[%s8321_s0 + $0x13] ss:$0 sm:$0xff]  ;;  %v8864_v59 = vld [vmem:[#allocation6_spill] sm:$0xff] }
  0x50   :  { %v2923_v39 = vmin.f32 %v8845_v60, %v321_v27  ;;  %v453_v51 = vmul.f32 %v2820_v53, %v445_v32  ;;  %v454_v36 = vmul.f32 %v2820_v53, %v446_v56  ;;  %v455_v48 = vmul.f32 %v2820_v53, %v447_v55  ;;  %v2980_v27 = vld [vmem:[%s8321_s0 + $0x1b] ss:$0 sm:$0xff] }
  0x51   :  { %v456_v37 = vmul.f32 %v2820_v53, %v448_v54  ;;  %v2933_v1 = vmul.f32 %v2431_v13, %v8830_v49  ;;  %v2936_v38 = vmul.f32 %v2431_v13, %v8831_v29  ;;  %v2939_v61 = vmul.f32 %v2431_v13, %v8832_v5  ;;  %8855 = vst [vmem:[#allocation38_spill] sm:$0xff] %v2980_v27  ;;  %v8878_v5 = vld [vmem:[#allocation44_spill] sm:$0xff]  ;;  %v8879_v49 = vld [vmem:[#allocation45_spill] sm:$0xff] }
  0x52   :  { %v457_v8 = vmul.f32 %v2820_v53, %v449_v20  ;;  %v2949_v2 = vmul.f32 %v2431_v13, %v8833_v28  ;;  %v2952_v0 = vmul.f32 %v2431_v13, %v8834_v26  ;;  %v2955_v63 = vmul.f32 %v2431_v13, %v8835_v22  ;;  %v8877_v26 = vld [vmem:[#allocation43_spill] sm:$0xff] }
  0x53   :  { %8846 = vst [vmem:[#allocation48_spill] sm:$0xff] %v2933_v1  ;;  %v2958_v62 = vmul.f32 %v2431_v13, %v8836_v6  ;;  %v2961_v53 = vmul.f32 %v2431_v13, %v8837_v19  ;;  %v458_v33 = vsub.f32 %v2828_v41, %v450_v34  ;;  %v459_v16 = vsub.f32 %v2828_v41, %v451_v40  ;;  %v8866_v34 = vld [vmem:[#allocation8_spill] sm:$0xff]  ;;  %v8876_v1 = vld [vmem:[#allocation42_spill] sm:$0xff] }
  0x54   :  { %8847 = vst [vmem:[#allocation49_spill] sm:$0xff] %v2936_v38  ;;  %v460_v23 = vsub.f32 %v2828_v41, %v452_v35  ;;  %v461_v58 = vsub.f32 %v2828_v41, %v453_v51  ;;  %v462_v4 = vsub.f32 %v2828_v41, %v454_v36  ;;  %v463_v47 = vsub.f32 %v2828_v41, %v455_v48  ;;  %v8868_v51 = vld [vmem:[#allocation9_spill] sm:$0xff]  ;;  %v8870_v48 = vld [vmem:[#allocation10_spill] sm:$0xff] }
  0x55   :  { %8848 = vst [vmem:[#allocation50_spill] sm:$0xff] %v2939_v61  ;;  %v464_v9 = vsub.f32 %v2828_v41, %v456_v37  ;;  %v465_v50 = vsub.f32 %v2828_v41, %v457_v8  ;;  %v466_v11 = vmul.f32 %v8854_v43, %v442_v25  ;;  %v2983_v15 = vsub.f32 %v8856_v10, %v2441_v52  ;;  %v8862_v25 = vld [vmem:[#allocation5_spill] sm:$0xff]  ;;  %v8872_v8 = vld [vmem:[#allocation11_spill] sm:$0xff] }
  0x56   :  { %8849 = vst [vmem:[#allocation51_spill] sm:$0xff] %v2949_v2  ;;  %v2986_v13 = vsub.f32 %v8858_v14, %v2442_v7  ;;  %v2989_v45 = vsub.f32 %v8860_v31, %v2442_v7  ;;  %v2992_v24 = vsub.f32 %v8862_v25, %v2442_v7  ;;  %v2995_v60 = vsub.f32 %v8864_v59, %v2442_v7  ;;  %v8875_v61 = vld [vmem:[#allocation41_spill] sm:$0xff] }
  0x57   :  { %8850 = vst [vmem:[#allocation52_spill] sm:$0xff] %v2952_v0  ;;  %v2998_v40 = vsub.f32 %v8866_v34, %v2442_v7  ;;  %v467_v35 = vmul.f32 %v8854_v43, %v443_v21  ;;  %v3002_v36 = vsub.f32 %v8868_v51, %v2442_v7  ;;  %v3005_v37 = vsub.f32 %v8870_v48, %v2442_v7 }
  0x58   :  { %8851 = vst [vmem:[#allocation53_spill] sm:$0xff] %v2955_v63  ;;  %v3008_v52 = vsub.f32 %v8872_v8, %v2442_v7  ;;  %v470_v19 = vmul.f32 %v8854_v43, %v446_v56  ;;  %v471_v41 = vmul.f32 %v8854_v43, %v447_v55  ;;  %v472_v63 = vmul.f32 %v8854_v43, %v448_v54  ;;  %v8874_v55 = vld [vmem:[#allocation40_spill] sm:$0xff] }
  0x59   :  { %8852 = vst [vmem:[#allocation54_spill] sm:$0xff] %v2958_v62  ;;  %v469_v62 = vmul.f32 %v8854_v43, %v445_v32  ;;  %v473_v21 = vmul.f32 %v8854_v43, %v449_v20  ;;  %v592_v6 = vmul.f32 %v2975_v17, %v2983_v15  ;;  %v593_v0 = vmul.f32 %v2980_v27, %v2986_v13 }
  0x5a   :  { %8853 = vst [vmem:[#allocation55_spill] sm:$0xff] %v2961_v53  ;;  %v468_v53 = vmul.f32 %v8854_v43, %v444_v42  ;;  %v594_v7 = vmul.f32 %v2980_v27, %v2989_v45  ;;  %v595_v42 = vmul.f32 %v2980_v27, %v2992_v24  ;;  %v596_v32 = vmul.f32 %v2980_v27, %v2995_v60 }
  0x5b   :  { %8857 = vst [vmem:[#allocation56_spill] sm:$0xff] %v2983_v15  ;;  %v597_v56 = vmul.f32 %v2980_v27, %v2998_v40  ;;  %v474_v54 = vsub.f32 %v8874_v55, %v466_v11  ;;  %v598_v20 = vmul.f32 %v2980_v27, %v3002_v36  ;;  %v599_v43 = vmul.f32 %v2980_v27, %v3005_v37  ;;  %v8880_v11 = vld [vmem:[#allocation46_spill] sm:$0xff] }
  0x5c   :  { %8859 = vst [vmem:[#allocation57_spill] sm:$0xff] %v2986_v13  ;;  %v600_v2 = vmul.f32 %v2980_v27, %v3008_v52  ;;  %v475_v38 = vsub.f32 %v8875_v61, %v467_v35  ;;  %v476_v22 = vsub.f32 %v8876_v1, %v468_v53  ;;  %v477_v28 = vsub.f32 %v8877_v26, %v469_v62 }
  0x5d   :  { %8861 = vst [vmem:[#allocation58_spill] sm:$0xff] %v2989_v45  ;;  %v478_v29 = vsub.f32 %v8878_v5, %v470_v19  ;;  %v601_v45 = vadd.f32 %v593_v0, %v592_v6  ;;  %v603_v13 = vadd.f32 %v595_v42, %v592_v6  ;;  %v604_v35 = vadd.f32 %v596_v32, %v592_v6 }
  0x5e   :  { %8863 = vst [vmem:[#allocation59_spill] sm:$0xff] %v2992_v24  ;;  %v8881_v24 = vld [vmem:[#allocation47_spill] sm:$0xff]  ;;  %v605_v8 = vadd.f32 %v597_v56, %v592_v6  ;;  %v482_v53 = vmul.f32 %v458_v33, %v458_v33  ;;  %v606_v48 = vadd.f32 %v598_v20, %v592_v6  ;;  %v607_v62 = vadd.f32 %v599_v43, %v592_v6 }
  0x5f   :  { %8865 = vst [vmem:[#allocation60_spill] sm:$0xff] %v2995_v60  ;;  %v480_v60 = vsub.f32 %v8880_v11, %v472_v63  ;;  %v608_v51 = vadd.f32 %v600_v2, %v592_v6  ;;  %v483_v19 = vmul.f32 %v459_v16, %v459_v16  ;;  %v484_v34 = vmul.f32 %v460_v23, %v460_v23 }
  0x60   :  { %8867 = vst [vmem:[#allocation61_spill] sm:$0xff] %v2998_v40  ;;  %v479_v40 = vsub.f32 %v8879_v49, %v471_v41  ;;  %v485_v41 = vmul.f32 %v461_v58, %v461_v58  ;;  %v486_v59 = vmul.f32 %v462_v4, %v462_v4  ;;  %v487_v63 = vmul.f32 %v463_v47, %v463_v47 }
  0x61   :  { %8869 = vst [vmem:[#allocation62_spill] sm:$0xff] %v3002_v36  ;;  %v481_v36 = vsub.f32 %v8881_v24, %v473_v21  ;;  %v488_v25 = vmul.f32 %v464_v9, %v464_v9  ;;  %v489_v21 = vmul.f32 %v465_v50, %v465_v50  ;;  %v491_v33 = vmul.f32 %v475_v38, %v475_v38 }
  0x62   :  { %8871 = vst [vmem:[#allocation63_spill] sm:$0xff] %v3005_v37  ;;  %v2443_v37 = vld [vmem:[%s8321_s0 + $0x23] ss:$0 sm:$0xff]  ;;  %v492_v20 = vmul.f32 %v476_v22, %v476_v22  ;;  %v493_v43 = vmul.f32 %v477_v28, %v477_v28  ;;  %v495_v2 = vmul.f32 %v479_v40, %v479_v40  ;;  %v496_v16 = vmul.f32 %v480_v60, %v480_v60 }
  0x63   :  { %8873 = vst [vmem:[#allocation64_spill] sm:$0xff] %v3008_v52  ;;  %v602_v52 = vadd.f32 %v594_v7, %v592_v6  ;;  %v610_v0 = vmul.f32 %v2443_v37, %v601_v45  ;;  %v612_v14 = vmul.f32 %v2443_v37, %v603_v13  ;;  %v613_v10 = vmul.f32 %v2443_v37, %v604_v35 }
  0x64   :  { %v614_v27 = vmul.f32 %v2443_v37, %v605_v8  ;;  %v490_v7 = vmul.f32 %v474_v54, %v474_v54  ;;  %v615_v42 = vmul.f32 %v2443_v37, %v606_v48  ;;  %v616_v32 = vmul.f32 %v2443_v37, %v607_v62 }
  0x65   :  { %v611_v31 = vmul.f32 %v2443_v37, %v602_v52  ;;  %v617_v56 = vmul.f32 %v2443_v37, %v608_v51  ;;  %v494_v6 = vmul.f32 %v478_v29, %v478_v29  ;;  %v497_v23 = vmul.f32 %v481_v36, %v481_v36 }
  0x66   :  { %v618_v58 = vmax.f32 %v610_v0, 0.0  ;;  %v620_v47 = vmax.f32 %v612_v14, 0.0  ;;  %v621_v9 = vmax.f32 %v613_v10, 0.0  ;;  %v622_v50 = vmax.f32 %v614_v27, 0.0 }
  0x67   :  { %v619_v4 = vmax.f32 %v611_v31, 0.0  ;;  %v3045_v45 = vadd.f32 %v490_v7, %v482_v53  ;;  %v623_v13 = vmax.f32 %v615_v42, 0.0  ;;  %v624_v8 = vmax.f32 %v616_v32, 0.0  ;;  %v8890_v53 = vld [vmem:[#allocation38_spill] sm:$0xff] }
  0x68   :  { %v625_v52 = vmax.f32 %v617_v56, 0.0  ;;  %v3047_v48 = vadd.f32 %v491_v33, %v483_v19  ;;  %v3049_v51 = vadd.f32 %v492_v20, %v484_v34  ;;  %v3051_v22 = vadd.f32 %v493_v43, %v485_v41  ;;  %v2438_v34 = vld [vmem:[%s8321_s0 + $0x32] ss:$0 sm:$0xff] }
  0x69   :  { %v3053_v28 = vadd.f32 %v494_v6, %v486_v59  ;;  %v3055_v29 = vadd.f32 %v495_v2, %v487_v63  ;;  %v3057_v38 = vadd.f32 %v496_v16, %v488_v25  ;;  %v3059_v14 = vadd.f32 %v497_v23, %v489_v21  ;;  %v8900_v25 = vld [vmem:[#allocation6_spill] sm:$0xff] }
  0x6a   :  { %v626_v27 = vmin.f32 %v618_v58, 1.0  ;;  %v627_v10 = vmin.f32 %v619_v4, 1.0  ;;  %v628_v31 = vmin.f32 %v620_v47, 1.0  ;;  %v629_v60 = vmin.f32 %v621_v9, 1.0  ;;  %v2448_v58 = vld [vmem:[%s8321_s0 + $0x4] ss:$0 sm:$0xff] }
  0x6b   :  { %v630_v40 = vmin.f32 %v622_v50, 1.0  ;;  %v631_v59 = vmin.f32 %v623_v13, 1.0  ;;  %v632_v37 = vmin.f32 %v624_v8, 1.0  ;;  %v633_v54 = vmin.f32 %v625_v52, 1.0 }
  0x6c   :  { %v634_v21 = vmul.f32 %v2975_v17, %v626_v27  ;;  %v635_v0 = vmul.f32 %v2975_v17, %v627_v10  ;;  %v636_v7 = vmul.f32 %v2975_v17, %v628_v31  ;;  %v637_v42 = vmul.f32 %v2975_v17, %v629_v60 }
  0x6d   :  { %v638_v32 = vmul.f32 %v2975_v17, %v630_v40  ;;  %v3086_v56 = vmul.f32 %v2438_v34, %v8874_v55  ;;  %v639_v33 = vmul.f32 %v2975_v17, %v631_v59  ;;  %v640_v20 = vmul.f32 %v2975_v17, %v632_v37 }
  0x6e   :  { %v641_v43 = vmul.f32 %v2975_v17, %v633_v54  ;;  %v3092_v6 = vmul.f32 %v2438_v34, %v8875_v61  ;;  %v3095_v2 = vmul.f32 %v2438_v34, %v8876_v1  ;;  %v3098_v16 = vmul.f32 %v2438_v34, %v8877_v26  ;;  %v2449_v17 = vld [vmem:[%s8321_s0 + $0xc] ss:$0 sm:$0xff]  ;;  %v8910_v26 = vld [vmem:[#allocation57_spill] sm:$0xff] }
  0x6f   :  { %8882 = vst [vmem:[#allocation65_spill] sm:$0xff] %v3086_v56  ;;  %v3101_v23 = vmul.f32 %v2438_v34, %v8878_v5  ;;  %v3110_v4 = vmul.f32 %v2438_v34, %v8879_v49  ;;  %v3113_v47 = vmul.f32 %v2438_v34, %v8880_v11  ;;  %v3116_v9 = vmul.f32 %v2438_v34, %v8881_v24  ;;  %v8904_v24 = vld [vmem:[#allocation9_spill] sm:$0xff]  ;;  %v8906_v11 = vld [vmem:[#allocation10_spill] sm:$0xff]  ;;  %v8912_v61 = vld [vmem:[#allocation59_spill] sm:$0xff] }
  0x70   :  { %8883 = vst [vmem:[#allocation66_spill] sm:$0xff] %v3092_v6  ;;  %v642_v50 = vsub.f32 %v2983_v15, %v634_v21  ;;  %v643_v13 = vsub.f32 %v2983_v15, %v635_v0  ;;  %v644_v8 = vsub.f32 %v2983_v15, %v636_v7  ;;  %v645_v52 = vsub.f32 %v2983_v15, %v637_v42  ;;  %v3131_v21 = vld [vmem:[%s8321_s0 + $0x14] ss:$0 sm:$0xff]  ;;  %v3136_v0 = vld [vmem:[%s8321_s0 + $0x1c] ss:$0 sm:$0xff]  ;;  %v8892_v7 = vld [vmem:[#allocation7_spill] sm:$0xff] }
  0x71   :  { %8884 = vst [vmem:[#allocation67_spill] sm:$0xff] %v3095_v2  ;;  %v646_v63 = vsub.f32 %v2983_v15, %v638_v32  ;;  %v647_v41 = vsub.f32 %v2983_v15, %v639_v33  ;;  %v648_v19 = vsub.f32 %v2983_v15, %v640_v20  ;;  %v649_v62 = vsub.f32 %v2983_v15, %v641_v43  ;;  %v8894_v32 = vld [vmem:[#allocation3_spill] sm:$0xff]  ;;  %v8896_v20 = vld [vmem:[#allocation4_spill] sm:$0xff] }
  0x72   :  { %8885 = vst [vmem:[#allocation68_spill] sm:$0xff] %v3098_v16  ;;  %v650_v35 = vmul.f32 %v8890_v53, %v626_v27  ;;  %v651_v34 = vmul.f32 %v8890_v53, %v627_v10  ;;  %v3139_v42 = vsub.f32 %v8892_v7, %v2448_v58  ;;  %v3142_v33 = vsub.f32 %v8894_v32, %v2449_v17  ;;  %v8898_v10 = vld [vmem:[#allocation5_spill] sm:$0xff]  ;;  %v8908_v16 = vld [vmem:[#allocation11_spill] sm:$0xff] }
  0x73   :  { %8886 = vst [vmem:[#allocation69_spill] sm:$0xff] %v3101_v23  ;;  %v3145_v27 = vsub.f32 %v8896_v20, %v2449_v17  ;;  %v3148_v43 = vsub.f32 %v8898_v10, %v2449_v17  ;;  %v3151_v36 = vsub.f32 %v8900_v25, %v2449_v17  ;;  %v3157_v15 = vsub.f32 %v8904_v24, %v2449_v17  ;;  %v8917_v20 = vld [vmem:[#allocation64_spill] sm:$0xff] }
  0x74   :  { %8887 = vst [vmem:[#allocation70_spill] sm:$0xff] %v3110_v4  ;;  %v652_v58 = vmul.f32 %v8890_v53, %v628_v31  ;;  %v653_v4 = vmul.f32 %v8890_v53, %v629_v60  ;;  %v3162_v23 = vsub.f32 %v8906_v11, %v2449_v17  ;;  %v3165_v2 = vsub.f32 %v8908_v16, %v2449_v17 }
  0x75   :  { %8888 = vst [vmem:[#allocation71_spill] sm:$0xff] %v3113_v47  ;;  %v654_v6 = vmul.f32 %v8890_v53, %v630_v40  ;;  %v655_v56 = vmul.f32 %v8890_v53, %v631_v59  ;;  %v656_v49 = vmul.f32 %v8890_v53, %v632_v37  ;;  %v657_v5 = vmul.f32 %v8890_v53, %v633_v54 }
  0x76   :  { %8889 = vst [vmem:[#allocation72_spill] sm:$0xff] %v3116_v9  ;;  %v8902_v9 = vld [vmem:[#allocation8_spill] sm:$0xff]  ;;  %v658_v1 = vsub.f32 %v8910_v26, %v650_v35  ;;  %v776_v31 = vmul.f32 %v3131_v21, %v3139_v42  ;;  %v777_v60 = vmul.f32 %v3136_v0, %v3142_v33  ;;  %v779_v40 = vmul.f32 %v3136_v0, %v3148_v43  ;;  %v8911_v35 = vld [vmem:[#allocation58_spill] sm:$0xff] }
  0x77   :  { %8891 = vst [vmem:[#allocation38_spill] sm:$0xff] %v3136_v0  ;;  %v3154_v47 = vsub.f32 %v8902_v9, %v2449_v17  ;;  %v778_v17 = vmul.f32 %v3136_v0, %v3145_v27  ;;  %v780_v59 = vmul.f32 %v3136_v0, %v3151_v36  ;;  %v782_v54 = vmul.f32 %v3136_v0, %v3157_v15  ;;  %v8915_v9 = vld [vmem:[#allocation62_spill] sm:$0xff] }
  0x78   :  { %8893 = vst [vmem:[#allocation73_spill] sm:$0xff] %v3139_v42  ;;  %v659_v53 = vsub.f32 %v8911_v35, %v651_v34  ;;  %v660_v55 = vsub.f32 %v8912_v61, %v652_v58  ;;  %v783_v16 = vmul.f32 %v3136_v0, %v3162_v23  ;;  %v784_v11 = vmul.f32 %v3136_v0, %v3165_v2  ;;  %v2450_v58 = vld [vmem:[%s8321_s0 + $0x24] ss:$0 sm:$0xff] }
  0x79   :  { %8895 = vst [vmem:[#allocation74_spill] sm:$0xff] %v3142_v33  ;;  %v781_v37 = vmul.f32 %v3136_v0, %v3154_v47  ;;  %v663_v25 = vsub.f32 %v8915_v9, %v655_v56  ;;  %v666_v32 = vmul.f32 %v642_v50, %v642_v50  ;;  %v785_v34 = vadd.f32 %v777_v60, %v776_v31 }
  0x7a   :  { %8897 = vst [vmem:[#allocation75_spill] sm:$0xff] %v3145_v27  ;;  %v8914_v27 = vld [vmem:[#allocation61_spill] sm:$0xff]  ;;  %v786_v7 = vadd.f32 %v778_v17, %v776_v31  ;;  %v788_v33 = vadd.f32 %v780_v59, %v776_v31  ;;  %v790_v0 = vadd.f32 %v782_v54, %v776_v31  ;;  %v668_v42 = vmul.f32 %v644_v8, %v644_v8 }
  0x7b   :  { %8899 = vst [vmem:[#allocation76_spill] sm:$0xff] %v3148_v43  ;;  %v8913_v43 = vld [vmem:[#allocation60_spill] sm:$0xff]  ;;  %v669_v56 = vmul.f32 %v645_v52, %v645_v52  ;;  %v670_v9 = vmul.f32 %v646_v63, %v646_v63  ;;  %v674_v50 = vmul.f32 %v658_v1, %v658_v1  ;;  %v794_v60 = vmul.f32 %v2450_v58, %v785_v34 }
  0x7c   :  { %8901 = vst [vmem:[#allocation77_spill] sm:$0xff] %v3151_v36  ;;  %v661_v24 = vsub.f32 %v8913_v43, %v653_v4  ;;  %v662_v36 = vsub.f32 %v8914_v27, %v654_v6  ;;  %v667_v4 = vmul.f32 %v643_v13, %v643_v13  ;;  %v791_v6 = vadd.f32 %v783_v16, %v776_v31 }
  0x7d   :  { %8903 = vst [vmem:[#allocation78_spill] sm:$0xff] %v3154_v47  ;;  %v8916_v47 = vld [vmem:[#allocation63_spill] sm:$0xff]  ;;  %v792_v27 = vadd.f32 %v784_v11, %v776_v31  ;;  %v795_v17 = vmul.f32 %v2450_v58, %v786_v7  ;;  %v797_v43 = vmul.f32 %v2450_v58, %v788_v33  ;;  %v799_v35 = vmul.f32 %v2450_v58, %v790_v0 }
  0x7e   :  { %8905 = vst [vmem:[#allocation79_spill] sm:$0xff] %v3157_v15  ;;  %v664_v10 = vsub.f32 %v8916_v47, %v656_v49  ;;  %v665_v15 = vsub.f32 %v8917_v20, %v657_v5  ;;  %v671_v49 = vmul.f32 %v647_v41, %v647_v41  ;;  %v672_v47 = vmul.f32 %v648_v19, %v648_v19 }
  0x7f   :  { %8907 = vst [vmem:[#allocation80_spill] sm:$0xff] %v3162_v23  ;;  %v787_v23 = vadd.f32 %v779_v40, %v776_v31  ;;  %v673_v5 = vmul.f32 %v649_v62, %v649_v62  ;;  %v675_v40 = vmul.f32 %v659_v53, %v659_v53  ;;  %v676_v59 = vmul.f32 %v660_v55, %v660_v55 }
  0x80   :  { %8909 = vst [vmem:[#allocation81_spill] sm:$0xff] %v3165_v2  ;;  %v789_v2 = vadd.f32 %v781_v37, %v776_v31  ;;  %v800_v37 = vmul.f32 %v2450_v58, %v791_v6  ;;  %v801_v54 = vmul.f32 %v2450_v58, %v792_v27  ;;  %v677_v13 = vmul.f32 %v661_v24, %v661_v24 }
  0x81   :  { %v796_v20 = vmul.f32 %v2450_v58, %v787_v23  ;;  %v678_v8 = vmul.f32 %v662_v36, %v662_v36  ;;  %v679_v16 = vmul.f32 %v663_v25, %v663_v25  ;;  %v680_v11 = vmul.f32 %v664_v10, %v664_v10  ;;  %v2445_v25 = vld [vmem:[%s8321_s0 + $0x33] ss:$0 sm:$0xff] }
  0x82   :  { %v798_v61 = vmul.f32 %v2450_v58, %v789_v2  ;;  %v681_v52 = vmul.f32 %v665_v15, %v665_v15  ;;  %v682_v63 = vadd.f32 %v674_v50, %v666_v32  ;;  %v802_v41 = vmax.f32 %v794_v60, 0.0  ;;  %v8930_v50 = vld [vmem:[#allocation58_spill] sm:$0xff] }
  0x83   :  { %v803_v19 = vmax.f32 %v795_v17, 0.0  ;;  %v804_v62 = vmax.f32 %v796_v20, 0.0  ;;  %v805_v1 = vmax.f32 %v797_v43, 0.0  ;;  %v807_v7 = vmax.f32 %v799_v35, 0.0 }
  0x84   :  { %v806_v31 = vmax.f32 %v798_v61, 0.0  ;;  %v683_v23 = vadd.f32 %v675_v40, %v667_v4  ;;  %v684_v33 = vadd.f32 %v676_v59, %v668_v42  ;;  %v808_v2 = vmax.f32 %v800_v37, 0.0  ;;  %v8934_v59 = vld [vmem:[#allocation60_spill] sm:$0xff] }
  0x85   :  { %v809_v0 = vmax.f32 %v801_v54, 0.0  ;;  %v685_v53 = vadd.f32 %v677_v13, %v669_v56  ;;  %v686_v55 = vadd.f32 %v678_v8, %v670_v9  ;;  %v687_v34 = vadd.f32 %v679_v16, %v671_v49  ;;  %v8936_v54 = vld [vmem:[#allocation61_spill] sm:$0xff]  ;;  %v8938_v8 = vld [vmem:[#allocation62_spill] sm:$0xff] }
  0x86   :  { %v688_v27 = vadd.f32 %v680_v11, %v672_v47  ;;  %v689_v24 = vadd.f32 %v681_v52, %v673_v5  ;;  %v8918_v36 = vmin.f32 %v2892_v12, %v3045_v45  ;;  %v810_v61 = vmin.f32 %v802_v41, 1.0  ;;  %v8940_v11 = vld [vmem:[#allocation63_spill] sm:$0xff] }
  0x87   :  { %v811_v32 = vmin.f32 %v803_v19, 1.0  ;;  %v812_v20 = vmin.f32 %v804_v62, 1.0  ;;  %v813_v42 = vmin.f32 %v805_v1, 1.0  ;;  %v814_v10 = vmin.f32 %v806_v31, 1.0  ;;  %v8944_v19 = vld [vmem:[#allocation73_spill] sm:$0xff] }
  0x88   :  { %v3203_v15 = vmin.f32 %v8918_v36, %v682_v63  ;;  %v815_v43 = vmin.f32 %v807_v7, 1.0  ;;  %v8919_v9 = vmin.f32 %v2896_v18, %v3047_v48  ;;  %v8920_v12 = vmin.f32 %v2900_v3, %v3049_v51  ;;  %v8942_v63 = vld [vmem:[#allocation64_spill] sm:$0xff]  ;;  %v2455_v7 = vld [vmem:[%s8321_s0 + $0x5] ss:$0 sm:$0xff] }
  0x89   :  { %v816_v35 = vmin.f32 %v808_v2, 1.0  ;;  %v817_v58 = vmin.f32 %v809_v0, 1.0  ;;  %v8921_v4 = vmin.f32 %v2907_v46, %v3051_v22  ;;  %v8922_v56 = vmin.f32 %v2911_v30, %v3053_v28 }
  0x8a   :  { %v3211_v47 = vmin.f32 %v8919_v9, %v683_v23  ;;  %v3216_v45 = vmin.f32 %v8920_v12, %v684_v33  ;;  %v8923_v18 = vmin.f32 %v2915_v44, %v3055_v29  ;;  %v8925_v3 = vmin.f32 %v2919_v57, %v3057_v38  ;;  %v2456_v23 = vld [vmem:[%s8321_s0 + $0xd] ss:$0 sm:$0xff] }
  0x8b   :  { %v3221_v6 = vmin.f32 %v8921_v4, %v685_v53  ;;  %v3226_v49 = vmin.f32 %v8922_v56, %v686_v55  ;;  %v8927_v46 = vmin.f32 %v2923_v39, %v3059_v14  ;;  %v3244_v5 = vmul.f32 %v2445_v25, %v8910_v26  ;;  %v8932_v39 = vld [vmem:[#allocation59_spill] sm:$0xff]  ;;  %v8946_v4 = vld [vmem:[#allocation74_spill] sm:$0xff] }
  0x8c   :  { %v3231_v48 = vmin.f32 %v8923_v18, %v687_v34  ;;  %v3236_v51 = vmin.f32 %v8925_v3, %v688_v27  ;;  %v818_v30 = vmul.f32 %v3131_v21, %v810_v61  ;;  %v819_v28 = vmul.f32 %v3131_v21, %v811_v32  ;;  %v3301_v18 = vld [vmem:[%s8321_s0 + $0x15] ss:$0 sm:$0xff]  ;;  %v8953_v3 = vld [vmem:[#allocation5_spill] sm:$0xff] }
  0x8d   :  { %v3241_v22 = vmin.f32 %v8927_v46, %v689_v24  ;;  %8929 = vst [vmem:[#allocation85_spill] sm:$0xff] %v3244_v5  ;;  %v820_v44 = vmul.f32 %v3131_v21, %v812_v20  ;;  %v821_v29 = vmul.f32 %v3131_v21, %v813_v42  ;;  %v822_v57 = vmul.f32 %v3131_v21, %v814_v10 }
  0x8e   :  { %8924 = vst [vmem:[#allocation82_spill] sm:$0xff] %v3231_v48  ;;  %v823_v38 = vmul.f32 %v3131_v21, %v815_v43  ;;  %v3253_v60 = vmul.f32 %v2445_v25, %v8930_v50  ;;  %v3256_v14 = vmul.f32 %v2445_v25, %v8932_v39  ;;  %v824_v17 = vmul.f32 %v3131_v21, %v816_v35 }
  0x8f   :  { %8926 = vst [vmem:[#allocation83_spill] sm:$0xff] %v3236_v51  ;;  %v825_v40 = vmul.f32 %v3131_v21, %v817_v58  ;;  %v3261_v37 = vmul.f32 %v2445_v25, %v8934_v59  ;;  %v3264_v13 = vmul.f32 %v2445_v25, %v8936_v54  ;;  %v3267_v16 = vmul.f32 %v2445_v25, %v8938_v8  ;;  %v8945_v21 = vld [vmem:[#allocation38_spill] sm:$0xff] }
  0x90   :  { %8928 = vst [vmem:[#allocation84_spill] sm:$0xff] %v3241_v22  ;;  %v3270_v52 = vmul.f32 %v2445_v25, %v8940_v11  ;;  %v3273_v41 = vmul.f32 %v2445_v25, %v8942_v63  ;;  %v826_v62 = vsub.f32 %v8944_v19, %v818_v30  ;;  %v827_v1 = vsub.f32 %v8944_v19, %v819_v28  ;;  %v8955_v30 = vld [vmem:[#allocation6_spill] sm:$0xff]  ;;  %v9018_v22 = vld [vmem:[#allocation13_spill] sm:$0xff] }
  0x91   :  { %8931 = vst [vmem:[#allocation86_spill] sm:$0xff] %v3253_v60  ;;  %v834_v31 = vmul.f32 %v8945_v21, %v810_v61  ;;  %v828_v33 = vsub.f32 %v8944_v19, %v820_v44  ;;  %v829_v2 = vsub.f32 %v8944_v19, %v821_v29  ;;  %v830_v0 = vsub.f32 %v8944_v19, %v822_v57  ;;  %v8957_v44 = vld [vmem:[#allocation8_spill] sm:$0xff]  ;;  %v8959_v57 = vld [vmem:[#allocation75_spill] sm:$0xff]  ;;  %v8968_v11 = vld [vmem:[#allocation78_spill] sm:$0xff] }
  0x92   :  { %8933 = vst [vmem:[#allocation87_spill] sm:$0xff] %v3256_v14  ;;  %v831_v53 = vsub.f32 %v8944_v19, %v823_v38  ;;  %v832_v55 = vsub.f32 %v8944_v19, %v824_v17  ;;  %v833_v34 = vsub.f32 %v8944_v19, %v825_v40  ;;  %v835_v27 = vmul.f32 %v8945_v21, %v811_v32  ;;  %v3306_v32 = vld [vmem:[%s8321_s0 + $0x1d] ss:$0 sm:$0xff]  ;;  %v8970_v60 = vld [vmem:[#allocation80_spill] sm:$0xff] }
  0x93   :  { %8935 = vst [vmem:[#allocation88_spill] sm:$0xff] %v3261_v37  ;;  %v836_v24 = vmul.f32 %v8945_v21, %v812_v20  ;;  %v837_v36 = vmul.f32 %v8945_v21, %v813_v42  ;;  %v838_v25 = vmul.f32 %v8945_v21, %v814_v10  ;;  %v839_v61 = vmul.f32 %v8945_v21, %v815_v43  ;;  %v8947_v20 = vld [vmem:[#allocation7_spill] sm:$0xff]  ;;  %v8960_v17 = vld [vmem:[#allocation9_spill] sm:$0xff] }
  0x94   :  { %8937 = vst [vmem:[#allocation89_spill] sm:$0xff] %v3264_v13  ;;  %v840_v9 = vmul.f32 %v8945_v21, %v816_v35  ;;  %v841_v12 = vmul.f32 %v8945_v21, %v817_v58  ;;  %v842_v56 = vsub.f32 %v8946_v4, %v834_v31  ;;  %v3309_v42 = vsub.f32 %v8947_v20, %v2455_v7  ;;  %v8949_v10 = vld [vmem:[#allocation3_spill] sm:$0xff]  ;;  %v8951_v35 = vld [vmem:[#allocation4_spill] sm:$0xff]  ;;  %v8962_v21 = vld [vmem:[#allocation10_spill] sm:$0xff] }
  0x95   :  { %8939 = vst [vmem:[#allocation90_spill] sm:$0xff] %v3267_v16  ;;  %v3312_v43 = vsub.f32 %v8949_v10, %v2456_v23  ;;  %v3315_v58 = vsub.f32 %v8951_v35, %v2456_v23  ;;  %v3318_v46 = vsub.f32 %v8953_v3, %v2456_v23  ;;  %v3321_v28 = vsub.f32 %v8955_v30, %v2456_v23  ;;  %v8964_v7 = vld [vmem:[#allocation11_spill] sm:$0xff]  ;;  %v8967_v19 = vld [vmem:[#allocation77_spill] sm:$0xff] }
  0x96   :  { %8941 = vst [vmem:[#allocation91_spill] sm:$0xff] %v3270_v52  ;;  %v3324_v29 = vsub.f32 %v8957_v44, %v2456_v23  ;;  %v843_v38 = vsub.f32 %v8959_v57, %v835_v27  ;;  %v3328_v40 = vsub.f32 %v8960_v17, %v2456_v23  ;;  %v3331_v31 = vsub.f32 %v8962_v21, %v2456_v23  ;;  %v8966_v52 = vld [vmem:[#allocation76_spill] sm:$0xff]  ;;  %v8969_v37 = vld [vmem:[#allocation79_spill] sm:$0xff]  ;;  %v8971_v27 = vld [vmem:[#allocation81_spill] sm:$0xff] }
  0x97   :  { %8943 = vst [vmem:[#allocation92_spill] sm:$0xff] %v3273_v41  ;;  %v3334_v41 = vsub.f32 %v8964_v7, %v2456_v23  ;;  %v844_v63 = vsub.f32 %v8966_v52, %v836_v24  ;;  %v845_v16 = vsub.f32 %v8967_v19, %v837_v36  ;;  %v846_v13 = vsub.f32 %v8968_v11, %v838_v25 }
  0x98   :  { %8948 = vst [vmem:[#allocation38_spill] sm:$0xff] %v3309_v42  ;;  %v847_v14 = vsub.f32 %v8969_v37, %v839_v61  ;;  %v848_v5 = vsub.f32 %v8970_v60, %v840_v9  ;;  %v849_v8 = vsub.f32 %v8971_v27, %v841_v12  ;;  %v960_v54 = vmul.f32 %v3301_v18, %v3309_v42 }
  0x99   :  { %8950 = vst [vmem:[#allocation93_spill] sm:$0xff] %v3312_v43  ;;  %v961_v59 = vmul.f32 %v3306_v32, %v3312_v43  ;;  %v962_v23 = vmul.f32 %v3306_v32, %v3315_v58  ;;  %v963_v24 = vmul.f32 %v3306_v32, %v3318_v46  ;;  %v964_v36 = vmul.f32 %v3306_v32, %v3321_v28 }
  0x9a   :  { %8952 = vst [vmem:[#allocation94_spill] sm:$0xff] %v3315_v58  ;;  %v965_v25 = vmul.f32 %v3306_v32, %v3324_v29  ;;  %v850_v61 = vmul.f32 %v826_v62, %v826_v62  ;;  %v966_v9 = vmul.f32 %v3306_v32, %v3328_v40  ;;  %v967_v12 = vmul.f32 %v3306_v32, %v3331_v31  ;;  %v2457_v62 = vld [vmem:[%s8321_s0 + $0x25] ss:$0 sm:$0xff] }
  0x9b   :  { %8954 = vst [vmem:[#allocation95_spill] sm:$0xff] %v3318_v46  ;;  %v968_v39 = vmul.f32 %v3306_v32, %v3334_v41  ;;  %v851_v50 = vmul.f32 %v827_v1, %v827_v1  ;;  %v852_v26 = vmul.f32 %v828_v33, %v828_v33  ;;  %v853_v7 = vmul.f32 %v829_v2, %v829_v2 }
  0x9c   :  { %8956 = vst [vmem:[#allocation96_spill] sm:$0xff] %v3321_v28  ;;  %v854_v21 = vmul.f32 %v830_v0, %v830_v0  ;;  %v855_v17 = vmul.f32 %v831_v53, %v831_v53  ;;  %v856_v44 = vmul.f32 %v832_v55, %v832_v55  ;;  %v857_v30 = vmul.f32 %v833_v34, %v833_v34 }
  0x9d   :  { %8958 = vst [vmem:[#allocation97_spill] sm:$0xff] %v3324_v29  ;;  %v969_v3 = vadd.f32 %v961_v59, %v960_v54  ;;  %v970_v35 = vadd.f32 %v962_v23, %v960_v54  ;;  %v971_v20 = vadd.f32 %v963_v24, %v960_v54  ;;  %v972_v10 = vadd.f32 %v964_v36, %v960_v54 }
  0x9e   :  { %8961 = vst [vmem:[#allocation98_spill] sm:$0xff] %v3328_v40  ;;  %v973_v40 = vadd.f32 %v965_v25, %v960_v54  ;;  %v974_v29 = vadd.f32 %v966_v9, %v960_v54  ;;  %v975_v28 = vadd.f32 %v967_v12, %v960_v54  ;;  %v859_v1 = vmul.f32 %v843_v38, %v843_v38 }
  0x9f   :  { %8963 = vst [vmem:[#allocation99_spill] sm:$0xff] %v3331_v31  ;;  %v858_v31 = vmul.f32 %v842_v56, %v842_v56  ;;  %v860_v33 = vmul.f32 %v844_v63, %v844_v63  ;;  %v861_v2 = vmul.f32 %v845_v16, %v845_v16  ;;  %v862_v0 = vmul.f32 %v846_v13, %v846_v13 }
  0xa0   :  { %8965 = vst [vmem:[#allocation100_spill] sm:$0xff] %v3334_v41  ;;  %v976_v41 = vadd.f32 %v968_v39, %v960_v54  ;;  %v863_v53 = vmul.f32 %v847_v14, %v847_v14  ;;  %v864_v55 = vmul.f32 %v848_v5, %v848_v5  ;;  %v865_v34 = vmul.f32 %v849_v8, %v849_v8 }
  0xa1   :  { %v978_v59 = vmul.f32 %v2457_v62, %v969_v3  ;;  %v979_v46 = vmul.f32 %v2457_v62, %v970_v35  ;;  %v980_v58 = vmul.f32 %v2457_v62, %v971_v20  ;;  %v981_v43 = vmul.f32 %v2457_v62, %v972_v10 }
  0xa2   :  { %v982_v42 = vmul.f32 %v2457_v62, %v973_v40  ;;  %v3363_v23 = vadd.f32 %v858_v31, %v850_v61  ;;  %v983_v24 = vmul.f32 %v2457_v62, %v974_v29  ;;  %v984_v36 = vmul.f32 %v2457_v62, %v975_v28 }
  0xa3   :  { %v985_v56 = vmul.f32 %v2457_v62, %v976_v41  ;;  %v3365_v25 = vadd.f32 %v859_v1, %v851_v50  ;;  %v3367_v39 = vadd.f32 %v860_v33, %v852_v26  ;;  %v3369_v54 = vadd.f32 %v861_v2, %v853_v7  ;;  %v2452_v26 = vld [vmem:[%s8321_s0 + $0x34] ss:$0 sm:$0xff] }
  0xa4   :  { %v3371_v13 = vadd.f32 %v862_v0, %v854_v21  ;;  %v3373_v5 = vadd.f32 %v863_v53, %v855_v17  ;;  %v3375_v14 = vadd.f32 %v864_v55, %v856_v44  ;;  %v3377_v8 = vadd.f32 %v865_v34, %v857_v30  ;;  %v8987_v30 = vld [vmem:[#allocation96_spill] sm:$0xff]  ;;  %v8988_v50 = vld [vmem:[#allocation97_spill] sm:$0xff] }
  0xa5   :  { %v986_v16 = vmax.f32 %v978_v59, 0.0  ;;  %v987_v63 = vmax.f32 %v979_v46, 0.0  ;;  %v988_v20 = vmax.f32 %v980_v58, 0.0  ;;  %v989_v10 = vmax.f32 %v981_v43, 0.0  ;;  %v8986_v43 = vld [vmem:[#allocation95_spill] sm:$0xff] }
  0xa6   :  { %8972 = vst [vmem:[#allocation101_spill] sm:$0xff] %v3373_v5  ;;  %v990_v35 = vmax.f32 %v982_v42, 0.0  ;;  %v991_v41 = vmax.f32 %v983_v24, 0.0  ;;  %v992_v3 = vmax.f32 %v984_v36, 0.0  ;;  %v993_v28 = vmax.f32 %v985_v56, 0.0 }
  0xa7   :  { %8973 = vst [vmem:[#allocation102_spill] sm:$0xff] %v3375_v14  ;;  %v994_v38 = vmin.f32 %v986_v16, 1.0  ;;  %v995_v17 = vmin.f32 %v987_v63, 1.0  ;;  %v996_v40 = vmin.f32 %v988_v20, 1.0  ;;  %v997_v21 = vmin.f32 %v989_v10, 1.0 }
  0xa8   :  { %8974 = vst [vmem:[#allocation103_spill] sm:$0xff] %v3377_v8  ;;  %v998_v31 = vmin.f32 %v990_v35, 1.0  ;;  %v3399_v7 = vmul.f32 %v2452_v26, %v8946_v4  ;;  %v999_v61 = vmin.f32 %v991_v41, 1.0  ;;  %v1000_v9 = vmin.f32 %v992_v3, 1.0 }
  0xa9   :  { %v1001_v12 = vmin.f32 %v993_v28, 1.0  ;;  %v3402_v62 = vmul.f32 %v2452_v26, %v8959_v57  ;;  %v3405_v1 = vmul.f32 %v2452_v26, %v8966_v52  ;;  %v3408_v33 = vmul.f32 %v2452_v26, %v8967_v19  ;;  %v8983_v28 = vld [vmem:[#allocation38_spill] sm:$0xff]  ;;  %v9011_v52 = vld [vmem:[#allocation16_spill] sm:$0xff] }
  0xaa   :  { %8975 = vst [vmem:[#allocation104_spill] sm:$0xff] %v3399_v7  ;;  %v3411_v2 = vmul.f32 %v2452_v26, %v8968_v11  ;;  %v3414_v0 = vmul.f32 %v2452_v26, %v8969_v37  ;;  %v3417_v53 = vmul.f32 %v2452_v26, %v8970_v60  ;;  %v3420_v55 = vmul.f32 %v2452_v26, %v8971_v27  ;;  %v9007_v7 = vld [vmem:[#allocation8_spill] sm:$0xff]  ;;  %v9009_v11 = vld [vmem:[#allocation9_spill] sm:$0xff] }
  0xab   :  { %8976 = vst [vmem:[#allocation105_spill] sm:$0xff] %v3402_v62  ;;  %v1002_v34 = vmul.f32 %v3301_v18, %v994_v38  ;;  %v1003_v59 = vmul.f32 %v3301_v18, %v995_v17  ;;  %v1004_v24 = vmul.f32 %v3301_v18, %v996_v40  ;;  %v1005_v36 = vmul.f32 %v3301_v18, %v997_v21 }
  0xac   :  { %8977 = vst [vmem:[#allocation106_spill] sm:$0xff] %v3405_v1  ;;  %v1006_v56 = vmul.f32 %v3301_v18, %v998_v31  ;;  %v1007_v16 = vmul.f32 %v3301_v18, %v999_v61  ;;  %v1008_v63 = vmul.f32 %v3301_v18, %v1000_v9  ;;  %v1009_v20 = vmul.f32 %v3301_v18, %v1001_v12  ;;  %v3442_v18 = vld [vmem:[%s8321_s0 + $0x28] ss:$0 sm:$0xff]  ;;  %v3505_v1 = vld [vmem:[%s8321_s0 + $0x29] ss:$0 sm:$0xff] }
  0xad   :  { %8978 = vst [vmem:[#allocation107_spill] sm:$0xff] %v3408_v33  ;;  %v1018_v10 = vmul.f32 %v3306_v32, %v994_v38  ;;  %v1019_v35 = vmul.f32 %v3306_v32, %v995_v17  ;;  %v1020_v26 = vmul.f32 %v3306_v32, %v996_v40  ;;  %v1021_v41 = vmul.f32 %v3306_v32, %v997_v21 }
  0xae   :  { %8979 = vst [vmem:[#allocation108_spill] sm:$0xff] %v3411_v2  ;;  %v1022_v3 = vmul.f32 %v3306_v32, %v998_v31  ;;  %v1010_v29 = vsub.f32 %v8983_v28, %v1002_v34  ;;  %v1023_v46 = vmul.f32 %v3306_v32, %v999_v61  ;;  %v1024_v58 = vmul.f32 %v3306_v32, %v1000_v9  ;;  %v2462_v31 = vld [vmem:[%s8321_s0 + $0x6] ss:$0 sm:$0xff]  ;;  %v8984_v34 = vld [vmem:[#allocation93_spill] sm:$0xff]  ;;  %v8991_v2 = vld [vmem:[#allocation100_spill] sm:$0xff] }
  0xaf   :  { %8980 = vst [vmem:[#allocation109_spill] sm:$0xff] %v3414_v0  ;;  %v1025_v42 = vmul.f32 %v3306_v32, %v1001_v12  ;;  %v1011_v38 = vsub.f32 %v8983_v28, %v1003_v59  ;;  %v1012_v17 = vsub.f32 %v8983_v28, %v1004_v24  ;;  %v1013_v40 = vsub.f32 %v8983_v28, %v1005_v36  ;;  %v2463_v32 = vld [vmem:[%s8321_s0 + $0xe] ss:$0 sm:$0xff]  ;;  %v8985_v24 = vld [vmem:[#allocation94_spill] sm:$0xff] }
  0xb0   :  { %8981 = vst [vmem:[#allocation110_spill] sm:$0xff] %v3417_v53  ;;  %v1014_v21 = vsub.f32 %v8983_v28, %v1006_v56  ;;  %v1015_v61 = vsub.f32 %v8983_v28, %v1007_v16  ;;  %v1016_v9 = vsub.f32 %v8983_v28, %v1008_v63  ;;  %v1017_v12 = vsub.f32 %v8983_v28, %v1009_v20  ;;  %v8989_v53 = vld [vmem:[#allocation98_spill] sm:$0xff]  ;;  %v8990_v0 = vld [vmem:[#allocation99_spill] sm:$0xff]  ;;  %v8992_v63 = vld [vmem:[#allocation12_spill] sm:$0xff] }
  0xb1   :  { %8982 = vst [vmem:[#allocation111_spill] sm:$0xff] %v3420_v55  ;;  %v1026_v59 = vsub.f32 %v8984_v34, %v1018_v10  ;;  %v1027_v36 = vsub.f32 %v8985_v24, %v1019_v35  ;;  %v1028_v56 = vsub.f32 %v8986_v43, %v1020_v26  ;;  %v1029_v44 = vsub.f32 %v8987_v30, %v1021_v41  ;;  %v8993_v20 = vld [vmem:[#allocation3_spill] sm:$0xff]  ;;  %v3473_v26 = vld [vmem:[%s8321_s0 + $0x16] ss:$0 sm:$0xff]  ;;  %v8999_v41 = vld [vmem:[#allocation14_spill] sm:$0xff] }
  0xb2   :  { %v1030_v55 = vsub.f32 %v8988_v50, %v1022_v3  ;;  %v1031_v27 = vsub.f32 %v8989_v53, %v1023_v46  ;;  %v1032_v60 = vsub.f32 %v8990_v0, %v1024_v58  ;;  %v1033_v16 = vsub.f32 %v8991_v2, %v1025_v42  ;;  %8994 = vst [vmem:[#allocation12_spill] sm:$0xff] %v3473_v26  ;;  %v3478_v58 = vld [vmem:[%s8321_s0 + $0x1e] ss:$0 sm:$0xff]  ;;  %v8996_v42 = vld [vmem:[#allocation7_spill] sm:$0xff]  ;;  %v9000_v3 = vld [vmem:[#allocation4_spill] sm:$0xff] }
  0xb3   :  { %v1034_v33 = vmul.f32 %v1010_v29, %v1010_v29  ;;  %vm154_vm0 = vcmp.lt.f32.partialorder %v8992_v63, 0.0  ;;  %vm163_vm1 = vcmp.gt.f32.partialorder %v3442_v18, %v8993_v20  ;;  %v1035_v10 = vmul.f32 %v1011_v38, %v1011_v38  ;;  %8995 = vst [vmem:[#allocation3_spill] sm:$0xff] %v3478_v58  ;;  %v9002_v28 = vld [vmem:[#allocation5_spill] sm:$0xff]  ;;  %v9014_v50 = vld [vmem:[#allocation11_spill] sm:$0xff] }
  0xb4   :  { %v3468_v35 = vmul.f32 %v1012_v17, %v1012_v17  ;;  %v3481_v46 = vsub.f32 %v8996_v42, %v2462_v31  ;;  %v3484_v29 = vsub.f32 %v8993_v20, %v2463_v32  ;;  %vm155_vm2 = vcmp.lt.f32.partialorder %v8999_v41, 0.0  ;;  %v9004_v31 = vld [vmem:[#allocation15_spill] sm:$0xff]  ;;  %v9016_v43 = vld [vmem:[#allocation17_spill] sm:$0xff]  ;;  %vm3612_vm13 = vmxor %vm154_vm0, %vm163_vm1 }
  0xb5   :  { %vm164_vm3 = vcmp.gt.f32.partialorder %v3442_v18, %v9000_v3  ;;  %v3489_v38 = vmul.f32 %v1013_v40, %v1013_v40  ;;  %v3491_v17 = vmul.f32 %v1014_v21, %v1014_v21  ;;  %v3494_v2 = vsub.f32 %v9000_v3, %v2463_v32  ;;  %v9005_v21 = vld [vmem:[#allocation6_spill] sm:$0xff] }
  0xb6   :  { %8997 = vst [vmem:[#allocation112_spill] sm:$0xff] %v3481_v46  ;;  %v3497_v0 = vsub.f32 %v9002_v28, %v2463_v32  ;;  %vm156_vm4 = vcmp.lt.f32.partialorder %v9004_v31, 0.0  ;;  %vm165_vm5 = vcmp.gt.f32.partialorder %v3442_v18, %v9002_v28  ;;  %v3507_v40 = vmul.f32 %v1015_v61, %v1015_v61  ;;  %v9012_v61 = vld [vmem:[#allocation10_spill] sm:$0xff]  ;;  %vm3628_vm0 = vmxor %vm155_vm2, %vm164_vm3  ;;  %v9046_v31 = vld [vmem:[#allocation51_spill] sm:$0xff] }
  0xb7   :  { %8998 = vst [vmem:[#allocation113_spill] sm:$0xff] %v3484_v29  ;;  %v3510_v62 = vsub.f32 %v9005_v21, %v2463_v32  ;;  %v3513_v37 = vsub.f32 %v9007_v7, %v2463_v32  ;;  %v3516_v19 = vsub.f32 %v9009_v11, %v2463_v32  ;;  %vm157_vm6 = vcmp.lt.f32.partialorder %v9011_v52, 0.0  ;;  %v9039_v11 = vld [vmem:[#allocation49_spill] sm:$0xff]  ;;  %vm3644_vm2 = vmxor %vm156_vm4, %vm165_vm5  ;;  %v9096_v41 = vld [vmem:[#allocation102_spill] sm:$0xff] }
  0xb8   :  { %9001 = vst [vmem:[#allocation14_spill] sm:$0xff] %v3494_v2  ;;  %vm166_vm7 = vcmp.gt.f32.partialorder %v3442_v18, %v9005_v21  ;;  %v3521_v57 = vmul.f32 %v1016_v9, %v1016_v9  ;;  %v3523_v4 = vmul.f32 %v1017_v12, %v1017_v12  ;;  %v3526_v53 = vsub.f32 %v9012_v61, %v2463_v32  ;;  %v9017_v12 = vld [vmem:[#allocation30_spill] sm:$0xff]  ;;  %v9159_v52 = vld [vmem:[#allocation96_spill] sm:$0xff] }
  0xb9   :  { %9003 = vst [vmem:[#allocation4_spill] sm:$0xff] %v3497_v0  ;;  %v3529_v30 = vsub.f32 %v9014_v50, %v2463_v32  ;;  %vm158_vm8 = vcmp.lt.f32.partialorder %v9016_v43, 0.0  ;;  %vm167_vm9 = vcmp.gt.f32.partialorder %v3442_v18, %v9007_v7  ;;  %v1042_v24 = vmul.f32 %v1026_v59, %v1026_v59  ;;  %v2469_v59 = vld [vmem:[%s8321_s0 + $0x7] ss:$0 sm:$0xff]  ;;  %vm3666_vm4 = vmxor %vm157_vm6, %vm166_vm7 }
  0xba   :  { %9006 = vst [vmem:[#allocation5_spill] sm:$0xff] %v3510_v62  ;;  %v1043_v34 = vmul.f32 %v1027_v36, %v1027_v36  ;;  %v1144_v8 = vmul.f32 %v3473_v26, %v3481_v46  ;;  %v1145_v9 = vmul.f32 %v3478_v58, %v3484_v29  ;;  %vm188_vm10 = vcmp.lt.f32.partialorder %v9018_v22, %v9017_v12  ;;  %v3550_v36 = vld [vmem:[%s8321_s0 + $0xf] ss:$0 sm:$0xff]  ;;  %vm3688_vm6 = vmxor %vm158_vm8, %vm167_vm9 }
  0xbb   :  { %9008 = vst [vmem:[#allocation15_spill] sm:$0xff] %v3513_v37  ;;  %v1044_v61 = vmul.f32 %v1028_v56, %v1028_v56  ;;  %v1045_v14 = vmul.f32 %v1029_v44, %v1029_v44  ;;  %v1146_v32 = vmul.f32 %v3478_v58, %v3494_v2  ;;  %v1147_v50 = vmul.f32 %v3478_v58, %v3497_v0  ;;  %vm3713_vm8 = vmand %vm3612_vm13, %vm188_vm10 }
  0xbc   :  { %9010 = vst [vmem:[#allocation114_spill] sm:$0xff] %v3516_v19  ;;  %v1046_v44 = vmul.f32 %v1030_v55, %v1030_v55  ;;  %v1148_v56 = vmul.f32 %v3478_v58, %v3510_v62  ;;  %v1149_v0 = vmul.f32 %v3478_v58, %v3513_v37  ;;  %v1150_v2 = vmul.f32 %v3478_v58, %v3516_v19  ;;  %v9022_v37 = vld [vmem:[#allocation32_spill] sm:$0xff] }
  0xbd   :  { %9013 = vst [vmem:[#allocation16_spill] sm:$0xff] %v3526_v53  ;;  %v1047_v51 = vmul.f32 %v1031_v27, %v1031_v27  ;;  %v1048_v29 = vmul.f32 %v1032_v60, %v1032_v60  ;;  %v1151_v55 = vmul.f32 %v3478_v58, %v3526_v53  ;;  %v1152_v62 = vmul.f32 %v3478_v58, %v3529_v30  ;;  %v9023_v19 = vld [vmem:[#allocation24_spill] sm:$0xff]  ;;  %v2464_v60 = vld [vmem:[%s8321_s0 + $0x26] ss:$0 sm:$0xff] }
  0xbe   :  { %9015 = vst [vmem:[#allocation115_spill] sm:$0xff] %v3529_v30  ;;  %v1049_v26 = vmul.f32 %v1033_v16, %v1033_v16  ;;  %v1050_v46 = vadd.f32 %v1042_v24, %v1034_v33  ;;  %v1051_v5 = vadd.f32 %v1043_v34, %v1035_v10  ;;  %v1153_v48 = vadd.f32 %v1145_v9, %v1144_v8  ;;  %v3586_v33 = vld [vmem:[%s8321_s0 + $0x17] ss:$0 sm:$0xff]  ;;  %v3591_v34 = vld [vmem:[%s8321_s0 + $0x1f] ss:$0 sm:$0xff]  ;;  %v9029_v10 = vld [vmem:[#allocation26_spill] sm:$0xff] }
  0xbf   :  { %v1154_v53 = vadd.f32 %v1146_v32, %v1144_v8  ;;  %v1155_v58 = vadd.f32 %v1147_v50, %v1144_v8  ;;  %9026 = vst [vmem:[#allocation17_spill] sm:$0xff] %v3586_v33  ;;  %v3594_v24 = vsub.f32 %v8996_v42, %v2469_v59  ;;  %v3598_v16 = vsub.f32 %v8993_v20, %v3550_v36  ;;  %v9038_v42 = vld [vmem:[#allocation34_spill] sm:$0xff] }
  0xc0   :  { %v1052_v50 = vadd.f32 %v1044_v61, %v3468_v35  ;;  %v1156_v9 = vadd.f32 %v1148_v56, %v1144_v8  ;;  %v1157_v32 = vadd.f32 %v1149_v0, %v1144_v8  ;;  %v1158_v30 = vadd.f32 %v1150_v2, %v1144_v8  ;;  %v9034_v2 = vld [vmem:[#allocation48_spill] sm:$0xff]  ;;  %v9035_v0 = vld [vmem:[#allocation21_spill] sm:$0xff] }
  0xc1   :  { %9027 = vst [vmem:[#allocation30_spill] sm:$0xff] %v3594_v24  ;;  %v1053_v35 = vadd.f32 %v1045_v14, %v3489_v38  ;;  %v1054_v61 = vadd.f32 %v1046_v44, %v3491_v17  ;;  %v1159_v56 = vadd.f32 %v1151_v55, %v1144_v8  ;;  %v1160_v27 = vadd.f32 %v1152_v62, %v1144_v8  ;;  %v9042_v17 = vld [vmem:[#allocation50_spill] sm:$0xff] }
  0xc2   :  { %9028 = vst [vmem:[#allocation13_spill] sm:$0xff] %v3598_v16  ;;  %v1055_v14 = vadd.f32 %v1047_v51, %v3507_v40  ;;  %v1056_v38 = vadd.f32 %v1048_v29, %v3521_v57  ;;  %v1057_v8 = vadd.f32 %v1049_v26, %v3523_v4  ;;  %v1162_v62 = vmul.f32 %v2464_v60, %v1153_v48  ;;  %v3653_v51 = vld [vmem:[%s8321_s0 + $0x2a] ss:$0 sm:$0xff] }
  0xc3   :  { %v1163_v57 = vmul.f32 %v2464_v60, %v1154_v53  ;;  %v1164_v4 = vmul.f32 %v2464_v60, %v1155_v58  ;;  %v3657_v48 = vmul.f32 %v3586_v33, %v3594_v24  ;;  %v1329_v26 = vmul.f32 %v3591_v34, %v3598_v16  ;;  %v9051_v16 = vld [vmem:[#allocation52_spill] sm:$0xff] }
  0xc4   :  { %v9047_v53 = vmin.f32 %v3203_v15, %v3363_v23  ;;  %v3677_v40 = vmul.f32 %v2464_v60, %v1156_v9  ;;  %v3679_v44 = vmul.f32 %v2464_v60, %v1157_v32  ;;  %v3681_v55 = vmul.f32 %v2464_v60, %v1158_v30 }
  0xc5   :  { %9043 = vst [vmem:[#allocation32_spill] sm:$0xff] %v3657_v48  ;;  %v9052_v15 = vmin.f32 %v3211_v47, %v3365_v25  ;;  %v9054_v30 = vmin.f32 %v3216_v45, %v3367_v39  ;;  %v3704_v9 = vmul.f32 %v2464_v60, %v1159_v56  ;;  %v3706_v43 = vmul.f32 %v2464_v60, %v1160_v27  ;;  %v9064_v60 = vld [vmem:[#allocation101_spill] sm:$0xff] }
  0xc6   :  { %v3675_v58 = vmin.f32 %v9047_v53, %v1050_v46  ;;  %v9056_v32 = vmov 0  ;;  %v9059_v47 = vmin.f32 %v3221_v6, %v3369_v54  ;;  %v9061_v45 = vmin.f32 %v3226_v49, %v3371_v13  ;;  %v9069_v6 = vld [vmem:[#allocation22_spill] sm:$0xff]  ;;  %v9073_v54 = vld [vmem:[#allocation40_spill] sm:$0xff] }
  0xc7   :  { %v3697_v23 = vmin.f32 %v9052_v15, %v1051_v5  ;;  %v3702_v46 = vmin.f32 %v9054_v30, %v1052_v50  ;;  %v9057_v32 = vsel %vm3713_vm8, 4294967295, %v9056_v32  ;;  %v9063_v5 = vld [vmem:[#allocation82_spill] sm:$0xff]  ;;  %v3735_v50 = vld [vmem:[%s8321_s0 + $0x35] ss:$0 sm:$0xff]  ;;  %v1170_v59 = vmax.f32 %v1162_v62, 0.0  ;;  %v9075_v62 = vld [vmem:[#allocation31_spill] sm:$0xff] }
  0xc8   :  { %9048 = vst [vmem:[#allocation24_spill] sm:$0xff] %v3675_v58  ;;  %v3720_v25 = vmin.f32 %v9059_v47, %v1053_v35  ;;  %v3725_v39 = vmin.f32 %v9061_v45, %v1054_v61  ;;  %v9065_v27 = vmin.f32 %v9063_v5, %v9064_v60  ;;  %vm9068_vm9 = vcmp.gt.f32.partialorder %v3505_v1, %v8993_v20  ;;  %v9099_v60 = vld [vmem:[#allocation84_spill] sm:$0xff] }
  0xc9   :  { %9053 = vst [vmem:[#allocation26_spill] sm:$0xff] %v3697_v23  ;;  %vm9070_vm10 = vcmp.lt.f32.partialorder %v9069_v6, 0.0  ;;  %v1171_v13 = vmax.f32 %v1163_v57, 0.0  ;;  %v1172_v35 = vmax.f32 %v1164_v4, 0.0  ;;  %v3751_v61 = vsub.f32 %v9000_v3, %v3550_v36  ;;  %v9081_v57 = vld [vmem:[#allocation23_spill] sm:$0xff] }
  0xca   :  { %9055 = vst [vmem:[#allocation48_spill] sm:$0xff] %v3702_v46  ;;  %v3730_v12 = vmin.f32 %v9065_v27, %v1055_v14  ;;  %vm3742_vm13 = vmxor %vm9070_vm10, %vm9068_vm9  ;;  %v1337_v56 = vadd.f32 %v1329_v26, %v3657_v48  ;;  %v3757_v14 = vld [vmem:[%s8321_s0 + $0x27] ss:$0 sm:$0xff]  ;;  %vm9076_vm9 = vcmp.lt.f32.partialorder %v9018_v22, %v9075_v62  ;;  %v9077_v53 = vmov 0  ;;  %v9085_v26 = vld [vmem:[#allocation41_spill] sm:$0xff] }
  0xcb   :  { %9058 = vst [vmem:[#allocation21_spill] sm:$0xff] %v9057_v32  ;;  %vm3764_vm10 = vmand %vm3628_vm0, %vm9076_vm9  ;;  %vm9080_vm7 = vcmp.gt.f32.partialorder %v3505_v1, %v9000_v3  ;;  %vm9082_vm5 = vcmp.lt.f32.partialorder %v9081_v57, 0.0  ;;  %v1173_v63 = vmax.f32 %v3677_v40, 0.0  ;;  %v1174_v15 = vmax.f32 %v3679_v44, 0.0  ;;  %v9094_v44 = vld [vmem:[#allocation42_spill] sm:$0xff]  ;;  %v9100_v27 = vld [vmem:[#allocation103_spill] sm:$0xff] }
  0xcc   :  { %9060 = vst [vmem:[#allocation34_spill] sm:$0xff] %v3720_v25  ;;  %v9078_v53 = vsel %vm3764_vm10, 4294967295, %v9077_v53  ;;  %vm3773_vm3 = vmxor %vm9082_vm5, %vm9080_vm7  ;;  %v1175_v30 = vmax.f32 %v3681_v55, 0.0  ;;  %v3785_v47 = vsub.f32 %v9002_v28, %v3550_v36  ;;  %vm9087_vm0 = vcmp.lt.f32.partialorder %v9018_v22, %v9022_v37  ;;  %v9095_v37 = vld [vmem:[#allocation83_spill] sm:$0xff]  ;;  %v9128_v25 = vld [vmem:[#allocation18_spill] sm:$0xff] }
  0xcd   :  { %9062 = vst [vmem:[#allocation49_spill] sm:$0xff] %v3725_v39  ;;  %vm3792_vm5 = vmand %vm3644_vm2, %vm9087_vm0  ;;  %v9088_v45 = vmov 0  ;;  %vm9090_vm7 = vcmp.gt.f32.partialorder %v3505_v1, %v9002_v28  ;;  %vm9091_vm9 = vcmp.lt.f32.partialorder %v9023_v19, 0.0  ;;  %v9097_v55 = vmin.f32 %v9095_v37, %v9096_v41  ;;  %v9132_v23 = vld [vmem:[#allocation35_spill] sm:$0xff] }
  0xce   :  { %9066 = vst [vmem:[#allocation50_spill] sm:$0xff] %v3730_v12  ;;  %v9089_v45 = vsel %vm3792_vm5, 4294967295, %v9088_v45  ;;  %vm3801_vm14 = vmxor %vm9091_vm9, %vm9090_vm7  ;;  %v9101_v6 = vmin.f32 %v9099_v60, %v9100_v27  ;;  %v1176_v19 = vmax.f32 %v3704_v9, 0.0  ;;  %v1177_v57 = vmax.f32 %v3706_v43, 0.0  ;;  %v9103_v12 = vld [vmem:[#allocation33_spill] sm:$0xff]  ;;  %v9112_v9 = vld [vmem:[#allocation43_spill] sm:$0xff] }
  0xcf   :  { %9067 = vst [vmem:[#allocation51_spill] sm:$0xff] %v3735_v50  ;;  %v3811_v5 = vmin.f32 %v9097_v55, %v1056_v38  ;;  %vm9104_vm2 = vcmp.lt.f32.partialorder %v9018_v22, %v9103_v12  ;;  %v9105_v39 = vmov 0  ;;  %vm9107_vm7 = vcmp.gt.f32.partialorder %v3505_v1, %v9005_v21  ;;  %v9108_v38 = vld [vmem:[#allocation25_spill] sm:$0xff]  ;;  %v9115_v12 = vld [vmem:[#allocation94_spill] sm:$0xff]  ;;  %v9118_v60 = vld [vmem:[#allocation19_spill] sm:$0xff] }
  0xd0   :  { %9074 = vst [vmem:[#allocation52_spill] sm:$0xff] %v3751_v61  ;;  %v3816_v62 = vmin.f32 %v9101_v6, %v1057_v8  ;;  %vm3825_vm0 = vmand %vm3666_vm4, %vm9104_vm2  ;;  %vm9109_vm9 = vcmp.lt.f32.partialorder %v9108_v38, 0.0  ;;  %v9113_v43 = vld [vmem:[#allocation93_spill] sm:$0xff]  ;;  %v3847_v37 = vmul.f32 %v3735_v50, %v9115_v12  ;;  %v3849_v41 = vmin.f32 %v1170_v59, 1.0  ;;  %v9119_v27 = vld [vmem:[#allocation10_spill] sm:$0xff] }
  0xd1   :  { %9079 = vst [vmem:[#allocation82_spill] sm:$0xff] %v9078_v53  ;;  %v9106_v39 = vsel %vm3825_vm0, 4294967295, %v9105_v39  ;;  %vm3834_vm1 = vmxor %vm9109_vm9, %vm9107_vm7  ;;  %v3843_v29 = vmul.f32 %v3735_v50, %v9113_v43  ;;  %v3853_v55 = vsub.f32 %v9005_v21, %v3550_v36  ;;  %v9120_v6 = vld [vmem:[#allocation28_spill] sm:$0xff]  ;;  %vm9121_vm15 = vcmp.gt.f32.partialorder %v3505_v1, %v9007_v7  ;;  %v9143_v12 = vld [vmem:[#allocation45_spill] sm:$0xff] }
  0xd2   :  { %9086 = vst [vmem:[#allocation101_spill] sm:$0xff] %v3785_v47  ;;  %vm9122_vm11 = vcmp.lt.f32.partialorder %v9029_v10, 0.0  ;;  %v9125_v38 = vld [vmem:[#allocation44_spill] sm:$0xff]  ;;  %v9126_v10 = vld [vmem:[#allocation9_spill] sm:$0xff]  ;;  %v9145_v43 = vld [vmem:[#allocation39_spill] sm:$0xff]  ;;  %v3918_v58 = vmin.f32 %v1174_v15, 1.0  ;;  %v3980_v40 = vsub.f32 %v9007_v7, %v3550_v36 }
  0xd3   :  { %9098 = vst [vmem:[#allocation22_spill] sm:$0xff] %v3811_v5  ;;  %vm3866_vm12 = vmxor %vm9122_vm11, %vm9121_vm15  ;;  %v3875_v5 = vmin.f32 %v1172_v35, 1.0  ;;  %vm9127_vm11 = vcmp.gt.f32.partialorder %v3442_v18, %v9126_v10  ;;  %vm9129_vm15 = vcmp.lt.f32.partialorder %v9128_v25, 0.0  ;;  %vm9133_vm4 = vcmp.gt.f32.partialorder %v3505_v1, %v9126_v10  ;;  %v9190_v32 = vld [vmem:[#allocation3_spill] sm:$0xff] }
  0xd4   :  { %9102 = vst [vmem:[#allocation40_spill] sm:$0xff] %v3816_v62  ;;  %v3873_v62 = vmin.f32 %v1171_v13, 1.0  ;;  %vm3885_vm7 = vmxor %vm9129_vm15, %vm9127_vm11  ;;  %v9134_v13 = vld [vmem:[#allocation27_spill] sm:$0xff]  ;;  %vm9139_vm11 = vcmp.lt.f32.partialorder %v9035_v0, %v9034_v2  ;;  %v9140_v25 = vmov 0  ;;  %v3920_v24 = vmin.f32 %v1175_v30, 1.0 }
  0xd5   :  { %9114 = vst [vmem:[#allocation31_spill] sm:$0xff] %v3843_v29  ;;  %v1346_v29 = vmul.f32 %v3757_v14, %v1337_v56  ;;  %vm9135_vm9 = vcmp.lt.f32.partialorder %v9134_v13, 0.0  ;;  %v9138_v56 = vld [vmem:[#allocation53_spill] sm:$0xff]  ;;  %vm3907_vm15 = vmand %vm3742_vm13, %vm9139_vm11  ;;  %v1331_v2 = vmul.f32 %v3591_v34, %v3785_v47  ;;  %vm9148_vm13 = vcmp.lt.f32.partialorder %v9018_v22, %v9038_v42  ;;  %v9157_v30 = vld [vmem:[#allocation95_spill] sm:$0xff] }
  0xd6   :  { %9116 = vst [vmem:[#allocation23_spill] sm:$0xff] %v3847_v37  ;;  %v1330_v37 = vmul.f32 %v3591_v34, %v3751_v61  ;;  %vm3896_vm2 = vmxor %vm9135_vm9, %vm9133_vm4  ;;  %v9141_v25 = vsel %vm3907_vm15, 4294967295, %v9140_v25  ;;  %v3916_v61 = vmin.f32 %v1173_v63, 1.0  ;;  %v9149_v49 = vmov 0  ;;  %v9295_v35 = vld [vmem:[#allocation11_spill] sm:$0xff] }
  0xd7   :  { %9117 = vst [vmem:[#allocation41_spill] sm:$0xff] %v3853_v55  ;;  %vm3929_vm11 = vmand %vm3688_vm6, %vm9148_vm13  ;;  %vm9152_vm9 = vcmp.lt.f32.partialorder %v9035_v0, %v9039_v11  ;;  %v9153_v63 = vmov 0  ;;  %v3946_v42 = vmul.f32 %v3735_v50, %v9157_v30  ;;  %v3950_v47 = vmul.f32 %v3735_v50, %v9159_v52 }
  0xd8   :  { %9142 = vst [vmem:[#allocation42_spill] sm:$0xff] %v9141_v25  ;;  %v9150_v49 = vsel %vm3929_vm11, 4294967295, %v9149_v49  ;;  %vm3938_vm0 = vmand %vm3773_vm3, %vm9152_vm9  ;;  %v3954_v11 = vmin.f32 %v1177_v57, 1.0  ;;  %vm9161_vm3 = vcmp.lt.f32.partialorder %v9035_v0, %v9042_v17  ;;  %v9162_v4 = vmov 0  ;;  %v9167_v17 = vld [vmem:[#allocation12_spill] sm:$0xff] }
  0xd9   :  { %9146 = vst [vmem:[#allocation83_spill] sm:$0xff] %v3918_v58  ;;  %v9154_v63 = vsel %vm3938_vm0, 4294967295, %v9153_v63  ;;  %vm3961_vm6 = vmand %vm3801_vm14, %vm9161_vm3  ;;  %v1332_v52 = vmul.f32 %v3591_v34, %v3853_v55  ;;  %vm9169_vm14 = vcmp.lt.f32.partialorder %v9035_v0, %v9046_v31  ;;  %v9170_v30 = vmov 0 }
  0xda   :  { %9147 = vst [vmem:[#allocation102_spill] sm:$0xff] %v3920_v24  ;;  %v9163_v4 = vsel %vm3961_vm6, 4294967295, %v9162_v4  ;;  %vm3989_vm13 = vmand %vm3834_vm1, %vm9169_vm14  ;;  %v1188_v15 = vmul.f32 %v9167_v17, %v3875_v5  ;;  %v1338_v55 = vadd.f32 %v1330_v37, %v3657_v48  ;;  %v1354_v33 = vmax.f32 %v1346_v29, 0.0  ;;  %v9178_v37 = vld [vmem:[#allocation98_spill] sm:$0xff] }
  0xdb   :  { %9151 = vst [vmem:[#allocation84_spill] sm:$0xff] %v9150_v49  ;;  %v3952_v49 = vmin.f32 %v1176_v19, 1.0  ;;  %v9165_v19 = vld [vmem:[#allocation97_spill] sm:$0xff]  ;;  %v9171_v30 = vsel %vm3989_vm13, 4294967295, %v9170_v30  ;;  %vm9173_vm9 = vcmp.lt.f32.partialorder %v9035_v0, %v9051_v16  ;;  %v9174_v31 = vmov 0 }
  0xdc   :  { %9155 = vst [vmem:[#allocation103_spill] sm:$0xff] %v9154_v63  ;;  %v3974_v57 = vmul.f32 %v3735_v50, %v9165_v19  ;;  %v1187_v19 = vmul.f32 %v9167_v17, %v3873_v62  ;;  %vm4005_vm1 = vmand %vm3866_vm12, %vm9173_vm9  ;;  %v1190_v13 = vmul.f32 %v9167_v17, %v3918_v58  ;;  %v1191_v29 = vmul.f32 %v9167_v17, %v3920_v24 }
  0xdd   :  { %9158 = vst [vmem:[#allocation33_spill] sm:$0xff] %v3946_v42  ;;  %v1186_v42 = vmul.f32 %v9167_v17, %v3849_v41  ;;  %v9175_v31 = vsel %vm4005_vm1, 4294967295, %v9174_v31  ;;  %v1339_v16 = vadd.f32 %v1331_v2, %v3657_v48  ;;  %v4024_v59 = vmul.f32 %v3735_v50, %v9178_v37  ;;  %v9189_v50 = vld [vmem:[#allocation112_spill] sm:$0xff] }
  0xde   :  { %9160 = vst [vmem:[#allocation25_spill] sm:$0xff] %v3950_v47  ;;  %v3970_v47 = vld [vmem:[%s8321_s0 + $0x2b] ss:$0 sm:$0xff]  ;;  %v1192_v8 = vmul.f32 %v9167_v17, %v3952_v49  ;;  %v1193_v58 = vmul.f32 %v9167_v17, %v3954_v11  ;;  %v4032_v24 = vsub.f32 %v9126_v10, %v3550_v36  ;;  %vm9184_vm4 = vcmp.gt.f32.partialorder %v3653_v51, %v8993_v20 }
  0xdf   :  { %9166 = vst [vmem:[#allocation43_spill] sm:$0xff] %v3974_v57  ;;  %v1189_v57 = vmul.f32 %v9167_v17, %v3916_v61  ;;  %vm9185_vm5 = vcmp.lt.f32.partialorder %v9073_v54, 0.0  ;;  %v4053_v37 = vsub.f32 %v9189_v50, %v1186_v42  ;;  %v1202_v2 = vmul.f32 %v9190_v32, %v3849_v41  ;;  %v9195_v41 = vld [vmem:[#allocation58_spill] sm:$0xff]  ;;  %v9260_v42 = vld [vmem:[#allocation67_spill] sm:$0xff] }
  0xe0   :  { %9168 = vst [vmem:[#allocation19_spill] sm:$0xff] %v3980_v40  ;;  %vm4045_vm15 = vmxor %vm9185_vm5, %vm9184_vm4  ;;  %v1333_v25 = vmul.f32 %v3591_v34, %v3980_v40  ;;  %v1340_v54 = vadd.f32 %v1332_v52, %v3657_v48  ;;  %vm9191_vm4 = vcmp.gt.f32.partialorder %v3653_v51, %v9000_v3  ;;  %vm9192_vm8 = vcmp.lt.f32.partialorder %v9085_v26, 0.0 }
  0xe1   :  { %9176 = vst [vmem:[#allocation28_spill] sm:$0xff] %v9175_v31  ;;  %vm4069_vm9 = vmxor %vm9192_vm8, %vm9191_vm4  ;;  %v4077_v52 = vsub.f32 %v9189_v50, %v1187_v19  ;;  %v4080_v40 = vsub.f32 %v9189_v50, %v1188_v15  ;;  %v4083_v63 = vmul.f32 %v3757_v14, %v1338_v55  ;;  %v1362_v53 = vmin.f32 %v1354_v33, 1.0  ;;  %v9201_v15 = vld [vmem:[#allocation59_spill] sm:$0xff] }
  0xe2   :  { %9179 = vst [vmem:[#allocation44_spill] sm:$0xff] %v4024_v59  ;;  %v9188_v59 = vld [vmem:[#allocation57_spill] sm:$0xff]  ;;  %vm9197_vm12 = vcmp.gt.f32.partialorder %v3653_v51, %v9002_v28  ;;  %vm9198_vm3 = vcmp.lt.f32.partialorder %v9094_v44, 0.0  ;;  %v4102_v33 = vsub.f32 %v9189_v50, %v1189_v57  ;;  %v4105_v55 = vsub.f32 %v9189_v50, %v1190_v13  ;;  %v9210_v13 = vld [vmem:[#allocation60_spill] sm:$0xff] }
  0xe3   :  { %9180 = vst [vmem:[#allocation18_spill] sm:$0xff] %v4032_v24  ;;  %vm4094_vm5 = vmxor %vm9198_vm3, %vm9197_vm12  ;;  %v4108_v19 = vsub.f32 %v9189_v50, %v1191_v29  ;;  %v4111_v44 = vmul.f32 %v3757_v14, %v1339_v16  ;;  %vm9206_vm14 = vcmp.gt.f32.partialorder %v3653_v51, %v9005_v21  ;;  %vm9207_vm0 = vcmp.lt.f32.partialorder %v9112_v9, 0.0 }
  0xe4   :  { %9202 = vst [vmem:[#allocation35_spill] sm:$0xff] %v4102_v33  ;;  %vm4122_vm4 = vmxor %vm9207_vm0, %vm9206_vm14  ;;  %v9208_v57 = vmov 0  ;;  %v4130_v29 = vsub.f32 %v9189_v50, %v1192_v8  ;;  %v4133_v16 = vsub.f32 %v9189_v50, %v1193_v58  ;;  %v1334_v9 = vmul.f32 %v3591_v34, %v4032_v24  ;;  %v9217_v8 = vld [vmem:[#allocation36_spill] sm:$0xff]  ;;  %v9229_v24 = vld [vmem:[#allocation113_spill] sm:$0xff] }
  0xe5   :  { %9203 = vst [vmem:[#allocation27_spill] sm:$0xff] %v4105_v55  ;;  %v9209_v57 = vsel %vm4122_vm4, 4294967295, %v9208_v57  ;;  %vm9213_vm0 = vcmp.gt.f32.partialorder %v3442_v18, %v9119_v27  ;;  %vm9214_vm14 = vcmp.lt.f32.partialorder %v9118_v60, 0.0  ;;  %v9215_v55 = vmov 0  ;;  %v9285_v50 = vld [vmem:[#allocation42_spill] sm:$0xff]  ;;  %v9370_v58 = vld [vmem:[#allocation61_spill] sm:$0xff] }
  0xe6   :  { %9204 = vst [vmem:[#allocation53_spill] sm:$0xff] %v4108_v19  ;;  %v1203_v19 = vmul.f32 %v9190_v32, %v3873_v62  ;;  %vm4144_vm6 = vmxor %vm9214_vm14, %vm9213_vm0  ;;  %vm9218_vm12 = vcmp.gt.f32.partialorder %v3505_v1, %v9119_v27  ;;  %vm9219_vm13 = vcmp.lt.f32.partialorder %v9120_v6, 0.0  ;;  %v9222_v62 = vld [vmem:[#allocation54_spill] sm:$0xff]  ;;  %vm9224_vm8 = vcmp.gt.f32.partialorder %v3653_v51, %v9007_v7 }
  0xe7   :  { %9211 = vst [vmem:[#allocation45_spill] sm:$0xff] %v4130_v29  ;;  %v9216_v55 = vsel %vm4144_vm6, 4294967295, %v9215_v55  ;;  %vm4155_vm3 = vmxor %vm9219_vm13, %vm9218_vm12  ;;  %vm9225_vm6 = vcmp.lt.f32.partialorder %v9125_v38, 0.0  ;;  %v1210_v29 = vsub.f32 %v9229_v24, %v1202_v2  ;;  %v1341_v33 = vadd.f32 %v1333_v25, %v3657_v48  ;;  %v9253_v25 = vld [vmem:[#allocation66_spill] sm:$0xff] }
  0xe8   :  { %9212 = vst [vmem:[#allocation39_spill] sm:$0xff] %v4133_v16  ;;  %vm4169_vm4 = vmxor %vm9225_vm6, %vm9224_vm8  ;;  %v1204_v16 = vmul.f32 %v9190_v32, %v3875_v5  ;;  %v4181_v60 = vmul.f32 %v3757_v14, %v1340_v54  ;;  %vm9230_vm6 = vcmp.lt.f32.partialorder %v9018_v22, %v9132_v23  ;;  %v9231_v38 = vmov 0 }
  0xe9   :  { %vm4188_vm8 = vmand %vm3885_vm7, %vm9230_vm6  ;;  %vm9234_vm13 = vcmp.lt.f32.partialorder %v9035_v0, %v9138_v56  ;;  %v9235_v5 = vmov 0  ;;  %vm9238_vm0 = vcmp.gt.f32.partialorder %v3653_v51, %v9126_v10  ;;  %vm9239_vm14 = vcmp.lt.f32.partialorder %v9143_v12, 0.0  ;;  %v9244_v56 = vld [vmem:[#allocation65_spill] sm:$0xff]  ;;  %v9259_v10 = vld [vmem:[#allocation102_spill] sm:$0xff] }
  0xea   :  { %v9232_v38 = vsel %vm4188_vm8, 4294967295, %v9231_v38  ;;  %vm4197_vm12 = vmand %vm3896_vm2, %vm9234_vm13  ;;  %v9240_v23 = vmov 0  ;;  %vm9245_vm6 = vcmp.lt.f32.partialorder %v9145_v43, %v9244_v56  ;;  %v1205_v54 = vmul.f32 %v9190_v32, %v3916_v61  ;;  %v9251_v56 = vld [vmem:[#allocation17_spill] sm:$0xff] }
  0xeb   :  { %9233 = vst [vmem:[#allocation12_spill] sm:$0xff] %v9232_v38  ;;  %v9236_v5 = vsel %vm4197_vm12, 4294967295, %v9235_v5  ;;  %vm4206_vm10 = vmxor %vm9239_vm14, %vm9238_vm0  ;;  %v1355_v24 = vmax.f32 %v4083_v63, 0.0  ;;  %v1386_v17 = vmul.f32 %v3591_v34, %v1362_v53  ;;  %v9258_v63 = vld [vmem:[#allocation83_spill] sm:$0xff]  ;;  %v1207_v31 = vmul.f32 %v9190_v32, %v9259_v10 }
  0xec   :  { %9237 = vst [vmem:[#allocation57_spill] sm:$0xff] %v9236_v5  ;;  %v9241_v23 = vsel %vm4206_vm10, 4294967295, %v9240_v23  ;;  %vm4217_vm2 = vmand %vm4045_vm15, %vm9245_vm6  ;;  %vm9254_vm6 = vcmp.lt.f32.partialorder %v9145_v43, %v9253_v25  ;;  %v1208_v46 = vmul.f32 %v9190_v32, %v3952_v49  ;;  %v1356_v25 = vmax.f32 %v4111_v44, 0.0  ;;  %v4267_v10 = vld [vmem:[%s8321_s0 + $0x2c] ss:$0 sm:$0xff]  ;;  %v9265_v44 = vld [vmem:[#allocation14_spill] sm:$0xff] }
  0xed   :  { %9242 = vst [vmem:[#allocation3_spill] sm:$0xff] %v9241_v23  ;;  %v1370_v23 = vmul.f32 %v9251_v56, %v1362_v53  ;;  %vm4240_vm14 = vmand %vm4069_vm9, %vm9254_vm6  ;;  %v1206_v53 = vmul.f32 %v9190_v32, %v9258_v63  ;;  %vm9261_vm9 = vcmp.lt.f32.partialorder %v9145_v43, %v9260_v42  ;;  %v1209_v49 = vmul.f32 %v9190_v32, %v3954_v11  ;;  %v9267_v5 = vld [vmem:[#allocation68_spill] sm:$0xff] }
  0xee   :  { %vm4258_vm6 = vmand %vm4094_vm5, %vm9261_vm9  ;;  %v4272_v63 = vsub.f32 %v9265_v44, %v1203_v19  ;;  %v1218_v26 = vmul.f32 %v4053_v37, %v4053_v37  ;;  %v1342_v42 = vadd.f32 %v1334_v9, %v3657_v48  ;;  %vm9268_vm5 = vcmp.lt.f32.partialorder %v9145_v43, %v9267_v5  ;;  %v9274_v9 = vld [vmem:[#allocation69_spill] sm:$0xff] }
  0xef   :  { %vm9269_vm9 = vnez %v9209_v57  ;;  %v1226_v32 = vmul.f32 %v1210_v29, %v1210_v29  ;;  %v4290_v11 = vsub.f32 %v9119_v27, %v3550_v36  ;;  %v4293_v37 = vmul.f32 %v3757_v14, %v1341_v33  ;;  %v9280_v29 = vld [vmem:[#allocation4_spill] sm:$0xff]  ;;  %v9281_v33 = vld [vmem:[#allocation30_spill] sm:$0xff]  ;;  %v9290_v5 = vld [vmem:[#allocation5_spill] sm:$0xff] }
  0xf0   :  { %9266 = vst [vmem:[#allocation58_spill] sm:$0xff] %v4272_v63  ;;  %vm4282_vm13 = vmand %vm9269_vm9, %vm9268_vm5  ;;  %v1357_v19 = vmax.f32 %v4181_v60, 0.0  ;;  %vm9275_vm0 = vcmp.lt.f32.partialorder %v9145_v43, %v9274_v9  ;;  %v9276_v57 = vmov 0  ;;  %v4308_v44 = vsub.f32 %v9280_v29, %v1204_v16  ;;  %v9282_v63 = vld [vmem:[#allocation13_spill] sm:$0xff]  ;;  %v9291_v16 = vld [vmem:[#allocation15_spill] sm:$0xff] }
  0xf1   :  { %9273 = vst [vmem:[#allocation59_spill] sm:$0xff] %v4290_v11  ;;  %vm4301_vm5 = vmand %vm4169_vm4, %vm9275_vm0  ;;  %v1363_v6 = vmin.f32 %v1355_v24, 1.0  ;;  %v1378_v48 = vsub.f32 %v9281_v33, %v1370_v23  ;;  %v1394_v60 = vsub.f32 %v9282_v63, %v1386_v17  ;;  %v9283_v9 = vld [vmem:[#allocation21_spill] sm:$0xff]  ;;  %vm9286_vm4 = vnez %v9285_v50  ;;  %v9293_v23 = vld [vmem:[#allocation114_spill] sm:$0xff] }
  0xf2   :  { %v9277_v57 = vsel %vm4301_vm5, 4294967295, %v9276_v57  ;;  %vm9284_vm15 = vnez %v9283_v9  ;;  %v4324_v2 = vsub.f32 %v9290_v5, %v1205_v54  ;;  %v4327_v24 = vsub.f32 %v9291_v16, %v1206_v53  ;;  %v9297_v9 = vld [vmem:[#allocation20_spill] sm:$0xff]  ;;  %v9301_v63 = vld [vmem:[#allocation37_spill] sm:$0xff]  ;;  %v9307_v53 = vld [vmem:[#allocation55_spill] sm:$0xff] }
  0xf3   :  { %9278 = vst [vmem:[#allocation60_spill] sm:$0xff] %v9277_v57  ;;  %vm9287_vm0 = vmxor %vm9284_vm15, %vm9286_vm4  ;;  %v9288_v57 = vmov 0  ;;  %v4330_v29 = vsub.f32 %v9293_v23, %v1207_v31  ;;  %v1364_v17 = vmin.f32 %v1356_v25, 1.0  ;;  %vm9296_vm9 = vcmp.gt.f32.partialorder %v3442_v18, %v9295_v35  ;;  %v9303_v54 = vld [vmem:[#allocation29_spill] sm:$0xff]  ;;  %v9308_v18 = vld [vmem:[#allocation47_spill] sm:$0xff] }
  0xf4   :  { %vm4319_vm7 = vmxor %vm9287_vm0, %vm4217_vm2  ;;  %9292 = vst [vmem:[#allocation36_spill] sm:$0xff] %v4327_v24  ;;  %vm9298_vm1 = vcmp.lt.f32.partialorder %v9297_v9, 0.0  ;;  %v9299_v50 = vmov 0  ;;  %vm9302_vm4 = vcmp.gt.f32.partialorder %v3505_v1, %v9295_v35  ;;  %vm9304_vm0 = vcmp.lt.f32.partialorder %v9303_v54, 0.0  ;;  %v9313_v25 = vld [vmem:[#allocation74_spill] sm:$0xff]  ;;  %v9314_v9 = vld [vmem:[#allocation16_spill] sm:$0xff] }
  0xf5   :  { %v9289_v57 = vsel %vm4319_vm7, 4294967295, %v9288_v57  ;;  %9294 = vst [vmem:[#allocation54_spill] sm:$0xff] %v4330_v29  ;;  %vm4337_vm15 = vmxor %vm9298_vm1, %vm9296_vm9  ;;  %v9305_v31 = vmov 0  ;;  %vm9309_vm2 = vcmp.gt.f32.partialorder %v3970_v47, %v8993_v20  ;;  %v9311_v1 = vmov 0  ;;  %v9316_v23 = vld [vmem:[#allocation115_spill] sm:$0xff]  ;;  %v9319_v29 = vld [vmem:[#allocation82_spill] sm:$0xff] }
  0xf6   :  { %v9300_v50 = vsel %vm4337_vm15, 4294967295, %v9299_v50  ;;  %vm4348_vm7 = vmxor %vm9304_vm0, %vm9302_vm4  ;;  %vm9310_vm15 = vcmp.lt.f32.partialorder %v9188_v59, 0.0  ;;  %v4370_v54 = vsub.f32 %v9314_v9, %v1208_v46  ;;  %v4373_v16 = vsub.f32 %v9316_v23, %v1209_v49  ;;  %v9321_v24 = vld [vmem:[#allocation103_spill] sm:$0xff] }
  0xf7   :  { %v9306_v31 = vsel %vm4348_vm7, 4294967295, %v9305_v31  ;;  %vm4362_vm5 = vmxor %vm9310_vm15, %vm9309_vm2  ;;  %v4377_v5 = vsub.f32 %v9295_v35, %v3550_v36  ;;  %v4380_v59 = vmul.f32 %v3757_v14, %v1342_v42  ;;  %vm9320_vm15 = vnez %v9319_v29  ;;  %v9330_v49 = vld [vmem:[#allocation75_spill] sm:$0xff]  ;;  %v9376_v9 = vld [vmem:[#allocation58_spill] sm:$0xff] }
  0xf8   :  { %v9312_v1 = vsel %vm4362_vm5, 4294967295, %v9311_v1  ;;  %9315 = vst [vmem:[#allocation65_spill] sm:$0xff] %v4370_v54  ;;  %vm9322_vm2 = vnez %v9321_v24  ;;  %v9324_v46 = vmov 0  ;;  %vm9326_vm1 = vcmp.gt.f32.partialorder %v3970_v47, %v9000_v3 }
  0xf9   :  { %9317 = vst [vmem:[#allocation17_spill] sm:$0xff] %v4373_v16  ;;  %vm9323_vm4 = vmxor %vm9320_vm15, %vm9322_vm2  ;;  %vm9327_vm9 = vcmp.lt.f32.partialorder %v9195_v41, 0.0  ;;  %v4405_v12 = vadd.f32 %v1226_v32, %v1218_v26  ;;  %v1335_v42 = vmul.f32 %v3591_v34, %v4290_v11  ;;  %v1358_v29 = vmax.f32 %v4293_v37, 0.0  ;;  %v9340_v32 = vld [vmem:[#allocation76_spill] sm:$0xff] }
  0xfa   :  { %9318 = vst [vmem:[#allocation66_spill] sm:$0xff] %v4377_v5  ;;  %vm4389_vm0 = vmxor %vm9323_vm4, %vm4240_vm14  ;;  %v1365_v24 = vmin.f32 %v1357_v19, 1.0  ;;  %vm9331_vm14 = vnez %v9089_v45  ;;  %v9334_v41 = vmov 0  ;;  %vm9336_vm15 = vcmp.gt.f32.partialorder %v3970_v47, %v9002_v28 }
  0xfb   :  { %v9325_v46 = vsel %vm4389_vm0, 4294967295, %v9324_v46  ;;  %vm4398_vm11 = vmxor %vm9327_vm9, %vm9326_vm1  ;;  %vm9332_vm1 = vnez %v9163_v4  ;;  %vm9337_vm2 = vcmp.lt.f32.partialorder %v9201_v15, 0.0  ;;  %v1371_v45 = vmul.f32 %v9251_v56, %v1363_v6 }
  0xfc   :  { %vm9333_vm9 = vmxor %vm9331_vm14, %vm9332_vm1  ;;  %v1387_v4 = vmul.f32 %v3591_v34, %v1363_v6  ;;  %v1402_v38 = vmul.f32 %v1378_v48, %v1378_v48  ;;  %v1410_v37 = vmul.f32 %v1394_v60, %v1394_v60  ;;  %vm9342_vm14 = vnez %v9171_v30  ;;  %v9393_v60 = vld [vmem:[#allocation56_spill] sm:$0xff] }
  0xfd   :  { %vm4417_vm4 = vmxor %vm9333_vm9, %vm4258_vm6  ;;  %vm9341_vm6 = vnez %v9106_v39  ;;  %v9344_v15 = vmov 0  ;;  %v1219_v39 = vmul.f32 %v4077_v52, %v4077_v52  ;;  %v4462_v30 = vmul.f32 %v4080_v40, %v4080_v40  ;;  %v9362_v52 = vld [vmem:[#allocation46_spill] sm:$0xff]  ;;  %v9408_v48 = vld [vmem:[#allocation28_spill] sm:$0xff] }
  0xfe   :  { %v9335_v41 = vsel %vm4417_vm4, 4294967295, %v9334_v41  ;;  %vm4426_vm7 = vmxor %vm9337_vm2, %vm9336_vm15  ;;  %vm9347_vm15 = vcmp.gt.f32.partialorder %v3970_v47, %v9005_v21  ;;  %vm9348_vm2 = vcmp.lt.f32.partialorder %v9210_v13, 0.0  ;;  %v1372_v61 = vmul.f32 %v9251_v56, %v1364_v17 }
  0xff   :  { %vm9343_vm1 = vmxor %vm9341_vm6, %vm9342_vm14  ;;  %v1388_v13 = vmul.f32 %v3591_v34, %v1364_v17  ;;  %vm9353_vm6 = vnez %v9216_v55  ;;  %v9354_v19 = vmov 0  ;;  %v9358_v40 = vmov 0  ;;  %v9379_v17 = vld [vmem:[#allocation70_spill] sm:$0xff] }
 0x100   :  { %vm4442_vm9 = vmxor %vm9343_vm1, %vm4282_vm13  ;;  %vm9352_vm13 = vcmp.lt.f32.partialorder %v9018_v22, %v9217_v8  ;;  %vm9357_vm1 = vcmp.lt.f32.partialorder %v9035_v0, %v9222_v62  ;;  %vm9363_vm0 = vcmp.lt.f32.partialorder %v9362_v52, 0.0  ;;  %v9364_v55 = vmov 0  ;;  %v9375_v52 = vld [vmem:[#allocation35_spill] sm:$0xff] }
 0x101   :  { %v9345_v15 = vsel %vm4442_vm9, 4294967295, %v9344_v15  ;;  %vm4451_vm5 = vmxor %vm9348_vm2, %vm9347_vm15  ;;  %vm9361_vm2 = vcmp.gt.f32.partialorder %v3653_v51, %v9119_v27  ;;  %v4512_v23 = vmul.f32 %v9375_v52, %v9375_v52  ;;  %v1227_v11 = vmul.f32 %v9376_v9, %v9376_v9  ;;  %v9385_v9 = vld [vmem:[#allocation9_spill] sm:$0xff] }
 0x102   :  { %9346 = vst [vmem:[#allocation83_spill] sm:$0xff] %v9345_v15  ;;  %vm4471_vm14 = vmand %vm9353_vm6, %vm9352_vm13  ;;  %v1336_v16 = vmul.f32 %v3591_v34, %v4377_v5  ;;  %v9382_v52 = vmov 0  ;;  %v9387_v5 = vld [vmem:[#allocation62_spill] sm:$0xff]  ;;  %v9401_v27 = vld [vmem:[#allocation73_spill] sm:$0xff]  ;;  %vm9409_vm12 = vnez %v9408_v48  ;;  %v1389_v48 = vmul.f32 %v3591_v34, %v1365_v24 }
 0x103   :  { %v9355_v19 = vsel %vm4471_vm14, 4294967295, %v9354_v19  ;;  %vm4480_vm15 = vmand %vm4155_vm3, %vm9357_vm1  ;;  %vm9369_vm1 = vcmp.gt.f32.partialorder %v3970_v47, %v9007_v7  ;;  %vm9371_vm14 = vcmp.lt.f32.partialorder %v9370_v58, 0.0  ;;  %v1359_v58 = vmax.f32 %v4380_v59, 0.0  ;;  %v9514_v15 = vld [vmem:[#allocation57_spill] sm:$0xff] }
 0x104   :  { %9356 = vst [vmem:[#allocation102_spill] sm:$0xff] %v9355_v19  ;;  %v9359_v40 = vsel %vm4480_vm15, 4294967295, %v9358_v40  ;;  %vm4489_vm4 = vmxor %vm9363_vm0, %vm9361_vm2  ;;  %vm9386_vm2 = vcmp.gt.f32.partialorder %v3970_v47, %v9385_v9  ;;  %vm9388_vm6 = vcmp.lt.f32.partialorder %v9387_v5, 0.0  ;;  %v9389_v59 = vmov 0  ;;  %v9404_v19 = vld [vmem:[#allocation60_spill] sm:$0xff]  ;;  %v9414_v5 = vld [vmem:[#allocation86_spill] sm:$0xff] }
 0x105   :  { %9360 = vst [vmem:[#allocation67_spill] sm:$0xff] %v9359_v40  ;;  %v9365_v55 = vsel %vm4489_vm4, 4294967295, %v9364_v55  ;;  %vm4503_vm15 = vmxor %vm9371_vm14, %vm9369_vm1  ;;  %vm9380_vm1 = vcmp.lt.f32.partialorder %v9145_v43, %v9379_v17  ;;  %v9394_v17 = vld [vmem:[#allocation85_spill] sm:$0xff]  ;;  %v9397_v7 = vmov 0  ;;  %v9406_v40 = vld [vmem:[#allocation84_spill] sm:$0xff]  ;;  %v9422_v36 = vmov 0 }
 0x106   :  { %9366 = vst [vmem:[#allocation68_spill] sm:$0xff] %v9365_v55  ;;  %vm4528_vm0 = vmand %vm4206_vm10, %vm9380_vm1  ;;  %vm9395_vm13 = vcmp.lt.f32.partialorder %v9393_v60, %v9394_v17  ;;  %vm9396_vm10 = vnez %v9312_v1  ;;  %v9403_v55 = vld [vmem:[#allocation32_spill] sm:$0xff]  ;;  %v1366_v17 = vmin.f32 %v1358_v29, 1.0  ;;  %v1373_v1 = vmul.f32 %v9251_v56, %v1365_v24  ;;  %v9425_v24 = vld [vmem:[#allocation27_spill] sm:$0xff] }
 0x107   :  { %v9383_v52 = vsel %vm4528_vm0, 4294967295, %v9382_v52  ;;  %vm4537_vm3 = vmxor %vm9388_vm6, %vm9386_vm2  ;;  %v1343_v8 = vadd.f32 %v1335_v42, %v9403_v55  ;;  %vm9415_vm2 = vcmp.lt.f32.partialorder %v9393_v60, %v9414_v5  ;;  %v1379_v29 = vsub.f32 %v9281_v33, %v1371_v45  ;;  %v4600_v45 = vld [vmem:[%s8321_s0 + $0x2d] ss:$0 sm:$0xff] }
 0x108   :  { %9384 = vst [vmem:[#allocation69_spill] sm:$0xff] %v9383_v52  ;;  %v9390_v59 = vsel %vm4537_vm3, 4294967295, %v9389_v59  ;;  %vm4548_vm1 = vmand %vm9396_vm10, %vm9395_vm13  ;;  %vm9405_vm13 = vnez %v9404_v19  ;;  %vm9407_vm10 = vnez %v9406_v40  ;;  %v9411_v52 = vmov 0  ;;  %v9419_v19 = vld [vmem:[#allocation52_spill] sm:$0xff] }
 0x109   :  { %9391 = vst [vmem:[#allocation30_spill] sm:$0xff] %v9390_v59  ;;  %v9398_v7 = vsel %vm4548_vm1, 4294967295, %v9397_v7  ;;  %v9402_v59 = vld [vmem:[#allocation24_spill] sm:$0xff]  ;;  %vm9410_vm14 = vmxor %vm9407_vm10, %vm9409_vm12  ;;  %v1395_v40 = vsub.f32 %v9419_v19, %v1387_v4  ;;  %v4604_v4 = vmul.f32 %v9425_v24, %v9425_v24  ;;  %v1380_v26 = vsub.f32 %v9281_v33, %v1372_v61 }
 0x10a   :  { %v1242_v54 = vmin.f32 %v9402_v59, %v4405_v12  ;;  %vm4568_vm3 = vmxor %vm9410_vm14, %vm9405_vm13  ;;  %v9416_v12 = vmov 0  ;;  %v1418_v59 = vadd.f32 %v1410_v37, %v1402_v38  ;;  %v1228_v38 = vmul.f32 %v4308_v44, %v4308_v44  ;;  %v9426_v37 = vld [vmem:[#allocation101_spill] sm:$0xff]  ;;  %v9427_v19 = vld [vmem:[#allocation88_spill] sm:$0xff] }
 0x10b   :  { %v9412_v52 = vsel %vm4568_vm3, 4294967295, %v9411_v52  ;;  %vm4577_vm6 = vmand %vm4398_vm11, %vm9415_vm2  ;;  %v9429_v5 = vmov 0  ;;  %v1229_v24 = vmul.f32 %v4324_v2, %v4324_v2  ;;  %v4623_v44 = vadd.f32 %v1227_v11, %v1219_v39  ;;  %v9440_v39 = vld [vmem:[#allocation41_spill] sm:$0xff] }
 0x10c   :  { %9413 = vst [vmem:[#allocation21_spill] sm:$0xff] %v9412_v52  ;;  %v9417_v12 = vsel %vm4577_vm6, 4294967295, %v9416_v12  ;;  %v9420_v52 = vld [vmem:[#allocation87_spill] sm:$0xff]  ;;  %v1344_v61 = vadd.f32 %v1336_v16, %v9403_v55  ;;  %v9435_v6 = vmov 0  ;;  %v4638_v42 = vmul.f32 %v3757_v14, %v1343_v8 }
 0x10d   :  { %vm9421_vm12 = vcmp.lt.f32.partialorder %v9393_v60, %v9420_v52  ;;  %v1396_v52 = vsub.f32 %v9426_v37, %v1388_v13  ;;  %v1367_v13 = vmin.f32 %v1359_v58, 1.0  ;;  %v9433_v37 = vld [vmem:[#allocation89_spill] sm:$0xff]  ;;  %v1374_v2 = vmul.f32 %v9251_v56, %v1366_v17 }
 0x10e   :  { %vm4591_vm14 = vmand %vm4426_vm7, %vm9421_vm12  ;;  %vm9428_vm7 = vcmp.lt.f32.partialorder %v9393_v60, %v9427_v19  ;;  %vm9434_vm10 = vcmp.lt.f32.partialorder %v9393_v60, %v9433_v37  ;;  %v9438_v19 = vld [vmem:[#allocation108_spill] sm:$0xff]  ;;  %v1381_v11 = vsub.f32 %v9281_v33, %v1373_v1  ;;  %v1390_v16 = vmul.f32 %v3591_v34, %v1366_v17 }
 0x10f   :  { %v9423_v36 = vsel %vm4591_vm14, 4294967295, %v9422_v36  ;;  %vm4615_vm2 = vmand %vm4451_vm5, %vm9428_vm7  ;;  %v1397_v55 = vsub.f32 %v9440_v39, %v1389_v48  ;;  %v1403_v62 = vmul.f32 %v1379_v29, %v1379_v29  ;;  %v1411_v58 = vmul.f32 %v1395_v40, %v1395_v40  ;;  %v9467_v29 = vld [vmem:[#allocation94_spill] sm:$0xff] }
 0x110   :  { %v9430_v5 = vsel %vm4615_vm2, 4294967295, %v9429_v5  ;;  %vm4631_vm5 = vmand %vm4503_vm15, %vm9434_vm10  ;;  %v4648_v37 = vmin.f32 %v1242_v54, %v1418_v59  ;;  %vm9442_vm10 = vcmp.lt.f32.partialorder %v9018_v22, %v9301_v63  ;;  %vm9443_vm12 = vnez %v9300_v50  ;;  %v9454_v63 = vld [vmem:[#allocation72_spill] sm:$0xff]  ;;  %v9468_v48 = vld [vmem:[#allocation26_spill] sm:$0xff] }
 0x111   :  { %9431 = vst [vmem:[#allocation42_spill] sm:$0xff] %v9430_v5  ;;  %v9436_v6 = vsel %vm4631_vm5, 4294967295, %v9435_v6  ;;  %vm4655_vm13 = vmand %vm9443_vm12, %vm9442_vm10  ;;  %v9444_v8 = vmov 0  ;;  %vm9446_vm11 = vcmp.lt.f32.partialorder %v9035_v0, %v9307_v53  ;;  %vm9447_vm15 = vnez %v9306_v31  ;;  %v9455_v50 = vld [vmem:[#allocation64_spill] sm:$0xff] }
 0x112   :  { %9437 = vst [vmem:[#allocation11_spill] sm:$0xff] %v9436_v6  ;;  %v9445_v8 = vsel %vm4655_vm13, 4294967295, %v9444_v8  ;;  %vm4664_vm8 = vmand %vm9447_vm15, %vm9446_vm11  ;;  %v9448_v17 = vmov 0  ;;  %vm9450_vm1 = vcmp.gt.f32.partialorder %v3653_v51, %v9295_v35  ;;  %vm9451_vm7 = vcmp.lt.f32.partialorder %v9308_v18, 0.0  ;;  %v9460_v51 = vld [vmem:[#allocation93_spill] sm:$0xff]  ;;  %v9461_v31 = vld [vmem:[#allocation36_spill] sm:$0xff] }
 0x113   :  { %9441 = vst [vmem:[#allocation20_spill] sm:$0xff] %v4648_v37  ;;  %v9449_v17 = vsel %vm4664_vm8, 4294967295, %v9448_v17  ;;  %vm4673_vm3 = vmxor %vm9451_vm7, %vm9450_vm1  ;;  %v9452_v22 = vmov 0  ;;  %vm9456_vm15 = vcmp.gt.f32.partialorder %v4267_v10, %v8993_v20  ;;  %vm9457_vm13 = vcmp.lt.f32.partialorder %v9313_v25, 0.0  ;;  %v9512_v5 = vld [vmem:[#allocation12_spill] sm:$0xff]  ;;  %v9552_v25 = vld [vmem:[#allocation34_spill] sm:$0xff] }
 0x114   :  { %v9453_v22 = vsel %vm4673_vm3, 4294967295, %v9452_v22  ;;  %vm4687_vm8 = vmxor %vm9457_vm13, %vm9456_vm15  ;;  %v1230_v53 = vmul.f32 %v9461_v31, %v9461_v31  ;;  %v4697_v18 = vadd.f32 %v1228_v38, %v4462_v30  ;;  %v1404_v54 = vmul.f32 %v1380_v26, %v1380_v26 }
 0x115   :  { %v1412_v1 = vmul.f32 %v1396_v52, %v1396_v52  ;;  %vm9463_vm10 = vcmp.gt.f32.partialorder %v4267_v10, %v9000_v3  ;;  %vm9464_vm1 = vcmp.lt.f32.partialorder %v9330_v49, 0.0  ;;  %v4716_v30 = vadd.f32 %v1229_v24, %v4512_v23  ;;  %v9474_v49 = vld [vmem:[#allocation95_spill] sm:$0xff] }
 0x116   :  { %vm4708_vm11 = vmxor %vm9464_vm1, %vm9463_vm10  ;;  %v1243_v40 = vmin.f32 %v9468_v48, %v4623_v44  ;;  %v1375_v59 = vmul.f32 %v9251_v56, %v1367_v13  ;;  %v1391_v38 = vmul.f32 %v3591_v34, %v1367_v13  ;;  %vm9470_vm7 = vcmp.gt.f32.partialorder %v4267_v10, %v9002_v28  ;;  %v9475_v44 = vld [vmem:[#allocation19_spill] sm:$0xff] }
 0x117   :  { %vm9471_vm12 = vcmp.lt.f32.partialorder %v9340_v32, 0.0  ;;  %v1353_v26 = vmul.f32 %v3757_v14, %v1344_v61  ;;  %v1360_v52 = vmax.f32 %v4638_v42, 0.0  ;;  %v1382_v24 = vsub.f32 %v9281_v33, %v1374_v2  ;;  %v9477_v32 = vld [vmem:[#allocation77_spill] sm:$0xff]  ;;  %v9558_v23 = vld [vmem:[#allocation99_spill] sm:$0xff] }
 0x118   :  { %vm4731_vm15 = vmxor %vm9471_vm12, %vm9470_vm7  ;;  %v1398_v13 = vsub.f32 %v9475_v44, %v1390_v16  ;;  %vm9476_vm7 = vcmp.gt.f32.partialorder %v4267_v10, %v9005_v21  ;;  %vm9478_vm6 = vcmp.lt.f32.partialorder %v9477_v32, 0.0  ;;  %v1405_v42 = vmul.f32 %v1381_v11, %v1381_v11  ;;  %v9486_v32 = vld [vmem:[#allocation71_spill] sm:$0xff]  ;;  %v9492_v11 = vld [vmem:[#allocation10_spill] sm:$0xff] }
 0x119   :  { %vm4751_vm1 = vmxor %vm9478_vm6, %vm9476_vm7  ;;  %v1413_v61 = vmul.f32 %v1397_v55, %v1397_v55  ;;  %v1419_v2 = vadd.f32 %v1411_v58, %v1403_v62  ;;  %2506 = vrsqrt.f32 %v4648_v37  ;;  %vm9487_vm6 = vcmp.lt.f32.partialorder %v9145_v43, %v9486_v32  ;;  %v9494_v55 = vld [vmem:[#allocation63_spill] sm:$0xff]  ;;  %v9501_v44 = vld [vmem:[#allocation8_spill] sm:$0xff] }
 0x11a   :  { %vm4768_vm7 = vmand %vm4489_vm4, %vm9487_vm6  ;;  %v9489_v39 = vmov 0  ;;  %vm9493_vm13 = vcmp.gt.f32.partialorder %v3970_v47, %v9492_v11  ;;  %vm9495_vm14 = vcmp.lt.f32.partialorder %v9494_v55, 0.0  ;;  %v9496_v62 = vmov 0  ;;  %v9503_v32 = vld [vmem:[#allocation78_spill] sm:$0xff]  ;;  %v9509_v58 = vld [vmem:[#allocation45_spill] sm:$0xff] }
 0x11b   :  { %v9490_v39 = vsel %vm4768_vm7, 4294967295, %v9489_v39  ;;  %vm4777_vm10 = vmxor %vm9495_vm14, %vm9493_vm13  ;;  %vm9502_vm6 = vcmp.gt.f32.partialorder %v4267_v10, %v9501_v44  ;;  %vm9504_vm2 = vcmp.lt.f32.partialorder %v9503_v32, 0.0  ;;  %v9505_v48 = vmov 0  ;;  %v9522_v44 = vld [vmem:[#allocation30_spill] sm:$0xff] }
 0x11c   :  { %9491 = vst [vmem:[#allocation37_spill] sm:$0xff] %v9490_v39  ;;  %v9497_v62 = vsel %vm4777_vm10, 4294967295, %v9496_v62  ;;  %vm4791_vm7 = vmxor %vm9504_vm2, %vm9502_vm6  ;;  %v1224_v11 = vmul.f32 %v9509_v58, %v9509_v58  ;;  %v9510_v39 = vld [vmem:[#allocation48_spill] sm:$0xff]  ;;  %v1420_v21 = vadd.f32 %v1412_v1, %v1404_v54  ;;  %vm9513_vm2 = vnez %v9512_v5  ;;  %v9528_v5 = vld [vmem:[#allocation79_spill] sm:$0xff] }
 0x11d   :  { %9498 = vst [vmem:[#allocation29_spill] sm:$0xff] %v9497_v62  ;;  %v9506_v48 = vsel %vm4791_vm7, 4294967295, %v9505_v48  ;;  %v9508_v62 = vld [vmem:[#allocation53_spill] sm:$0xff]  ;;  %v1244_v14 = vmin.f32 %v9510_v39, %v4697_v18  ;;  %vm9515_vm6 = vnez %v9514_v15  ;;  %v9517_v55 = vmov 0  ;;  %v9534_v18 = vld [vmem:[#allocation104_spill] sm:$0xff] }
 0x11e   :  { %v1223_v16 = vmul.f32 %v9508_v62, %v9508_v62  ;;  %vm9516_vm14 = vmxor %vm9513_vm2, %vm9515_vm6  ;;  %v9520_v62 = vld [vmem:[#allocation90_spill] sm:$0xff]  ;;  %vm9523_vm4 = vnez %v9522_v44  ;;  %v9524_v58 = vmov 0  ;;  %vm9527_vm10 = vcmp.gt.f32.partialorder %v4267_v10, %v9385_v9  ;;  %v9544_v1 = vld [vmem:[#allocation105_spill] sm:$0xff] }
 0x11f   :  { %vm4811_vm12 = vmxor %vm9516_vm14, %vm4528_vm0  ;;  %vm9521_vm13 = vcmp.lt.f32.partialorder %v9393_v60, %v9520_v62  ;;  %vm9529_vm3 = vcmp.lt.f32.partialorder %v9528_v5, 0.0  ;;  %v9530_v15 = vmov 0  ;;  %vm9535_vm14 = vcmp.lt.f32.partialorder %v9401_v27, %v9534_v18  ;;  %v9539_v44 = vld [vmem:[#allocation54_spill] sm:$0xff]  ;;  %v9540_v62 = vld [vmem:[#allocation65_spill] sm:$0xff] }
 0x120   :  { %v9518_v55 = vsel %vm4811_vm12, 4294967295, %v9517_v55  ;;  %vm4820_vm9 = vmand %vm9523_vm4, %vm9521_vm13  ;;  %v1231_v32 = vmul.f32 %v9539_v44, %v9539_v44  ;;  %v1232_v5 = vmul.f32 %v9540_v62, %v9540_v62  ;;  %v9541_v18 = vld [vmem:[#allocation18_spill] sm:$0xff]  ;;  %vm9545_vm2 = vcmp.lt.f32.partialorder %v9401_v27, %v9544_v1 }
 0x121   :  { %9519 = vst [vmem:[#allocation55_spill] sm:$0xff] %v9518_v55  ;;  %v9525_v58 = vsel %vm4820_vm9, 4294967295, %v9524_v58  ;;  %vm4829_vm7 = vmxor %vm9529_vm3, %vm9527_vm10  ;;  %v1399_v39 = vsub.f32 %v9541_v18, %v1391_v38  ;;  %v1238_v44 = vadd.f32 %v1230_v53, %v4604_v4  ;;  %v1361_v62 = vmax.f32 %v1353_v26, 0.0  ;;  %v9548_v38 = vld [vmem:[#allocation106_spill] sm:$0xff]  ;;  %v9554_v4 = vld [vmem:[#allocation107_spill] sm:$0xff] }
 0x122   :  { %9526 = vst [vmem:[#allocation47_spill] sm:$0xff] %v9525_v58  ;;  %v9531_v15 = vsel %vm4829_vm7, 4294967295, %v9530_v15  ;;  %vm4840_vm4 = vmand %vm4687_vm8, %vm9535_vm14  ;;  %v1414_v55 = vmul.f32 %v1398_v13, %v1398_v13  ;;  %vm9549_vm14 = vcmp.lt.f32.partialorder %v9401_v27, %v9548_v38  ;;  %v1245_v1 = vmin.f32 %v9552_v25, %v4716_v30  ;;  %v9559_v26 = vld [vmem:[#allocation51_spill] sm:$0xff]  ;;  %v9562_v38 = vld [vmem:[#allocation38_spill] sm:$0xff] }
 0x123   :  { %9532 = vst [vmem:[#allocation74_spill] sm:$0xff] %v9531_v15  ;;  %v1383_v15 = vsub.f32 %v9281_v33, %v1375_v59  ;;  %vm4862_vm6 = vmand %vm4708_vm11, %vm9545_vm2  ;;  %v1406_v59 = vmul.f32 %v1382_v24, %v1382_v24  ;;  %v1368_v6 = vmin.f32 %v1360_v52, 1.0  ;;  %v1421_v0 = vadd.f32 %v1413_v61, %v1405_v42  ;;  %v9561_v13 = vld [vmem:[#allocation31_spill] sm:$0xff]  ;;  %v4899_v42 = vpop.eup %2506  ;;  %v9570_v61 = vld [vmem:[#allocation17_spill] sm:$0xff] }
 0x124   :  { %vm4872_vm10 = vmand %vm4731_vm15, %vm9549_vm14  ;;  %v4878_v58 = vmin.f32 %v1243_v40, %v1419_v2  ;;  %vm9555_vm11 = vcmp.lt.f32.partialorder %v9401_v27, %v9554_v4  ;;  %v4891_v24 = vmul.f32 %v9559_v26, %v9558_v23  ;;  %v9563_v30 = vld [vmem:[#allocation39_spill] sm:$0xff]  ;;  %v4897_v52 = vmin.f32 %v1244_v14, %v1420_v21  ;;  %9565 = vst [vmem:[#allocation76_spill] sm:$0xff] %v4899_v42  ;;  %v9577_v14 = vld [vmem:[#allocation49_spill] sm:$0xff] }
 0x125   :  { %vm4885_vm2 = vmand %vm4751_vm1, %vm9555_vm11  ;;  %v1225_v40 = vmul.f32 %v9563_v30, %v9563_v30  ;;  %vm9566_vm1 = vcmp.lt.f32.partialorder %v9401_v27, %v9438_v19  ;;  %vm9567_vm14 = vnez %v9506_v48  ;;  %v9568_v31 = vmov 0  ;;  %v9626_v18 = vld [vmem:[#allocation6_spill] sm:$0xff] }
 0x126   :  { %9553 = vst [vmem:[#allocation82_spill] sm:$0xff] %v4878_v58  ;;  %vm4906_vm11 = vmand %vm9567_vm14, %vm9566_vm1  ;;  %v1233_v2 = vmul.f32 %v9570_v61, %v9570_v61  ;;  %v4912_v25 = vadd.f32 %v1231_v32, %v1223_v16  ;;  %v1407_v4 = vmul.f32 %v1383_v15, %v1383_v15  ;;  %v1415_v30 = vmul.f32 %v1399_v39, %v1399_v39  ;;  %v9616_v15 = vld [vmem:[#allocation25_spill] sm:$0xff]  ;;  %v9619_v32 = vld [vmem:[#allocation83_spill] sm:$0xff] }
 0x127   :  { %9560 = vst [vmem:[#allocation103_spill] sm:$0xff] %v4891_v24  ;;  %v9569_v31 = vsel %vm4906_vm11, 4294967295, %v9568_v31  ;;  %vm9571_vm15 = vnez %v9289_v57  ;;  %vm9572_vm13 = vnez %v9398_v7  ;;  %v9574_v21 = vmov 0 }
 0x128   :  { %9564 = vst [vmem:[#allocation75_spill] sm:$0xff] %v4897_v52  ;;  %vm9573_vm3 = vmxor %vm9571_vm15, %vm9572_vm13  ;;  %v4925_v19 = vadd.f32 %v1232_v5, %v1224_v11  ;;  %v1246_v48 = vmin.f32 %v9577_v14, %v1238_v44  ;;  %v1369_v61 = vmin.f32 %v1361_v62, 1.0  ;;  %v1422_v16 = vadd.f32 %v1414_v55, %v1406_v59  ;;  %v9588_v11 = vld [vmem:[#allocation92_spill] sm:$0xff]  ;;  %v9589_v55 = vld [vmem:[#allocation81_spill] sm:$0xff] }
 0x129   :  { %vm4921_vm0 = vmxor %vm9573_vm3, %vm4840_vm4  ;;  %vm9580_vm8 = vcmp.lt.f32.partialorder %v9145_v43, %v9454_v63  ;;  %vm9581_vm13 = vnez %v9453_v22  ;;  %v9582_v57 = vmov 0  ;;  %vm9584_vm3 = vcmp.gt.f32.partialorder %v3970_v47, %v9295_v35  ;;  %v9621_v5 = vld [vmem:[#allocation42_spill] sm:$0xff]  ;;  %v5047_v59 = vld [vmem:[%s8321_s0 + $0x2e] ss:$0 sm:$0xff] }
 0x12a   :  { %v9575_v21 = vsel %vm4921_vm0, 4294967295, %v9574_v21  ;;  %9576 = vst [vmem:[#allocation46_spill] sm:$0xff] %v4925_v19  ;;  %vm4937_vm4 = vmand %vm9581_vm13, %vm9580_vm8  ;;  %vm9585_vm15 = vcmp.lt.f32.partialorder %v9455_v50, 0.0  ;;  %v9586_v7 = vmov 0  ;;  %vm9590_vm13 = vcmp.gt.f32.partialorder %v4600_v45, %v8993_v20  ;;  %v9639_v14 = vld [vmem:[#allocation67_spill] sm:$0xff] }
 0x12b   :  { %v9583_v57 = vsel %vm4937_vm4, 4294967295, %v9582_v57  ;;  %vm4946_vm0 = vmxor %vm9585_vm15, %vm9584_vm3  ;;  %vm9591_vm14 = vcmp.lt.f32.partialorder %v9460_v51, 0.0  ;;  %v1376_v43 = vmul.f32 %v9251_v56, %v1368_v6  ;;  %v1392_v22 = vmul.f32 %v3591_v34, %v1368_v6  ;;  %v9604_v51 = vld [vmem:[#allocation23_spill] sm:$0xff]  ;;  %9633 = vst [vmem:[#allocation70_spill] sm:$0xff] %v5047_v59 }
 0x12c   :  { %v9587_v7 = vsel %vm4946_vm0, 4294967295, %v9586_v7  ;;  %vm4960_vm4 = vmxor %vm9591_vm14, %vm9590_vm13  ;;  %v4966_v63 = vmin.f32 %v1245_v1, %v1421_v0  ;;  %2508 = vrsqrt.f32 %v4878_v58  ;;  %vm9595_vm3 = vnez %v9325_v46  ;;  %v9605_v46 = vld [vmem:[#allocation33_spill] sm:$0xff]  ;;  %v9628_v0 = vld [vmem:[#allocation96_spill] sm:$0xff] }
 0x12d   :  { %vm9596_vm15 = vnez %v9417_v12  ;;  %v9598_v50 = vmov 0  ;;  %vm9600_vm14 = vcmp.gt.f32.partialorder %v4600_v45, %v9000_v3  ;;  %vm9601_vm13 = vcmp.lt.f32.partialorder %v9467_v29, 0.0 }
 0x12e   :  { %9594 = vst [vmem:[#allocation61_spill] sm:$0xff] %v4966_v63  ;;  %vm9597_vm1 = vmxor %vm9595_vm3, %vm9596_vm15  ;;  %v1501_v9 = vmul.f32 %v4899_v42, %v4648_v37  ;;  %2510 = vrsqrt.f32 %v4897_v52  ;;  %v9609_v12 = vmov 0  ;;  %v9614_v29 = vmov 0  ;;  %v9686_v37 = vld [vmem:[#allocation14_spill] sm:$0xff] }
 0x12f   :  { %vm4976_vm8 = vmxor %vm9597_vm1, %vm4862_vm6  ;;  %vm9606_vm6 = vnez %v9335_v41  ;;  %vm9607_vm1 = vnez %v9423_v36  ;;  %v9617_v41 = vld [vmem:[#allocation43_spill] sm:$0xff]  ;;  %v9618_v36 = vld [vmem:[#allocation50_spill] sm:$0xff]  ;;  %v1423_v54 = vadd.f32 %v1415_v30, %v1407_v4  ;;  %v9630_v44 = vmov 0 }
 0x130   :  { %v9599_v50 = vsel %vm4976_vm8, 4294967295, %v9598_v50  ;;  %vm4985_vm5 = vmxor %vm9601_vm13, %vm9600_vm14  ;;  %vm9612_vm14 = vcmp.gt.f32.partialorder %v4600_v45, %v9002_v28  ;;  %vm9613_vm13 = vcmp.lt.f32.partialorder %v9474_v49, 0.0  ;;  %v1247_v39 = vmin.f32 %v9618_v36, %v4912_v25  ;;  %v9635_v4 = vld [vmem:[#allocation37_spill] sm:$0xff]  ;;  %v9637_v30 = vld [vmem:[#allocation102_spill] sm:$0xff] }
 0x131   :  { %vm9608_vm3 = vmxor %vm9606_vm6, %vm9607_vm1  ;;  %vm9622_vm6 = vnez %v9621_v5  ;;  %v9624_v49 = vmov 0  ;;  %v5042_v62 = vadd.f32 %v1233_v2, %v1225_v40  ;;  %v1377_v1 = vmul.f32 %v9251_v56, %v1369_v61  ;;  %v9644_v2 = vld [vmem:[#allocation91_spill] sm:$0xff]  ;;  %v9646_v36 = vld [vmem:[#allocation29_spill] sm:$0xff] }
 0x132   :  { %vm5003_vm15 = vmxor %vm9608_vm3, %vm4872_vm10  ;;  %vm9620_vm10 = vnez %v9619_v32  ;;  %v1393_v53 = vmul.f32 %v3591_v34, %v1369_v61  ;;  %v5051_v25 = vmin.f32 %v1246_v48, %v1422_v16  ;;  %v9642_v40 = vmov 0  ;;  %v9651_v56 = vld [vmem:[#allocation10_spill] sm:$0xff]  ;;  %v9653_v48 = vld [vmem:[#allocation80_spill] sm:$0xff] }
 0x133   :  { %v9610_v12 = vsel %vm5003_vm15, 4294967295, %v9609_v12  ;;  %vm5012_vm11 = vmxor %vm9613_vm13, %vm9612_vm14  ;;  %vm9627_vm14 = vcmp.gt.f32.partialorder %v4600_v45, %v9626_v18  ;;  %vm9629_vm13 = vcmp.lt.f32.partialorder %v9628_v0, 0.0  ;;  %9632 = vst [vmem:[#allocation58_spill] sm:$0xff] %v5042_v62  ;;  %vm9647_vm0 = vnez %v9646_v36  ;;  %v9657_v16 = vld [vmem:[#allocation110_spill] sm:$0xff]  ;;  %v9658_v32 = vld [vmem:[#allocation8_spill] sm:$0xff] }
 0x134   :  { %9611 = vst [vmem:[#allocation35_spill] sm:$0xff] %v9610_v12  ;;  %v9615_v29 = vsel %vm5012_vm11, 4294967295, %v9614_v29  ;;  %vm9623_vm1 = vmxor %vm9620_vm10, %vm9622_vm6  ;;  %vm9638_vm10 = vnez %v9637_v30  ;;  %vm9640_vm6 = vnez %v9639_v14  ;;  %v9648_v34 = vmov 0  ;;  %v9660_v5 = vld [vmem:[#allocation97_spill] sm:$0xff]  ;;  %v5101_v14 = vld [vmem:[%s8321_s0 + $0x36] ss:$0 sm:$0xff] }
 0x135   :  { %vm5029_vm3 = vmxor %vm9623_vm1, %vm4885_vm2  ;;  %9634 = vst [vmem:[#allocation3_spill] sm:$0xff] %v5051_v25  ;;  %vm9636_vm2 = vnez %v9635_v4  ;;  %vm9652_vm15 = vcmp.gt.f32.partialorder %v4267_v10, %v9651_v56  ;;  %v9655_v61 = vmov 0  ;;  %v9665_v36 = vld [vmem:[#allocation59_spill] sm:$0xff]  ;;  %2512 = vrsqrt.f32 %v4966_v63  ;;  %v9668_v62 = vld [vmem:[#allocation109_spill] sm:$0xff] }
 0x136   :  { %v9625_v49 = vsel %vm5029_vm3, 4294967295, %v9624_v49  ;;  %vm5038_vm8 = vmxor %vm9629_vm13, %vm9627_vm14  ;;  %vm9645_vm13 = vcmp.lt.f32.partialorder %v9393_v60, %v9644_v2  ;;  %v1384_v2 = vsub.f32 %v9281_v33, %v1376_v43  ;;  %v9671_v19 = vmov 0  ;;  %v9674_v43 = vld [vmem:[#allocation9_spill] sm:$0xff] }
 0x137   :  { %v9631_v44 = vsel %vm5038_vm8, 4294967295, %v9630_v44  ;;  %vm9641_vm1 = vmxor %vm9638_vm10, %vm9640_vm6  ;;  %vm9654_vm8 = vcmp.lt.f32.partialorder %v9653_v48, 0.0  ;;  %vm9659_vm6 = vcmp.gt.f32.partialorder %v4600_v45, %v9658_v32  ;;  %v1400_v48 = vsub.f32 %v9665_v36, %v1392_v22  ;;  %v9676_v22 = vld [vmem:[#allocation98_spill] sm:$0xff]  ;;  %v9685_v30 = vld [vmem:[#allocation113_spill] sm:$0xff] }
 0x138   :  { %vm5060_vm14 = vmxor %vm9641_vm1, %vm9636_vm2  ;;  %vm9661_vm1 = vcmp.lt.f32.partialorder %v9660_v5, 0.0  ;;  %vm9677_vm10 = vcmp.lt.f32.partialorder %v9676_v22, 0.0  ;;  %v9678_v36 = vmov 0  ;;  %vm9682_vm2 = vcmp.lt.f32.partialorder %v9562_v38, %v9561_v13  ;;  %v9687_v22 = vld [vmem:[#allocation4_spill] sm:$0xff]  ;;  %v5143_v5 = vpop.eup %2508  ;;  %v9689_v4 = vld [vmem:[#allocation21_spill] sm:$0xff] }
 0x139   :  { %v9643_v40 = vsel %vm5060_vm14, 4294967295, %v9642_v40  ;;  %vm5069_vm3 = vmand %vm9647_vm0, %vm9645_vm13  ;;  %v9691_v13 = vld [vmem:[#allocation11_spill] sm:$0xff]  ;;  %v9694_v47 = vmov 0  ;;  %vm9697_vm9 = vcmp.lt.f32.partialorder %v9562_v38, %v9604_v51  ;;  %v9706_v6 = vmov 0 }
 0x13a   :  { %v9649_v34 = vsel %vm5069_vm3, 4294967295, %v9648_v34  ;;  %vm5078_vm11 = vmxor %vm9654_vm8, %vm9652_vm15  ;;  %vm9669_vm15 = vcmp.lt.f32.partialorder %v9401_v27, %v9668_v62  ;;  %v9683_v62 = vmov 0  ;;  %vm9690_vm8 = vnez %v9689_v4  ;;  %v9702_v4 = vld [vmem:[#allocation114_spill] sm:$0xff] }
 0x13b   :  { %9650 = vst [vmem:[#allocation62_spill] sm:$0xff] %v9649_v34  ;;  %v9656_v61 = vsel %vm5078_vm11, 4294967295, %v9655_v61  ;;  %vm5092_vm13 = vmxor %vm9661_vm1, %vm9659_vm6  ;;  %vm9675_vm1 = vcmp.gt.f32.partialorder %v4600_v45, %v9674_v43  ;;  %v1385_v51 = vsub.f32 %v9281_v33, %v1377_v1  ;;  %2514 = vrsqrt.f32 %v5051_v25  ;;  %v9777_v34 = vld [vmem:[#allocation55_spill] sm:$0xff] }
 0x13c   :  { %vm5115_vm6 = vmand %vm4829_vm7, %vm9669_vm15  ;;  %vm9719_vm15 = vcmp.lt.f32.partialorder %v9685_v30, 0.0  ;;  %v1278_v0 = vmul.f32 %v5101_v14, %v9687_v22 }
 0x13d   :  { %v9672_v19 = vsel %vm5115_vm6, 4294967295, %v9671_v19  ;;  %vm5124_vm0 = vmxor %vm9677_vm10, %vm9675_vm1  ;;  %vm9688_vm1 = vnez %v9569_v31  ;;  %v9701_v31 = vld [vmem:[#allocation15_spill] sm:$0xff] }
 0x13e   :  { %9673 = vst [vmem:[#allocation56_spill] sm:$0xff] %v9672_v19  ;;  %v9679_v36 = vsel %vm5124_vm0, 4294967295, %v9678_v36  ;;  %vm5135_vm7 = vmand %vm4960_vm4, %vm9682_vm2  ;;  %vm9692_vm0 = vnez %v9691_v13  ;;  %v5168_v13 = vmin.f32 %v1247_v39, %v1423_v54  ;;  %v5170_v19 = vpop.eup %2510  ;;  %v1408_v39 = vmul.f32 %v1384_v2, %v1384_v2 }
 0x13f   :  { %9680 = vst [vmem:[#allocation85_spill] sm:$0xff] %v9679_v36  ;;  %v9684_v62 = vsel %vm5135_vm7, 4294967295, %v9683_v62  ;;  %v1502_v36 = vmul.f32 %v4899_v42, %v1501_v9  ;;  %vm9693_vm4 = vmxor %vm9690_vm8, %vm9692_vm0  ;;  %v9698_v9 = vmov 0  ;;  %v9700_v42 = vld [vmem:[#allocation5_spill] sm:$0xff]  ;;  %vm9704_vm0 = vcmp.lt.f32.partialorder %v9562_v38, %v9605_v46  ;;  %v5216_v2 = vpop.eup %2512 }
 0x140   :  { %vm5152_vm2 = vmxor %vm9693_vm4, %vm9688_vm1  ;;  %9703 = vst [vmem:[#allocation24_spill] sm:$0xff] %v5170_v19  ;;  %vm9705_vm8 = vnez %v9615_v29  ;;  %vm9711_vm4 = vnez %v9631_v44  ;;  %v9712_v46 = vmov 0  ;;  %v1276_v29 = vmul.f32 %v5101_v14, %v9685_v30 }
 0x141   :  { %v9695_v47 = vsel %vm5152_vm2, 4294967295, %v9694_v47  ;;  %vm5161_vm10 = vmand %vm4985_vm5, %vm9697_vm9  ;;  %vm1259_vm9 = vcmp.gt.f32.partialorder %v5047_v59, %v8993_v20  ;;  %vm9710_vm5 = vcmp.lt.f32.partialorder %v9562_v38, %v9616_v15  ;;  %v1416_v54 = vmul.f32 %v1400_v48, %v1400_v48 }
 0x142   :  { %9696 = vst [vmem:[#allocation73_spill] sm:$0xff] %v9695_v47  ;;  %v9699_v9 = vsel %vm5161_vm10, 4294967295, %v9698_v9  ;;  %vm5177_vm1 = vmand %vm9705_vm8, %vm9704_vm0  ;;  %v9709_v47 = vld [vmem:[#allocation66_spill] sm:$0xff]  ;;  %vm9714_vm8 = vcmp.lt.f32.partialorder %v9562_v38, %v9617_v41  ;;  %v9715_v15 = vmov 0  ;;  %v1277_v44 = vmul.f32 %v5101_v14, %v9686_v37 }
 0x143   :  { %v9707_v6 = vsel %vm5177_vm1, 4294967295, %v9706_v6  ;;  %v1401_v24 = vsub.f32 %v9709_v47, %v1393_v53  ;;  %vm5191_vm6 = vmand %vm9711_vm4, %vm9710_vm5  ;;  %v5212_v1 = vmul.f32 0.5, %v1502_v36  ;;  %v1513_v53 = vmul.f32 %v5143_v5, %v4878_v58  ;;  %v5313_v58 = vpop.eup %2514 }
 0x144   :  { %9708 = vst [vmem:[#allocation32_spill] sm:$0xff] %v9707_v6  ;;  %v9713_v46 = vsel %vm5191_vm6, 4294967295, %v9712_v46  ;;  %vm5204_vm12 = vmand %vm5092_vm13, %vm9714_vm8  ;;  %v9720_v41 = vmov 0  ;;  %v1525_v36 = vmul.f32 %v5170_v19, %v4897_v52  ;;  %2516 = vrsqrt.f32 %v5168_v13  ;;  %v5311_v52 = vld [vmem:[%s8321_s0 + $0x2f] ss:$0 sm:$0xff] }
 0x145   :  { %v9716_v15 = vsel %vm5204_vm12, 4294967295, %v9715_v15  ;;  %vm5229_vm5 = vmxor %vm9719_vm15, %vm1259_vm9  ;;  %vm9722_vm4 = vnez %v9583_v57  ;;  %vm9723_vm8 = vnez %v9445_v8  ;;  %vm9724_vm0 = vnez %v9449_v17  ;;  %v9736_v17 = vld [vmem:[#allocation111_spill] sm:$0xff]  ;;  %v9737_v57 = vld [vmem:[#allocation100_spill] sm:$0xff] }
 0x146   :  { %9717 = vst [vmem:[#allocation60_spill] sm:$0xff] %v9716_v15  ;;  %v9721_v41 = vsel %vm5229_vm5, 4294967295, %v9720_v41  ;;  %vm9725_vm7 = vmxor %vm9723_vm8, %vm9724_vm0  ;;  %v9726_v48 = vmov 0  ;;  %vm9728_vm15 = vcmp.lt.f32.partialorder %v9393_v60, %v9588_v11  ;;  %vm9729_vm9 = vnez %v9587_v7 }
 0x147   :  { %vm5245_vm13 = vmxor %vm9725_vm7, %vm9722_vm4  ;;  %v9730_v30 = vmov 0  ;;  %vm9732_vm12 = vcmp.gt.f32.partialorder %v4267_v10, %v9295_v35  ;;  %vm9733_vm5 = vcmp.lt.f32.partialorder %v9589_v55, 0.0  ;;  %v9734_v8 = vmov 0  ;;  %v5288_v55 = vld [vmem:[%s8321_s0 + $0x37] ss:$0 sm:$0xff] }
 0x148   :  { %v9727_v48 = vsel %vm5245_vm13, 4294967295, %v9726_v48  ;;  %vm5254_vm2 = vmand %vm9729_vm9, %vm9728_vm15  ;;  %vm9738_vm15 = vcmp.gt.f32.partialorder %v5047_v59, %v9000_v3  ;;  %vm9739_vm9 = vcmp.lt.f32.partialorder %v9686_v37, 0.0  ;;  %v1279_v60 = vmul.f32 %v5101_v14, %v9700_v42  ;;  %v9806_v10 = vld [vmem:[#allocation76_spill] sm:$0xff] }
 0x149   :  { %v9731_v30 = vsel %vm5254_vm2, 4294967295, %v9730_v30  ;;  %vm5263_vm11 = vmxor %vm9733_vm5, %vm9732_vm12  ;;  %v1409_v7 = vmul.f32 %v1385_v51, %v1385_v51  ;;  %v1417_v11 = vmul.f32 %v1401_v24, %v1401_v24  ;;  %vm9744_vm4 = vcmp.lt.f32.partialorder %v9687_v22, 0.0  ;;  %v9747_v51 = vld [vmem:[#allocation112_spill] sm:$0xff]  ;;  %v9818_v22 = vld [vmem:[#allocation101_spill] sm:$0xff] }
 0x14a   :  { %v9735_v8 = vsel %vm5263_vm11, 4294967295, %v9734_v8  ;;  %vm5279_vm12 = vmxor %vm9739_vm9, %vm9738_vm15  ;;  %vm9743_vm9 = vcmp.gt.f32.partialorder %v5047_v59, %v9002_v28  ;;  %v1280_v24 = vmul.f32 %v5101_v14, %v9701_v31  ;;  %v1424_v47 = vadd.f32 %v1416_v54, %v1408_v39 }
 0x14b   :  { %vm5301_vm7 = vmxor %vm9744_vm4, %vm9743_vm9  ;;  %vm9749_vm0 = vcmp.gt.f32.partialorder %v5047_v59, %v9626_v18  ;;  %vm9750_vm15 = vcmp.lt.f32.partialorder %v9700_v42, 0.0  ;;  %v1504_v39 = vsub.f32 1.5, %v5212_v1  ;;  %v1514_v54 = vmul.f32 %v5143_v5, %v1513_v53  ;;  %v9825_v42 = vld [vmem:[#allocation20_spill] sm:$0xff] }
 0x14c   :  { %vm5324_vm10 = vmxor %vm9750_vm15, %vm9749_vm0  ;;  %v1537_v6 = vmul.f32 %v5216_v2, %v4966_v63  ;;  %v5335_v12 = vmul.f32 %v9559_v26, %v9737_v57  ;;  %vm9754_vm9 = vcmp.gt.f32.partialorder %v5047_v59, %v9658_v32  ;;  %vm9755_vm8 = vcmp.lt.f32.partialorder %v9701_v31, 0.0  ;;  %v9768_v63 = vld [vmem:[#allocation58_spill] sm:$0xff] }
 0x14d   :  { %vm5346_vm1 = vmxor %vm9755_vm8, %vm9754_vm9  ;;  %v5352_v1 = vmul.f32 %v5101_v14, %v9702_v4  ;;  %v1526_v26 = vmul.f32 %v5170_v19, %v1525_v36  ;;  %vm9758_vm6 = vcmp.lt.f32.partialorder %v9401_v27, %v9657_v16  ;;  %vm9759_vm8 = vnez %v9656_v61  ;;  %v9769_v16 = vld [vmem:[#allocation40_spill] sm:$0xff] }
 0x14e   :  { %vm5365_vm9 = vmand %vm9759_vm8, %vm9758_vm6  ;;  %v9760_v31 = vmov 0  ;;  %vm9762_vm0 = vcmp.gt.f32.partialorder %v4600_v45, %v9651_v56  ;;  %vm9763_vm4 = vcmp.lt.f32.partialorder %v9558_v23, 0.0  ;;  %v9764_v53 = vmov 0  ;;  %v9774_v56 = vld [vmem:[#allocation13_spill] sm:$0xff]  ;;  %v9775_v36 = vld [vmem:[#allocation56_spill] sm:$0xff] }
 0x14f   :  { %v9761_v31 = vsel %vm5365_vm9, 4294967295, %v9760_v31  ;;  %vm5374_vm5 = vmxor %vm9763_vm4, %vm9762_vm0  ;;  %v1249_v19 = vmin.f32 %v9769_v16, %v9768_v63  ;;  %vm9770_vm8 = vcmp.lt.f32.partialorder %v9747_v51, %v1276_v29  ;;  %vm9771_vm3 = vnez %v9721_v41  ;;  %v9779_v63 = vld [vmem:[#allocation47_spill] sm:$0xff]  ;;  %v9784_v41 = vld [vmem:[#allocation44_spill] sm:$0xff] }
 0x150   :  { %v9765_v53 = vsel %vm5374_vm5, 4294967295, %v9764_v53  ;;  %vm5387_vm14 = vmand %vm9771_vm3, %vm9770_vm8  ;;  %v1425_v23 = vadd.f32 %v1417_v11, %v1409_v7  ;;  %v1460_v32 = vmul.f32 %v5288_v55, %v9774_v56  ;;  %vm9776_vm4 = vnez %v9775_v36  ;;  %v9786_v7 = vld [vmem:[#allocation85_spill] sm:$0xff]  ;;  %v9797_v16 = vld [vmem:[#allocation22_spill] sm:$0xff] }
 0x151   :  { %9766 = vst [vmem:[#allocation84_spill] sm:$0xff] %v9765_v53  ;;  %v5393_v53 = vpop.eup %2516  ;;  %vm9778_vm0 = vnez %v9777_v34  ;;  %vm9780_vm15 = vnez %v9779_v63  ;;  %v9782_v29 = vmov 0  ;;  %vm9785_vm3 = vcmp.lt.f32.partialorder %v9562_v38, %v9784_v41  ;;  %v9798_v63 = vld [vmem:[#allocation46_spill] sm:$0xff] }
 0x152   :  { %vm9781_vm6 = vmxor %vm9778_vm0, %vm9780_vm15  ;;  %vm9787_vm8 = vnez %v9786_v7  ;;  %v9788_v11 = vmov 0  ;;  %vm9790_vm11 = vcmp.gt.f32.partialorder %v5047_v59, %v9674_v43  ;;  %vm9791_vm13 = vcmp.lt.f32.partialorder %v9702_v4, 0.0  ;;  %v9808_v59 = vld [vmem:[#allocation115_spill] sm:$0xff] }
 0x153   :  { %vm5402_vm5 = vmxor %vm9781_vm6, %vm9776_vm4  ;;  %v9792_v34 = vmov 0  ;;  %vm9794_vm15 = vcmp.lt.f32.partialorder %v9747_v51, %v1277_v44  ;;  %v9799_v41 = vmin.f32 %v9797_v16, %v9798_v63  ;;  %vm1434_vm4 = vcmp.lt.f32.partialorder %v9774_v56, 0.0  ;;  %v9801_v44 = vld [vmem:[#allocation73_spill] sm:$0xff] }
 0x154   :  { %v9783_v29 = vsel %vm5402_vm5, 4294967295, %v9782_v29  ;;  %vm5411_vm9 = vmand %vm9787_vm8, %vm9785_vm3  ;;  %v1549_v4 = vmul.f32 %v5313_v58, %v5051_v25  ;;  %vm9803_vm8 = vcmp.lt.f32.partialorder %v9747_v51, %v1278_v0  ;;  %v1505_v16 = vmul.f32 %v9806_v10, %v1504_v39  ;;  %v9807_v25 = vld [vmem:[#allocation16_spill] sm:$0xff]  ;;  %v9819_v56 = vld [vmem:[#allocation41_spill] sm:$0xff] }
 0x155   :  { %v9789_v11 = vsel %vm5411_vm9, 4294967295, %v9788_v11  ;;  %vm5420_vm2 = vmxor %vm9791_vm13, %vm9790_vm11  ;;  %v5435_v7 = vmin.f32 %v9799_v41, %v1424_v47  ;;  %vm1443_vm11 = vcmp.gt.f32.partialorder %v5311_v52, %v8993_v20  ;;  %v1515_v63 = vmul.f32 0.5, %v1514_v54  ;;  %v9812_v39 = vld [vmem:[#allocation52_spill] sm:$0xff] }
 0x156   :  { %v9793_v34 = vsel %vm5420_vm2, 4294967295, %v9792_v34  ;;  %vm5428_vm6 = vmand %vm5279_vm12, %vm9794_vm15  ;;  %v1538_v41 = vmul.f32 %v5216_v2, %v1537_v6  ;;  %v5459_v43 = vmul.f32 %v5101_v14, %v9807_v25  ;;  %v5463_v15 = vmul.f32 %v5101_v14, %v9808_v59  ;;  %v9863_v14 = vld [vmem:[#allocation103_spill] sm:$0xff] }
 0x157   :  { %vm5451_vm15 = vmand %vm5301_vm7, %vm9803_vm8  ;;  %vm9809_vm7 = vcmp.lt.f32.partialorder %v9747_v51, %v1279_v60  ;;  %v1527_v6 = vmul.f32 0.5, %v1526_v26  ;;  %v5475_v37 = vmin.f32 %v1249_v19, %v1425_v23  ;;  %v1561_v60 = vmul.f32 %v5393_v53, %v5168_v13 }
 0x158   :  { %vm5471_vm8 = vmand %vm5324_vm10, %vm9809_vm7  ;;  %vm9815_vm10 = vcmp.lt.f32.partialorder %v9747_v51, %v1280_v24  ;;  %v9816_v19 = vmov 0  ;;  %v1550_v54 = vmul.f32 %v5313_v58, %v1549_v4  ;;  %2518 = vrsqrt.f32 %v5435_v7  ;;  %v9902_v24 = vld [vmem:[#allocation82_spill] sm:$0xff] }
 0x159   :  { %vm5483_vm13 = vmxor %vm1434_vm4, %vm1443_vm11  ;;  %vm9820_vm11 = vnez %v9575_v21  ;;  %vm9821_vm0 = vnez %v9684_v62  ;;  %v1506_v26 = vmul.f32 %v1505_v16, %v9825_v42  ;;  %v1516_v23 = vsub.f32 1.5, %v1515_v63  ;;  %v9926_v21 = vld [vmem:[#allocation61_spill] sm:$0xff] }
 0x15a   :  { %vm5494_vm7 = vmand %vm5346_vm1, %vm9815_vm10  ;;  %v1539_v4 = vmul.f32 0.5, %v1538_v41  ;;  %v9834_v62 = vmov 0  ;;  %vm9840_vm3 = vnez %v9699_v9  ;;  %2520 = vrsqrt.f32 %v5475_v37  ;;  %v9846_v9 = vld [vmem:[#allocation32_spill] sm:$0xff] }
 0x15b   :  { %v9817_v19 = vsel %vm5494_vm7, 4294967295, %v9816_v19  ;;  %vm9822_vm12 = vmxor %vm9820_vm11, %vm9821_vm0  ;;  %vm9828_vm7 = vcmp.lt.f32.partialorder %v9401_v27, %v9736_v17  ;;  %vm9832_vm0 = vcmp.gt.f32.partialorder %v4600_v45, %v9295_v35  ;;  %vm9833_vm11 = vcmp.lt.f32.partialorder %v9737_v57, 0.0 }
 0x15c   :  { %vm5509_vm2 = vmxor %vm9822_vm12, %vm5387_vm14  ;;  %vm9829_vm14 = vnez %v9735_v8  ;;  %v1528_v45 = vsub.f32 1.5, %v1527_v6  ;;  %v9842_v8 = vmov 0  ;;  %v1462_v17 = vmul.f32 %v5288_v55, %v9818_v22 }
 0x15d   :  { %vm5525_vm12 = vmand %vm9829_vm14, %vm9828_vm7  ;;  %vm9836_vm14 = vcmp.lt.f32.partialorder %v9281_v33, %v1460_v32  ;;  %v1461_v32 = vmul.f32 %v5288_v55, %v9812_v39  ;;  %v1562_v57 = vmul.f32 %v5393_v53, %v1561_v60  ;;  %v1463_v36 = vmul.f32 %v5288_v55, %v9819_v56  ;;  %v9865_v60 = vld [vmem:[#allocation84_spill] sm:$0xff] }
 0x15e   :  { %vm5534_vm1 = vmxor %vm9833_vm11, %vm9832_vm0  ;;  %vm1507_vm0 = vcmp.eq.f32.partialorder %v9825_v42, inf  ;;  %vm9839_vm11 = vnez %v9599_v50  ;;  %v9844_v50 = vld [vmem:[#allocation35_spill] sm:$0xff]  ;;  %v1510_v10 = vand.u32 2147483648, %v9825_v42  ;;  %v1551_v16 = vmul.f32 0.5, %v1550_v54 }
 0x15f   :  { %v9835_v62 = vsel %vm5534_vm1, 4294967295, %v9834_v62  ;;  %vm5548_vm4 = vmand %vm5483_vm13, %vm9836_vm14  ;;  %vm9845_vm13 = vnez %v9844_v50  ;;  %vm9851_vm14 = vnez %v9625_v49  ;;  %v9854_v47 = vmov 0  ;;  %v5602_v49 = vpop.eup %2518  ;;  %v9869_v54 = vld [vmem:[#allocation19_spill] sm:$0xff]  ;;  %v9880_v50 = vld [vmem:[#allocation18_spill] sm:$0xff] }
 0x160   :  { %vm9841_vm10 = vmxor %vm9839_vm11, %vm9840_vm3  ;;  %vm9847_vm3 = vnez %v9846_v9  ;;  %vm9852_vm11 = vnez %v9713_v46  ;;  %v1508_v63 = vsel %vm1507_vm0, %v9825_v42, %v1506_v26  ;;  %v1517_v41 = vmul.f32 %v5143_v5, %v1516_v23  ;;  %v9858_v46 = vld [vmem:[#allocation62_spill] sm:$0xff]  ;;  %v9875_v23 = vld [vmem:[#allocation24_spill] sm:$0xff] }
 0x161   :  { %vm5560_vm1 = vmxor %vm9841_vm10, %vm5428_vm6  ;;  %v1540_v0 = vsub.f32 1.5, %v1539_v4  ;;  %v9861_v6 = vmov 0  ;;  %vm9864_vm0 = vcmp.lt.f32.partialorder %v9562_v38, %v9863_v14  ;;  %v1464_v26 = vmul.f32 %v5288_v55, %v9869_v54  ;;  %v9887_v9 = vld [vmem:[#allocation60_spill] sm:$0xff] }
 0x162   :  { %v9843_v8 = vsel %vm5560_vm1, 4294967295, %v9842_v8  ;;  %vm9848_vm6 = vmxor %vm9845_vm13, %vm9847_vm3  ;;  %vm9856_vm3 = vnez %v9761_v31  ;;  %v9870_v31 = vld [vmem:[#allocation8_spill] sm:$0xff]  ;;  %v1529_v4 = vmul.f32 %v9875_v23, %v1528_v45  ;;  %v1552_v14 = vsub.f32 1.5, %v1551_v16  ;;  %v9904_v16 = vld [vmem:[#allocation70_spill] sm:$0xff] }
 0x163   :  { %vm5577_vm10 = vmxor %vm9848_vm6, %vm5451_vm15  ;;  %v1518_v27 = vmul.f32 %v1517_v41, %v9902_v24  ;;  %v1541_v23 = vmul.f32 %v5216_v2, %v1540_v0  ;;  %v9909_v2 = vld [vmem:[#allocation75_spill] sm:$0xff] }
 0x164   :  { %vm9853_vm7 = vmxor %vm9851_vm14, %vm9852_vm11  ;;  %vm9866_vm11 = vnez %v9865_v60  ;;  %v5696_v60 = vpop.eup %2520  ;;  %v1530_v0 = vmul.f32 %v1529_v4, %v9909_v2  ;;  %v1553_v45 = vmul.f32 %v5313_v58, %v1552_v14  ;;  %v9922_v58 = vmov 0  ;;  %v9960_v4 = vld [vmem:[#allocation59_spill] sm:$0xff] }
 0x165   :  { %vm5591_vm1 = vmxor %vm9853_vm7, %vm5471_vm8  ;;  %vm9857_vm8 = vnez %v9643_v40  ;;  %vm9859_vm7 = vnez %v9858_v46  ;;  %v1546_v46 = vand.u32 2147483648, %v9926_v21 }
 0x166   :  { %v9855_v47 = vsel %vm5591_vm1, 4294967295, %v9854_v47  ;;  %vm9860_vm6 = vmxor %vm9857_vm8, %vm9859_vm7  ;;  %vm9872_vm8 = vcmp.lt.f32.partialorder %v9812_v39, 0.0  ;;  %v9878_v39 = vmov 0  ;;  %vm9882_vm1 = vcmp.lt.f32.partialorder %v9818_v22, 0.0 }
 0x167   :  { %vm5611_vm14 = vmxor %vm9860_vm6, %vm9856_vm3  ;;  %vm9871_vm3 = vcmp.gt.f32.partialorder %v5311_v52, %v9000_v3  ;;  %vm9886_vm6 = vnez %v9801_v44  ;;  %v9890_v22 = vmov 0 }
 0x168   :  { %v9862_v6 = vsel %vm5611_vm14, 4294967295, %v9861_v6  ;;  %vm5620_vm13 = vmand %vm9866_vm11, %vm9864_vm0  ;;  %vm9876_vm0 = vcmp.lt.f32.partialorder %v9747_v51, %v5352_v1  ;;  %vm9877_vm11 = vnez %v9793_v34  ;;  %v5664_v1 = vmul.f32 %v5288_v55, %v9880_v50 }
 0x169   :  { %vm5632_vm7 = vmxor %vm9872_vm8, %vm9871_vm3  ;;  %vm9881_vm8 = vcmp.gt.f32.partialorder %v5311_v52, %v9002_v28  ;;  %v1563_v34 = vmul.f32 0.5, %v1562_v57  ;;  %vm9888_vm3 = vnez %v9887_v9  ;;  %v1585_v9 = vmul.f32 %v5696_v60, %v5475_v37 }
 0x16a   :  { %vm5648_vm15 = vmand %vm9877_vm11, %vm9876_vm0  ;;  %vm9885_vm11 = vnez %v9817_v19  ;;  %vm1470_vm0 = vcmp.lt.f32.partialorder %v9281_v33, %v1462_v17  ;;  %v2554_v19 = vmov -1.0   ;;  %v1522_v17 = vand.u32 2147483648, %v9902_v24 }
 0x16b   :  { %v9879_v39 = vsel %vm5648_vm15, 4294967295, %v9878_v39  ;;  %vm5658_vm14 = vmxor %vm9882_vm1, %vm9881_vm8  ;;  %vm9892_vm1 = vcmp.gt.f32.partialorder %v5311_v52, %v9626_v18  ;;  %vm9893_vm8 = vcmp.lt.f32.partialorder %v9819_v56, 0.0 }
 0x16c   :  { %vm9889_vm9 = vmxor %vm9886_vm6, %vm9888_vm3  ;;  %vm9897_vm6 = vcmp.eq.f32.partialorder %v9825_v42, 0.0  ;;  %vm9898_vm3 = vcmp.gt.f32.partialorder %v5311_v52, %v9870_v31  ;;  %v1573_v42 = vmul.f32 %v5602_v49, %v5435_v7 }
 0x16d   :  { %vm5674_vm5 = vmxor %vm9889_vm9, %vm9885_vm11  ;;  %v1511_v57 = vsel %vm9897_vm6, %v1510_v10, %v1508_v63  ;;  %vm9899_vm11 = vcmp.lt.f32.partialorder %v9869_v54, 0.0  ;;  %v9903_v10 = vld [vmem:[#allocation10_spill] sm:$0xff]  ;;  %v9905_v63 = vld [vmem:[#allocation9_spill] sm:$0xff]  ;;  %v1564_v54 = vsub.f32 1.5, %v1563_v34  ;;  %v1542_v34 = vmul.f32 %v1541_v23, %v9926_v21 }
 0x16e   :  { %v9891_v22 = vsel %vm5674_vm5, 4294967295, %v9890_v22  ;;  %vm5683_vm15 = vmxor %vm9893_vm8, %vm9892_vm1  ;;  %vm9924_vm8 = vnez %v9843_v8  ;;  %v1582_v8 = vand.u32 2147483648, %v5435_v7 }
 0x16f   :  { %vm9896_vm9 = vmxor %vm5509_vm2, %vm5548_vm4  ;;  %vm9921_vm4 = vnez %v9835_v62 }
 0x170   :  { %v1492_v44 = vsel %vm9896_vm9, 1.0, %v2554_v19  ;;  %vm5703_vm1 = vmxor %vm9899_vm11, %vm9898_vm3  ;;  %vm9906_vm3 = vcmp.lt.f32.partialorder %v9281_v33, %v1461_v32 }
 0x171   :  { %vm5722_vm11 = vmand %vm5632_vm7, %vm9906_vm3  ;;  %v1596_v40 = vmul.f32 %v1511_v57, %v1492_v44  ;;  %vm9912_vm3 = vcmp.lt.f32.partialorder %v9281_v33, %v1463_v36  ;;  %v9918_v36 = vmov 0  ;;  %v9931_v44 = vld [vmem:[#allocation3_spill] sm:$0xff]  ;;  %v1565_v57 = vmul.f32 %v5393_v53, %v1564_v54 }
 0x172   :  { %vm5735_vm9 = vmand %vm5658_vm14, %vm1470_vm0  ;;  %vm9915_vm14 = vnez %v9727_v48  ;;  %vm9916_vm0 = vnez %v9731_v30  ;;  %v1534_v30 = vand.u32 2147483648, %v9909_v2  ;;  %v1586_v53 = vmul.f32 %v5696_v60, %v1585_v9 }
 0x173   :  { %vm5744_vm2 = vmand %vm5683_vm15, %vm9912_vm3  ;;  %vm9920_vm3 = vcmp.lt.f32.partialorder %v9562_v38, %v5335_v12  ;;  %v1574_v38 = vmul.f32 %v5602_v49, %v1573_v42  ;;  %v1604_v14 = vmul.f32 0.1, %v1596_v40 }
 0x174   :  { %vm9917_vm6 = vmxor %vm9915_vm14, %vm9916_vm0  ;;  %vm9937_vm14 = vcmp.lt.f32.partialorder %v9880_v50, 0.0  ;;  %vm9944_vm0 = vnez %v9783_v29  ;;  %v1558_v50 = vand.u32 2147483648, %v9931_v44  ;;  %v1587_v54 = vmul.f32 0.5, %v1586_v53 }
 0x175   :  { %vm5760_vm15 = vmxor %vm9917_vm6, %vm5525_vm12  ;;  %vm9925_vm12 = vcmp.eq.f32.partialorder %v9902_v24, inf  ;;  %vm9927_vm6 = vcmp.eq.f32.partialorder %v9909_v2, inf  ;;  %v1575_v41 = vmul.f32 0.5, %v1574_v38 }
 0x176   :  { %v9919_v36 = vsel %vm5760_vm15, 4294967295, %v9918_v36  ;;  %vm5769_vm7 = vmand %vm9921_vm4, %vm9920_vm3  ;;  %v1520_v48 = vsel %vm9925_vm12, %v9902_v24, %v1518_v27  ;;  %v1532_v12 = vsel %vm9927_vm6, %v9909_v2, %v1530_v0  ;;  %vm9928_vm12 = vcmp.lt.f32.partialorder %v9281_v33, %v1464_v26 }
 0x177   :  { %v9923_v58 = vsel %vm5769_vm7, 4294967295, %v9922_v58  ;;  %vm5797_vm5 = vmand %vm5703_vm1, %vm9928_vm12  ;;  %vm9932_vm6 = vnez %v9855_v47  ;;  %vm9934_vm12 = vcmp.eq.f32.partialorder %v9902_v24, 0.0  ;;  %v1554_v27 = vmul.f32 %v1553_v45, %v9931_v44 }
 0x178   :  { %vm9933_vm1 = vmxor %vm9924_vm8, %vm5722_vm11  ;;  %v1523_v56 = vsel %vm9934_vm12, %v1522_v17, %v1520_v48  ;;  %vm9935_vm4 = vnez %v9862_v6  ;;  %vm9936_vm3 = vcmp.gt.f32.partialorder %v5311_v52, %v9905_v63  ;;  %vm9941_vm11 = vcmp.eq.f32.partialorder %v9909_v2, 0.0 }
 0x179   :  { %v1493_v26 = vsel %vm9933_vm1, 1.0, %v2554_v19  ;;  %vm5827_vm15 = vmxor %vm9937_vm14, %vm9936_vm3  ;;  %v1535_v23 = vsel %vm9941_vm11, %v1534_v30, %v1532_v12  ;;  %vm9942_vm1 = vcmp.eq.f32.partialorder %v9926_v21, inf  ;;  %vm9943_vm12 = vnez %v9879_v39  ;;  %v9969_v12 = vld [vmem:[#allocation66_spill] sm:$0xff] }
 0x17a   :  { %vm9940_vm8 = vmxor %vm5577_vm10, %vm5735_vm9  ;;  %v1544_v42 = vsel %vm9942_vm1, %v9926_v21, %v1542_v34  ;;  %vm9945_vm10 = vnez %v9789_v11  ;;  %vm9949_vm1 = vnez %v9891_v22  ;;  %v1566_v11 = vmul.f32 %v1565_v57, %v5168_v13 }
 0x17b   :  { %v1494_v24 = vsel %vm9940_vm8, 1.0, %v2554_v19  ;;  %vm9946_vm9 = vmxor %vm9944_vm0, %vm9945_vm10  ;;  %v1597_v39 = vmul.f32 %v1523_v56, %v1493_v26  ;;  %v1612_v2 = vmax.f32 %v1604_v14, -80.0  ;;  %vm9951_vm0 = vcmp.lt.f32.partialorder %v9281_v33, %v5664_v1 }
 0x17c   :  { %vm5853_vm8 = vmxor %vm9946_vm9, %vm9943_vm12  ;;  %vm9954_vm10 = vcmp.eq.f32.partialorder %v9926_v21, 0.0  ;;  %v1598_v40 = vmul.f32 %v1535_v23, %v1494_v24  ;;  %v1576_v17 = vsub.f32 1.5, %v1575_v41  ;;  %vm9962_vm11 = vcmp.lt.f32.partialorder %v9808_v59, 0.0 }
 0x17d   :  { %vm9950_vm14 = vmxor %vm9932_vm6, %vm5744_vm2  ;;  %v1547_v47 = vsel %vm9954_vm10, %v1546_v46, %v1544_v42  ;;  %vm9955_vm2 = vcmp.eq.f32.partialorder %v9931_v44, inf  ;;  %vm9956_vm6 = vcmp.gt.f32.partialorder %v9904_v16, %v9903_v10  ;;  %vm1567_vm10 = vcmp.eq.f32.partialorder %v5168_v13, inf }
 0x17e   :  { %v1495_v29 = vsel %vm9950_vm14, 1.0, %v2554_v19  ;;  %vm5875_vm12 = vmand %vm5827_vm15, %vm9951_vm0  ;;  %v1556_v32 = vsel %vm9955_vm2, %v9931_v44, %v1554_v27  ;;  %vm9957_vm14 = vcmp.lt.f32.partialorder %v9807_v25, 0.0  ;;  %vm1291_vm15 = vcmp.lt.f32.partialorder %v9747_v51, %v5463_v15 }
 0x17f   :  { %vm5889_vm9 = vmxor %vm9957_vm14, %vm9956_vm6  ;;  %vm9961_vm2 = vcmp.gt.f32.partialorder %v9904_v16, %v9295_v35  ;;  %v1466_v25 = vmul.f32 %v5288_v55, %v9960_v4  ;;  %v1570_v16 = vand.u32 2147483648, %v5168_v13  ;;  %v1599_v48 = vmul.f32 %v1547_v47, %v1495_v29 }
 0x180   :  { %vm5902_vm3 = vmxor %vm9962_vm11, %vm9961_vm2  ;;  %vm9966_vm2 = vcmp.eq.f32.partialorder %v9931_v44, 0.0  ;;  %v1605_v30 = vmul.f32 0.1, %v1597_v39  ;;  %v1620_v21 = vsub.f32 0.0, %v1612_v2  ;;  %vm9967_vm0 = vnez %v9919_v36 }
 0x181   :  { %vm9965_vm14 = vmxor %vm9949_vm1, %vm5797_vm5  ;;  %v1559_v59 = vsel %vm9966_vm2, %v1558_v50, %v1556_v32  ;;  %v1568_v22 = vsel %vm1567_vm10, %v5168_v13, %v1566_v11  ;;  %vm1569_vm5 = vcmp.eq.f32.partialorder %v5168_v13, 0.0  ;;  %v1588_v34 = vsub.f32 1.5, %v1587_v54 }
 0x182   :  { %v1496_v9 = vsel %vm9965_vm14, 1.0, %v2554_v19  ;;  %vm1489_vm11 = vmxor %vm5853_vm8, %vm5875_vm12  ;;  %v1606_v38 = vmul.f32 0.1, %v1598_v40  ;;  %vm9968_vm1 = vcmp.lt.f32.partialorder %v9747_v51, %v5459_v43  ;;  %v1467_v62 = vmul.f32 %v5288_v55, %v9969_v12 }
 0x183   :  { %vm1298_vm14 = vmand %vm5889_vm9, %vm9968_vm1  ;;  %v1577_v46 = vmul.f32 %v5602_v49, %v1576_v17  ;;  %vm1450_vm6 = vcmp.gt.f32.partialorder %v5311_v52, %v9295_v35  ;;  %vm1474_vm9 = vcmp.lt.f32.partialorder %v9281_v33, %v1466_v25  ;;  %v1497_v43 = vsel %vm1489_vm11, 1.0, %v2554_v19 }
 0x184   :  { %vm5943_vm10 = vmand %vm5902_vm3, %vm1291_vm15  ;;  %v1600_v55 = vmul.f32 %v1559_v59, %v1496_v9  ;;  %vm9972_vm1 = vcmp.gt.f32.partialorder %v5311_v52, %v9903_v10  ;;  %vm9973_vm3 = vcmp.lt.f32.partialorder %v9960_v4, 0.0  ;;  %v1571_v15 = vsel %vm1569_vm5, %v1570_v16, %v1568_v22 }
 0x185   :  { %vm1457_vm15 = vmxor %vm9973_vm3, %vm9972_vm1  ;;  %v1607_v51 = vmul.f32 0.1, %v1599_v48  ;;  %v1613_v49 = vmax.f32 %v1605_v30, -80.0  ;;  %v1628_v44 = vmul.f32 1.442695, %v1620_v21  ;;  %v1589_v14 = vmul.f32 %v5696_v60, %v1588_v34 }
 0x186   :  { %vm9974_vm2 = vmxor %vm9935_vm4, %vm5620_vm13  ;;  %v1614_v26 = vmax.f32 %v1606_v38, -80.0  ;;  %vm9977_vm8 = vcmp.lt.f32.partialorder %v9969_v12, 0.0  ;;  %vm1475_vm11 = vcmp.lt.f32.partialorder %v9281_v33, %v1467_v62  ;;  %v1578_v52 = vmul.f32 %v1577_v46, %v5435_v7 }
 0x187   :  { %vm5966_vm7 = vmxor %vm9974_vm2, %vm1298_vm14  ;;  %vm1579_vm13 = vcmp.eq.f32.partialorder %v5435_v7, inf  ;;  %v1601_v6 = vmul.f32 %v1571_v15, %v1497_v43  ;;  %v1608_v5 = vmul.f32 0.1, %v1600_v55  ;;  %vm9980_vm4 = vnez %v9923_v58 }
 0x188   :  { %vm1458_vm12 = vmxor %vm9977_vm8, %vm1450_vm6  ;;  %v1615_v33 = vmax.f32 %v1607_v51, -80.0  ;;  %v1621_v27 = vsub.f32 0.0, %v1613_v49  ;;  %2522 = vpow2.f32 %v1628_v44  ;;  %v1590_v24 = vmul.f32 %v1589_v14, %v5475_v37  ;;  %v2474_v44 = vld [vmem:[%s8321_s0 + $0x40] ss:$0 sm:$0xff] }
 0x189   :  { %vm5975_vm5 = vmand %vm1457_vm15, %vm1474_vm9  ;;  %v1622_v23 = vsub.f32 0.0, %v1614_v26  ;;  %v1580_v36 = vsel %vm1579_vm13, %v5435_v7, %v1578_v52  ;;  %vm1591_vm9 = vcmp.eq.f32.partialorder %v5475_v37, inf  ;;  %v1609_v58 = vmul.f32 0.1, %v1601_v6 }
 0x18a   :  { %vm9981_vm14 = vmxor %vm9967_vm0, %vm9980_vm4  ;;  %v1616_v42 = vmax.f32 %v1608_v5, -80.0  ;;  %vm1593_vm3 = vcmp.eq.f32.partialorder %v5475_v37, 0.0  ;;  %v1594_v41 = vand.u32 2147483648, %v5475_v37  ;;  %v1623_v61 = vsub.f32 0.0, %v1615_v33 }
 0x18b   :  { %vm5987_vm6 = vmxor %vm9981_vm14, %vm5943_vm10  ;;  %vm1581_vm10 = vcmp.eq.f32.partialorder %v5435_v7, 0.0  ;;  %v1630_v50 = vmul.f32 1.442695, %v1621_v27  ;;  %v1592_v7 = vsel %vm1591_vm9, %v5475_v37, %v1590_v24  ;;  %v1632_v39 = vmul.f32 1.442695, %v1622_v23 }
 0x18c   :  { %vm5991_vm2 = vmand %vm1458_vm12, %vm1475_vm11  ;;  %v1583_v11 = vsel %vm1581_vm10, %v1582_v8, %v1580_v36  ;;  %v1617_v47 = vmax.f32 %v1609_v58, -80.0  ;;  %v1624_v32 = vsub.f32 0.0, %v1616_v42  ;;  %v1595_v54 = vsel %vm1593_vm3, %v1594_v41, %v1592_v7 }
 0x18d   :  { %vm1490_vm0 = vmxor %vm5966_vm7, %vm5975_vm5  ;;  %2524 = vpow2.f32 %v1630_v50  ;;  %v1634_v1 = vmul.f32 1.442695, %v1623_v61  ;;  %v6045_v5 = vsub.f32 %v8993_v20, %v2474_v44  ;;  %v6052_v27 = vsub.f32 %v9000_v3, %v2474_v44 }
 0x18e   :  { %vm1491_vm1 = vmxor %vm5987_vm6, %vm5991_vm2  ;;  %v1498_v29 = vsel %vm1490_vm0, 1.0, %v2554_v19  ;;  %v2523_v2 = vpop.eup %2522  ;;  %2526 = vpow2.f32 %v1632_v39  ;;  %v1625_v25 = vsub.f32 0.0, %v1617_v47  ;;  %v1636_v9 = vmul.f32 1.442695, %v1624_v32 }
 0x18f   :  { %v1499_v0 = vsel %vm1491_vm1, 1.0, %v2554_v19  ;;  %v1602_v40 = vmul.f32 %v1583_v11, %v1498_v29  ;;  %v6013_v4 = vadd.f32 1.0, %v2523_v2  ;;  %2528 = vpow2.f32 %v1634_v1 }
 0x190   :  { %v1603_v17 = vmul.f32 %v1595_v54, %v1499_v0  ;;  %v1638_v48 = vmul.f32 1.442695, %v1625_v25  ;;  %v6055_v53 = vsub.f32 %v9002_v28, %v2474_v44  ;;  %v6063_v23 = vsub.f32 %v9626_v18, %v2474_v44 }
 0x191   :  { %v1610_v45 = vmul.f32 0.1, %v1602_v40  ;;  %2530 = vrcp.f32 %v6013_v4  ;;  %vm1657_vm7 = vweird.f32 %v6013_v4  ;;  %v1661_v8 = vand.u32 2147483647, %v6013_v4 }
 0x192   :  { %v1611_v59 = vmul.f32 0.1, %v1603_v17  ;;  %2532 = vpow2.f32 %v1636_v9  ;;  %v1663_v24 = vand.u32 2147483648, %v6013_v4  ;;  %v6066_v36 = vsub.f32 %v9870_v31, %v2474_v44 }
 0x193   :  { %v2525_v37 = vpop.eup %2524  ;;  %v1618_v19 = vmax.f32 %v1610_v45, -80.0  ;;  %2534 = vpow2.f32 %v1638_v48  ;;  %v6069_v58 = vsub.f32 %v9905_v63, %v2474_v44  ;;  %v6075_v29 = vsub.f32 %v9903_v10, %v2474_v44  ;;  %v6111_v48 = vld [vmem:[%s8321_s0 + $0x48] ss:$0 sm:$0xff] }
 0x194   :  { %v2527_v16 = vpop.eup %2526  ;;  %v6016_v30 = vadd.f32 1.0, %v2525_v37  ;;  %v1619_v38 = vmax.f32 %v1611_v59, -80.0  ;;  %v6086_v47 = vsub.f32 %v9295_v35, %v2474_v44  ;;  %vm6088_vm12 = vcmp.eq.f32.partialorder %v1661_v8, 8.507059e+37 }
 0x195   :  { %v2529_v21 = vpop.eup %2528  ;;  %v6018_v22 = vadd.f32 1.0, %v2527_v16  ;;  %v1626_v12 = vsub.f32 0.0, %v1618_v19  ;;  %v1664_v54 = vor.u32 1.1754944e-38, %v1663_v24  ;;  %vm1785_vm11 = vcmp.lt.f32.partialorder %v6045_v5, 0.0 }
 0x196   :  { %v6022_v62 = vadd.f32 1.0, %v2529_v21  ;;  %2536 = vrcp.f32 %v6016_v30  ;;  %v1627_v43 = vsub.f32 0.0, %v1619_v38  ;;  %v1678_v39 = vand.u32 2147483648, %v6016_v30 }
 0x197   :  { %v6020_v34 = vpop.eup %2530  ;;  %2538 = vrcp.f32 %v6018_v22  ;;  %v1640_v55 = vmul.f32 1.442695, %v1626_v12  ;;  %v1693_v0 = vand.u32 2147483648, %v6018_v22  ;;  %vm1786_vm5 = vcmp.lt.f32.partialorder %v6052_v27, 0.0 }
 0x198   :  { %v2533_v46 = vpop.eup %2532  ;;  %v1653_v13 = vmul.f32 %v6020_v34, %v6013_v4  ;;  %2540 = vrcp.f32 %v6022_v62  ;;  %v1642_v14 = vmul.f32 1.442695, %v1627_v43  ;;  %vm1658_vm15 = vweird.f32 %v6020_v34 }
 0x199   :  { %v6028_v15 = vadd.f32 1.0, %v2533_v46  ;;  %v2535_v51 = vpop.eup %2534  ;;  %2542 = vpow2.f32 %v1640_v55  ;;  %vm6079_vm8 = vmor %vm1657_vm7, %vm1658_vm15  ;;  %v1708_v1 = vand.u32 2147483648, %v6022_v62  ;;  %v6115_v38 = vor.u32 1.1754944e-38, %v1678_v39  ;;  %v10005_v39 = vld [vmem:[#allocation7_spill] sm:$0xff] }
 0x19a   :  { %v1654_v49 = vsub.f32 1.0, %v1653_v13  ;;  %v6038_v52 = vadd.f32 1.0, %v2535_v51  ;;  %v6118_v12 = vor.u32 1.1754944e-38, %v1693_v0  ;;  %v2476_v13 = vld [vmem:[%s8321_s0 + $0x38] ss:$0 sm:$0xff]  ;;  %vm1787_vm13 = vcmp.lt.f32.partialorder %v6055_v53, 0.0 }
 0x19b   :  { %9986 = vst [vmem:[#allocation28_spill] sm:$0xff] %v6028_v15  ;;  %2544 = vrcp.f32 %v6028_v15  ;;  %v1723_v25 = vand.u32 2147483648, %v6028_v15  ;;  %v6127_v55 = vor.u32 1.1754944e-38, %v1708_v1  ;;  %vm1788_vm4 = vcmp.lt.f32.partialorder %v6063_v23, 0.0 }
 0x19c   :  { %v6034_v57 = vpop.eup %2536  ;;  %9987 = vst [vmem:[#allocation86_spill] sm:$0xff] %v6038_v52  ;;  %v1655_v56 = vmul.f32 %v6020_v34, %v1654_v49  ;;  %2546 = vpow2.f32 %v1642_v14  ;;  %v1738_v9 = vand.u32 2147483648, %v6038_v52  ;;  %vm1789_vm14 = vcmp.lt.f32.partialorder %v6066_v36, 0.0  ;;  %v2484_v49 = vld [vmem:[%s8321_s0 + $0x3a] ss:$0 sm:$0xff] }
 0x19d   :  { %v6036_v26 = vpop.eup %2538  ;;  %v1668_v6 = vmul.f32 %v6034_v57, %v6016_v30  ;;  %2548 = vrcp.f32 %v6038_v52  ;;  %9996 = vst [vmem:[#allocation108_spill] sm:$0xff] %v6115_v38  ;;  %v6136_v14 = vor.u32 1.1754944e-38, %v1723_v25  ;;  %vm1794_vm10 = vcmp.gt.f32.partialorder %v6111_v48, %v8993_v20 }
 0x19e   :  { %v6047_v60 = vpop.eup %2540  ;;  %v1683_v33 = vmul.f32 %v6036_v26, %v6018_v22  ;;  %v1656_v41 = vadd.f32 %v6020_v34, %v1655_v56  ;;  %9997 = vst [vmem:[#allocation72_spill] sm:$0xff] %v6118_v12  ;;  %v6138_v56 = vor.u32 1.1754944e-38, %v1738_v9  ;;  %vm1795_vm1 = vcmp.gt.f32.partialorder %v6111_v48, %v9000_v3 }
 0x19f   :  { %9988 = vst [vmem:[#allocation87_spill] sm:$0xff] %v6047_v60  ;;  %v2543_v42 = vpop.eup %2542  ;;  %v1669_v61 = vsub.f32 1.0, %v1668_v6  ;;  %v1698_v50 = vmul.f32 %v6047_v60, %v6022_v62  ;;  %v2477_v6 = vld [vmem:[%s8321_s0 + $0x50] ss:$0 sm:$0xff]  ;;  %vm1796_vm3 = vcmp.gt.f32.partialorder %v6111_v48, %v9002_v28  ;;  %vm1797_vm7 = vcmp.gt.f32.partialorder %v6111_v48, %v9626_v18 }
 0x1a0   :  { %v1684_v2 = vsub.f32 1.0, %v1683_v33  ;;  %v6094_v17 = vadd.f32 1.0, %v2543_v42  ;;  %v1660_v37 = vsel %vm6079_vm8, %v6020_v34, %v1656_v41  ;;  %9999 = vst [vmem:[#allocation93_spill] sm:$0xff] %v6127_v55  ;;  %v2478_v33 = vld [vmem:[%s8321_s0 + $0x41] ss:$0 sm:$0xff]  ;;  %vm1798_vm15 = vcmp.gt.f32.partialorder %v6111_v48, %v9870_v31  ;;  %vm6229_vm8 = vmxor %vm1785_vm11, %vm1794_vm10 }
 0x1a1   :  { %v6077_v11 = vpop.eup %2544  ;;  %v1670_v16 = vmul.f32 %v6034_v57, %v1669_v61  ;;  %v1699_v59 = vsub.f32 1.0, %v1698_v50  ;;  %v6134_v44 = vsel %vm6088_vm12, %v1664_v54, %v1660_v37  ;;  %10001 = vst [vmem:[#allocation94_spill] sm:$0xff] %v6136_v14  ;;  %v6186_v0 = vmul.f32 %v2477_v6, %v6045_v5  ;;  %v6192_v54 = vld [vmem:[%s8321_s0 + $0x49] ss:$0 sm:$0xff]  ;;  %v2481_v5 = vld [vmem:[%s8321_s0 + $0x51] ss:$0 sm:$0xff]  ;;  %vm6249_vm11 = vmxor %vm1786_vm5, %vm1795_vm1 }
 0x1a2   :  { %9989 = vst [vmem:[#allocation27_spill] sm:$0xff] %v6077_v11  ;;  %v2547_v4 = vpop.eup %2546  ;;  %v6105_v19 = vmul.f32 %v6077_v11, %v6028_v15  ;;  %v1685_v34 = vmul.f32 %v6036_v26, %v1684_v2  ;;  %2550 = vrcp.f32 %v6094_v17  ;;  %v6183_v2 = vsub.f32 %v10005_v39, %v2476_v13  ;;  %vm6263_vm2 = vmxor %vm1787_vm13, %vm1796_vm3 }
 0x1a3   :  { %9994 = vst [vmem:[#allocation88_spill] sm:$0xff] %v6094_v17  ;;  %v6113_v21 = vpop.eup %2548  ;;  %v6125_v43 = vadd.f32 1.0, %v2547_v4  ;;  %v6149_v8 = vadd.f32 %v6034_v57, %v1670_v16  ;;  %v6152_v24 = vmul.f32 %v6047_v60, %v1699_v59  ;;  %v1842_v32 = vsub.f32 %v8993_v20, %v2478_v33  ;;  %vm6277_vm9 = vmxor %vm1788_vm4, %vm1797_vm7 }
 0x1a4   :  { %9995 = vst [vmem:[#allocation89_spill] sm:$0xff] %v6113_v21  ;;  %v6157_v41 = vmul.f32 %v6113_v21, %v6038_v52  ;;  %v6163_v61 = vadd.f32 %v6036_v26, %v1685_v34  ;;  %v6199_v1 = vmul.f32 %v2477_v6, %v6052_v27  ;;  %v1843_v4 = vsub.f32 %v9000_v3, %v2478_v33  ;;  %vm6304_vm4 = vmxor %vm1789_vm14, %vm1798_vm15 }
 0x1a5   :  { %9998 = vst [vmem:[#allocation64_spill] sm:$0xff] %v6125_v43  ;;  %v6205_v9 = vmul.f32 %v2477_v6, %v6055_v53  ;;  %v6208_v37 = vmul.f32 %v2477_v6, %v6063_v23  ;;  %v6211_v16 = vmul.f32 %v2477_v6, %v6066_v36  ;;  %v1844_v59 = vsub.f32 %v9002_v28, %v2478_v33  ;;  %v6297_v23 = vld [vmem:[%s8321_s0 + $0x42] ss:$0 sm:$0xff] }
 0x1a6   :  { %10000 = vst [vmem:[#allocation36_spill] sm:$0xff] %v6134_v44  ;;  %v6215_v34 = vmul.f32 %v2477_v6, %v6069_v58  ;;  %v6218_v13 = vmul.f32 %v2477_v6, %v6075_v29  ;;  %v6221_v7 = vmul.f32 %v2477_v6, %v6086_v47  ;;  %v1845_v50 = vsub.f32 %v9626_v18, %v2478_v33  ;;  %v2480_v6 = vld [vmem:[%s8321_s0 + $0x39] ss:$0 sm:$0xff] }
 0x1a7   :  { %10002 = vst [vmem:[#allocation26_spill] sm:$0xff] %v6138_v56  ;;  %v1846_v51 = vsub.f32 %v9870_v31, %v2478_v33  ;;  %vm1850_vm0 = vcmp.lt.f32.partialorder %v1842_v32, 0.0  ;;  %vm1859_vm12 = vcmp.gt.f32.partialorder %v6192_v54, %v8993_v20  ;;  %v1847_v45 = vsub.f32 %v9905_v63, %v2478_v33 }
 0x1a8   :  { %10003 = vst [vmem:[#allocation95_spill] sm:$0xff] %v6157_v41  ;;  %v6202_v25 = vpop.eup %2550  ;;  %vm1860_vm6 = vcmp.gt.f32.partialorder %v6192_v54, %v9000_v3  ;;  %v1848_v42 = vsub.f32 %v9903_v10, %v2478_v33  ;;  %v1849_v40 = vsub.f32 %v9295_v35, %v2478_v33  ;;  %vm6290_vm1 = vmxor %vm1850_vm0, %vm1859_vm12  ;;  %v10017_v33 = vmov 0 }
 0x1a9   :  { %10004 = vst [vmem:[#allocation77_spill] sm:$0xff] %v6163_v61  ;;  %v10018_v33 = vsel %vm6304_vm4, 4294967295, %v10017_v33  ;;  %vm10019_vm13 = vcmp.lt.f32.partialorder %v1843_v4, 0.0  ;;  %v6321_v36 = vsub.f32 %v10005_v39, %v2480_v6  ;;  %v1878_v44 = vmul.f32 %v2481_v5, %v1842_v32 }
 0x1aa   :  { %10006 = vst [vmem:[#allocation71_spill] sm:$0xff] %v6202_v25  ;;  %vm6316_vm3 = vmxor %vm10019_vm13, %vm1860_vm6  ;;  %vm10022_vm14 = vweird.f32 %v6034_v57  ;;  %vm10023_vm15 = vweird.f32 %v6016_v30  ;;  %v10024_v55 = vmov 0  ;;  %vm10026_vm7 = vcmp.gt.f32.partialorder %v6111_v48, %v9905_v63 }
 0x1ab   :  { %vm6327_vm0 = vmor %vm10023_vm15, %vm10022_vm14  ;;  %vm10027_vm6 = vcmp.lt.f32.partialorder %v6069_v58, 0.0  ;;  %v10028_v43 = vmov 0  ;;  %vm10030_vm14 = vcmp.gt.f32.partialorder %v6192_v54, %v9002_v28  ;;  %vm10031_vm15 = vcmp.lt.f32.partialorder %v1844_v59, 0.0 }
 0x1ac   :  { %v10025_v55 = vsel %vm6327_vm0, 4294967295, %v10024_v55  ;;  %vm6336_vm13 = vmxor %vm10027_vm6, %vm10026_vm7  ;;  %v1879_v58 = vmul.f32 %v2481_v5, %v1843_v4  ;;  %vm10034_vm7 = vcmp.gt.f32.partialorder %v6111_v48, %v9903_v10  ;;  %vm10035_vm6 = vcmp.lt.f32.partialorder %v6075_v29, 0.0 }
 0x1ad   :  { %v10029_v43 = vsel %vm6336_vm13, 4294967295, %v10028_v43  ;;  %vm6348_vm0 = vmxor %vm10031_vm15, %vm10030_vm14  ;;  %v10036_v6 = vmov 0  ;;  %vm10038_vm14 = vcmp.gt.f32.partialorder %v6192_v54, %v9626_v18  ;;  %vm10039_vm15 = vcmp.lt.f32.partialorder %v1845_v50, 0.0 }
 0x1ae   :  { %vm6357_vm13 = vmxor %vm10035_vm6, %vm10034_vm7  ;;  %v1880_v4 = vmul.f32 %v2481_v5, %v1844_v59  ;;  %v1881_v17 = vmul.f32 %v2481_v5, %v1845_v50  ;;  %vm10042_vm7 = vcmp.gt.f32.partialorder %v6111_v48, %v9295_v35  ;;  %vm10043_vm6 = vcmp.lt.f32.partialorder %v6086_v47, 0.0  ;;  %v6395_v48 = vld [vmem:[%s8321_s0 + $0x4a] ss:$0 sm:$0xff] }
 0x1af   :  { %v10037_v6 = vsel %vm6357_vm13, 4294967295, %v10036_v6  ;;  %vm6367_vm10 = vmxor %vm10039_vm15, %vm10038_vm14  ;;  %v10044_v29 = vmov 0  ;;  %vm10046_vm14 = vcmp.gt.f32.partialorder %v6192_v54, %v9870_v31  ;;  %vm10047_vm15 = vcmp.lt.f32.partialorder %v1846_v51, 0.0 }
 0x1b0   :  { %vm6376_vm13 = vmxor %vm10043_vm6, %vm10042_vm7  ;;  %v10048_v59 = vmov 0  ;;  %v1882_v50 = vmul.f32 %v2481_v5, %v1846_v51  ;;  %v1915_v47 = vsub.f32 %v8993_v20, %v6297_v23  ;;  %vm10050_vm6 = vcmp.gt.f32.partialorder %v6192_v54, %v9905_v63 }
 0x1b1   :  { %v10045_v29 = vsel %vm6376_vm13, 4294967295, %v10044_v29  ;;  %vm6386_vm4 = vmxor %vm10047_vm15, %vm10046_vm14  ;;  %vm10051_vm12 = vcmp.lt.f32.partialorder %v1847_v45, 0.0  ;;  %v10052_v21 = vmov 0  ;;  %v1883_v51 = vmul.f32 %v2481_v5, %v1847_v45 }
 0x1b2   :  { %v10049_v59 = vsel %vm6386_vm4, 4294967295, %v10048_v59  ;;  %vm6403_vm14 = vmxor %vm10051_vm12, %vm10050_vm6  ;;  %v1916_v52 = vsub.f32 %v9000_v3, %v6297_v23  ;;  %vm10054_vm4 = vcmp.gt.f32.partialorder %v6192_v54, %v9903_v10  ;;  %vm10055_vm12 = vcmp.lt.f32.partialorder %v1848_v42, 0.0 }
 0x1b3   :  { %v10053_v21 = vsel %vm6403_vm14, 4294967295, %v10052_v21  ;;  %vm6418_vm6 = vmxor %vm10055_vm12, %vm10054_vm4  ;;  %v1884_v45 = vmul.f32 %v2481_v5, %v1848_v42  ;;  %v1917_v12 = vsub.f32 %v9002_v28, %v6297_v23  ;;  %vm10058_vm5 = vcmp.gt.f32.partialorder %v6192_v54, %v9295_v35 }
 0x1b4   :  { %vm10059_vm13 = vcmp.lt.f32.partialorder %v1849_v40, 0.0  ;;  %v1885_v38 = vmul.f32 %v2481_v5, %v1849_v40  ;;  %v1918_v42 = vsub.f32 %v9626_v18, %v6297_v23  ;;  %vm10062_vm7 = vcmp.lt.f32.partialorder %v6183_v2, %v6186_v0 }
 0x1b5   :  { %vm6429_vm14 = vmxor %vm10059_vm13, %vm10058_vm5  ;;  %v10063_v54 = vmov 0  ;;  %vm10065_vm13 = vcmp.lt.f32.partialorder %v6321_v36, %v1878_v44  ;;  %v10066_v40 = vmov 0  ;;  %v1919_v5 = vsub.f32 %v9870_v31, %v6297_v23  ;;  %v6465_v44 = vld [vmem:[%s8321_s0 + $0x52] ss:$0 sm:$0xff] }
 0x1b6   :  { %vm6442_vm15 = vmand %vm6229_vm8, %vm10062_vm7  ;;  %v10069_v56 = vmov 0  ;;  %vm10071_vm5 = vcmp.lt.f32.partialorder %v6321_v36, %v1879_v58  ;;  %v10072_v0 = vmov 0  ;;  %v1920_v41 = vsub.f32 %v9905_v63, %v6297_v23 }
 0x1b7   :  { %v10064_v54 = vsel %vm6442_vm15, 4294967295, %v10063_v54  ;;  %vm6451_vm4 = vmand %vm6290_vm1, %vm10065_vm13  ;;  %vm10068_vm1 = vcmp.lt.f32.partialorder %v6183_v2, %v6199_v1  ;;  %v10075_v46 = vmov 0  ;;  %v10078_v14 = vmov 0 }
 0x1b8   :  { %v10067_v40 = vsel %vm6451_vm4, 4294967295, %v10066_v40  ;;  %vm6472_vm7 = vmand %vm6249_vm11, %vm10068_vm1  ;;  %vm10074_vm1 = vcmp.lt.f32.partialorder %v6183_v2, %v6205_v9  ;;  %v1921_v1 = vsub.f32 %v9903_v10, %v6297_v23  ;;  %v10081_v9 = vmov 0 }
 0x1b9   :  { %v10070_v56 = vsel %vm6472_vm7, 4294967295, %v10069_v56  ;;  %vm6481_vm12 = vmand %vm6316_vm3, %vm10071_vm5  ;;  %vm10077_vm5 = vcmp.lt.f32.partialorder %v6321_v36, %v1880_v4  ;;  %v10084_v27 = vmov 0  ;;  %v1922_v32 = vsub.f32 %v9295_v35, %v6297_v23 }
 0x1ba   :  { %v10073_v0 = vsel %vm6481_vm12, 4294967295, %v10072_v0  ;;  %vm6494_vm13 = vmand %vm6263_vm2, %vm10074_vm1  ;;  %vm10080_vm1 = vcmp.lt.f32.partialorder %v6183_v2, %v6208_v37  ;;  %vm10087_vm2 = vcmp.lt.f32.partialorder %v1915_v47, 0.0  ;;  %v10092_v25 = vmov 0 }
 0x1bb   :  { %v10076_v46 = vsel %vm6494_vm13, 4294967295, %v10075_v46  ;;  %vm6503_vm7 = vmand %vm6348_vm0, %vm10077_vm5  ;;  %vm10083_vm5 = vcmp.lt.f32.partialorder %v6321_v36, %v1881_v17  ;;  %v6544_v17 = vld [vmem:[%s8321_s0 + $0x43] ss:$0 sm:$0xff]  ;;  %v10097_v53 = vmov 0  ;;  %vm10100_vm13 = vcmp.gt.f32.partialorder %v6395_v48, %v9000_v3 }
 0x1bc   :  { %v10079_v14 = vsel %vm6503_vm7, 4294967295, %v10078_v14  ;;  %vm6516_vm3 = vmand %vm6277_vm9, %vm10080_vm1  ;;  %vm10086_vm1 = vcmp.gt.f32.partialorder %v6395_v48, %v8993_v20  ;;  %vm10095_vm9 = vcmp.lt.f32.partialorder %v6321_v36, %v1882_v50  ;;  %vm10101_vm7 = vcmp.lt.f32.partialorder %v1916_v52, 0.0 }
 0x1bd   :  { %v10082_v9 = vsel %vm6516_vm3, 4294967295, %v10081_v9  ;;  %vm6525_vm11 = vmand %vm6367_vm10, %vm10083_vm5  ;;  %vm10090_vm10 = vcmp.lt.f32.partialorder %v6183_v2, %v6211_v16  ;;  %vm10091_vm5 = vnez %v10018_v33  ;;  %v10102_v16 = vmov 0 }
 0x1be   :  { %v10085_v27 = vsel %vm6525_vm11, 4294967295, %v10084_v27  ;;  %vm6537_vm0 = vmxor %vm10087_vm2, %vm10086_vm1  ;;  %vm10096_vm2 = vnez %v10049_v59  ;;  %v6574_v23 = vsub.f32 %v10005_v39, %v2484_v49  ;;  %v1951_v33 = vmul.f32 %v6465_v44, %v1915_v47 }
 0x1bf   :  { %vm6551_vm8 = vmand %vm10091_vm5, %vm10090_vm10  ;;  %vm10105_vm5 = vcmp.lt.f32.partialorder %v6183_v2, %v6215_v34  ;;  %v10107_v4 = vmov 0  ;;  %v10111_v59 = vmov 0  ;;  %v1952_v34 = vmul.f32 %v6465_v44, %v1916_v52  ;;  %v6822_v52 = vld [vmem:[%s8321_s0 + $0x44] ss:$0 sm:$0xff] }
 0x1c0   :  { %v10093_v25 = vsel %vm6551_vm8, 4294967295, %v10092_v25  ;;  %vm6559_vm1 = vmand %vm10096_vm2, %vm10095_vm9  ;;  %vm10106_vm2 = vnez %v10029_v43  ;;  %vm10121_vm8 = vcmp.lt.f32.partialorder %v6321_v36, %v1884_v45  ;;  %v10122_v50 = vmov 0 }
 0x1c1   :  { %10094 = vst [vmem:[#allocation68_spill] sm:$0xff] %v10093_v25  ;;  %v10098_v53 = vsel %vm6559_vm1, 4294967295, %v10097_v53  ;;  %vm6569_vm10 = vmxor %vm10101_vm7, %vm10100_vm13  ;;  %vm10109_vm7 = vcmp.lt.f32.partialorder %v6321_v36, %v1883_v51  ;;  %vm10110_vm13 = vnez %v10053_v21  ;;  %vm10113_vm1 = vcmp.gt.f32.partialorder %v6395_v48, %v9002_v28 }
 0x1c2   :  { %10099 = vst [vmem:[#allocation63_spill] sm:$0xff] %v10098_v53  ;;  %v10103_v16 = vsel %vm6569_vm10, 4294967295, %v10102_v16  ;;  %vm6586_vm3 = vmand %vm10106_vm2, %vm10105_vm5  ;;  %vm10114_vm10 = vcmp.lt.f32.partialorder %v1917_v12, 0.0  ;;  %vm10117_vm2 = vcmp.lt.f32.partialorder %v6183_v2, %v6218_v13  ;;  %v10119_v21 = vmov 0  ;;  %v10195_v53 = vld [vmem:[#allocation95_spill] sm:$0xff] }
 0x1c3   :  { %v10108_v4 = vsel %vm6586_vm3, 4294967295, %v10107_v4  ;;  %vm6594_vm11 = vmand %vm10110_vm13, %vm10109_vm7  ;;  %vm10118_vm7 = vnez %v10037_v6  ;;  %vm10124_vm3 = vcmp.gt.f32.partialorder %v6395_v48, %v9626_v18  ;;  %v1953_v13 = vmul.f32 %v6465_v44, %v1917_v12 }
 0x1c4   :  { %v10112_v59 = vsel %vm6594_vm11, 4294967295, %v10111_v59  ;;  %vm6604_vm5 = vmxor %vm10114_vm10, %vm10113_vm1  ;;  %vm10125_vm11 = vcmp.lt.f32.partialorder %v1918_v42, 0.0  ;;  %v1954_v15 = vmul.f32 %v6465_v44, %v1918_v42  ;;  %v10130_v6 = vmov 0 }
 0x1c5   :  { %vm6614_vm13 = vmand %vm10118_vm7, %vm10117_vm2  ;;  %vm10132_vm1 = vcmp.lt.f32.partialorder %v6321_v36, %v1885_v38  ;;  %v10133_v47 = vmov 0  ;;  %v1955_v38 = vmul.f32 %v6465_v44, %v1919_v5  ;;  %v1988_v61 = vsub.f32 %v8993_v20, %v6544_v17 }
 0x1c6   :  { %v10120_v21 = vsel %vm6614_vm13, 4294967295, %v10119_v21  ;;  %vm6622_vm9 = vmand %vm6418_vm6, %vm10121_vm8  ;;  %vm10128_vm6 = vcmp.lt.f32.partialorder %v6183_v2, %v6221_v7  ;;  %vm10129_vm8 = vnez %v10045_v29  ;;  %vm10135_vm13 = vcmp.gt.f32.partialorder %v6395_v48, %v9870_v31  ;;  %v6671_v7 = vld [vmem:[%s8321_s0 + $0x4b] ss:$0 sm:$0xff] }
 0x1c7   :  { %v10123_v50 = vsel %vm6622_vm9, 4294967295, %v10122_v50  ;;  %vm6632_vm2 = vmxor %vm10125_vm11, %vm10124_vm3  ;;  %vm10136_vm9 = vcmp.lt.f32.partialorder %v1919_v5, 0.0  ;;  %v10139_v2 = vand.u32 2147483647, %v6016_v30  ;;  %v10140_v36 = vmov 0 }
 0x1c8   :  { %vm6643_vm7 = vmand %vm10129_vm8, %vm10128_vm6  ;;  %v6681_v29 = vadd.f32 %v6047_v60, %v6152_v24  ;;  %vm10144_vm8 = vcmp.lt.f32.partialorder %v1920_v41, 0.0  ;;  %v1956_v30 = vmul.f32 %v6465_v44, %v1920_v41  ;;  %v1989_v24 = vsub.f32 %v9000_v3, %v6544_v17 }
 0x1c9   :  { %v10131_v6 = vsel %vm6643_vm7, 4294967295, %v10130_v6  ;;  %vm6651_vm11 = vmand %vm6429_vm14, %vm10132_vm1  ;;  %vm6675_vm14 = vcmp.eq.f32.partialorder %v10139_v2, 8.507059e+37  ;;  %vm10143_vm1 = vcmp.gt.f32.partialorder %v6395_v48, %v9905_v63  ;;  %v10149_v45 = vmov 0 }
 0x1ca   :  { %v10134_v47 = vsel %vm6651_vm11, 4294967295, %v10133_v47  ;;  %vm6661_vm6 = vmxor %vm10136_vm9, %vm10135_vm13  ;;  %v10141_v36 = vsel %vm6675_vm14, 4294967295, %v10140_v36  ;;  %10142 = vst [vmem:[#allocation78_spill] sm:$0xff] %v6681_v29  ;;  %vm10147_vm14 = vweird.f32 %v6036_v26  ;;  %vm10148_vm9 = vweird.f32 %v6018_v22 }
 0x1cb   :  { %vm6689_vm3 = vmxor %vm10144_vm8, %vm10143_vm1  ;;  %v10151_v42 = vsub.f32 1.0, %v6105_v19  ;;  %vm10153_vm1 = vcmp.gt.f32.partialorder %v6395_v48, %v9903_v10  ;;  %vm10154_vm8 = vcmp.lt.f32.partialorder %v1921_v1, 0.0  ;;  %v1957_v49 = vmul.f32 %v6465_v44, %v1921_v1  ;;  %v6932_v19 = vld [vmem:[%s8321_s0 + $0x4c] ss:$0 sm:$0xff] }
 0x1cc   :  { %vm6701_vm13 = vmor %vm10148_vm9, %vm10147_vm14  ;;  %v1990_v2 = vsub.f32 %v9002_v28, %v6544_v17  ;;  %vm10157_vm9 = vcmp.gt.f32.partialorder %v6395_v48, %v9295_v35  ;;  %v1991_v1 = vsub.f32 %v9626_v18, %v6544_v17  ;;  %v10162_v48 = vmov 0 }
 0x1cd   :  { %v10150_v45 = vsel %vm6701_vm13, 4294967295, %v10149_v45  ;;  %v6708_v5 = vmul.f32 %v6077_v11, %v10151_v42  ;;  %vm6714_vm10 = vmxor %vm10154_vm8, %vm10153_vm1  ;;  %vm10158_vm13 = vcmp.lt.f32.partialorder %v1922_v32, 0.0  ;;  %v1958_v42 = vmul.f32 %v6465_v44, %v1922_v32  ;;  %v2488_v32 = vld [vmem:[%s8321_s0 + $0x3b] ss:$0 sm:$0xff] }
 0x1ce   :  { %vm6726_vm7 = vmxor %vm10158_vm13, %vm10157_vm9  ;;  %vm10161_vm13 = vcmp.lt.f32.partialorder %v6574_v23, %v1951_v33  ;;  %v1992_v44 = vsub.f32 %v9870_v31, %v6544_v17  ;;  %v6758_v33 = vld [vmem:[%s8321_s0 + $0x53] ss:$0 sm:$0xff]  ;;  %vm10165_vm11 = vcmp.lt.f32.partialorder %v6574_v23, %v1952_v34  ;;  %vm10166_vm8 = vnez %v10103_v16 }
 0x1cf   :  { %10152 = vst [vmem:[#allocation53_spill] sm:$0xff] %v6708_v5  ;;  %vm6744_vm9 = vmand %vm6537_vm0, %vm10161_vm13  ;;  %v1993_v58 = vsub.f32 %v9905_v63, %v6544_v17  ;;  %vm10171_vm0 = vcmp.lt.f32.partialorder %v6574_v23, %v1953_v13  ;;  %v10172_v16 = vmov 0  ;;  %v1994_v34 = vsub.f32 %v9903_v10, %v6544_v17 }
 0x1d0   :  { %v10163_v48 = vsel %vm6744_vm9, 4294967295, %v10162_v48  ;;  %vm6769_vm1 = vmand %vm10166_vm8, %vm10165_vm11  ;;  %vm10176_vm13 = vcmp.lt.f32.partialorder %v6574_v23, %v1954_v15  ;;  %v10177_v43 = vmov 0  ;;  %v1995_v13 = vsub.f32 %v9295_v35, %v6544_v17  ;;  %v10287_v15 = vld [vmem:[#allocation63_spill] sm:$0xff] }
 0x1d1   :  { %vm6786_vm11 = vmand %vm6604_vm5, %vm10171_vm0  ;;  %vm10179_vm12 = vcmp.gt.f32.partialorder %v6671_v7, %v8993_v20  ;;  %vm10180_vm4 = vcmp.lt.f32.partialorder %v1988_v61, 0.0  ;;  %vm10185_vm8 = vcmp.lt.f32.partialorder %v6574_v23, %v1955_v38  ;;  %v10186_v17 = vmov 0 }
 0x1d2   :  { %v10173_v16 = vsel %vm6786_vm11, 4294967295, %v10172_v16  ;;  %vm6803_vm5 = vmand %vm6632_vm2, %vm10176_vm13  ;;  %vm10188_vm14 = vcmp.gt.f32.partialorder %v6671_v7, %v9000_v3  ;;  %v6847_v38 = vsub.f32 %v10005_v39, %v2488_v32  ;;  %v2024_v12 = vmul.f32 %v6758_v33, %v1988_v61 }
 0x1d3   :  { %v10178_v43 = vsel %vm6803_vm5, 4294967295, %v10177_v43  ;;  %vm6815_vm9 = vmxor %vm10180_vm4, %vm10179_vm12  ;;  %vm10189_vm5 = vcmp.lt.f32.partialorder %v1989_v24, 0.0  ;;  %v10192_v29 = vand.u32 2147483647, %v6018_v22  ;;  %v10193_v11 = vmov 0 }
 0x1d4   :  { %vm6832_vm15 = vmand %vm6661_vm6, %vm10185_vm8  ;;  %vm10198_vm0 = vcmp.lt.f32.partialorder %v6574_v23, %v1956_v30  ;;  %v10199_v32 = vmov 0  ;;  %vm10202_vm13 = vcmp.lt.f32.partialorder %v1990_v2, 0.0  ;;  %v2025_v61 = vmul.f32 %v6758_v33, %v1989_v24 }
 0x1d5   :  { %v10187_v17 = vsel %vm6832_vm15, 4294967295, %v10186_v17  ;;  %vm6842_vm11 = vmxor %vm10189_vm5, %vm10188_vm14  ;;  %vm6852_vm6 = vcmp.eq.f32.partialorder %v10192_v29, 8.507059e+37  ;;  %vm10207_vm12 = vcmp.lt.f32.partialorder %v6574_v23, %v1957_v49  ;;  %v10208_v29 = vmov 0 }
 0x1d6   :  { %v10194_v11 = vsel %vm6852_vm6, 4294967295, %v10193_v11  ;;  %vm6865_vm4 = vmand %vm6689_vm3, %vm10198_vm0  ;;  %vm10201_vm6 = vcmp.gt.f32.partialorder %v6671_v7, %v9002_v28  ;;  %vm10211_vm14 = vcmp.lt.f32.partialorder %v1991_v1, 0.0  ;;  %v2026_v30 = vmul.f32 %v6758_v33, %v1990_v2 }
 0x1d7   :  { %v10200_v32 = vsel %vm6865_vm4, 4294967295, %v10199_v32  ;;  %vm6875_vm15 = vmxor %vm10202_vm13, %vm10201_vm6  ;;  %vm10210_vm6 = vcmp.gt.f32.partialorder %v6671_v7, %v9626_v18  ;;  %v2027_v24 = vmul.f32 %v6758_v33, %v1991_v1  ;;  %vm10216_vm8 = vcmp.lt.f32.partialorder %v6574_v23, %v1958_v42  ;;  %v10225_v1 = vld [vmem:[#allocation108_spill] sm:$0xff] }
 0x1d8   :  { %vm6888_vm2 = vmand %vm6714_vm10, %vm10207_vm12  ;;  %v10217_v41 = vmov 0  ;;  %vm10219_vm5 = vcmp.gt.f32.partialorder %v6671_v7, %v9870_v31  ;;  %vm10220_vm3 = vcmp.lt.f32.partialorder %v1992_v44, 0.0  ;;  %v2028_v23 = vmul.f32 %v6758_v33, %v1992_v44 }
 0x1d9   :  { %v10209_v29 = vsel %vm6888_vm2, 4294967295, %v10208_v29  ;;  %vm6898_vm4 = vmxor %vm10211_vm14, %vm10210_vm6  ;;  %v2061_v2 = vsub.f32 %v8993_v20, %v6822_v52  ;;  %v10230_v44 = vmov 0  ;;  %vm10232_vm14 = vcmp.gt.f32.partialorder %v6671_v7, %v9905_v63 }
 0x1da   :  { %vm6912_vm13 = vmand %vm6726_vm7, %vm10216_vm8  ;;  %vm10223_vm7 = vnez %v10025_v55  ;;  %vm10226_vm8 = vnez %v10141_v36  ;;  %vm10233_vm6 = vcmp.lt.f32.partialorder %v1993_v58, 0.0  ;;  %v10234_v55 = vmov 0  ;;  %v10236_v36 = vld [vmem:[#allocation77_spill] sm:$0xff] }
 0x1db   :  { %v10218_v41 = vsel %vm6912_vm13, 4294967295, %v10217_v41  ;;  %vm6922_vm2 = vmxor %vm10220_vm3, %vm10219_vm5  ;;  %v10224_v42 = vsel %vm10223_vm7, %v6034_v57, %v6149_v8  ;;  %vm10228_vm5 = vweird.f32 %v6047_v60  ;;  %vm10229_vm3 = vweird.f32 %v6022_v62 }
 0x1dc   :  { %v6942_v25 = vsel %vm10226_vm8, %v10225_v1, %v10224_v42  ;;  %vm6948_vm0 = vmor %vm10229_vm3, %vm10228_vm5  ;;  %v2029_v57 = vmul.f32 %v6758_v33, %v1993_v58  ;;  %vm2032_vm7 = vcmp.lt.f32.partialorder %v6847_v38, %v2024_v12  ;;  %v2062_v8 = vsub.f32 %v9000_v3, %v6822_v52 }
 0x1dd   :  { %10227 = vst [vmem:[#allocation45_spill] sm:$0xff] %v6942_v25  ;;  %v10231_v44 = vsel %vm6948_vm0, 4294967295, %v10230_v44  ;;  %vm6956_vm10 = vmxor %vm10233_vm6, %vm10232_vm14  ;;  %vm10237_vm8 = vnez %v10150_v45  ;;  %vm10238_vm5 = vcmp.gt.f32.partialorder %v6671_v7, %v9903_v10  ;;  %vm10239_vm3 = vcmp.lt.f32.partialorder %v1994_v34, 0.0 }
 0x1de   :  { %v10235_v55 = vsel %vm6956_vm10, 4294967295, %v10234_v55  ;;  %v1690_v42 = vsel %vm10237_vm8, %v6036_v26, %v10236_v36  ;;  %vm6972_vm14 = vmxor %vm10239_vm3, %vm10238_vm5  ;;  %v10240_v1 = vmov 0  ;;  %v2030_v58 = vmul.f32 %v6758_v33, %v1994_v34 }
 0x1df   :  { %v10241_v1 = vsel %vm6972_vm14, 4294967295, %v10240_v1  ;;  %v2063_v12 = vsub.f32 %v9002_v28, %v6822_v52  ;;  %vm10242_vm0 = vcmp.gt.f32.partialorder %v6671_v7, %v9295_v35  ;;  %vm10243_vm12 = vcmp.lt.f32.partialorder %v1995_v13, 0.0  ;;  %vm7007_vm5 = vmand %vm6815_vm9, %vm2032_vm7 }
 0x1e0   :  { %vm6984_vm8 = vmxor %vm10243_vm12, %vm10242_vm0  ;;  %v10244_v26 = vmov 0  ;;  %v2031_v45 = vmul.f32 %v6758_v33, %v1995_v13  ;;  %v2064_v34 = vsub.f32 %v9626_v18, %v6822_v52  ;;  %vm10246_vm6 = vnez %v10163_v48 }
 0x1e1   :  { %v10245_v26 = vsel %vm6984_vm8, 4294967295, %v10244_v26  ;;  %vm10247_vm13 = vnez %v10064_v54  ;;  %vm10248_vm14 = vnez %v10067_v40  ;;  %v10252_v33 = vmov 0  ;;  %v2492_v54 = vld [vmem:[%s8321_s0 + $0x3c] ss:$0 sm:$0xff]  ;;  %v7021_v40 = vld [vmem:[%s8321_s0 + $0x54] ss:$0 sm:$0xff] }
 0x1e2   :  { %vm10249_vm10 = vmxor %vm10247_vm13, %vm10248_vm14  ;;  %v10253_v33 = vsel %vm7007_vm5, 4294967295, %v10252_v33  ;;  %v2065_v48 = vsub.f32 %v9870_v31, %v6822_v52  ;;  %vm10254_vm9 = vnez %v10070_v56  ;;  %vm10255_vm13 = vnez %v10073_v0 }
 0x1e3   :  { %vm7000_vm0 = vmxor %vm10249_vm10, %vm10246_vm6  ;;  %v10257_v5 = vmov 0  ;;  %vm10259_vm6 = vcmp.lt.f32.partialorder %v6847_v38, %v2025_v61  ;;  %v10260_v13 = vmov 0  ;;  %v2066_v56 = vsub.f32 %v9905_v63, %v6822_v52 }
 0x1e4   :  { %vm10256_vm10 = vmxor %vm10254_vm9, %vm10255_vm13  ;;  %vm10262_vm9 = vnez %v10173_v16  ;;  %vm10263_vm13 = vnez %v10076_v46  ;;  %v10266_v0 = vmov 0  ;;  %v10269_v37 = vmov 0 }
 0x1e5   :  { %vm7030_vm7 = vmxor %vm10256_vm10, %vm6769_vm1  ;;  %vm10264_vm10 = vnez %v10079_v14  ;;  %v2067_v46 = vsub.f32 %v9903_v10, %v6822_v52  ;;  %v10275_v14 = vmov 0  ;;  %v10278_v16 = vmov 0 }
 0x1e6   :  { %v10258_v5 = vsel %vm7030_vm7, 4294967295, %v10257_v5  ;;  %vm7039_vm12 = vmand %vm6842_vm11, %vm10259_vm6  ;;  %vm10268_vm6 = vcmp.lt.f32.partialorder %v6847_v38, %v2026_v30  ;;  %v10290_v22 = vmov 0  ;;  %v10293_v61 = vmov 0 }
 0x1e7   :  { %v10261_v13 = vsel %vm7039_vm12, 4294967295, %v10260_v13  ;;  %vm10265_vm14 = vmxor %vm10263_vm13, %vm10264_vm10  ;;  %vm10272_vm13 = vnez %v10082_v9  ;;  %vm10273_vm10 = vnez %v10085_v27  ;;  %v2068_v9 = vsub.f32 %v9295_v35, %v6822_v52  ;;  %v10285_v52 = vld [vmem:[#allocation68_spill] sm:$0xff] }
 0x1e8   :  { %vm7054_vm8 = vmxor %vm10265_vm14, %vm10262_vm9  ;;  %vm10271_vm9 = vnez %v10178_v43  ;;  %v7106_v43 = vld [vmem:[%s8321_s0 + $0x45] ss:$0 sm:$0xff]  ;;  %v7138_v51 = vsub.f32 %v10005_v39, %v2492_v54  ;;  %v2097_v30 = vmul.f32 %v7021_v40, %v2061_v2  ;;  %v10342_v36 = vmov 0 }
 0x1e9   :  { %v10267_v0 = vsel %vm7054_vm8, 4294967295, %v10266_v0  ;;  %vm7063_vm3 = vmand %vm6875_vm15, %vm10268_vm6  ;;  %vm10277_vm6 = vcmp.lt.f32.partialorder %v6847_v38, %v2027_v24  ;;  %vm10288_vm15 = vnez %v10287_v15  ;;  %v10299_v24 = vld [vmem:[#allocation72_spill] sm:$0xff]  ;;  %v2103_v54 = vmul.f32 %v7021_v40, %v2067_v46 }
 0x1ea   :  { %v10270_v37 = vsel %vm7063_vm3, 4294967295, %v10269_v37  ;;  %vm10274_vm11 = vmxor %vm10272_vm13, %vm10273_vm10  ;;  %vm10281_vm13 = vcmp.lt.f32.partialorder %v2061_v2, 0.0  ;;  %vm10295_vm3 = vcmp.gt.f32.partialorder %v6932_v19, %v9000_v3  ;;  %v10310_v2 = vmov 0 }
 0x1eb   :  { %vm7078_vm8 = vmxor %vm10274_vm11, %vm10271_vm9  ;;  %vm10280_vm9 = vcmp.gt.f32.partialorder %v6932_v19, %v8993_v20  ;;  %v2104_v15 = vmul.f32 %v7021_v40, %v2068_v9  ;;  %v10372_v27 = vmov 0  ;;  %v10399_v25 = vand.u32 2147483647, %v6022_v62 }
 0x1ec   :  { %v10276_v14 = vsel %vm7078_vm8, 4294967295, %v10275_v14  ;;  %vm7087_vm1 = vmand %vm6898_vm4, %vm10277_vm6  ;;  %vm10284_vm4 = vnez %v10187_v17  ;;  %vm10286_vm6 = vnez %v10285_v52  ;;  %v10297_v17 = vmov 0 }
 0x1ed   :  { %v10279_v16 = vsel %vm7087_vm1, 4294967295, %v10278_v16  ;;  %vm7099_vm10 = vmxor %vm10281_vm13, %vm10280_vm9  ;;  %vm10292_vm9 = vcmp.lt.f32.partialorder %v6847_v38, %v2028_v23  ;;  %v10306_v23 = vmov 0  ;;  %vm10308_vm8 = vcmp.lt.f32.partialorder %v6847_v38, %v2029_v57 }
 0x1ee   :  { %vm10289_vm14 = vmxor %vm10286_vm6, %vm10288_vm15  ;;  %vm10296_vm15 = vcmp.lt.f32.partialorder %v2062_v8, 0.0  ;;  %vm10303_vm6 = vnez %v10108_v4  ;;  %vm10309_vm1 = vnez %v10235_v55  ;;  %v2098_v4 = vmul.f32 %v7021_v40, %v2062_v8 }
 0x1ef   :  { %vm7115_vm11 = vmxor %vm10289_vm14, %vm10284_vm4  ;;  %vm10302_vm4 = vnez %v10200_v32  ;;  %v10317_v32 = vld [vmem:[#allocation27_spill] sm:$0xff]  ;;  %v10322_v55 = vmov 0  ;;  %v10326_v57 = vmov 0  ;;  %v10337_v8 = vmov 0 }
 0x1f0   :  { %v10291_v22 = vsel %vm7115_vm11, 4294967295, %v10290_v22  ;;  %vm7123_vm13 = vmand %vm6922_vm2, %vm10292_vm9  ;;  %vm10300_vm2 = vnez %v10194_v11  ;;  %vm10304_vm9 = vnez %v10112_v59  ;;  %v10314_v11 = vmov 0  ;;  %v10316_v59 = vld [vmem:[#allocation28_spill] sm:$0xff] }
 0x1f1   :  { %v10294_v61 = vsel %vm7123_vm13, 4294967295, %v10293_v61  ;;  %vm7133_vm14 = vmxor %vm10296_vm15, %vm10295_vm3  ;;  %v7144_v49 = vsel %vm10300_vm2, %v10299_v24, %v1690_v42  ;;  %vm10320_vm2 = vnez %v10123_v50  ;;  %v2099_v50 = vmul.f32 %v7021_v40, %v2063_v12  ;;  %v10365_v24 = vld [vmem:[#allocation86_spill] sm:$0xff] }
 0x1f2   :  { %v10298_v17 = vsel %vm7133_vm14, 4294967295, %v10297_v17  ;;  %10301 = vst [vmem:[#allocation48_spill] sm:$0xff] %v7144_v49  ;;  %vm10305_vm3 = vmxor %vm10303_vm6, %vm10304_vm9  ;;  %vm10312_vm14 = vcmp.gt.f32.partialorder %v6932_v19, %v9002_v28  ;;  %vm10313_vm6 = vcmp.lt.f32.partialorder %v2063_v12, 0.0  ;;  %v2102_v12 = vmul.f32 %v7021_v40, %v2066_v56 }
 0x1f3   :  { %vm7153_vm15 = vmxor %vm10305_vm3, %vm10302_vm4  ;;  %vm10319_vm3 = vnez %v10120_v21  ;;  %v10331_v21 = vmov 0  ;;  %v10363_v52 = vmov 0  ;;  %vm10376_vm7 = vcmp.lt.f32.partialorder %v7138_v51, %v2099_v50 }
 0x1f4   :  { %v10307_v23 = vsel %vm7153_vm15, 4294967295, %v10306_v23  ;;  %vm7161_vm11 = vmand %vm10309_vm1, %vm10308_vm8  ;;  %vm10318_vm1 = vnez %v10209_v29  ;;  %v2100_v29 = vmul.f32 %v7021_v40, %v2064_v34  ;;  %v2141_v50 = vsub.f32 %v9295_v35, %v7106_v43 }
 0x1f5   :  { %v10311_v2 = vsel %vm7161_vm11, 4294967295, %v10310_v2  ;;  %vm7171_vm4 = vmxor %vm10313_vm6, %vm10312_vm14  ;;  %vm10324_vm14 = vcmp.lt.f32.partialorder %v6847_v38, %v2030_v58  ;;  %vm10325_vm6 = vnez %v10241_v1  ;;  %v2139_v1 = vsub.f32 %v9905_v63, %v7106_v43  ;;  %v10515_v58 = vld [vmem:[#allocation93_spill] sm:$0xff] }
 0x1f6   :  { %v10315_v11 = vsel %vm7171_vm4, 4294967295, %v10314_v11  ;;  %vm10321_vm13 = vmxor %vm10319_vm3, %vm10320_vm2  ;;  %vm10329_vm4 = vcmp.gt.f32.partialorder %v6932_v19, %v9626_v18  ;;  %vm10330_vm2 = vcmp.lt.f32.partialorder %v2064_v34, 0.0  ;;  %vm10334_vm3 = vnez %v10131_v6 }
 0x1f7   :  { %vm7185_vm15 = vmxor %vm10321_vm13, %vm10318_vm1  ;;  %vm10333_vm1 = vnez %v10218_v41  ;;  %v7244_v41 = vld [vmem:[%s8321_s0 + $0x4d] ss:$0 sm:$0xff]  ;;  %v10388_v49 = vmov 0  ;;  %v10402_v42 = vsub.f32 1.0, %v10195_v53  ;;  %v10407_v62 = vmov 0 }
 0x1f8   :  { %v10323_v55 = vsel %vm7185_vm15, 4294967295, %v10322_v55  ;;  %vm7193_vm11 = vmand %vm10325_vm6, %vm10324_vm14  ;;  %vm10335_vm14 = vnez %v10134_v47  ;;  %v2101_v47 = vmul.f32 %v7021_v40, %v2065_v48  ;;  %vm10358_vm15 = vcmp.lt.f32.partialorder %v2067_v46, 0.0 }
 0x1f9   :  { %v10327_v57 = vsel %vm7193_vm11, 4294967295, %v10326_v57  ;;  %vm7203_vm13 = vmxor %vm10330_vm2, %vm10329_vm4  ;;  %vm10340_vm4 = vcmp.lt.f32.partialorder %v6847_v38, %v2031_v45  ;;  %vm10341_vm2 = vnez %v10245_v26  ;;  %v2134_v38 = vsub.f32 %v8993_v20, %v7106_v43  ;;  %v10355_v45 = vld [vmem:[#allocation53_spill] sm:$0xff] }
 0x1fa   :  { %10328 = vst [vmem:[#allocation69_spill] sm:$0xff] %v10327_v57  ;;  %v10332_v21 = vsel %vm7203_vm13, 4294967295, %v10331_v21  ;;  %vm10336_vm6 = vmxor %vm10334_vm3, %vm10335_vm14  ;;  %vm10345_vm13 = vcmp.gt.f32.partialorder %v6932_v19, %v9870_v31  ;;  %vm10346_vm3 = vcmp.lt.f32.partialorder %v2065_v48, 0.0  ;;  %v2135_v26 = vsub.f32 %v9000_v3, %v7106_v43 }
 0x1fb   :  { %vm7216_vm9 = vmxor %vm10336_vm6, %vm10333_vm1  ;;  %vm10352_vm6 = vcmp.lt.f32.partialorder %v2066_v56, 0.0  ;;  %v7264_v34 = vadd.f32 %v10317_v32, %v10355_v45  ;;  %v2136_v56 = vsub.f32 %v9002_v28, %v7106_v43  ;;  %v2137_v46 = vsub.f32 %v9626_v18, %v7106_v43  ;;  %v10366_v45 = vld [vmem:[#allocation89_spill] sm:$0xff] }
 0x1fc   :  { %v10338_v8 = vsel %vm7216_vm9, 4294967295, %v10337_v8  ;;  %vm7224_vm8 = vmand %vm10341_vm2, %vm10340_vm4  ;;  %vm10362_vm2 = vcmp.lt.f32.partialorder %v2068_v9, 0.0  ;;  %v2138_v40 = vsub.f32 %v9870_v31, %v7106_v43  ;;  %v2496_v9 = vld [vmem:[%s8321_s0 + $0x3d] ss:$0 sm:$0xff]  ;;  %vm10386_vm12 = vcmp.gt.f32.partialorder %v7244_v41, %v8993_v20 }
 0x1fd   :  { %10339 = vst [vmem:[#allocation12_spill] sm:$0xff] %v10338_v8  ;;  %v10343_v36 = vsel %vm7224_vm8, 4294967295, %v10342_v36  ;;  %vm7234_vm1 = vmxor %vm10346_vm3, %vm10345_vm13  ;;  %vm10351_vm13 = vcmp.gt.f32.partialorder %v6932_v19, %v9905_v63  ;;  %vm10357_vm3 = vcmp.gt.f32.partialorder %v6932_v19, %v9903_v10  ;;  %v7417_v60 = vmul.f32 %v10366_v45, %v10402_v42 }
 0x1fe   :  { %10344 = vst [vmem:[#allocation57_spill] sm:$0xff] %v10343_v36  ;;  %vm7254_vm4 = vmxor %vm10352_vm6, %vm10351_vm13  ;;  %vm10361_vm6 = vcmp.gt.f32.partialorder %v6932_v19, %v9295_v35  ;;  %vm10406_vm9 = vcmp.lt.f32.partialorder %v7138_v51, %v2102_v12  ;;  %v10420_v42 = vmov 0  ;;  %v10429_v48 = vmov 0  ;;  %v7590_v19 = vld [vmem:[%s8321_s0 + $0x56] ss:$0 sm:$0xff] }
 0x1ff   :  { %10356 = vst [vmem:[#allocation90_spill] sm:$0xff] %v7264_v34  ;;  %vm7270_vm11 = vmxor %vm10358_vm15, %vm10357_vm3  ;;  %vm10392_vm3 = vcmp.lt.f32.partialorder %v7138_v51, %v2101_v47  ;;  %v7405_v47 = vsub.f32 %v10005_v39, %v2496_v9  ;;  %v10400_v34 = vmov 0  ;;  %v10449_v57 = vmov 0 }
 0x200   :  { %vm7282_vm14 = vmxor %vm10362_vm2, %vm10361_vm6  ;;  %vm10370_vm2 = vcmp.lt.f32.partialorder %v7138_v51, %v2098_v4  ;;  %vm10371_vm6 = vnez %v10298_v17  ;;  %v10378_v17 = vmov 0  ;;  %v2140_v4 = vsub.f32 %v9903_v10, %v7106_v43  ;;  %10403 = vst [vmem:[#allocation30_spill] sm:$0xff] %v7417_v60 }
 0x201   :  { %v10364_v52 = vsel %vm7282_vm14, 4294967295, %v10363_v52  ;;  %vm10367_vm14 = vcmp.lt.f32.partialorder %v7138_v51, %v2097_v30  ;;  %v7316_v30 = vld [vmem:[%s8321_s0 + $0x55] ss:$0 sm:$0xff]  ;;  %vm7327_vm13 = vmand %vm10371_vm6, %vm10370_vm2  ;;  %vm10377_vm2 = vnez %v10315_v11  ;;  %v10384_v11 = vmov 0 }
 0x202   :  { %vm7302_vm15 = vmand %vm7099_vm10, %vm10367_vm14  ;;  %v10373_v27 = vsel %vm7327_vm13, 4294967295, %v10372_v27  ;;  %vm10382_vm10 = vcmp.lt.f32.partialorder %v7138_v51, %v2100_v29  ;;  %vm10387_vm13 = vcmp.lt.f32.partialorder %v2134_v38, 0.0  ;;  %v10393_v43 = vmov 0 }
 0x203   :  { %vm7344_vm6 = vmand %vm10377_vm2, %vm10376_vm7  ;;  %vm10383_vm7 = vnez %v10332_v21  ;;  %v7380_v21 = vld [vmem:[%s8321_s0 + $0x46] ss:$0 sm:$0xff]  ;;  %v2170_v6 = vmul.f32 %v7316_v30, %v2134_v38  ;;  %v2171_v53 = vmul.f32 %v7316_v30, %v2135_v26  ;;  %v10415_v38 = vmov 0 }
 0x204   :  { %v10379_v17 = vsel %vm7344_vm6, 4294967295, %v10378_v17  ;;  %vm7361_vm2 = vmand %vm10383_vm7, %vm10382_vm10  ;;  %vm10396_vm6 = vcmp.lt.f32.partialorder %v2135_v26, 0.0  ;;  %vm10409_vm10 = vcmp.gt.f32.partialorder %v7244_v41, %v9002_v28  ;;  %vm10410_vm7 = vcmp.lt.f32.partialorder %v2136_v56, 0.0 }
 0x205   :  { %v10385_v11 = vsel %vm7361_vm2, 4294967295, %v10384_v11  ;;  %vm7373_vm5 = vmxor %vm10387_vm13, %vm10386_vm12  ;;  %vm10395_vm2 = vcmp.gt.f32.partialorder %v7244_v41, %v9000_v3  ;;  %v2172_v12 = vmul.f32 %v7316_v30, %v2136_v56  ;;  %v2173_v26 = vmul.f32 %v7316_v30, %v2137_v46 }
 0x206   :  { %v10389_v49 = vsel %vm7373_vm5, 4294967295, %v10388_v49  ;;  %vm7390_vm14 = vmand %vm7234_vm1, %vm10392_vm3  ;;  %vm7410_vm1 = vcmp.eq.f32.partialorder %v10399_v25, 8.507059e+37  ;;  %vm10427_vm3 = vcmp.lt.f32.partialorder %v7138_v51, %v2104_v15  ;;  %vm10432_vm13 = vcmp.gt.f32.partialorder %v7244_v41, %v9870_v31  ;;  %v10436_v15 = vld [vmem:[#allocation88_spill] sm:$0xff]  ;;  %v10513_v25 = vld [vmem:[#allocation78_spill] sm:$0xff] }
 0x207   :  { %v10394_v43 = vsel %vm7390_vm14, 4294967295, %v10393_v43  ;;  %vm7400_vm5 = vmxor %vm10396_vm6, %vm10395_vm2  ;;  %v10401_v34 = vsel %vm7410_vm1, 4294967295, %v10400_v34  ;;  %vm10413_vm2 = vweird.f32 %v10317_v32  ;;  %vm10428_vm6 = vnez %v10364_v52  ;;  %v7502_v52 = vld [vmem:[%s8321_s0 + $0x4e] ss:$0 sm:$0xff] }
 0x208   :  { %vm7427_vm12 = vmand %vm7254_vm4, %vm10406_vm9  ;;  %vm10414_vm9 = vweird.f32 %v10316_v59  ;;  %vm10433_vm1 = vcmp.lt.f32.partialorder %v2138_v40, 0.0  ;;  %v2207_v56 = vsub.f32 %v8993_v20, %v7380_v21  ;;  %v2208_v8 = vsub.f32 %v9000_v3, %v7380_v21 }
 0x209   :  { %v10408_v62 = vsel %vm7427_vm12, 4294967295, %v10407_v62  ;;  %vm7437_vm14 = vmxor %vm10410_vm7, %vm10409_vm10  ;;  %vm10419_vm10 = vcmp.lt.f32.partialorder %v7138_v51, %v2103_v54  ;;  %v2174_v51 = vmul.f32 %v7316_v30, %v2138_v40  ;;  %v2175_v40 = vmul.f32 %v7316_v30, %v2139_v1 }
 0x20a   :  { %vm7446_vm4 = vmor %vm10414_vm9, %vm10413_vm2  ;;  %vm10422_vm9 = vcmp.gt.f32.partialorder %v7244_v41, %v9626_v18  ;;  %v10448_v60 = vand.u32 2147483647, %v10316_v59  ;;  %v10457_v59 = vmov 0  ;;  %v2211_v7 = vsub.f32 %v9870_v31, %v7380_v21 }
 0x20b   :  { %v10416_v38 = vsel %vm7446_vm4, 4294967295, %v10415_v38  ;;  %vm7458_vm7 = vmand %vm7270_vm11, %vm10419_vm10  ;;  %vm10423_vm4 = vcmp.lt.f32.partialorder %v2137_v46, 0.0  ;;  %v10437_v46 = vld [vmem:[#allocation71_spill] sm:$0xff]  ;;  %vm10444_vm10 = vcmp.gt.f32.partialorder %v7244_v41, %v9903_v10  ;;  %vm10455_vm11 = vweird.f32 %v10366_v45 }
 0x20c   :  { %v10421_v42 = vsel %vm7458_vm7, 4294967295, %v10420_v42  ;;  %vm7468_vm12 = vmxor %vm10423_vm4, %vm10422_vm9  ;;  %v7506_v9 = vmul.f32 %v10437_v46, %v10436_v15  ;;  %vm10445_vm4 = vcmp.lt.f32.partialorder %v2140_v4, 0.0  ;;  %vm10478_vm8 = vnez %v10270_v37  ;;  %v10550_v46 = vld [vmem:[#allocation12_spill] sm:$0xff] }
 0x20d   :  { %vm7482_vm2 = vmand %vm10428_vm6, %vm10427_vm3  ;;  %vm10451_vm6 = vcmp.gt.f32.partialorder %v7244_v41, %v9295_v35  ;;  %v10489_v37 = vmov 0  ;;  %v10505_v29 = vmov 0  ;;  %v10538_v54 = vmov 0 }
 0x20e   :  { %v10430_v48 = vsel %vm7482_vm2, 4294967295, %v10429_v48  ;;  %vm7492_vm7 = vmxor %vm10433_vm1, %vm10432_vm13  ;;  %10438 = vst [vmem:[#allocation104_spill] sm:$0xff] %v7506_v9  ;;  %vm10439_vm13 = vcmp.gt.f32.partialorder %v7244_v41, %v9905_v63  ;;  %vm10440_vm1 = vcmp.lt.f32.partialorder %v2139_v1, 0.0  ;;  %v2176_v9 = vmul.f32 %v7316_v30, %v2140_v4 }
 0x20f   :  { %10431 = vst [vmem:[#allocation79_spill] sm:$0xff] %v10430_v48  ;;  %vm7512_vm3 = vmxor %vm10440_vm1, %vm10439_vm13  ;;  %v10443_v48 = vld [vmem:[#allocation64_spill] sm:$0xff]  ;;  %v2209_v1 = vsub.f32 %v9002_v28, %v7380_v21  ;;  %vm7535_vm1 = vcmp.eq.f32.partialorder %v10448_v60, 8.507059e+37  ;;  %v2177_v4 = vmul.f32 %v7316_v30, %v2141_v50  ;;  %v2210_v60 = vsub.f32 %v9626_v18, %v7380_v21 }
 0x210   :  { %2552 = vrcp.f32 %v10443_v48  ;;  %vm7525_vm9 = vmxor %vm10445_vm4, %vm10444_vm10  ;;  %v10450_v57 = vsel %vm7535_vm1, 4294967295, %v10449_v57  ;;  %vm10452_vm10 = vcmp.lt.f32.partialorder %v2141_v50, 0.0  ;;  %v10453_v48 = vmov 0 }
 0x211   :  { %vm7543_vm4 = vmxor %vm10452_vm10, %vm10451_vm6  ;;  %vm10456_vm1 = vweird.f32 %v10365_v24  ;;  %vm10459_vm6 = vnez %v10253_v33  ;;  %v10461_v41 = vmov 0  ;;  %v10465_v30 = vmov 0  ;;  %v2500_v33 = vld [vmem:[%s8321_s0 + $0x3e] ss:$0 sm:$0xff] }
 0x212   :  { %v10454_v48 = vsel %vm7543_vm4, 4294967295, %v10453_v48  ;;  %vm7556_vm2 = vmor %vm10456_vm1, %vm10455_vm11  ;;  %vm10463_vm4 = vcmp.lt.f32.partialorder %v7405_v47, %v2170_v6  ;;  %vm10464_vm11 = vnez %v10389_v49  ;;  %v10471_v49 = vmov 0  ;;  %v10512_v6 = vld [vmem:[#allocation87_spill] sm:$0xff] }
 0x213   :  { %v10458_v59 = vsel %vm7556_vm2, 4294967295, %v10457_v59  ;;  %vm10460_vm10 = vmxor %vm7000_vm0, %vm10459_vm6  ;;  %vm10469_vm6 = vnez %v10261_v13  ;;  %vm10473_vm2 = vcmp.lt.f32.partialorder %v7405_v47, %v2171_v53  ;;  %v10474_v50 = vmov 0 }
 0x214   :  { %vm7567_vm13 = vmxor %vm10460_vm10, %vm7302_vm15  ;;  %vm10467_vm15 = vnez %v10373_v27  ;;  %v10480_v13 = vmov 0  ;;  %v10483_v27 = vmov 0 }
 0x215   :  { %v10462_v41 = vsel %vm7567_vm13, 4294967295, %v10461_v41  ;;  %vm7576_vm1 = vmand %vm10464_vm11, %vm10463_vm4  ;;  %vm10468_vm4 = vnez %v10258_v5  ;;  %v2212_v5 = vsub.f32 %v9905_v63, %v7380_v21  ;;  %vm10482_vm13 = vcmp.lt.f32.partialorder %v7405_v47, %v2172_v12 }
 0x216   :  { %v10466_v30 = vsel %vm7576_vm1, 4294967295, %v10465_v30  ;;  %vm10470_vm10 = vmxor %vm10468_vm4, %vm10469_vm6  ;;  %vm10476_vm6 = vnez %v10379_v17  ;;  %v10492_v17 = vmov 0 }
 0x217   :  { %vm7599_vm11 = vmxor %vm10470_vm10, %vm10467_vm15  ;;  %vm10477_vm10 = vnez %v10267_v0  ;;  %v2213_v0 = vsub.f32 %v9903_v10, %v7380_v21 }
 0x218   :  { %v10472_v49 = vsel %vm7599_vm11, 4294967295, %v10471_v49  ;;  %vm7608_vm0 = vmand %vm7400_vm5, %vm10473_vm2 }
 0x219   :  { %v10475_v50 = vsel %vm7608_vm0, 4294967295, %v10474_v50  ;;  %vm10479_vm11 = vmxor %vm10477_vm10, %vm10478_vm8  ;;  %vm10487_vm10 = vnez %v10279_v16  ;;  %v10591_v16 = vand.u32 2147483647, %v10365_v24 }
 0x21a   :  { %vm7624_vm5 = vmxor %vm10479_vm11, %vm10476_vm6  ;;  %vm10485_vm11 = vnez %v10385_v11  ;;  %vm10486_vm6 = vnez %v10276_v14  ;;  %v2214_v14 = vsub.f32 %v9295_v35, %v7380_v21  ;;  %v7673_v11 = vpop.eup %2552  ;;  %v10502_v21 = vmov 0 }
 0x21b   :  { %v10481_v13 = vsel %vm7624_vm5, 4294967295, %v10480_v13  ;;  %vm7633_vm15 = vmand %vm7437_vm14, %vm10482_vm13  ;;  %vm10491_vm13 = vcmp.lt.f32.partialorder %v7405_v47, %v2173_v26  ;;  %vm10500_vm14 = vnez %v10294_v61  ;;  %v7705_v61 = vsub.f32 %v10005_v39, %v2500_v33 }
 0x21c   :  { %v10484_v27 = vsel %vm7633_vm15, 4294967295, %v10483_v27  ;;  %vm10488_vm2 = vmxor %vm10486_vm6, %vm10487_vm10  ;;  %vm10495_vm6 = vcmp.lt.f32.partialorder %v2207_v56, 0.0  ;;  %vm10507_vm15 = vcmp.gt.f32.partialorder %v7502_v52, %v9000_v3  ;;  %v10522_v26 = vmov 0 }
 0x21d   :  { %vm7648_vm5 = vmxor %vm10488_vm2, %vm10485_vm11  ;;  %vm10494_vm11 = vcmp.gt.f32.partialorder %v7502_v52, %v8993_v20  ;;  %vm10504_vm2 = vcmp.lt.f32.partialorder %v7405_v47, %v2174_v51  ;;  %v10618_v33 = vmov 0 }
 0x21e   :  { %v10490_v37 = vsel %vm7648_vm5, 4294967295, %v10489_v37  ;;  %vm7657_vm4 = vmand %vm7468_vm12, %vm10491_vm13  ;;  %vm10498_vm12 = vnez %v10394_v43  ;;  %vm10499_vm13 = vnez %v10291_v22  ;;  %v2243_v43 = vmul.f32 %v7590_v19, %v2207_v56  ;;  %v10548_v56 = vld [vmem:[#allocation79_spill] sm:$0xff] }
 0x21f   :  { %v10493_v17 = vsel %vm7657_vm4, 4294967295, %v10492_v17  ;;  %vm7669_vm10 = vmxor %vm10495_vm6, %vm10494_vm11  ;;  %vm10524_vm4 = vcmp.lt.f32.partialorder %v7405_v47, %v2175_v40  ;;  %v10555_v40 = vmov 0 }
 0x220   :  { %vm10501_vm8 = vmxor %vm10499_vm13, %vm10500_vm14  ;;  %vm10508_vm14 = vcmp.lt.f32.partialorder %v2208_v8, 0.0  ;;  %vm10520_vm13 = vnez %v10311_v2  ;;  %v2244_v2 = vmul.f32 %v7590_v19, %v2208_v8  ;;  %v10541_v8 = vmov 0 }
 0x221   :  { %vm7682_vm5 = vmxor %vm10501_vm8, %vm10498_vm12  ;;  %vm10519_vm12 = vnez %v10307_v23 }
 0x222   :  { %v10503_v21 = vsel %vm7682_vm5, 4294967295, %v10502_v21  ;;  %vm7690_vm11 = vmand %vm7492_vm7, %vm10504_vm2  ;;  %vm10511_vm7 = vnez %v10231_v44  ;;  %vm10516_vm2 = vnez %v10401_v34  ;;  %v10525_v44 = vmov 0  ;;  %v10531_v34 = vld [vmem:[#allocation90_spill] sm:$0xff] }
 0x223   :  { %v10506_v29 = vsel %vm7690_vm11, 4294967295, %v10505_v29  ;;  %vm7700_vm8 = vmxor %vm10508_vm14, %vm10507_vm15  ;;  %v10514_v53 = vsel %vm10511_vm7, %v10512_v6, %v10513_v25  ;;  %vm10518_vm15 = vnez %v10408_v62  ;;  %vm10527_vm11 = vcmp.gt.f32.partialorder %v7502_v52, %v9002_v28  ;;  %v10535_v62 = vld [vmem:[#allocation69_spill] sm:$0xff]  ;;  %v10566_v6 = vld [vmem:[#allocation71_spill] sm:$0xff] }
 0x224   :  { %v7716_v12 = vsel %vm10516_vm2, %v10515_v58, %v10514_v53  ;;  %vm10521_vm14 = vmxor %vm10519_vm12, %vm10520_vm13  ;;  %vm10528_vm12 = vcmp.lt.f32.partialorder %v2209_v1, 0.0  ;;  %vm10534_vm13 = vnez %v10323_v55  ;;  %v2245_v55 = vmul.f32 %v7590_v19, %v2209_v1  ;;  %v10571_v58 = vld [vmem:[#allocation64_spill] sm:$0xff] }
 0x225   :  { %10517 = vst [vmem:[#allocation54_spill] sm:$0xff] %v7716_v12  ;;  %vm7725_vm6 = vmxor %vm10521_vm14, %vm10518_vm15  ;;  %vm10536_vm14 = vnez %v10535_v62  ;;  %v10559_v1 = vmov 0  ;;  %v2247_v53 = vmul.f32 %v7590_v19, %v2211_v7  ;;  %v10576_v62 = vld [vmem:[#allocation36_spill] sm:$0xff]  ;;  %v10623_v25 = vmov 0 }
 0x226   :  { %v10523_v26 = vsel %vm7725_vm6, 4294967295, %v10522_v26  ;;  %vm7733_vm7 = vmand %vm7512_vm3, %vm10524_vm4  ;;  %vm10532_vm3 = vnez %v10416_v38  ;;  %vm10533_vm4 = vnez %v10421_v42  ;;  %v7785_v38 = vld [vmem:[%s8321_s0 + $0x47] ss:$0 sm:$0xff] }
 0x227   :  { %v10526_v44 = vsel %vm7733_vm7, 4294967295, %v10525_v44  ;;  %vm7743_vm15 = vmxor %vm10528_vm12, %vm10527_vm11  ;;  %v1720_v36 = vsel %vm10532_vm3, %v10317_v32, %v10531_v34  ;;  %vm10540_vm11 = vcmp.lt.f32.partialorder %v7405_v47, %v2176_v9  ;;  %vm10543_vm7 = vcmp.gt.f32.partialorder %v7502_v52, %v9626_v18  ;;  %v10547_v42 = vld [vmem:[#allocation30_spill] sm:$0xff]  ;;  %v10552_v9 = vld [vmem:[#allocation57_spill] sm:$0xff] }
 0x228   :  { %vm10537_vm2 = vmxor %vm10534_vm13, %vm10536_vm14  ;;  %vm10544_vm13 = vcmp.lt.f32.partialorder %v2210_v60, 0.0  ;;  %v10545_v32 = vmov 0  ;;  %v7789_v51 = vadd.f32 %v10366_v45, %v10547_v42  ;;  %vm10558_vm3 = vnez %v10454_v48  ;;  %v10577_v42 = vld [vmem:[#allocation45_spill] sm:$0xff] }
 0x229   :  { %vm7759_vm5 = vmxor %vm10537_vm2, %vm10533_vm4  ;;  %vm10551_vm4 = vnez %v10550_v46  ;;  %v2248_v34 = vmul.f32 %v7590_v19, %v2212_v5  ;;  %v2283_v22 = vsub.f32 %v9626_v18, %v7785_v38 }
 0x22a   :  { %v10539_v54 = vsel %vm7759_vm5, 4294967295, %v10538_v54  ;;  %vm7767_vm12 = vmand %vm7525_vm9, %vm10540_vm11  ;;  %vm10549_vm9 = vnez %v10548_v56  ;;  %vm10572_vm5 = vcmp.gt.f32.partialorder %v7502_v52, %v9903_v10  ;;  %v2377_v56 = vadd.f32 %v10577_v42, %v10576_v62 }
 0x22b   :  { %v10542_v8 = vsel %vm7767_vm12, 4294967295, %v10541_v8  ;;  %vm7777_vm2 = vmxor %vm10544_vm13, %vm10543_vm7  ;;  %vm10553_vm7 = vnez %v10552_v9  ;;  %vm10557_vm13 = vcmp.lt.f32.partialorder %v7405_v47, %v2177_v4  ;;  %vm2231_vm12 = vcmp.gt.f32.partialorder %v7502_v52, %v9295_v35  ;;  %v10565_v4 = vld [vmem:[#allocation104_spill] sm:$0xff] }
 0x22c   :  { %v10546_v32 = vsel %vm7777_vm2, 4294967295, %v10545_v32  ;;  %vm10554_vm14 = vmxor %vm10551_vm4, %vm10553_vm7  ;;  %vm10561_vm2 = vcmp.gt.f32.partialorder %v7502_v52, %v9870_v31  ;;  %vm10562_vm4 = vcmp.lt.f32.partialorder %v2211_v7, 0.0  ;;  %v2246_v47 = vmul.f32 %v7590_v19, %v2210_v60  ;;  %v10578_v7 = vld [vmem:[#allocation94_spill] sm:$0xff] }
 0x22d   :  { %vm7798_vm11 = vmxor %vm10554_vm14, %vm10549_vm9  ;;  %v1744_v48 = vsub.f32 1.0, %v10565_v4  ;;  %vm10567_vm7 = vcmp.gt.f32.partialorder %v7502_v52, %v9905_v63  ;;  %vm10568_vm14 = vcmp.lt.f32.partialorder %v2212_v5, 0.0  ;;  %v2249_v9 = vmul.f32 %v7590_v19, %v2213_v0  ;;  %v7863_v4 = vld [vmem:[%s8321_s0 + $0x4f] ss:$0 sm:$0xff] }
 0x22e   :  { %v10556_v40 = vsel %vm7798_vm11, 4294967295, %v10555_v40  ;;  %vm7806_vm6 = vmand %vm10558_vm3, %vm10557_vm13  ;;  %vm10573_vm11 = vcmp.lt.f32.partialorder %v2213_v0, 0.0  ;;  %v2280_v5 = vsub.f32 %v8993_v20, %v7785_v38  ;;  %v2250_v0 = vmul.f32 %v7590_v19, %v2214_v14 }
 0x22f   :  { %v10560_v1 = vsel %vm7806_vm6, 4294967295, %v10559_v1  ;;  %vm7816_vm9 = vmxor %vm10562_vm4, %vm10561_vm2  ;;  %vm2251_vm2 = vcmp.lt.f32.partialorder %v7705_v61, %v2243_v43  ;;  %vm10580_vm4 = vcmp.lt.f32.partialorder %v2214_v14, 0.0  ;;  %v1758_v42 = vmul.f32 %v7673_v11, %v10571_v58 }
 0x230   :  { %vm7827_vm13 = vmxor %vm10568_vm14, %vm10567_vm7  ;;  %vm10579_vm14 = vnez %v10450_v57  ;;  %v1745_v57 = vmul.f32 %v10566_v6, %v1744_v48  ;;  %v10589_v19 = vmov 0  ;;  %v2282_v14 = vsub.f32 %v9002_v28, %v7785_v38  ;;  %v10603_v48 = vld [vmem:[#allocation48_spill] sm:$0xff] }
 0x231   :  { %vm7838_vm6 = vmxor %vm10573_vm11, %vm10572_vm5  ;;  %v7849_v46 = vsel %vm10579_vm14, %v10578_v7, %v1720_v36  ;;  %v2281_v7 = vsub.f32 %v9000_v3, %v7785_v38  ;;  %vm7905_vm11 = vcmp.eq.f32.partialorder %v10591_v16, 8.507059e+37  ;;  %v10592_v43 = vmov 0 }
 0x232   :  { %vm7852_vm3 = vmxor %vm10580_vm4, %vm2231_vm12  ;;  %v10593_v43 = vsel %vm7905_vm11, 4294967295, %v10592_v43  ;;  %vm10594_vm14 = vweird.f32 %v10566_v6  ;;  %vm10595_vm7 = vweird.f32 %v10436_v15  ;;  %vm10600_vm12 = vcmp.lt.f32.partialorder %v7705_v61, %v2245_v55 }
 0x233   :  { %vm7879_vm5 = vmand %vm7669_vm10, %vm2251_vm2  ;;  %vm10588_vm10 = vcmp.lt.f32.partialorder %v7705_v61, %v2244_v2  ;;  %v2378_v16 = vadd.f32 %v2377_v56, %v10603_v48  ;;  %vm10606_vm1 = vcmp.lt.f32.partialorder %v7705_v61, %v2246_v47  ;;  %v2284_v55 = vsub.f32 %v9870_v31, %v7785_v38  ;;  %v2504_v56 = vld [vmem:[%s8321_s0 + $0x3f] ss:$0 sm:$0xff]  ;;  %v7957_v47 = vld [vmem:[%s8321_s0 + $0x57] ss:$0 sm:$0xff] }
 0x234   :  { %vm7897_vm2 = vmand %vm7700_vm8, %vm10588_vm10  ;;  %vm10607_vm10 = vnez %v10546_v32  ;;  %v10613_v32 = vmov 0  ;;  %v2285_v48 = vsub.f32 %v9905_v63, %v7785_v38  ;;  %v1759_v62 = vsub.f32 1.0, %v1758_v42 }
 0x235   :  { %v10590_v19 = vsel %vm7897_vm2, 4294967295, %v10589_v19  ;;  %vm7913_vm0 = vmor %vm10595_vm7, %vm10594_vm14  ;;  %vm10622_vm2 = vcmp.lt.f32.partialorder %v7705_v61, %v2249_v9  ;;  %vm10625_vm7 = vcmp.gt.f32.partialorder %v7863_v4, %v8993_v20  ;;  %vm10626_vm8 = vcmp.lt.f32.partialorder %v2280_v5, 0.0 }
 0x236   :  { %vm7927_vm11 = vmand %vm7743_vm15, %vm10600_vm12  ;;  %vm10612_vm12 = vcmp.lt.f32.partialorder %v7705_v61, %v2247_v53  ;;  %v2286_v53 = vsub.f32 %v9903_v10, %v7785_v38  ;;  %v2379_v60 = vadd.f32 %v2378_v16, %v7716_v12  ;;  %v10636_v20 = vmov 0 }
 0x237   :  { %vm7943_vm15 = vmand %vm10607_vm10, %vm10606_vm1  ;;  %vm10617_vm10 = vcmp.lt.f32.partialorder %v7705_v61, %v2248_v34  ;;  %v2287_v34 = vsub.f32 %v9295_v35, %v7785_v38  ;;  %v10631_v38 = vmov 0  ;;  %v2316_v52 = vmul.f32 %v7957_v47, %v2280_v5 }
 0x238   :  { %vm7968_vm4 = vmand %vm7816_vm9, %vm10612_vm12  ;;  %v2317_v16 = vmul.f32 %v7957_v47, %v2281_v7  ;;  %v10648_v5 = vmov 0  ;;  %vm10651_vm12 = vcmp.lt.f32.partialorder %v2284_v55, 0.0  ;;  %v10675_v36 = vmov 0 }
 0x239   :  { %v10614_v32 = vsel %vm7968_vm4, 4294967295, %v10613_v32  ;;  %vm7984_vm9 = vmand %vm7827_vm13, %vm10617_vm10  ;;  %vm10642_vm4 = vcmp.gt.f32.partialorder %v7863_v4, %v9002_v28  ;;  %v2318_v28 = vmul.f32 %v7957_v47, %v2282_v14 }
 0x23a   :  { %v10619_v33 = vsel %vm7984_vm9, 4294967295, %v10618_v33  ;;  %vm8000_vm13 = vmand %vm7838_vm6, %vm10622_vm2  ;;  %vm10629_vm6 = vweird.f32 %v7673_v11  ;;  %vm10630_vm2 = vweird.f32 %v10571_v58 }
 0x23b   :  { %v10624_v25 = vsel %vm8000_vm13, 4294967295, %v10623_v25  ;;  %vm8012_vm1 = vmxor %vm10626_vm8, %vm10625_vm7  ;;  %vm10635_vm8 = vcmp.lt.f32.partialorder %v7705_v61, %v2250_v0  ;;  %v2314_v61 = vsub.f32 %v10005_v39, %v2504_v56  ;;  %v1746_v0 = vadd.f32 %v10566_v6, %v1745_v57 }
 0x23c   :  { %vm8021_vm14 = vmor %vm10630_vm2, %vm10629_vm6  ;;  %vm10638_vm2 = vcmp.gt.f32.partialorder %v7863_v4, %v9000_v3  ;;  %vm10643_vm13 = vcmp.lt.f32.partialorder %v2282_v14, 0.0  ;;  %v1760_v39 = vmul.f32 %v7673_v11, %v1759_v62  ;;  %v10652_v62 = vmov 0 }
 0x23d   :  { %v10632_v38 = vsel %vm8021_vm14, 4294967295, %v10631_v38  ;;  %vm8033_vm7 = vmand %vm7852_vm3, %vm10635_vm8  ;;  %vm10639_vm14 = vcmp.lt.f32.partialorder %v2281_v7, 0.0  ;;  %vm10646_vm3 = vcmp.gt.f32.partialorder %v7863_v4, %v9626_v18  ;;  %vm10647_vm8 = vcmp.lt.f32.partialorder %v2283_v22, 0.0 }
 0x23e   :  { %v10637_v20 = vsel %vm8033_vm7, 4294967295, %v10636_v20  ;;  %vm8043_vm9 = vmxor %vm10639_vm14, %vm10638_vm2  ;;  %vm10650_vm14 = vcmp.gt.f32.partialorder %v7863_v4, %v9870_v31  ;;  %v2319_v18 = vmul.f32 %v7957_v47, %v2283_v22  ;;  %v2380_v57 = vadd.f32 %v2379_v60, %v7849_v46 }
 0x23f   :  { %vm8056_vm6 = vmxor %vm10643_vm13, %vm10642_vm4  ;;  %v10654_v7 = vand.u32 2147483647, %v10436_v15  ;;  %v10655_v14 = vmov 0  ;;  %v10657_v56 = vand.u32 2147483648, %v10436_v15  ;;  %v10661_v31 = vmov 0 }
 0x240   :  { %vm8068_vm10 = vmxor %vm10647_vm8, %vm10646_vm3  ;;  %vm10659_vm8 = vnez %v10466_v30  ;;  %vm10663_vm13 = vcmp.gt.f32.partialorder %v7863_v4, %v9905_v63  ;;  %vm10664_vm2 = vcmp.lt.f32.partialorder %v2285_v48, 0.0  ;;  %v10665_v22 = vmov 0 }
 0x241   :  { %v10649_v5 = vsel %vm8068_vm10, 4294967295, %v10648_v5  ;;  %vm8079_vm7 = vmxor %vm10651_vm12, %vm10650_vm14  ;;  %vm8087_vm3 = vcmp.eq.f32.partialorder %v10654_v7, 8.507059e+37  ;;  %v1754_v12 = vor.u32 1.1754944e-38, %v10657_v56  ;;  %vm10658_vm12 = vnez %v10462_v41 }
 0x242   :  { %v10653_v62 = vsel %vm8079_vm7, 4294967295, %v10652_v62  ;;  %v10656_v14 = vsel %vm8087_vm3, 4294967295, %v10655_v14  ;;  %vm10660_vm14 = vmxor %vm10658_vm12, %vm10659_vm8  ;;  %v2320_v15 = vmul.f32 %v7957_v47, %v2284_v55  ;;  %v1766_v41 = vand.u32 2147483647, %v10571_v58 }
 0x243   :  { %vm8100_vm4 = vmxor %vm10660_vm14, %vm7879_vm5  ;;  %v1768_v30 = vand.u32 2147483648, %v10571_v58  ;;  %vm10667_vm5 = vnez %v10590_v19  ;;  %vm10668_vm12 = vnez %v10472_v49  ;;  %vm10669_vm8 = vnez %v10475_v50  ;;  %v10679_v50 = vld [vmem:[#allocation26_spill] sm:$0xff] }
 0x244   :  { %v10662_v31 = vsel %vm8100_vm4, 4294967295, %v10661_v31  ;;  %vm8108_vm7 = vmxor %vm10664_vm2, %vm10663_vm13  ;;  %v10671_v63 = vmov 0  ;;  %vm10673_vm2 = vcmp.gt.f32.partialorder %v7863_v4, %v9903_v10  ;;  %vm10674_vm13 = vcmp.lt.f32.partialorder %v2286_v53, 0.0 }
 0x245   :  { %v10666_v22 = vsel %vm8108_vm7, 4294967295, %v10665_v22  ;;  %vm10670_vm14 = vmxor %vm10668_vm12, %vm10669_vm8  ;;  %v2321_v58 = vmul.f32 %v7957_v47, %v2285_v48  ;;  %vm10677_vm3 = vnez %v10458_v59  ;;  %v1750_v10 = vsel %vm7913_vm0, %v10566_v6, %v1746_v0  ;;  %v10755_v0 = vld [vmem:[#allocation54_spill] sm:$0xff] }
 0x246   :  { %vm8122_vm4 = vmxor %vm10670_vm14, %vm10667_vm5  ;;  %v10678_v49 = vsel %vm10677_vm3, %v10366_v45, %v7789_v51  ;;  %vm10680_vm5 = vnez %v10593_v43  ;;  %vm10681_vm12 = vnez %v10481_v13  ;;  %vm10682_vm8 = vnez %v10484_v27 }
 0x247   :  { %v10672_v63 = vsel %vm8122_vm4, 4294967295, %v10671_v63  ;;  %vm8130_vm10 = vmxor %vm10674_vm13, %vm10673_vm2  ;;  %v1740_v19 = vsel %vm10680_vm5, %v10679_v50, %v10678_v49  ;;  %v10684_v59 = vmov 0  ;;  %vm10686_vm3 = vcmp.gt.f32.partialorder %v7863_v4, %v9295_v35 }
 0x248   :  { %v10676_v36 = vsel %vm8130_vm10, 4294967295, %v10675_v36  ;;  %vm10683_vm14 = vmxor %vm10681_vm12, %vm10682_vm8  ;;  %vm10687_vm13 = vcmp.lt.f32.partialorder %v2287_v34, 0.0  ;;  %v10688_v45 = vmov 0  ;;  %v2322_v51 = vmul.f32 %v7957_v47, %v2286_v53 }
 0x249   :  { %vm8153_vm2 = vmxor %vm10683_vm14, %vm7927_vm11  ;;  %vm2326_vm0 = vcmp.lt.f32.partialorder %v2314_v61, %v2318_v28  ;;  %v1761_v13 = vadd.f32 %v7673_v11, %v1760_v39  ;;  %vm10690_vm11 = vnez %v10490_v37  ;;  %vm10691_vm12 = vnez %v10493_v17 }
 0x24a   :  { %v10685_v59 = vsel %vm8153_vm2, 4294967295, %v10684_v59  ;;  %vm8161_vm5 = vmxor %vm10687_vm13, %vm10686_vm3  ;;  %v10693_v27 = vmov 0  ;;  %v2323_v35 = vmul.f32 %v7957_v47, %v2287_v34  ;;  %vm2327_vm3 = vcmp.lt.f32.partialorder %v2314_v61, %v2319_v18  ;;  %v10751_v34 = vld [vmem:[#allocation45_spill] sm:$0xff] }
 0x24b   :  { %v10689_v45 = vsel %vm8161_vm5, 4294967295, %v10688_v45  ;;  %vm10692_vm8 = vmxor %vm10690_vm11, %vm10691_vm12  ;;  %vm10695_vm13 = vcmp.lt.f32.partialorder %v2314_v61, %v2316_v52  ;;  %v10696_v6 = vmov 0  ;;  %v2381_v4 = vadd.f32 %v2380_v57, %v1740_v19 }
 0x24c   :  { %vm8174_vm14 = vmxor %vm10692_vm8, %vm7943_vm15  ;;  %vm10698_vm2 = vnez %v10614_v32  ;;  %vm10699_vm4 = vnez %v10503_v21  ;;  %vm10700_vm15 = vnez %v10506_v29  ;;  %v10702_v37 = vmov 0  ;;  %v10757_v29 = vld [vmem:[#allocation2_spill] sm:$0xff] }
 0x24d   :  { %v10694_v27 = vsel %vm8174_vm14, 4294967295, %v10693_v27  ;;  %vm8182_vm7 = vmand %vm8012_vm1, %vm10695_vm13  ;;  %vm2328_vm8 = vcmp.lt.f32.partialorder %v2314_v61, %v2320_v15  ;;  %vm10704_vm14 = vcmp.lt.f32.partialorder %v2314_v61, %v2317_v16  ;;  %vm10707_vm13 = vnez %v10619_v33  ;;  %v10748_v33 = vld [vmem:[#allocation36_spill] sm:$0xff] }
 0x24e   :  { %v10697_v6 = vsel %vm8182_vm7, 4294967295, %v10696_v6  ;;  %vm10701_vm11 = vmxor %vm10699_vm4, %vm10700_vm15  ;;  %vm10708_vm7 = vnez %v10523_v26  ;;  %vm10709_vm5 = vnez %v10526_v44  ;;  %v10711_v21 = vmov 0 }
 0x24f   :  { %vm8193_vm12 = vmxor %vm10701_vm11, %vm10698_vm2  ;;  %vm2329_vm2 = vcmp.lt.f32.partialorder %v2314_v61, %v2321_v58  ;;  %v1769_v2 = vor.u32 1.1754944e-38, %v1768_v30  ;;  %vm10717_vm11 = vnez %v10539_v54  ;;  %v10720_v26 = vmov 0 }
 0x250   :  { %v10703_v37 = vsel %vm8193_vm12, 4294967295, %v10702_v37  ;;  %vm8200_vm1 = vmand %vm8043_vm9, %vm10704_vm14  ;;  %vm10715_vm9 = vnez %v10656_v14  ;;  %vm10716_vm14 = vnez %v10624_v25  ;;  %v10723_v44 = vmov 0 }
 0x251   :  { %vm10710_vm10 = vmxor %vm10708_vm7, %vm10709_vm5  ;;  %v1755_v43 = vsel %vm10715_vm9, %v1754_v12, %v1750_v10  ;;  %vm10725_vm9 = vnez %v10632_v38  ;;  %vm10726_vm12 = vnez %v10637_v20  ;;  %v2555_v55 = vmov 0.0   ;;  %v10753_v20 = vld [vmem:[#allocation48_spill] sm:$0xff] }
 0x252   :  { %vm8211_vm4 = vmxor %vm10710_vm10, %vm10707_vm13  ;;  %vm10718_vm10 = vnez %v10542_v8  ;;  %vm2330_vm13 = vcmp.lt.f32.partialorder %v2314_v61, %v2322_v51  ;;  %v1765_v12 = vsel %vm10725_vm9, %v7673_v11, %v1761_v13  ;;  %v2382_v11 = vadd.f32 %v2381_v4, %v1755_v43 }
 0x253   :  { %v10712_v21 = vsel %vm8211_vm4, 4294967295, %v10711_v21  ;;  %vm8217_vm15 = vmand %vm8056_vm6, %vm2326_vm0  ;;  %vm10722_vm6 = vnez %v10649_v5  ;;  %vm1767_vm4 = vcmp.eq.f32.partialorder %v1766_v41, 8.507059e+37  ;;  %vm10735_vm9 = vnez %v10666_v22 }
 0x254   :  { %vm10719_vm7 = vmxor %vm10717_vm11, %vm10718_vm10  ;;  %vm10727_vm11 = vnez %v10556_v40 }
 0x255   :  { %vm8230_vm5 = vmxor %vm10719_vm7, %vm10716_vm14  ;;  %vm10728_vm14 = vnez %v10560_v1  ;;  %v1770_v1 = vsel %vm1767_vm4, %v1769_v2, %v1765_v12  ;;  %vm10747_vm4 = vnez %v10685_v59 }
 0x256   :  { %v10721_v26 = vsel %vm8230_vm5, 4294967295, %v10720_v26  ;;  %vm8236_vm0 = vmand %vm10722_vm6, %vm2327_vm3  ;;  %vm2331_vm3 = vcmp.lt.f32.partialorder %v2314_v61, %v2323_v35  ;;  %vm10732_vm6 = vnez %v10653_v62  ;;  %v2383_v23 = vadd.f32 %v2382_v11, %v1770_v1 }
 0x257   :  { %v10724_v44 = vsel %vm8236_vm0, 4294967295, %v10723_v44  ;;  %vm10729_vm10 = vmxor %vm10727_vm11, %vm10728_vm14  ;;  %vm10738_vm11 = vnez %v10676_v36  ;;  %vm10741_vm14 = vnez %v10689_v45 }
 0x258   :  { %vm8250_vm7 = vmxor %vm10729_vm10, %vm10726_vm12  ;;  %vm10744_vm10 = vnez %v10697_v6  ;;  %v2384_v61 = vrot.slane %v2383_v23, 4 }
 0x259   :  { %vm8256_vm5 = vmand %vm10732_vm6, %vm2328_vm8 }
 0x25a   :  { %vm8262_vm0 = vmand %vm10735_vm9, %vm2329_vm2  ;;  %vm10745_vm2 = vnez %v10662_v31  ;;  %v2385_v56 = vadd.f32 %v2384_v61, %v2383_v23 }
 0x25b   :  { %vm8268_vm12 = vmand %vm10738_vm11, %vm2330_vm13  ;;  %vm10746_vm13 = vnez %v10672_v63  ;;  %vm10749_vm11 = vnez %v10724_v44 }
 0x25c   :  { %vm8274_vm8 = vmand %vm10741_vm14, %vm2331_vm3  ;;  %vm10750_vm14 = vnez %v10694_v27  ;;  %v2386_v58 = vrot.slane %v2385_v56, 2 }
 0x25d   :  { %vm2340_vm6 = vmxor %vm10745_vm2, %vm10744_vm10 }
 0x25e   :  { %vm2341_vm9 = vmxor %vm10746_vm13, %vm8200_vm1  ;;  %v2348_v47 = vsel %vm2340_vm6, 1.0, %v2555_v55  ;;  %vm10752_vm1 = vnez %v10703_v37  ;;  %vm10756_vm13 = vnez %v10721_v26  ;;  %v2387_v45 = vadd.f32 %v2386_v58, %v2385_v56 }
 0x25f   :  { %vm2342_vm3 = vmxor %vm10747_vm4, %vm8217_vm15  ;;  %v2349_v32 = vsel %vm2341_vm9, 1.0, %v2555_v55  ;;  %v2356_v53 = vmul.f32 %v2348_v47, %v10748_v33  ;;  %vm10754_vm15 = vnez %v10712_v21 }
 0x260   :  { %vm2343_vm10 = vmxor %vm10750_vm14, %vm10749_vm11  ;;  %v2350_v25 = vsel %vm2342_vm3, 1.0, %v2555_v55  ;;  %v2357_v42 = vmul.f32 %v2349_v32, %v10751_v34  ;;  %v2390_v60 = vadd.f32 %v2349_v32, %v2348_v47 }
 0x261   :  { %vm2344_vm2 = vmxor %vm10752_vm1, %vm8256_vm5  ;;  %v2351_v38 = vsel %vm2343_vm10, 1.0, %v2555_v55  ;;  %v2358_v9 = vmul.f32 %v2350_v25, %v10753_v20 }
 0x262   :  { %vm2345_vm6 = vmxor %vm10754_vm15, %vm8262_vm0  ;;  %v2352_v52 = vsel %vm2344_vm2, 1.0, %v2555_v55  ;;  %v2359_v3 = vmul.f32 %v2351_v38, %v10755_v0  ;;  %v2364_v16 = vadd.f32 %v2357_v42, %v2356_v53  ;;  %v2391_v39 = vadd.f32 %v2390_v60, %v2350_v25 }
 0x263   :  { %vm2346_vm9 = vmxor %vm10756_vm13, %vm8268_vm12  ;;  %v2353_v5 = vsel %vm2345_vm6, 1.0, %v2555_v55  ;;  %v2360_v28 = vmul.f32 %v2352_v52, %v7849_v46  ;;  %vm2405_vm0 = vcmp.eq.s32.totalorder %v10757_v29, 1  ;;  %vm2408_vm12 = vcmp.eq.s32.totalorder %v10757_v29, 2 }
 0x264   :  { %vm2347_vm5 = vmxor %vm8250_vm7, %vm8274_vm8  ;;  %v2365_v62 = vadd.f32 %v2364_v16, %v2358_v9  ;;  %v2392_v18 = vadd.f32 %v2391_v39, %v2351_v38  ;;  %v2354_v57 = vsel %vm2346_vm9, 1.0, %v2555_v55  ;;  %v2361_v7 = vmul.f32 %v2353_v5, %v1740_v19 }
 0x265   :  { %v2355_v22 = vsel %vm2347_vm5, 1.0, %v2555_v55  ;;  %v2362_v15 = vmul.f32 %v2354_v57, %v1755_v43  ;;  %v2388_v19 = vrot.slane %v2387_v45, 1  ;;  %vm2403_vm7 = vcmp.eq.s32.totalorder %v10757_v29, 0 }
 0x266   :  { %v2366_v14 = vadd.f32 %v2365_v62, %v2359_v3  ;;  %v2393_v31 = vadd.f32 %v2392_v18, %v2352_v52  ;;  %v2363_v63 = vmul.f32 %v2355_v22, %v1770_v1 }
 0x267   :  { %v2389_v17 = vadd.f32 %v2388_v19, %v2387_v45 }
 0x268   :  { %v2367_v41 = vadd.f32 %v2366_v14, %v2360_v28  ;;  %v2394_v30 = vadd.f32 %v2393_v31, %v2353_v5 }
 0x269   :  { %v2406_v44 = vsel %vm2405_vm0, %v2389_v17, 0.0 }
 0x26a   :  { %v2368_v36 = vadd.f32 %v2367_v41, %v2361_v7  ;;  %v2395_v49 = vadd.f32 %v2394_v30, %v2354_v57 }
 0x26c   :  { %v2369_v50 = vadd.f32 %v2368_v36, %v2362_v15  ;;  %v2396_v10 = vadd.f32 %v2395_v49, %v2355_v22 }
 0x26e   :  { %v2370_v59 = vadd.f32 %v2369_v50, %v2363_v63  ;;  %v2397_v46 = vrot.slane %v2396_v10, 4 }
 0x270   :  { %v2371_v51 = vrot.slane %v2370_v59, 4  ;;  %v2398_v13 = vadd.f32 %v2397_v46, %v2396_v10 }
 0x272   :  { %v2372_v27 = vadd.f32 %v2371_v51, %v2370_v59  ;;  %v2399_v35 = vrot.slane %v2398_v13, 2 }
 0x274   :  { %v2373_v6 = vrot.slane %v2372_v27, 2  ;;  %v2400_v4 = vadd.f32 %v2399_v35, %v2398_v13 }
 0x276   :  { %v2374_v37 = vadd.f32 %v2373_v6, %v2372_v27  ;;  %v2401_v21 = vrot.slane %v2400_v4, 1 }
 0x278   :  { %v2375_v43 = vrot.slane %v2374_v37, 1  ;;  %v2402_v2 = vadd.f32 %v2401_v21, %v2400_v4 }
 0x27a   :  { %v2376_v26 = vadd.f32 %v2375_v43, %v2374_v37  ;;  %v2409_v54 = vsel %vm2408_vm12, %v2402_v2, 0.0 }
 0x27c   :  { %v2404_v12 = vsel %vm2403_vm7, %v2376_v26, 0.0 }
 0x27d   :  { %v2407_v8 = vadd.f32 %v2406_v44, %v2404_v12 }
 0x27f   :  { %v2410_v11 = vadd.f32 %v2409_v54, %v2407_v8 }
 0x281   :  { %2411 = vst [vmem:[%s8322_s1] sm:$0xff] %v2410_v11 }

</bundles_post_ra>
